<compile_context>
chip_gen: v6e
topology: v6e:2x2x1
jax: 0.10.0
libtpu: 0.0.40
codegen_flags: <defaults>
</compile_context>

<pallas_src>
import functools

import jax
import jax.numpy as jnp
from jax import lax
from jax.experimental import pallas as pl
from jax.experimental.pallas import tpu as pltpu

# Module hyper-parameters (from the PyTorch source).
ENC_C = 64
ENC_KS = 4
ENC_STR = 2
ENC_PAD = 1
LEAKY_SLOPE = 0.2
BN_EPS = 1e-5


# --------------------------------------------------------------------------
# Pallas GEMM + bias + activation kernel (shared by all conv blocks and head)
# --------------------------------------------------------------------------
def _gemm_bias_act_kernel(act, x_ref, w_ref, b_ref, o_ref):
    # x: [TM, K] bf16, w: [K, N] bf16, b: [1, N] f32  ->  o: [TM, N]
    acc = jnp.dot(x_ref[...], w_ref[...], preferred_element_type=jnp.float32)
    acc = acc + b_ref[...]
    if act == "leaky_relu":
        acc = jnp.where(acc >= 0.0, acc, LEAKY_SLOPE * acc)
    o_ref[...] = acc.astype(o_ref.dtype)


def _pick_row_tile(m, cap=256):
    """Largest row tile <= cap that divides m and is sublane friendly."""
    if m <= cap:
        return m
    t = cap - (cap % 8)
    while t >= 8:
        if m % t == 0:
            return t
        t -= 8
    return m


def _gemm_bias_act(x, w, b, *, act="none", out_dtype=jnp.float32, row_tile=256):
    m, k = x.shape
    k2, n = w.shape
    assert k == k2 and b.shape == (1, n)
    tm = _pick_row_tile(m, row_tile)
    grid = (m // tm,)
    bytes_accessed = int(x.size * x.dtype.itemsize + w.size * w.dtype.itemsize
                         + b.size * b.dtype.itemsize
                         + m * n * jnp.dtype(out_dtype).itemsize)
    return pl.pallas_call(
        functools.partial(_gemm_bias_act_kernel, act),
        out_shape=jax.ShapeDtypeStruct((m, n), out_dtype),
        grid=grid,
        in_specs=[
            pl.BlockSpec((tm, k), lambda i: (i, 0)),   # row-tiled activations
            pl.BlockSpec((k, n), lambda i: (0, 0)),    # weights resident
            pl.BlockSpec((1, n), lambda i: (0, 0)),    # bias resident
        ],
        out_specs=pl.BlockSpec((tm, n), lambda i: (i, 0)),
        compiler_params=pltpu.CompilerParams(dimension_semantics=("parallel",)),
        cost_estimate=pl.CostEstimate(flops=2 * m * k * n, transcendentals=0,
                                      bytes_accessed=bytes_accessed),
    )(x, w, b)


def _gemm_bias_act_jnp(x, w, b, *, act="none", out_dtype=jnp.float32):
    """Plain-jnp mirror of the Pallas GEMM (same precision policy)."""
    acc = jnp.dot(x, w, preferred_element_type=jnp.float32) + b
    if act == "leaky_relu":
        acc = jnp.where(acc >= 0.0, acc, LEAKY_SLOPE * acc)
    return acc.astype(out_dtype)


# --------------------------------------------------------------------------
# im2col (layout plumbing, done in XLA between pallas_calls)
# --------------------------------------------------------------------------
def _im2col(x, ks, stride, pad):
    """x: [N, H, W, C] -> [N*OH*OW, ks*ks*C], feature order (kh, kw, c)."""
    n, h, w, c = x.shape
    oh = (h + 2 * pad - ks) // stride + 1
    ow = (w + 2 * pad - ks) // stride + 1
    xp = jnp.pad(x, ((0, 0), (pad, pad), (pad, pad), (0, 0)))
    taps = []
    for kh in range(ks):
        for kw in range(ks):
            taps.append(xp[:, kh:kh + stride * (oh - 1) + 1:stride,
                           kw:kw + stride * (ow - 1) + 1:stride, :])
    patches = jnp.stack(taps, axis=3)                 # [N, OH, OW, ks*ks, C]
    return patches.reshape(n * oh * ow, ks * ks * c), (n, oh, ow)


# --------------------------------------------------------------------------
# Parameters: PyTorch-style init + packing (BN fold, im2col layout, bf16)
# --------------------------------------------------------------------------
def init_encoder_params(key, latent_dim, img_shape, n_blocks=4):
    c, h, w = img_shape
    keys = jax.random.split(key, n_blocks + 1)
    blocks = []
    for i in range(n_blocks):
        cout = ENC_C * (2 ** i)
        kk = jax.random.split(keys[i], 6)
        fan_in = c * ENC_KS * ENC_KS
        bound = fan_in ** -0.5
        blocks.append(dict(
            conv_w=jax.random.uniform(kk[0], (cout, c, ENC_KS, ENC_KS),
                                      jnp.float32, -bound, bound),
            conv_b=jax.random.uniform(kk[1], (cout,), jnp.float32, -bound, bound),
            bn_gamma=jax.random.uniform(kk[2], (cout,), jnp.float32, 1.8, 2.6),
            bn_beta=jax.random.uniform(kk[3], (cout,), jnp.float32, -0.2, 0.2),
            bn_mean=jax.random.uniform(kk[4], (cout,), jnp.float32, -0.2, 0.2),
            bn_var=jax.random.uniform(kk[5], (cout,), jnp.float32, 0.8, 1.2),
        ))
        c = cout
        h = (h + 2 * ENC_PAD - ENC_KS) // ENC_STR + 1
        w = (w + 2 * ENC_PAD - ENC_KS) // ENC_STR + 1
    f = c * h * w
    kk = jax.random.split(keys[-1], 4)
    bound = f ** -0.5
    return dict(
        blocks=blocks,
        fc1_w=jax.random.uniform(kk[0], (latent_dim, f), jnp.float32, -bound, bound),
        fc1_b=jax.random.uniform(kk[1], (latent_dim,), jnp.float32, -bound, bound),
        fc2_w=jax.random.uniform(kk[2], (latent_dim, f), jnp.float32, -bound, bound),
        fc2_b=jax.random.uniform(kk[3], (latent_dim,), jnp.float32, -bound, bound),
        last_out_shape=(c, h, w),
        fcs_infeatures=f,
    )


def pack_params(params, weight_dtype=jnp.bfloat16):
    """Fold BN into conv weights/bias, pack into im2col GEMM form, fuse fc1||fc2."""
    packed_blocks = []
    for p in params["blocks"]:
        cout, cin, kh, kw = p["conv_w"].shape
        scale = p["bn_gamma"] / jnp.sqrt(p["bn_var"] + BN_EPS)          # [cout]
        w = p["conv_w"] * scale[:, None, None, None]
        b = (p["conv_b"] - p["bn_mean"]) * scale + p["bn_beta"]
        wm = jnp.transpose(w, (2, 3, 1, 0)).reshape(kh * kw * cin, cout)
        packed_blocks.append((wm.astype(weight_dtype),
                              b.reshape(1, cout).astype(jnp.float32)))
    cl, hl, wl = params["last_out_shape"]
    l = params["fc1_w"].shape[0]

    def reorder(fcw):  # PyTorch (C,H,W) flatten order -> our (H,W,C) order
        return fcw.reshape(l, cl, hl, wl).transpose(0, 2, 3, 1).reshape(l, hl * wl * cl)

    head_w = jnp.concatenate([reorder(params["fc1_w"]),
                              reorder(params["fc2_w"])], axis=0).T      # [F, 2L]
    head_b = jnp.concatenate([params["fc1_b"], params["fc2_b"]]).reshape(1, 2 * l)
    return dict(blocks=packed_blocks,
                head_w=head_w.astype(weight_dtype),
                head_b=head_b.astype(jnp.float32))


# --------------------------------------------------------------------------
# Forward passes
# --------------------------------------------------------------------------
def encoder_forward(x_nchw, packed, *, gemm):
    """EncoderConvPlus forward. x_nchw: [N, C, H, W] f32 -> (mu, logvar)."""
    h = jnp.transpose(x_nchw, (0, 2, 3, 1)).astype(jnp.bfloat16)        # NHWC bf16
    for wm, b in packed["blocks"]:
        patches, (n, oh, ow) = _im2col(h, ENC_KS, ENC_STR, ENC_PAD)
        out = gemm(patches, wm, b, act="leaky_relu", out_dtype=jnp.bfloat16)
        h = out.reshape(n, oh, ow, wm.shape[1])
    feats = h.reshape(h.shape[0], -1)           # (h, w, c) order == packed head order
    head = gemm(feats, packed["head_w"], packed["head_b"],
                act="none", out_dtype=jnp.float32)
    l = packed["head_b"].shape[1] // 2
    return head[:, :l], head[:, l:]


def encoder_forward_ref_f32(x_nchw, params):
    """Module-faithful float32 reference: conv -> BN(eval) -> LeakyReLU, fc1/fc2."""
    h = x_nchw
    for p in params["blocks"]:
        h = lax.conv_general_dilated(
            h, p["conv_w"], window_strides=(ENC_STR, ENC_STR),
            padding=((ENC_PAD, ENC_PAD), (ENC_PAD, ENC_PAD)),
            dimension_numbers=("NCHW", "OIHW", "NCHW"))
        h = h + p["conv_b"][None, :, None, None]
        inv = (p["bn_gamma"] / jnp.sqrt(p["bn_var"] + BN_EPS))[None, :, None, None]
        h = (h - p["bn_mean"][None, :, None, None]) * inv + p["bn_beta"][None, :, None, None]
        h = jnp.where(h >= 0.0, h, LEAKY_SLOPE * h)
    hf = h.reshape(h.shape[0], -1)              # NCHW flatten == PyTorch .view
    mu = hf @ params["fc1_w"].T + params["fc1_b"]
    logvar = hf @ params["fc2_w"].T + params["fc2_b"]
    return mu, logvar


if __name__ == "__main__":
    IMG_SHAPE = (4, 16, 16)            # (C, H, W)
    BATCH, LATENT_DIM, N_BLOCKS = 2, 16, 4

    key = jax.random.PRNGKey(0)
    kx, kp = jax.random.split(key)
    x = jax.random.normal(kx, (BATCH,) + IMG_SHAPE, jnp.float32)

    params = init_encoder_params(kp, LATENT_DIM, IMG_SHAPE, N_BLOCKS)
    packed = pack_params(params)

    fwd_pallas = jax.jit(functools.partial(encoder_forward, gemm=_gemm_bias_act))
    mu, logvar = jax.block_until_ready(fwd_pallas(x, packed))
    assert mu.shape == (BATCH, LATENT_DIM) and logvar.shape == (BATCH, LATENT_DIM)

    # Check 1 (tight): same packed bf16 params, plain-jnp GEMM chain.
    fwd_mirror = jax.jit(functools.partial(encoder_forward, gemm=_gemm_bias_act_jnp))
    mu_m, lv_m = fwd_mirror(x, packed)
    assert jnp.allclose(mu, mu_m, atol=1e-2, rtol=1e-2)
    assert jnp.allclose(logvar, lv_m, atol=1e-2, rtol=1e-2)

    # Check 2 (semantic): float32 conv + BatchNorm(eval) + LeakyReLU + fc1/fc2.
    mu_r, lv_r = jax.jit(encoder_forward_ref_f32)(x, params)
    assert jnp.allclose(mu, mu_r, atol=5e-2)
    assert jnp.allclose(logvar, lv_r, atol=5e-2)

    print("KERNEL_OK")
</pallas_src>

<mosaic_0001>
module attributes {stable_mosaic.version = 11 : i64} {
  func.func @_gemm_bias_act_kernel(%arg0: i32, %arg1: memref<128x64xbf16, #tpu.memory_space<vmem>>, %arg2: memref<64x64xbf16, #tpu.memory_space<vmem>>, %arg3: memref<1x64xf32, #tpu.memory_space<vmem>>, %arg4: memref<128x64xbf16, #tpu.memory_space<vmem>>) attributes {dimension_semantics = [#tpu.dimension_semantics<parallel>], iteration_bounds = array<i64: 1>, scalar_prefetch = 0 : i64, scratch_operands = 0 : i64, tpu.core_type = #tpu.core_type<tc>, window_params = [{transform_indices = @transform_0, window_bounds = array<i64: 128, 64>}, {pipeline_mode = #tpu.pipeline_mode<synchronous>, transform_indices = @transform_1, window_bounds = array<i64: 64, 64>}, {pipeline_mode = #tpu.pipeline_mode<synchronous>, transform_indices = @transform_2, window_bounds = array<i64: 1, 64>}, {transform_indices = @transform_3, window_bounds = array<i64: 128, 64>}]} {
    %c0 = arith.constant 0 : index
    %c0_0 = arith.constant 0 : index
    %0 = vector.load %arg1[%c0, %c0_0] : memref<128x64xbf16, #tpu.memory_space<vmem>>, vector<128x64xbf16>
    %c0_1 = arith.constant 0 : index
    %c0_2 = arith.constant 0 : index
    %1 = vector.load %arg2[%c0_1, %c0_2] : memref<64x64xbf16, #tpu.memory_space<vmem>>, vector<64x64xbf16>
    %cst = arith.constant dense<0.000000e+00> : vector<128x64xf32>
    %2 = tpu.matmul %0, %1, %cst {dimension_numbers = #tpu.dot_dimension_numbers<[1], [0], [0], [1], [0, 0, 1, 1], [], []>} : vector<128x64xbf16>, vector<64x64xbf16>, vector<128x64xf32> -> vector<128x64xf32>
    %c0_3 = arith.constant 0 : index
    %c0_4 = arith.constant 0 : index
    %3 = vector.load %arg3[%c0_3, %c0_4] : memref<1x64xf32, #tpu.memory_space<vmem>>, vector<1x64xf32>
    %4 = vector.broadcast %3 : vector<1x64xf32> to vector<128x64xf32>
    %5 = arith.addf %2, %4 : vector<128x64xf32>
    %cst_5 = arith.constant 0.000000e+00 : f32
    %6 = vector.broadcast %cst_5 : f32 to vector<128x64xf32>
    %7 = arith.cmpf oge, %5, %6 : vector<128x64xf32>
    %cst_6 = arith.constant 2.000000e-01 : f32
    %8 = vector.broadcast %cst_6 : f32 to vector<128x64xf32>
    %9 = arith.mulf %8, %5 : vector<128x64xf32>
    %10 = arith.select %7, %5, %9 : vector<128x64xi1>, vector<128x64xf32>
    %11 = arith.truncf %10 : vector<128x64xf32> to vector<128x64xbf16>
    %c0_7 = arith.constant 0 : index
    %c0_8 = arith.constant 0 : index
    %12 = vector.load %arg4[%c0_7, %c0_8] : memref<128x64xbf16, #tpu.memory_space<vmem>>, vector<128x64xbf16>
    tpu.vector_store %arg4[%c0_7, %c0_8], %11 {strides = array<i32>} : memref<128x64xbf16, #tpu.memory_space<vmem>>, vector<128x64xbf16>,
    return
  }
  func.func @transform_0(%arg0: i32) -> (i32, i32) {
    %c0_i32 = arith.constant 0 : i32
    %c0_i32_0 = arith.constant 0 : i32
    return %arg0, %c0_i32 : i32, i32
  }
  func.func @transform_1(%arg0: i32) -> (i32, i32) {
    %c0_i32 = arith.constant 0 : i32
    %c0_i32_0 = arith.constant 0 : i32
    %c0_i32_1 = arith.constant 0 : i32
    return %c0_i32, %c0_i32_0 : i32, i32
  }
  func.func @transform_2(%arg0: i32) -> (i32, i32) {
    %c0_i32 = arith.constant 0 : i32
    %c0_i32_0 = arith.constant 0 : i32
    %c0_i32_1 = arith.constant 0 : i32
    return %c0_i32, %c0_i32_0 : i32, i32
  }
  func.func @transform_3(%arg0: i32) -> (i32, i32) {
    %c0_i32 = arith.constant 0 : i32
    %c0_i32_0 = arith.constant 0 : i32
    return %arg0, %c0_i32 : i32, i32
  }
}

module attributes {stable_mosaic.version = 11 : i64} {
  func.func @_gemm_bias_act_kernel(%arg0: i32, %arg1: memref<32x1024xbf16, #tpu.memory_space<vmem>>, %arg2: memref<1024x128xbf16, #tpu.memory_space<vmem>>, %arg3: memref<1x128xf32, #tpu.memory_space<vmem>>, %arg4: memref<32x128xbf16, #tpu.memory_space<vmem>>) attributes {dimension_semantics = [#tpu.dimension_semantics<parallel>], iteration_bounds = array<i64: 1>, scalar_prefetch = 0 : i64, scratch_operands = 0 : i64, tpu.core_type = #tpu.core_type<tc>, window_params = [{transform_indices = @transform_0, window_bounds = array<i64: 32, 1024>}, {pipeline_mode = #tpu.pipeline_mode<synchronous>, transform_indices = @transform_1, window_bounds = array<i64: 1024, 128>}, {pipeline_mode = #tpu.pipeline_mode<synchronous>, transform_indices = @transform_2, window_bounds = array<i64: 1, 128>}, {transform_indices = @transform_3, window_bounds = array<i64: 32, 128>}]} {
    %c0 = arith.constant 0 : index
    %c0_0 = arith.constant 0 : index
    %0 = vector.load %arg1[%c0, %c0_0] : memref<32x1024xbf16, #tpu.memory_space<vmem>>, vector<32x1024xbf16>
    %c0_1 = arith.constant 0 : index
    %c0_2 = arith.constant 0 : index
    %1 = vector.load %arg2[%c0_1, %c0_2] : memref<1024x128xbf16, #tpu.memory_space<vmem>>, vector<1024x128xbf16>
    %cst = arith.constant dense<0.000000e+00> : vector<32x128xf32>
    %2 = tpu.matmul %0, %1, %cst {dimension_numbers = #tpu.dot_dimension_numbers<[1], [0], [0], [1], [0, 0, 1, 1], [], []>} : vector<32x1024xbf16>, vector<1024x128xbf16>, vector<32x128xf32> -> vector<32x128xf32>
    %c0_3 = arith.constant 0 : index
    %c0_4 = arith.constant 0 : index
    %3 = vector.load %arg3[%c0_3, %c0_4] : memref<1x128xf32, #tpu.memory_space<vmem>>, vector<1x128xf32>
    %4 = vector.broadcast %3 : vector<1x128xf32> to vector<32x128xf32>
    %5 = arith.addf %2, %4 : vector<32x128xf32>
    %cst_5 = arith.constant 0.000000e+00 : f32
    %6 = vector.broadcast %cst_5 : f32 to vector<32x128xf32>
    %7 = arith.cmpf oge, %5, %6 : vector<32x128xf32>
    %cst_6 = arith.constant 2.000000e-01 : f32
    %8 = vector.broadcast %cst_6 : f32 to vector<32x128xf32>
    %9 = arith.mulf %8, %5 : vector<32x128xf32>
    %10 = arith.select %7, %5, %9 : vector<32x128xi1>, vector<32x128xf32>
    %11 = arith.truncf %10 : vector<32x128xf32> to vector<32x128xbf16>
    %c0_7 = arith.constant 0 : index
    %c0_8 = arith.constant 0 : index
    %12 = vector.load %arg4[%c0_7, %c0_8] : memref<32x128xbf16, #tpu.memory_space<vmem>>, vector<32x128xbf16>
    tpu.vector_store %arg4[%c0_7, %c0_8], %11 {strides = array<i32>} : memref<32x128xbf16, #tpu.memory_space<vmem>>, vector<32x128xbf16>,
    return
  }
  func.func @transform_0(%arg0: i32) -> (i32, i32) {
    %c0_i32 = arith.constant 0 : i32
    %c0_i32_0 = arith.constant 0 : i32
    return %arg0, %c0_i32 : i32, i32
  }
  func.func @transform_1(%arg0: i32) -> (i32, i32) {
    %c0_i32 = arith.constant 0 : i32
    %c0_i32_0 = arith.constant 0 : i32
    %c0_i32_1 = arith.constant 0 : i32
    return %c0_i32, %c0_i32_0 : i32, i32
  }
  func.func @transform_2(%arg0: i32) -> (i32, i32) {
    %c0_i32 = arith.constant 0 : i32
    %c0_i32_0 = arith.constant 0 : i32
    %c0_i32_1 = arith.constant 0 : i32
    return %c0_i32, %c0_i32_0 : i32, i32
  }
  func.func @transform_3(%arg0: i32) -> (i32, i32) {
    %c0_i32 = arith.constant 0 : i32
    %c0_i32_0 = arith.constant 0 : i32
    return %arg0, %c0_i32 : i32, i32
  }
}

module attributes {stable_mosaic.version = 11 : i64} {
  func.func @_gemm_bias_act_kernel(%arg0: i32, %arg1: memref<8x2048xbf16, #tpu.memory_space<vmem>>, %arg2: memref<2048x256xbf16, #tpu.memory_space<vmem>>, %arg3: memref<1x256xf32, #tpu.memory_space<vmem>>, %arg4: memref<8x256xbf16, #tpu.memory_space<vmem>>) attributes {dimension_semantics = [#tpu.dimension_semantics<parallel>], iteration_bounds = array<i64: 1>, scalar_prefetch = 0 : i64, scratch_operands = 0 : i64, tpu.core_type = #tpu.core_type<tc>, window_params = [{transform_indices = @transform_0, window_bounds = array<i64: 8, 2048>}, {pipeline_mode = #tpu.pipeline_mode<synchronous>, transform_indices = @transform_1, window_bounds = array<i64: 2048, 256>}, {pipeline_mode = #tpu.pipeline_mode<synchronous>, transform_indices = @transform_2, window_bounds = array<i64: 1, 256>}, {transform_indices = @transform_3, window_bounds = array<i64: 8, 256>}]} {
    %c0 = arith.constant 0 : index
    %c0_0 = arith.constant 0 : index
    %0 = vector.load %arg1[%c0, %c0_0] : memref<8x2048xbf16, #tpu.memory_space<vmem>>, vector<8x2048xbf16>
    %c0_1 = arith.constant 0 : index
    %c0_2 = arith.constant 0 : index
    %1 = vector.load %arg2[%c0_1, %c0_2] : memref<2048x256xbf16, #tpu.memory_space<vmem>>, vector<2048x256xbf16>
    %cst = arith.constant dense<0.000000e+00> : vector<8x256xf32>
    %2 = tpu.matmul %0, %1, %cst {dimension_numbers = #tpu.dot_dimension_numbers<[1], [0], [0], [1], [0, 0, 1, 1], [], []>} : vector<8x2048xbf16>, vector<2048x256xbf16>, vector<8x256xf32> -> vector<8x256xf32>
    %c0_3 = arith.constant 0 : index
    %c0_4 = arith.constant 0 : index
    %3 = vector.load %arg3[%c0_3, %c0_4] : memref<1x256xf32, #tpu.memory_space<vmem>>, vector<1x256xf32>
    %4 = vector.broadcast %3 : vector<1x256xf32> to vector<8x256xf32>
    %5 = arith.addf %2, %4 : vector<8x256xf32>
    %cst_5 = arith.constant 0.000000e+00 : f32
    %6 = vector.broadcast %cst_5 : f32 to vector<8x256xf32>
    %7 = arith.cmpf oge, %5, %6 : vector<8x256xf32>
    %cst_6 = arith.constant 2.000000e-01 : f32
    %8 = vector.broadcast %cst_6 : f32 to vector<8x256xf32>
    %9 = arith.mulf %8, %5 : vector<8x256xf32>
    %10 = arith.select %7, %5, %9 : vector<8x256xi1>, vector<8x256xf32>
    %11 = arith.truncf %10 : vector<8x256xf32> to vector<8x256xbf16>
    %c0_7 = arith.constant 0 : index
    %c0_8 = arith.constant 0 : index
    %12 = vector.load %arg4[%c0_7, %c0_8] : memref<8x256xbf16, #tpu.memory_space<vmem>>, vector<8x256xbf16>
    tpu.vector_store %arg4[%c0_7, %c0_8], %11 {strides = array<i32>} : memref<8x256xbf16, #tpu.memory_space<vmem>>, vector<8x256xbf16>,
    return
  }
  func.func @transform_0(%arg0: i32) -> (i32, i32) {
    %c0_i32 = arith.constant 0 : i32
    %c0_i32_0 = arith.constant 0 : i32
    return %arg0, %c0_i32 : i32, i32
  }
  func.func @transform_1(%arg0: i32) -> (i32, i32) {
    %c0_i32 = arith.constant 0 : i32
    %c0_i32_0 = arith.constant 0 : i32
    %c0_i32_1 = arith.constant 0 : i32
    return %c0_i32, %c0_i32_0 : i32, i32
  }
  func.func @transform_2(%arg0: i32) -> (i32, i32) {
    %c0_i32 = arith.constant 0 : i32
    %c0_i32_0 = arith.constant 0 : i32
    %c0_i32_1 = arith.constant 0 : i32
    return %c0_i32, %c0_i32_0 : i32, i32
  }
  func.func @transform_3(%arg0: i32) -> (i32, i32) {
    %c0_i32 = arith.constant 0 : i32
    %c0_i32_0 = arith.constant 0 : i32
    return %arg0, %c0_i32 : i32, i32
  }
}

module attributes {stable_mosaic.version = 11 : i64} {
  func.func @_gemm_bias_act_kernel(%arg0: i32, %arg1: memref<2x4096xbf16, #tpu.memory_space<vmem>>, %arg2: memref<4096x512xbf16, #tpu.memory_space<vmem>>, %arg3: memref<1x512xf32, #tpu.memory_space<vmem>>, %arg4: memref<2x512xbf16, #tpu.memory_space<vmem>>) attributes {dimension_semantics = [#tpu.dimension_semantics<parallel>], iteration_bounds = array<i64: 1>, scalar_prefetch = 0 : i64, scratch_operands = 0 : i64, tpu.core_type = #tpu.core_type<tc>, window_params = [{transform_indices = @transform_0, window_bounds = array<i64: 2, 4096>}, {pipeline_mode = #tpu.pipeline_mode<synchronous>, transform_indices = @transform_1, window_bounds = array<i64: 4096, 512>}, {pipeline_mode = #tpu.pipeline_mode<synchronous>, transform_indices = @transform_2, window_bounds = array<i64: 1, 512>}, {transform_indices = @transform_3, window_bounds = array<i64: 2, 512>}]} {
    %c0 = arith.constant 0 : index
    %c0_0 = arith.constant 0 : index
    %0 = vector.load %arg1[%c0, %c0_0] : memref<2x4096xbf16, #tpu.memory_space<vmem>>, vector<2x4096xbf16>
    %c0_1 = arith.constant 0 : index
    %c0_2 = arith.constant 0 : index
    %1 = vector.load %arg2[%c0_1, %c0_2] : memref<4096x512xbf16, #tpu.memory_space<vmem>>, vector<4096x512xbf16>
    %cst = arith.constant dense<0.000000e+00> : vector<2x512xf32>
    %2 = tpu.matmul %0, %1, %cst {dimension_numbers = #tpu.dot_dimension_numbers<[1], [0], [0], [1], [0, 0, 1, 1], [], []>} : vector<2x4096xbf16>, vector<4096x512xbf16>, vector<2x512xf32> -> vector<2x512xf32>
    %c0_3 = arith.constant 0 : index
    %c0_4 = arith.constant 0 : index
    %3 = vector.load %arg3[%c0_3, %c0_4] : memref<1x512xf32, #tpu.memory_space<vmem>>, vector<1x512xf32>
    %4 = vector.broadcast %3 : vector<1x512xf32> to vector<2x512xf32>
    %5 = arith.addf %2, %4 : vector<2x512xf32>
    %cst_5 = arith.constant 0.000000e+00 : f32
    %6 = vector.broadcast %cst_5 : f32 to vector<2x512xf32>
    %7 = arith.cmpf oge, %5, %6 : vector<2x512xf32>
    %cst_6 = arith.constant 2.000000e-01 : f32
    %8 = vector.broadcast %cst_6 : f32 to vector<2x512xf32>
    %9 = arith.mulf %8, %5 : vector<2x512xf32>
    %10 = arith.select %7, %5, %9 : vector<2x512xi1>, vector<2x512xf32>
    %11 = arith.truncf %10 : vector<2x512xf32> to vector<2x512xbf16>
    %c0_7 = arith.constant 0 : index
    %c0_8 = arith.constant 0 : index
    %12 = vector.load %arg4[%c0_7, %c0_8] : memref<2x512xbf16, #tpu.memory_space<vmem>>, vector<2x512xbf16>
    tpu.vector_store %arg4[%c0_7, %c0_8], %11 {strides = array<i32>} : memref<2x512xbf16, #tpu.memory_space<vmem>>, vector<2x512xbf16>,
    return
  }
  func.func @transform_0(%arg0: i32) -> (i32, i32) {
    %c0_i32 = arith.constant 0 : i32
    %c0_i32_0 = arith.constant 0 : i32
    return %arg0, %c0_i32 : i32, i32
  }
  func.func @transform_1(%arg0: i32) -> (i32, i32) {
    %c0_i32 = arith.constant 0 : i32
    %c0_i32_0 = arith.constant 0 : i32
    %c0_i32_1 = arith.constant 0 : i32
    return %c0_i32, %c0_i32_0 : i32, i32
  }
  func.func @transform_2(%arg0: i32) -> (i32, i32) {
    %c0_i32 = arith.constant 0 : i32
    %c0_i32_0 = arith.constant 0 : i32
    %c0_i32_1 = arith.constant 0 : i32
    return %c0_i32, %c0_i32_0 : i32, i32
  }
  func.func @transform_3(%arg0: i32) -> (i32, i32) {
    %c0_i32 = arith.constant 0 : i32
    %c0_i32_0 = arith.constant 0 : i32
    return %arg0, %c0_i32 : i32, i32
  }
}

module attributes {stable_mosaic.version = 11 : i64} {
  func.func @_gemm_bias_act_kernel(%arg0: i32, %arg1: memref<2x512xbf16, #tpu.memory_space<vmem>>, %arg2: memref<512x32xbf16, #tpu.memory_space<vmem>>, %arg3: memref<1x32xf32, #tpu.memory_space<vmem>>, %arg4: memref<2x32xf32, #tpu.memory_space<vmem>>) attributes {dimension_semantics = [#tpu.dimension_semantics<parallel>], iteration_bounds = array<i64: 1>, scalar_prefetch = 0 : i64, scratch_operands = 0 : i64, tpu.core_type = #tpu.core_type<tc>, window_params = [{transform_indices = @transform_0, window_bounds = array<i64: 2, 512>}, {pipeline_mode = #tpu.pipeline_mode<synchronous>, transform_indices = @transform_1, window_bounds = array<i64: 512, 32>}, {pipeline_mode = #tpu.pipeline_mode<synchronous>, transform_indices = @transform_2, window_bounds = array<i64: 1, 32>}, {transform_indices = @transform_3, window_bounds = array<i64: 2, 32>}]} {
    %c0 = arith.constant 0 : index
    %c0_0 = arith.constant 0 : index
    %0 = vector.load %arg1[%c0, %c0_0] : memref<2x512xbf16, #tpu.memory_space<vmem>>, vector<2x512xbf16>
    %c0_1 = arith.constant 0 : index
    %c0_2 = arith.constant 0 : index
    %1 = vector.load %arg2[%c0_1, %c0_2] : memref<512x32xbf16, #tpu.memory_space<vmem>>, vector<512x32xbf16>
    %cst = arith.constant dense<0.000000e+00> : vector<2x32xf32>
    %2 = tpu.matmul %0, %1, %cst {dimension_numbers = #tpu.dot_dimension_numbers<[1], [0], [0], [1], [0, 0, 1, 1], [], []>} : vector<2x512xbf16>, vector<512x32xbf16>, vector<2x32xf32> -> vector<2x32xf32>
    %c0_3 = arith.constant 0 : index
    %c0_4 = arith.constant 0 : index
    %3 = vector.load %arg3[%c0_3, %c0_4] : memref<1x32xf32, #tpu.memory_space<vmem>>, vector<1x32xf32>
    %4 = vector.broadcast %3 : vector<1x32xf32> to vector<2x32xf32>
    %5 = arith.addf %2, %4 : vector<2x32xf32>
    %c0_5 = arith.constant 0 : index
    %c0_6 = arith.constant 0 : index
    %6 = vector.load %arg4[%c0_5, %c0_6] : memref<2x32xf32, #tpu.memory_space<vmem>>, vector<2x32xf32>
    tpu.vector_store %arg4[%c0_5, %c0_6], %5 {strides = array<i32>} : memref<2x32xf32, #tpu.memory_space<vmem>>, vector<2x32xf32>,
    return
  }
  func.func @transform_0(%arg0: i32) -> (i32, i32) {
    %c0_i32 = arith.constant 0 : i32
    %c0_i32_0 = arith.constant 0 : i32
    return %arg0, %c0_i32 : i32, i32
  }
  func.func @transform_1(%arg0: i32) -> (i32, i32) {
    %c0_i32 = arith.constant 0 : i32
    %c0_i32_0 = arith.constant 0 : i32
    %c0_i32_1 = arith.constant 0 : i32
    return %c0_i32, %c0_i32_0 : i32, i32
  }
  func.func @transform_2(%arg0: i32) -> (i32, i32) {
    %c0_i32 = arith.constant 0 : i32
    %c0_i32_0 = arith.constant 0 : i32
    %c0_i32_1 = arith.constant 0 : i32
    return %c0_i32, %c0_i32_0 : i32, i32
  }
  func.func @transform_3(%arg0: i32) -> (i32, i32) {
    %c0_i32 = arith.constant 0 : i32
    %c0_i32_0 = arith.constant 0 : i32
    return %arg0, %c0_i32 : i32, i32
  }
}

</mosaic_0001>

<bundles_post_ra>
// kernel: encoder_forward.5
= control target key start
LH: loop header
LB: loop body
LE: loop exit
PB: predicated region body
PF: predicated region fallthrough
CT: control target
= control target key end

     0   :  { %8 = vsyncpa [#allocation3], 0  ;;  %s695_s0 = inlined_call_operand.vmem [shape: bf16[128,64], index: 0, kind: input, shape index: {}]   ;;  %s696_s1 = inlined_call_operand.hbm [shape: bf16[64,64], index: 1, kind: input, shape index: {}]   ;;  %s697_s2 = inlined_call_operand.hbm [shape: f32[1,64], index: 2, kind: input, shape index: {}]   ;;  %s698_s3 = inlined_call_operand.vmem [shape: bf16[128,64], index: 3, kind: output, shape index: {}]  }
   0x1   :  { %9 = vsyncpa [#allocation5], 0  ;;  %s550_s12 = smov [#allocation2]  }
   0x2   :  { %s17_s13 = sshll.u32 %s550_s12, 4  ;;  %s18_s13 = int_to_ptr.vmem [resolvable:$true] %s17_s13 }
   0x3   :  { %s514_s14 = scalar_lea.vmem %s18_s13, 512  ;;  %p519_p1 = scmp.lt.s32.totalorder %s18_s13, %s18_s13 }
   0x4   :  { %p515_p0 = scmp.ne.s32.totalorder %s18_s13, %s514_s14  ;;  %p520_p2 = scmp.lt.s32.totalorder %s514_s14, %s514_s14 }
   0x6   :  { %p521_p3 = por %p520_p2, %p519_p1 }
   0x8   :  { %p522_p4 = pnand %p521_p3, %p515_p0 }
   0xa   :  { %525 = shalt.err (!%p522_p4)
}
   0xb   :  { %s551_s15 = smov 64   ;;  %s552_s16 = smov 4  }
   0xc   :  { %23 = dma.hbm_to_vmem [thread:$0]  %s696_s1, 512, %s18_s13, [#allocation3], %s551_s15, %s551_s15, %s552_s16  }
   0xd   :  { %s553_s19 = smov [#allocation4]  }
   0xe   :  { %s30_s20 = sshll.u32 %s553_s19, 4  ;;  %s31_s20 = int_to_ptr.vmem [resolvable:$true] %s30_s20 }
   0xf   :  { %s534_s21 = scalar_lea.vmem %s31_s20, 16  ;;  %s538_s22 = scalar_lea.vmem %s31_s20, 32 }
  0x10   :  { %p535_p5 = scmp.ne.s32.totalorder %s31_s20, %s534_s21  ;;  %p539_p6 = scmp.lt.s32.totalorder %s31_s20, %s31_s20 }
  0x11   :  { %p540_p7 = scmp.lt.s32.totalorder %s538_s22, %s534_s21 }
  0x13   :  { %p541_p8 = por %p540_p7, %p539_p6 }
  0x15   :  { %p542_p9 = pnand %p541_p8, %p535_p5 }
  0x17   :  { %545 = shalt.err (!%p542_p9)
}
  0x18   :  { %33 = dma.hbm_to_vmem [thread:$0]  %s697_s2, 16, %s31_s20, [#allocation5]  }
  0x19   :  { %546 = dma.done.wait [#allocation3], 512  }
  0x1a   :  { %547 = vsyncadd [#allocation3], 4294966784 }
  0x1b   :  { %548 = dma.done.wait [#allocation5], 16  }
  0x1c   :  { %549 = vsyncadd [#allocation5], 4294967280  ;;  %v494_v0 = vld [vmem:[#allocation2 + $0x18] sm:$0xff]   ;;  %v495_v1 = vld [vmem:[#allocation2 + $0x10] sm:$0xff]   ;;  %vm136_vm0 = vcmask 523264   ;;  %vm370_vm3 = vcmask 519168  }
  0x1d   :  { %458 = vmatprep.subr.bf16.mxu0 %v494_v0  ;;  %482 = vmatprep.subr.bf16.mxu1 %v494_v0  ;;  %v496_v2 = vld [vmem:[#allocation2 + $0x8] sm:$0xff]   ;;  %v498_v3 = vld [vmem:[%s695_s0] sm:$0xff]   ;;  %v502_v8 = vld [vmem:[%s695_s0 + $0x10] sm:$0xff]  }
  0x1e   :  { %459 = vmatpush3.bf16.msra.mxu0 %v494_v0  ;;  %486 = vmatpush3.bf16.msra.mxu1 %v494_v0  ;;  %v499_v4 = vld [vmem:[%s695_s0 + $0x20] sm:$0xff]   ;;  %v500_v6 = vld [vmem:[%s695_s0 + $0x8] sm:$0xff]   ;;  %v503_v9 = vld [vmem:[%s695_s0 + $0x30] sm:$0xff]  }
  0x1f   :  { %460 = vmatprep.subr.bf16.mxu0 %v495_v1  ;;  %483 = vmatprep.subr.bf16.mxu1 %v495_v1  ;;  %v497_v5 = vld [vmem:[#allocation2] sm:$0xff]   ;;  %v501_v7 = vld [vmem:[%s695_s0 + $0x28] sm:$0xff]   ;;  %v504_v10 = vld [vmem:[%s695_s0 + $0x18] sm:$0xff]  }
  0x20   :  { %466 = vmatprep.mubr.msk.bf16.mxu0 %vm136_vm0, %v498_v3  ;;  %474 = vmatprep.mubr.msk.bf16.mxu1 %vm136_vm0, %v499_v4  ;;  %v505_v11 = vld [vmem:[%s695_s0 + $0x38] sm:$0xff]   ;;  %v612_v12 = vld [vmem:[#allocation4] ss:$0 sm:$0xff] }
  0x22   :  { %461 = vmatpush3.bf16.msra.mxu0 %v495_v1  ;;  %487 = vmatpush3.bf16.msra.mxu1 %v495_v1 }
  0x23   :  { %462 = vmatprep.subr.bf16.mxu0 %v496_v2  ;;  %484 = vmatprep.subr.bf16.mxu1 %v496_v2 }
  0x26   :  { %463 = vmatpush3.bf16.msra.mxu0 %v496_v2  ;;  %488 = vmatpush3.bf16.msra.mxu1 %v496_v2 }
  0x27   :  { %464 = vmatprep.subr.bf16.mxu0 %v497_v5  ;;  %485 = vmatprep.subr.bf16.mxu1 %v497_v5 }
  0x2a   :  { %465 = vmatpush3.bf16.msra.mxu0 %v497_v5  ;;  %489 = vmatpush3.bf16.msra.mxu1 %v497_v5 }
  0x2d   :  { %467 = vmatmul.mubr.msk.bf16.vlgmr.msra.gmra.mxu0 %vm136_vm0, %v500_v6  ;;  %475 = vmatmul.mubr.msk.bf16.vlgmr.msra.gmra.mxu1 %vm136_vm0, %v501_v7 }
  0x2e   :  { %470 = vmatprep.mubr.msk.bf16.mxu0 %vm136_vm0, %v502_v8  ;;  %478 = vmatprep.mubr.msk.bf16.mxu1 %vm136_vm0, %v503_v9 }
  0x35   :  { %471 = vmatmul.mubr.msk.bf16.gmra.mxu0 %vm136_vm0, %v504_v10  ;;  %479 = vmatmul.mubr.msk.bf16.gmra.mxu1 %vm136_vm0, %v505_v11 }
  0xed   :  { %v468_v13 = vpop.f32.mrf.mxu0  ;;  %v476_v14 = vpop.f32.mrf.mxu1 }
  0xee   :  { %v204_v15 = vadd.f32 %v468_v13, %v612_v12  ;;  %v236_v16 = vadd.f32 %v476_v14, %v612_v12 }
  0xef   :  { %v195_v17 = vpop.f32.mrf.mxu0  ;;  %v227_v18 = vpop.f32.mrf.mxu1 }
  0xf0   :  { %vm260_vm1 = vcmp.ge.f32.partialorder %v204_v15, 0.0  ;;  %v276_v19 = vmul.f32 0.2, %v204_v15  ;;  %vm268_vm2 = vcmp.ge.f32.partialorder %v236_v16, 0.0  ;;  %v284_v20 = vmul.f32 0.2, %v236_v16 }
  0xf1   :  { %v196_v21 = vadd.f32 %v612_v12, %v195_v17  ;;  %v228_v22 = vadd.f32 %v612_v12, %v227_v18  ;;  %v469_v23 = vpop.f32.mrf.mxu0  ;;  %v477_v24 = vpop.f32.mrf.mxu1 }
  0xf2   :  { %v292_v25 = vsel %vm260_vm1, %v204_v15, %v276_v19  ;;  %v300_v26 = vsel %vm268_vm2, %v236_v16, %v284_v20  ;;  %v207_v27 = vadd.f32 %v469_v23, %v612_v12  ;;  %v239_v28 = vadd.f32 %v477_v24, %v612_v12 }
  0xf3   :  { %v432_v29 = vpack.c.bf16 %v292_v25, %v292_v25  ;;  %v440_v30 = vpack.c.bf16 %v300_v26, %v300_v26  ;;  %vm258_vm4 = vcmp.ge.f32.partialorder %v196_v21, 0.0  ;;  %v274_v31 = vmul.f32 0.2, %v196_v21  ;;  %v198_v32 = vpop.f32.mrf.mxu0  ;;  %v230_v33 = vpop.f32.mrf.mxu1 }
  0xf4   :  { %vm266_vm5 = vcmp.ge.f32.partialorder %v228_v22, 0.0  ;;  %v282_v34 = vmul.f32 0.2, %v228_v22  ;;  %vm261_vm6 = vcmp.ge.f32.partialorder %v207_v27, 0.0  ;;  %v277_v35 = vmul.f32 0.2, %v207_v27 }
  0xf5   :  { %373 = vst.msk [vmem:[%s698_s3 + $0x8] sm:$0xf] %vm370_vm3, %v432_v29  ;;  %381 = vst.msk [vmem:[%s698_s3 + $0x28] sm:$0xf] %vm370_vm3, %v440_v30  ;;  %v290_v36 = vsel %vm258_vm4, %v196_v21, %v274_v31  ;;  %vm269_vm7 = vcmp.ge.f32.partialorder %v239_v28, 0.0  ;;  %v199_v38 = vadd.f32 %v612_v12, %v198_v32  ;;  %v472_v39 = vpop.f32.mrf.mxu0  ;;  %v480_v40 = vpop.f32.mrf.mxu1  ;;  %v231_v44 = vadd.f32 %v612_v12, %v230_v33 }
  0xf6   :  { %v285_v37 = vmul.f32 0.2, %v239_v28  ;;  %v430_v41 = vpack.c.bf16 %v290_v36, %v290_v36  ;;  %v298_v42 = vsel %vm266_vm5, %v228_v22, %v282_v34  ;;  %v293_v43 = vsel %vm261_vm6, %v207_v27, %v277_v35 }
  0xf7   :  { %v438_v45 = vpack.c.bf16 %v298_v42, %v298_v42  ;;  %v433_v46 = vpack.c.bf16 %v293_v43, %v293_v43  ;;  %vm259_vm8 = vcmp.ge.f32.partialorder %v199_v38, 0.0  ;;  %v211_v48 = vpop.f32.mrf.mxu0  ;;  %v243_v49 = vpop.f32.mrf.mxu1  ;;  %v275_v51 = vmul.f32 0.2, %v199_v38 }
  0xf8   :  { %v301_v47 = vsel %vm269_vm7, %v239_v28, %v285_v37  ;;  %371 = vst.msk [vmem:[%s698_s3] sm:$0xf] %vm370_vm3, %v430_v41  ;;  %vm267_vm9 = vcmp.ge.f32.partialorder %v231_v44, 0.0  ;;  %v283_v52 = vmul.f32 0.2, %v231_v44  ;;  %v220_v53 = vadd.f32 %v472_v39, %v612_v12 }
  0xf9   :  { %v441_v50 = vpack.c.bf16 %v301_v47, %v301_v47  ;;  %379 = vst.msk [vmem:[%s698_s3 + $0x20] sm:$0xf] %vm370_vm3, %v438_v45  ;;  %374 = vst.msk [vmem:[%s698_s3 + $0xc] sm:$0xf] %vm370_vm3, %v433_v46  ;;  %v252_v54 = vadd.f32 %v480_v40, %v612_v12  ;;  %v212_v55 = vadd.f32 %v612_v12, %v211_v48  ;;  %v473_v57 = vpop.f32.mrf.mxu0  ;;  %v481_v58 = vpop.f32.mrf.mxu1 }
  0xfa   :  { %v244_v56 = vadd.f32 %v612_v12, %v243_v49  ;;  %v291_v59 = vsel %vm259_vm8, %v199_v38, %v275_v51  ;;  %v299_v60 = vsel %vm267_vm9, %v231_v44, %v283_v52  ;;  %v223_v61 = vadd.f32 %v473_v57, %v612_v12 }
  0xfb   :  { %382 = vst.msk [vmem:[%s698_s3 + $0x2c] sm:$0xf] %vm370_vm3, %v441_v50  ;;  %v255_v62 = vadd.f32 %v481_v58, %v612_v12  ;;  %v431_v63 = vpack.c.bf16 %v291_v59, %v291_v59  ;;  %v439_v0 = vpack.c.bf16 %v299_v60, %v299_v60  ;;  %vm264_vm10 = vcmp.ge.f32.partialorder %v220_v53, 0.0  ;;  %v214_v6 = vpop.f32.mrf.mxu0  ;;  %v246_v11 = vpop.f32.mrf.mxu1 }
  0xfc   :  { %v280_v1 = vmul.f32 0.2, %v220_v53  ;;  %vm272_vm11 = vcmp.ge.f32.partialorder %v252_v54, 0.0  ;;  %v288_v2 = vmul.f32 0.2, %v252_v54  ;;  %vm262_vm12 = vcmp.ge.f32.partialorder %v212_v55, 0.0 }
  0xfd   :  { %v278_v3 = vmul.f32 0.2, %v212_v55  ;;  %372 = vst.msk [vmem:[%s698_s3 + $0x4] sm:$0xf] %vm370_vm3, %v431_v63  ;;  %380 = vst.msk [vmem:[%s698_s3 + $0x24] sm:$0xf] %vm370_vm3, %v439_v0  ;;  %v215_v19 = vadd.f32 %v612_v12, %v214_v6  ;;  %v247_v21 = vadd.f32 %v612_v12, %v246_v11 }
  0xfe   :  { %v296_v4 = vsel %vm264_vm10, %v220_v53, %v280_v1  ;;  %vm270_vm13 = vcmp.ge.f32.partialorder %v244_v56, 0.0  ;;  %v286_v5 = vmul.f32 0.2, %v244_v56  ;;  %vm265_vm14 = vcmp.ge.f32.partialorder %v223_v61, 0.0 }
  0xff   :  { %v436_v7 = vpack.c.bf16 %v296_v4, %v296_v4  ;;  %v304_v8 = vsel %vm272_vm11, %v252_v54, %v288_v2  ;;  %v294_v9 = vsel %vm262_vm12, %v212_v55, %v278_v3  ;;  %v281_v10 = vmul.f32 0.2, %v223_v61 }
 0x100   :  { %v444_v13 = vpack.c.bf16 %v304_v8, %v304_v8  ;;  %v434_v14 = vpack.c.bf16 %v294_v9, %v294_v9  ;;  %v302_v15 = vsel %vm270_vm13, %v244_v56, %v286_v5  ;;  %vm273_vm15 = vcmp.ge.f32.partialorder %v255_v62, 0.0 }
 0x101   :  { %377 = vst.msk [vmem:[%s698_s3 + $0x18] sm:$0xf] %vm370_vm3, %v436_v7  ;;  %v442_v16 = vpack.c.bf16 %v302_v15, %v302_v15  ;;  %v297_v17 = vsel %vm265_vm14, %v223_v61, %v281_v10  ;;  %v289_v18 = vmul.f32 0.2, %v255_v62  ;;  %vm263_vm0 = vcmp.ge.f32.partialorder %v215_v19, 0.0 }
 0x102   :  { %385 = vst.msk [vmem:[%s698_s3 + $0x38] sm:$0xf] %vm370_vm3, %v444_v13  ;;  %375 = vst.msk [vmem:[%s698_s3 + $0x10] sm:$0xf] %vm370_vm3, %v434_v14  ;;  %v437_v20 = vpack.c.bf16 %v297_v17, %v297_v17  ;;  %v279_v23 = vmul.f32 0.2, %v215_v19 }
 0x103   :  { %383 = vst.msk [vmem:[%s698_s3 + $0x30] sm:$0xf] %vm370_vm3, %v442_v16  ;;  %v305_v22 = vsel %vm273_vm15, %v255_v62, %v289_v18  ;;  %vm271_vm1 = vcmp.ge.f32.partialorder %v247_v21, 0.0  ;;  %v287_v25 = vmul.f32 0.2, %v247_v21 }
 0x104   :  { %378 = vst.msk [vmem:[%s698_s3 + $0x1c] sm:$0xf] %vm370_vm3, %v437_v20  ;;  %v445_v24 = vpack.c.bf16 %v305_v22, %v305_v22  ;;  %v295_v26 = vsel %vm263_vm0, %v215_v19, %v279_v23 }
 0x105   :  { %v435_v12 = vpack.c.bf16 %v295_v26, %v295_v26  ;;  %v303_v27 = vsel %vm271_vm1, %v247_v21, %v287_v25 }
 0x106   :  { %386 = vst.msk [vmem:[%s698_s3 + $0x3c] sm:$0xf] %vm370_vm3, %v445_v24  ;;  %v443_v28 = vpack.c.bf16 %v303_v27, %v303_v27 }
 0x107   :  { %376 = vst.msk [vmem:[%s698_s3 + $0x14] sm:$0xf] %vm370_vm3, %v435_v12 }
 0x108   :  { %384 = vst.msk [vmem:[%s698_s3 + $0x34] sm:$0xf] %vm370_vm3, %v443_v28 }
 0x109   :  { %391 = vsyncpa [#allocation3], 1 }
 0x10a   :  { %392 = vsyncpa [#allocation5], 1 }

// kernel: encoder_forward.6
= control target key start
LH: loop header
LB: loop body
LE: loop exit
PB: predicated region body
PF: predicated region fallthrough
CT: control target
= control target key end

     0   :  { %8 = vsyncpa [#allocation3], 0  ;;  %s1298_s0 = inlined_call_operand.vmem [shape: bf16[32,1024], index: 0, kind: input, shape index: {}]   ;;  %s1299_s1 = inlined_call_operand.hbm [shape: bf16[1024,128], index: 1, kind: input, shape index: {}]   ;;  %s1300_s2 = inlined_call_operand.hbm [shape: f32[1,128], index: 2, kind: input, shape index: {}]   ;;  %s1301_s3 = inlined_call_operand.vmem [shape: bf16[32,128], index: 3, kind: output, shape index: {}]  }
   0x1   :  { %9 = vsyncpa [#allocation5], 0  ;;  %s1214_s12 = smov [#allocation2]  }
   0x2   :  { %s17_s13 = sshll.u32 %s1214_s12, 4  ;;  %s18_s13 = int_to_ptr.vmem [resolvable:$true] %s17_s13 }
   0x3   :  { %s1178_s14 = scalar_lea.vmem %s18_s13, 8192  ;;  %p1183_p1 = scmp.lt.s32.totalorder %s18_s13, %s18_s13 }
   0x4   :  { %p1179_p0 = scmp.ne.s32.totalorder %s18_s13, %s1178_s14  ;;  %p1184_p2 = scmp.lt.s32.totalorder %s1178_s14, %s1178_s14 }
   0x6   :  { %p1185_p3 = por %p1184_p2, %p1183_p1 }
   0x8   :  { %p1186_p4 = pnand %p1185_p3, %p1179_p0 }
   0xa   :  { %1189 = shalt.err (!%p1186_p4)
}
   0xb   :  { %s1215_s15 = smov 64   ;;  %s1216_s16 = smov 4  }
   0xc   :  { %23 = dma.hbm_to_vmem [thread:$0]  %s1299_s1, 8192, %s18_s13, [#allocation3], %s1215_s15, %s1215_s15, %s1216_s16  }
   0xd   :  { %s1217_s19 = smov [#allocation4]  }
   0xe   :  { %s30_s20 = sshll.u32 %s1217_s19, 4  ;;  %s31_s20 = int_to_ptr.vmem [resolvable:$true] %s30_s20 }
   0xf   :  { %s1198_s21 = scalar_lea.vmem %s31_s20, 16  ;;  %s1202_s22 = scalar_lea.vmem %s31_s20, 32 }
  0x10   :  { %p1199_p5 = scmp.ne.s32.totalorder %s31_s20, %s1198_s21  ;;  %p1203_p6 = scmp.lt.s32.totalorder %s31_s20, %s31_s20 }
  0x11   :  { %p1204_p7 = scmp.lt.s32.totalorder %s1202_s22, %s1198_s21 }
  0x13   :  { %p1205_p8 = por %p1204_p7, %p1203_p6 }
  0x15   :  { %p1206_p9 = pnand %p1205_p8, %p1199_p5 }
  0x17   :  { %1209 = shalt.err (!%p1206_p9)
}
  0x18   :  { %33 = dma.hbm_to_vmem [thread:$0]  %s1300_s2, 16, %s31_s20, [#allocation5]  }
  0x19   :  { %1210 = dma.done.wait [#allocation3], 8192  }
  0x1a   :  { %1211 = vsyncadd [#allocation3], 4294959104 }
  0x1b   :  { %1212 = dma.done.wait [#allocation5], 16  }
  0x1c   :  { %1213 = vsyncadd [#allocation5], 4294967280  ;;  %v1106_v0 = vld [vmem:[#allocation2 + $0x78] sm:$0xff]   ;;  %v1110_v4 = vld [vmem:[#allocation2 + $0x70] sm:$0xff]  }
  0x1d   :  { %v1107_v1 = vld [vmem:[#allocation2 + $0xf8] sm:$0xff]   ;;  %990 = vmatprep.subr.bf16.mxu0 %v1106_v0  ;;  %v1111_v5 = vld [vmem:[#allocation2 + $0xf0] sm:$0xff]   ;;  %v1114_v8 = vld [vmem:[#allocation2 + $0x68] sm:$0xff]  }
  0x1e   :  { %v1108_v2 = vld [vmem:[#allocation2 + $0x38] sm:$0xff]   ;;  %1018 = vmatprep.subr.bf16.mxu1 %v1107_v1  ;;  %v1112_v6 = vld [vmem:[#allocation2 + $0x30] sm:$0xff]   ;;  %v1115_v9 = vld [vmem:[#allocation2 + $0xe8] sm:$0xff]  }
  0x1f   :  { %v1109_v3 = vld [vmem:[#allocation2 + $0xb8] sm:$0xff]   ;;  %991 = vmatpush3.bf16.msra.mxu0 %v1108_v2  ;;  %v1113_v7 = vld [vmem:[#allocation2 + $0xb0] sm:$0xff]   ;;  %v1116_v10 = vld [vmem:[#allocation2 + $0x28] sm:$0xff]  }
  0x20   :  { %1019 = vmatpush3.bf16.msra.mxu1 %v1109_v3  ;;  %992 = vmatprep.subr.bf16.mxu0 %v1110_v4  ;;  %v1117_v11 = vld [vmem:[#allocation2 + $0xa8] sm:$0xff]   ;;  %v1118_v12 = vld [vmem:[#allocation2 + $0x60] sm:$0xff]   ;;  %v1122_v16 = vld [vmem:[#allocation2 + $0x58] sm:$0xff]  }
  0x21   :  { %1020 = vmatprep.subr.bf16.mxu1 %v1111_v5  ;;  %v1119_v13 = vld [vmem:[#allocation2 + $0xe0] sm:$0xff]   ;;  %v1123_v17 = vld [vmem:[#allocation2 + $0xd8] sm:$0xff]   ;;  %v1126_v20 = vld [vmem:[#allocation2 + $0x50] sm:$0xff]  }
  0x22   :  { %v1120_v14 = vld [vmem:[#allocation2 + $0x20] sm:$0xff]   ;;  %v1124_v18 = vld [vmem:[#allocation2 + $0x18] sm:$0xff]   ;;  %v1127_v21 = vld [vmem:[#allocation2 + $0xd0] sm:$0xff]  }
  0x23   :  { %993 = vmatpush3.bf16.msra.mxu0 %v1112_v6  ;;  %v1121_v15 = vld [vmem:[#allocation2 + $0xa0] sm:$0xff]   ;;  %v1125_v19 = vld [vmem:[#allocation2 + $0x98] sm:$0xff]   ;;  %v1128_v22 = vld [vmem:[#allocation2 + $0x10] sm:$0xff]  }
  0x24   :  { %1021 = vmatpush3.bf16.msra.mxu1 %v1113_v7  ;;  %994 = vmatprep.subr.bf16.mxu0 %v1114_v8  ;;  %v1129_v23 = vld [vmem:[#allocation2 + $0x90] sm:$0xff]   ;;  %v1130_v24 = vld [vmem:[#allocation2 + $0x48] sm:$0xff]   ;;  %v1134_v28 = vld [vmem:[#allocation2 + $0x40] sm:$0xff]  }
  0x25   :  { %1022 = vmatprep.subr.bf16.mxu1 %v1115_v9  ;;  %v1131_v25 = vld [vmem:[#allocation2 + $0xc8] sm:$0xff]   ;;  %v1135_v29 = vld [vmem:[#allocation2 + $0xc0] sm:$0xff]   ;;  %v1138_v40 = vld [vmem:[#allocation2 + $0x178] sm:$0xff]  }
  0x26   :  { %v1132_v26 = vld [vmem:[#allocation2 + $0x8] sm:$0xff]   ;;  %v1136_v30 = vld [vmem:[#allocation2] sm:$0xff]   ;;  %v1139_v41 = vld [vmem:[#allocation2 + $0x1f8] sm:$0xff]  }
  0x27   :  { %995 = vmatpush3.bf16.msra.mxu0 %v1116_v10  ;;  %v1133_v27 = vld [vmem:[#allocation2 + $0x88] sm:$0xff]   ;;  %v1137_v31 = vld [vmem:[#allocation2 + $0x80] sm:$0xff]   ;;  %v1140_v42 = vld [vmem:[#allocation2 + $0x138] sm:$0xff]  }
  0x28   :  { %1023 = vmatpush3.bf16.msra.mxu1 %v1117_v11  ;;  %996 = vmatprep.subr.bf16.mxu0 %v1118_v12  ;;  %v41_v32 = vld [vmem:[%s1298_s0] sm:$0xff]  ;;  %v42_v34 = vld [vmem:[%s1298_s0 + $0x8] sm:$0xff]  ;;  %v1141_v43 = vld [vmem:[#allocation2 + $0x1b8] sm:$0xff]  }
  0x29   :  { %1024 = vmatprep.subr.bf16.mxu1 %v1119_v13  ;;  %v45_v33 = vld [vmem:[%s1298_s0 + $0x20] sm:$0xff]  ;;  %v46_v37 = vld [vmem:[%s1298_s0 + $0x28] sm:$0xff]  ;;  %v1142_v44 = vld [vmem:[#allocation2 + $0x170] sm:$0xff]  }
  0x2a   :  { %v891_v35 = vcombine.low %v41_v32, %v45_v33  ;;  %v892_v36 = vcombine.high %v41_v32, %v45_v33  ;;  %v893_v38 = vcombine.low %v42_v34, %v46_v37  ;;  %v894_v39 = vcombine.high %v42_v34, %v46_v37  ;;  %v1143_v45 = vld [vmem:[#allocation2 + $0x1f0] sm:$0xff]   ;;  %v1146_v48 = vld [vmem:[#allocation2 + $0x168] sm:$0xff]   ;;  %v1150_v52 = vld [vmem:[#allocation2 + $0x160] sm:$0xff]  }
  0x2b   :  { %997 = vmatpush3.bf16.msra.mxu0 %v1120_v14  ;;  %v1144_v46 = vld [vmem:[#allocation2 + $0x130] sm:$0xff]   ;;  %v1147_v49 = vld [vmem:[#allocation2 + $0x1e8] sm:$0xff]   ;;  %v1151_v53 = vld [vmem:[#allocation2 + $0x1e0] sm:$0xff]  }
  0x2c   :  { %1025 = vmatpush3.bf16.msra.mxu1 %v1121_v15  ;;  %998 = vmatprep.subr.bf16.mxu0 %v1122_v16  ;;  %v1145_v47 = vld [vmem:[#allocation2 + $0x1b0] sm:$0xff]   ;;  %v1148_v50 = vld [vmem:[#allocation2 + $0x128] sm:$0xff]   ;;  %v1152_v54 = vld [vmem:[#allocation2 + $0x120] sm:$0xff]  }
  0x2d   :  { %1026 = vmatprep.subr.bf16.mxu1 %v1123_v17  ;;  %688 = vmatprep.mubr.bf16.mxu0 %v892_v36  ;;  %v1149_v51 = vld [vmem:[#allocation2 + $0x1a8] sm:$0xff]   ;;  %v1153_v55 = vld [vmem:[#allocation2 + $0x1a0] sm:$0xff]   ;;  %v1154_v56 = vld [vmem:[#allocation2 + $0x158] sm:$0xff]  }
  0x2e   :  { %737 = vmatprep.mubr.bf16.mxu1 %v894_v39  ;;  %v1155_v57 = vld [vmem:[#allocation2 + $0x1d8] sm:$0xff]   ;;  %v49_v58 = vld [vmem:[%s1298_s0 + $0x40] sm:$0xff]  ;;  %v50_v0 = vld [vmem:[%s1298_s0 + $0x48] sm:$0xff] }
  0x2f   :  { %999 = vmatpush3.bf16.msra.mxu0 %v1124_v18  ;;  %v53_v59 = vld [vmem:[%s1298_s0 + $0x60] sm:$0xff]  ;;  %v1156_v61 = vld [vmem:[#allocation2 + $0x118] sm:$0xff]   ;;  %v54_v1 = vld [vmem:[%s1298_s0 + $0x68] sm:$0xff] }
  0x30   :  { %1027 = vmatpush3.bf16.msra.mxu1 %v1125_v19  ;;  %1000 = vmatprep.subr.bf16.mxu0 %v1126_v20  ;;  %v900_v60 = vcombine.high %v49_v58, %v53_v59  ;;  %v899_v62 = vcombine.low %v49_v58, %v53_v59  ;;  %v1157_v63 = vld [vmem:[#allocation2 + $0x198] sm:$0xff]   ;;  %v902_v2 = vcombine.high %v50_v0, %v54_v1  ;;  %v1158_v4 = vld [vmem:[#allocation2 + $0x150] sm:$0xff]   ;;  %v1162_v8 = vld [vmem:[#allocation2 + $0x148] sm:$0xff]  }
  0x31   :  { %1028 = vmatprep.subr.bf16.mxu1 %v1127_v21  ;;  %v901_v3 = vcombine.low %v50_v0, %v54_v1  ;;  %v1159_v5 = vld [vmem:[#allocation2 + $0x1d0] sm:$0xff]   ;;  %v1163_v9 = vld [vmem:[#allocation2 + $0x1c8] sm:$0xff]   ;;  %v1166_v12 = vld [vmem:[#allocation2 + $0x140] sm:$0xff]  }
  0x32   :  { %v1160_v6 = vld [vmem:[#allocation2 + $0x110] sm:$0xff]   ;;  %v1164_v10 = vld [vmem:[#allocation2 + $0x108] sm:$0xff]   ;;  %v1167_v13 = vld [vmem:[#allocation2 + $0x1c0] sm:$0xff]  }
  0x33   :  { %1001 = vmatpush3.bf16.msra.mxu0 %v1128_v22  ;;  %v1161_v7 = vld [vmem:[#allocation2 + $0x190] sm:$0xff]   ;;  %v1165_v11 = vld [vmem:[#allocation2 + $0x188] sm:$0xff]   ;;  %v1168_v14 = vld [vmem:[#allocation2 + $0x100] sm:$0xff]  }
  0x34   :  { %1029 = vmatpush3.bf16.msra.mxu1 %v1129_v23  ;;  %1002 = vmatprep.subr.bf16.mxu0 %v1130_v24  ;;  %v1169_v15 = vld [vmem:[#allocation2 + $0x180] sm:$0xff]   ;;  %v43_v16 = vld [vmem:[%s1298_s0 + $0x10] sm:$0xff]  ;;  %v44_v18 = vld [vmem:[%s1298_s0 + $0x18] sm:$0xff] }
  0x35   :  { %1030 = vmatprep.subr.bf16.mxu1 %v1131_v25  ;;  %v47_v17 = vld [vmem:[%s1298_s0 + $0x30] sm:$0xff]  ;;  %v48_v19 = vld [vmem:[%s1298_s0 + $0x38] sm:$0xff] }
  0x36   :  { %v895_v20 = vcombine.low %v43_v16, %v47_v17  ;;  %v896_v21 = vcombine.high %v43_v16, %v47_v17  ;;  %v897_v22 = vcombine.low %v44_v18, %v48_v19  ;;  %v898_v23 = vcombine.high %v44_v18, %v48_v19  ;;  %v51_v24 = vld [vmem:[%s1298_s0 + $0x50] sm:$0xff] }
  0x37   :  { %1003 = vmatpush3.bf16.msra.mxu0 %v1132_v26  ;;  %v55_v25 = vld [vmem:[%s1298_s0 + $0x70] sm:$0xff]  ;;  %v52_v26 = vld [vmem:[%s1298_s0 + $0x58] sm:$0xff] }
  0x38   :  { %1031 = vmatpush3.bf16.msra.mxu1 %v1133_v27  ;;  %1004 = vmatprep.subr.bf16.mxu0 %v1134_v28  ;;  %v904_v27 = vcombine.high %v51_v24, %v55_v25  ;;  %v56_v28 = vld [vmem:[%s1298_s0 + $0x78] sm:$0xff] }
  0x39   :  { %1032 = vmatprep.subr.bf16.mxu1 %v1135_v29  ;;  %v906_v29 = vcombine.high %v52_v26, %v56_v28 }
  0x3b   :  { %1005 = vmatpush3.bf16.msra.mxu0 %v1136_v30  ;;  %v903_v30 = vcombine.low %v51_v24, %v55_v25 }
  0x3c   :  { %1033 = vmatpush3.bf16.msra.mxu1 %v1137_v31  ;;  %1046 = vmatprep.subr.bf16.mxu0 %v1138_v40  ;;  %v905_v31 = vcombine.low %v52_v26, %v56_v28 }
  0x3d   :  { %1074 = vmatprep.subr.bf16.mxu1 %v1139_v41 }
  0x3e   :  { %689 = vmatmul.mubr.bf16.vlgmr.msra.gmra.mxu0 %v891_v35 }
  0x3f   :  { %738 = vmatmul.mubr.bf16.vlgmr.msra.gmra.mxu1 %v893_v38  ;;  %1047 = vmatpush3.bf16.msra.mxu0 %v1140_v42 }
  0x40   :  { %1075 = vmatpush3.bf16.msra.mxu1 %v1141_v43  ;;  %1048 = vmatprep.subr.bf16.mxu0 %v1142_v44 }
  0x41   :  { %1076 = vmatprep.subr.bf16.mxu1 %v1143_v45  ;;  %696 = vmatprep.mubr.bf16.mxu0 %v900_v60 }
  0x42   :  { %745 = vmatprep.mubr.bf16.mxu1 %v902_v2 }
  0x43   :  { %1049 = vmatpush3.bf16.msra.mxu0 %v1144_v46 }
  0x44   :  { %1077 = vmatpush3.bf16.msra.mxu1 %v1145_v47  ;;  %1050 = vmatprep.subr.bf16.mxu0 %v1146_v48  ;;  %v890_v47 = vld [vmem:[#allocation4] ss:$0 sm:$0xff] }
  0x45   :  { %1078 = vmatprep.subr.bf16.mxu1 %v1147_v49 }
  0x46   :  { %697 = vmatmul.mubr.bf16.gmra.mxu0 %v899_v62 }
  0x47   :  { %1051 = vmatpush3.bf16.msra.mxu0 %v1148_v50  ;;  %746 = vmatmul.mubr.bf16.gmra.mxu1 %v901_v3 }
  0x48   :  { %1079 = vmatpush3.bf16.msra.mxu1 %v1149_v51  ;;  %1052 = vmatprep.subr.bf16.mxu0 %v1150_v52 }
  0x49   :  { %1080 = vmatprep.subr.bf16.mxu1 %v1151_v53  ;;  %786 = vmatprep.mubr.bf16.mxu0 %v896_v21 }
  0x4a   :  { %835 = vmatprep.mubr.bf16.mxu1 %v898_v23 }
  0x4b   :  { %1053 = vmatpush3.bf16.msra.mxu0 %v1152_v54 }
  0x4c   :  { %1081 = vmatpush3.bf16.msra.mxu1 %v1153_v55  ;;  %1054 = vmatprep.subr.bf16.mxu0 %v1154_v56 }
  0x4d   :  { %1082 = vmatprep.subr.bf16.mxu1 %v1155_v57 }
  0x4f   :  { %1055 = vmatpush3.bf16.msra.mxu0 %v1156_v61 }
  0x50   :  { %1083 = vmatpush3.bf16.msra.mxu1 %v1157_v63  ;;  %1056 = vmatprep.subr.bf16.mxu0 %v1158_v4 }
  0x51   :  { %1084 = vmatprep.subr.bf16.mxu1 %v1159_v5 }
  0x53   :  { %1057 = vmatpush3.bf16.msra.mxu0 %v1160_v6 }
  0x54   :  { %1085 = vmatpush3.bf16.msra.mxu1 %v1161_v7  ;;  %1058 = vmatprep.subr.bf16.mxu0 %v1162_v8 }
  0x55   :  { %1086 = vmatprep.subr.bf16.mxu1 %v1163_v9 }
  0x57   :  { %1059 = vmatpush3.bf16.msra.mxu0 %v1164_v10 }
  0x58   :  { %1087 = vmatpush3.bf16.msra.mxu1 %v1165_v11  ;;  %1060 = vmatprep.subr.bf16.mxu0 %v1166_v12 }
  0x59   :  { %1088 = vmatprep.subr.bf16.mxu1 %v1167_v13 }
  0x5b   :  { %1061 = vmatpush3.bf16.msra.mxu0 %v1168_v14 }
  0x5c   :  { %1089 = vmatpush3.bf16.msra.mxu1 %v1169_v15 }
  0x5e   :  { %787 = vmatmul.mubr.bf16.vlgmr.msra.gmra.mxu0 %v895_v20 }
  0x5f   :  { %836 = vmatmul.mubr.bf16.vlgmr.msra.gmra.mxu1 %v897_v22  ;;  %794 = vmatprep.mubr.bf16.mxu0 %v904_v27 }
  0x60   :  { %843 = vmatprep.mubr.bf16.mxu1 %v906_v29 }
  0x66   :  { %795 = vmatmul.mubr.bf16.gmra.mxu0 %v903_v30 }
  0x67   :  { %844 = vmatmul.mubr.bf16.gmra.mxu1 %v905_v31 }
  0xfe   :  { %v1006_v32 = vpop.f32.mrf.mxu0 }
  0xff   :  { %v1034_v33 = vpop.f32.mrf.mxu1 }
 0x100   :  { %v1007_v34 = vpop.f32.mrf.mxu0 }
 0x101   :  { %v1035_v35 = vpop.f32.mrf.mxu1  ;;  %v1008_v46 = vadd.f32 %v1007_v34, %v1006_v32 }
 0x102   :  { %v1009_v36 = vpop.f32.mrf.mxu0  ;;  %v1036_v52 = vadd.f32 %v1035_v35, %v1034_v33 }
 0x103   :  { %v1037_v37 = vpop.f32.mrf.mxu1  ;;  %v691_v51 = vadd.f32 %v1008_v46, %v890_v47 }
 0x104   :  { %v1010_v38 = vpop.f32.mrf.mxu0 }
 0x105   :  { %v1038_v39 = vpop.f32.mrf.mxu1  ;;  %v1011_v48 = vadd.f32 %v1010_v38, %v1009_v36  ;;  %v740_v58 = vadd.f32 %v1036_v52, %v691_v51 }
 0x106   :  { %v1012_v40 = vpop.f32.mrf.mxu0  ;;  %v1039_v61 = vadd.f32 %v1038_v39, %v1037_v37 }
 0x107   :  { %v1040_v41 = vpop.f32.mrf.mxu1  ;;  %v694_v55 = vadd.f32 %v1011_v48, %v890_v47 }
 0x108   :  { %v1013_v42 = vpop.f32.mrf.mxu0 }
 0x109   :  { %v1041_v43 = vpop.f32.mrf.mxu1  ;;  %v1014_v59 = vadd.f32 %v1013_v42, %v1012_v40  ;;  %v743_v2 = vadd.f32 %v1039_v61, %v694_v55 }
 0x10a   :  { %v1015_v44 = vpop.f32.mrf.mxu0  ;;  %v1042_v7 = vadd.f32 %v1041_v43, %v1040_v41 }
 0x10b   :  { %v1043_v45 = vpop.f32.mrf.mxu1  ;;  %v699_v6 = vadd.f32 %v1014_v59, %v890_v47 }
 0x10c   :  { %v1016_v49 = vpop.f32.mrf.mxu0 }
 0x10d   :  { %v1044_v50 = vpop.f32.mrf.mxu1  ;;  %v1017_v3 = vadd.f32 %v1016_v49, %v1015_v44  ;;  %v748_v18 = vadd.f32 %v1042_v7, %v699_v6 }
 0x10e   :  { %v1045_v15 = vadd.f32 %v1044_v50, %v1043_v45 }
 0x10f   :  { %v702_v14 = vadd.f32 %v1017_v3, %v890_v47 }
 0x111   :  { %v751_v27 = vadd.f32 %v1045_v15, %v702_v14 }
 0x11e   :  { %v1062_v53 = vpop.f32.mrf.mxu0 }
 0x11f   :  { %v1090_v54 = vpop.f32.mrf.mxu1 }
 0x120   :  { %v1063_v56 = vpop.f32.mrf.mxu0 }
 0x121   :  { %v1091_v57 = vpop.f32.mrf.mxu1  ;;  %v1064_v60 = vadd.f32 %v1063_v56, %v1062_v53 }
 0x122   :  { %v1065_v62 = vpop.f32.mrf.mxu0  ;;  %v1092_v1 = vadd.f32 %v1091_v57, %v1090_v54 }
 0x123   :  { %v1093_v63 = vpop.f32.mrf.mxu1  ;;  %v789_v0 = vadd.f32 %v1064_v60, %v740_v58 }
 0x124   :  { %v1066_v4 = vpop.f32.mrf.mxu0 }
 0x125   :  { %v1094_v5 = vpop.f32.mrf.mxu1  ;;  %v838_v8 = vadd.f32 %v1092_v1, %v789_v0  ;;  %v1067_v9 = vadd.f32 %v1066_v4, %v1065_v62 }
 0x126   :  { %v1068_v10 = vpop.f32.mrf.mxu0  ;;  %v1095_v13 = vadd.f32 %v1094_v5, %v1093_v63 }
 0x127   :  { %v1096_v11 = vpop.f32.mrf.mxu1  ;;  %v792_v12 = vadd.f32 %v1067_v9, %v743_v2  ;;  %v856_v19 = vmul.f32 0.2, %v838_v8  ;;  %vm852_vm0 = vcmp.ge.f32.partialorder %v838_v8, 0.0 }
 0x128   :  { %v1069_v16 = vpop.f32.mrf.mxu0 }
 0x129   :  { %v1097_v17 = vpop.f32.mrf.mxu1  ;;  %v841_v20 = vadd.f32 %v1095_v13, %v792_v12  ;;  %v1070_v21 = vadd.f32 %v1069_v16, %v1068_v10  ;;  %v860_v30 = vsel %vm852_vm0, %v838_v8, %v856_v19 }
 0x12a   :  { %v1071_v22 = vpop.f32.mrf.mxu0  ;;  %v1098_v26 = vadd.f32 %v1097_v17, %v1096_v11 }
 0x12b   :  { %v1099_v23 = vpop.f32.mrf.mxu1  ;;  %vm853_vm1 = vcmp.ge.f32.partialorder %v841_v20, 0.0  ;;  %v857_v24 = vmul.f32 0.2, %v841_v20  ;;  %v797_v25 = vadd.f32 %v1070_v21, %v748_v18 }
 0x12c   :  { %v1072_v28 = vpop.f32.mrf.mxu0 }
 0x12d   :  { %v1100_v29 = vpop.f32.mrf.mxu1  ;;  %v861_v31 = vsel %vm853_vm1, %v841_v20, %v857_v24  ;;  %v846_v32 = vadd.f32 %v1098_v26, %v797_v25  ;;  %v1073_v33 = vadd.f32 %v1072_v28, %v1071_v22 }
 0x12e   :  { %v982_v34 = vpack.c.bf16 %v861_v31, %v860_v30  ;;  %v1101_v36 = vadd.f32 %v1100_v29, %v1099_v23 }
 0x12f   :  { %v800_v35 = vadd.f32 %v1073_v33, %v751_v27  ;;  %v858_v37 = vmul.f32 0.2, %v846_v32  ;;  %vm854_vm2 = vcmp.ge.f32.partialorder %v846_v32, 0.0 }
 0x130   :  { %983 = vst [vmem:[%s1301_s3] sm:$0xff] %v982_v34  }
 0x131   :  { %v849_v38 = vadd.f32 %v1101_v36, %v800_v35  ;;  %v862_v40 = vsel %vm854_vm2, %v846_v32, %v858_v37 }
 0x133   :  { %vm855_vm3 = vcmp.ge.f32.partialorder %v849_v38, 0.0  ;;  %v859_v39 = vmul.f32 0.2, %v849_v38 }
 0x135   :  { %v863_v41 = vsel %vm855_vm3, %v849_v38, %v859_v39 }
 0x136   :  { %v987_v42 = vpack.c.bf16 %v863_v41, %v862_v40 }
 0x138   :  { %989 = vst [vmem:[%s1301_s3 + $0x8] sm:$0xff] %v987_v42  }
 0x139   :  { %888 = vsyncpa [#allocation3], 1 }
 0x13a   :  { %889 = vsyncpa [#allocation5], 1 }

// kernel: encoder_forward.9
= control target key start
LH: loop header
LB: loop body
LE: loop exit
PB: predicated region body
PF: predicated region fallthrough
CT: control target
= control target key end

     0   :  { %v505_v22 = vmov 1966171168   ;;  %v99_v24 = vlaneseq  ;;  %vm388_vm0 = vcmask 254976   ;;  %s631_s1 = inlined_call_operand.vmem [shape: bf16[512,32], index: 1, kind: input, shape index: {}]   ;;  %s632_s0 = inlined_call_operand.vmem [shape: bf16[2,512], index: 0, kind: input, shape index: {}]   ;;  %s633_s2 = inlined_call_operand.vmem [shape: f32[1,32], index: 2, kind: input, shape index: {}]   ;;  %s634_s3 = inlined_call_operand.vmem [shape: f32[2,32], index: 3, kind: output, shape index: {}]  }
   0x1   :  { %v473_v0 = vld [vmem:[%s631_s1 + $0x78] sm:$0xff]   ;;  %v477_v4 = vld [vmem:[%s631_s1 + $0x70] sm:$0xff]   ;;  %v481_v8 = vld [vmem:[%s631_s1 + $0x68] sm:$0xff]   ;;  %v97_v23 = vunpack.c.l.s4 %v505_v22 }
   0x2   :  { %v474_v1 = vld [vmem:[%s631_s1 + $0xf8] sm:$0xff]   ;;  %428 = vmatprep.subr.bf16.mxu0 %v473_v0  ;;  %v478_v5 = vld [vmem:[%s631_s1 + $0xf0] sm:$0xff]   ;;  %v482_v9 = vld [vmem:[%s631_s1 + $0xe8] sm:$0xff]   ;;  %v100_v30 = vshrl.u32 %v99_v24, 7 }
   0x3   :  { %v475_v2 = vld [vmem:[%s631_s1 + $0x38] sm:$0xff]   ;;  %450 = vmatprep.subr.bf16.mxu1 %v474_v1  ;;  %v479_v6 = vld [vmem:[%s631_s1 + $0x30] sm:$0xff]   ;;  %v483_v10 = vld [vmem:[%s631_s1 + $0x28] sm:$0xff]   ;;  %v98_v29 = vunpack.c.0.s8 %v97_v23 }
   0x4   :  { %v476_v3 = vld [vmem:[%s631_s1 + $0xb8] sm:$0xff]   ;;  %429 = vmatpush3.bf16.msra.mxu0 %v475_v2  ;;  %v480_v7 = vld [vmem:[%s631_s1 + $0xb0] sm:$0xff]   ;;  %v484_v11 = vld [vmem:[%s631_s1 + $0xa8] sm:$0xff]  }
   0x5   :  { %451 = vmatpush3.bf16.msra.mxu1 %v476_v3  ;;  %430 = vmatprep.subr.bf16.mxu0 %v477_v4  ;;  %v485_v12 = vld [vmem:[%s631_s1 + $0x60] sm:$0xff]   ;;  %v489_v16 = vld [vmem:[%s631_s1 + $0x58] sm:$0xff]   ;;  %v493_v20 = vld [vmem:[%s631_s1 + $0x50] sm:$0xff]   ;;  %v101_v35 = vsub.s32 %v98_v29, %v100_v30 }
   0x6   :  { %452 = vmatprep.subr.bf16.mxu1 %v478_v5  ;;  %v486_v13 = vld [vmem:[%s631_s1 + $0xe0] sm:$0xff]   ;;  %v490_v17 = vld [vmem:[%s631_s1 + $0xd8] sm:$0xff]   ;;  %v494_v21 = vld [vmem:[%s631_s1 + $0xd0] sm:$0xff]  }
   0x7   :  { %v487_v14 = vld [vmem:[%s631_s1 + $0x20] sm:$0xff]   ;;  %v491_v18 = vld [vmem:[%s631_s1 + $0x18] sm:$0xff]   ;;  %v495_v25 = vld [vmem:[%s631_s1 + $0x10] sm:$0xff]  }
   0x8   :  { %431 = vmatpush3.bf16.msra.mxu0 %v479_v6  ;;  %v488_v15 = vld [vmem:[%s631_s1 + $0xa0] sm:$0xff]   ;;  %v492_v19 = vld [vmem:[%s631_s1 + $0x98] sm:$0xff]   ;;  %v496_v26 = vld [vmem:[%s631_s1 + $0x90] sm:$0xff]  }
   0x9   :  { %453 = vmatpush3.bf16.msra.mxu1 %v480_v7  ;;  %432 = vmatprep.subr.bf16.mxu0 %v481_v8  ;;  %v497_v27 = vld [vmem:[%s631_s1 + $0x48] sm:$0xff]   ;;  %v501_v33 = vld [vmem:[%s631_s1 + $0x40] sm:$0xff]  }
   0xa   :  { %454 = vmatprep.subr.bf16.mxu1 %v482_v9  ;;  %v498_v28 = vld [vmem:[%s631_s1 + $0xc8] sm:$0xff]   ;;  %v502_v34 = vld [vmem:[%s631_s1 + $0xc0] sm:$0xff]  }
   0xb   :  { %v499_v31 = vld [vmem:[%s631_s1 + $0x8] sm:$0xff]   ;;  %v503_v36 = vld [vmem:[%s631_s1] sm:$0xff]  }
   0xc   :  { %433 = vmatpush3.bf16.msra.mxu0 %v483_v10  ;;  %v500_v32 = vld [vmem:[%s631_s1 + $0x88] sm:$0xff]   ;;  %v504_v37 = vld [vmem:[%s631_s1 + $0x80] sm:$0xff]  }
   0xd   :  { %455 = vmatpush3.bf16.msra.mxu1 %v484_v11  ;;  %434 = vmatprep.subr.bf16.mxu0 %v485_v12  ;;  %v395_v38 = vld.sshfl [vmem:[%s632_s0] sm:$0x33 pattern:$0x75316420] }
   0xe   :  { %456 = vmatprep.subr.bf16.mxu1 %v486_v13  ;;  %v95_v39 = vcombine.high %v395_v38, %v395_v38  ;;  %v102_v40 = vrot.slane %v395_v38, %v101_v35  ;;  %v394_v46 = vld [vmem:[%s633_s2] ss:$0 sm:$0xff] }
  0x10   :  { %435 = vmatpush3.bf16.msra.mxu0 %v487_v14  ;;  %v109_v41 = vrot.slane %v95_v39, %v101_v35  ;;  %v110_v42 = vcombine.high %v102_v40, %v102_v40 }
  0x11   :  { %457 = vmatpush3.bf16.msra.mxu1 %v488_v15  ;;  %436 = vmatprep.subr.bf16.mxu0 %v489_v16 }
  0x12   :  { %458 = vmatprep.subr.bf16.mxu1 %v490_v17  ;;  %340 = vmatprep.mubr.bf16.mxu0 %v109_v41  ;;  %v111_v43 = vcombine.high %v109_v41, %v109_v41 }
  0x14   :  { %437 = vmatpush3.bf16.msra.mxu0 %v491_v18  ;;  %380 = vmatprep.mubr.bf16.mxu1 %v111_v43 }
  0x15   :  { %459 = vmatpush3.bf16.msra.mxu1 %v492_v19  ;;  %438 = vmatprep.subr.bf16.mxu0 %v493_v20 }
  0x16   :  { %460 = vmatprep.subr.bf16.mxu1 %v494_v21 }
  0x18   :  { %439 = vmatpush3.bf16.msra.mxu0 %v495_v25 }
  0x19   :  { %461 = vmatpush3.bf16.msra.mxu1 %v496_v26  ;;  %440 = vmatprep.subr.bf16.mxu0 %v497_v27 }
  0x1a   :  { %462 = vmatprep.subr.bf16.mxu1 %v498_v28 }
  0x1c   :  { %441 = vmatpush3.bf16.msra.mxu0 %v499_v31 }
  0x1d   :  { %463 = vmatpush3.bf16.msra.mxu1 %v500_v32  ;;  %442 = vmatprep.subr.bf16.mxu0 %v501_v33 }
  0x1e   :  { %464 = vmatprep.subr.bf16.mxu1 %v502_v34 }
  0x20   :  { %443 = vmatpush3.bf16.msra.mxu0 %v503_v36 }
  0x21   :  { %465 = vmatpush3.bf16.msra.mxu1 %v504_v37 }
  0x23   :  { %341 = vmatmul.mubr.bf16.vlgmr.msra.gmra.mxu0 %v102_v40 }
  0x24   :  { %381 = vmatmul.mubr.bf16.vlgmr.msra.gmra.mxu1 %v110_v42 }
  0xe3   :  { %v444_v44 = vpop.f32.mrf.mxu0 }
  0xe4   :  { %v466_v45 = vpop.f32.mrf.mxu1 }
  0xe5   :  { %v445_v47 = vpop.f32.mrf.mxu0 }
  0xe6   :  { %v446_v48 = vadd.f32 %v445_v47, %v444_v44  ;;  %v467_v49 = vpop.f32.mrf.mxu1 }
  0xe7   :  { %v447_v50 = vpop.f32.mrf.mxu0  ;;  %v468_v52 = vadd.f32 %v467_v49, %v466_v45 }
  0xe8   :  { %v343_v51 = vadd.f32 %v446_v48, %v394_v46  ;;  %v469_v53 = vpop.f32.mrf.mxu1 }
  0xe9   :  { %v448_v54 = vpop.f32.mrf.mxu0 }
  0xea   :  { %v383_v55 = vadd.f32 %v468_v52, %v343_v51  ;;  %v470_v56 = vpop.f32.mrf.mxu1 }
  0xec   :  { %389 = vst.msk [vmem:[%s634_s3] sm:$0x3] %vm388_vm0, %v383_v55 }

// kernel: encoder_forward.7
= control target key start
LH: loop header
LB: loop body
LE: loop exit
PB: predicated region body
PF: predicated region fallthrough
CT: control target
= control target key end

     0   :  { %8 = vsyncpa [#allocation3], 0  ;;  %s2816_s0 = inlined_call_operand.vmem [shape: bf16[8,2048], index: 0, kind: input, shape index: {}]   ;;  %s2817_s1 = inlined_call_operand.hbm [shape: bf16[2048,256], index: 1, kind: input, shape index: {}]   ;;  %s2818_s2 = inlined_call_operand.hbm [shape: f32[1,256], index: 2, kind: input, shape index: {}]   ;;  %s2819_s3 = inlined_call_operand.vmem [shape: bf16[8,256], index: 3, kind: output, shape index: {}]  }
   0x1   :  { %9 = vsyncpa [#allocation5], 0  ;;  %s2723_s12 = smov [#allocation2]  }
   0x2   :  { %s17_s13 = sshll.u32 %s2723_s12, 4  ;;  %s18_s13 = int_to_ptr.vmem [resolvable:$true] %s17_s13 }
   0x3   :  { %s2687_s14 = scalar_lea.vmem %s18_s13, 32768  ;;  %p2692_p1 = scmp.lt.s32.totalorder %s18_s13, %s18_s13 }
   0x4   :  { %p2688_p0 = scmp.ne.s32.totalorder %s18_s13, %s2687_s14  ;;  %p2693_p2 = scmp.lt.s32.totalorder %s2687_s14, %s2687_s14 }
   0x6   :  { %p2694_p3 = por %p2693_p2, %p2692_p1 }
   0x8   :  { %p2695_p4 = pnand %p2694_p3, %p2688_p0 }
   0xa   :  { %2698 = shalt.err (!%p2695_p4)
}
   0xb   :  { %s2724_s15 = smov 128   ;;  %s2725_s16 = smov 8  }
   0xc   :  { %23 = dma.hbm_to_vmem [thread:$0]  %s2817_s1, 32768, %s18_s13, [#allocation3], %s2724_s15, %s2724_s15, %s2725_s16  }
   0xd   :  { %s2726_s19 = smov [#allocation4]  }
   0xe   :  { %s30_s20 = sshll.u32 %s2726_s19, 4  ;;  %s31_s20 = int_to_ptr.vmem [resolvable:$true] %s30_s20 }
   0xf   :  { %s2707_s21 = scalar_lea.vmem %s31_s20, 32  ;;  %p2712_p6 = scmp.lt.s32.totalorder %s31_s20, %s31_s20 }
  0x10   :  { %p2708_p5 = scmp.ne.s32.totalorder %s31_s20, %s2707_s21  ;;  %p2713_p7 = scmp.lt.s32.totalorder %s2707_s21, %s2707_s21 }
  0x12   :  { %p2714_p8 = por %p2713_p7, %p2712_p6 }
  0x14   :  { %p2715_p9 = pnand %p2714_p8, %p2708_p5 }
  0x16   :  { %2718 = shalt.err (!%p2715_p9)
}
  0x17   :  { %33 = dma.hbm_to_vmem [thread:$0]  %s2818_s2, 32, %s31_s20, [#allocation5]  }
  0x18   :  { %2719 = dma.done.wait [#allocation3], 32768  }
  0x19   :  { %2720 = vsyncadd [#allocation3], 4294934528 }
  0x1a   :  { %2721 = dma.done.wait [#allocation5], 32  }
  0x1b   :  { %2722 = vsyncadd [#allocation5], 4294967264  ;;  %v2279_v0 = vld [vmem:[#allocation2 + $0x74] ss:$8 sps:$4 sm:$0xff]   ;;  %v2283_v2 = vld [vmem:[#allocation2 + $0x70] ss:$8 sps:$4 sm:$0xff]  }
  0x1c   :  { %v2281_v1 = vld [vmem:[#allocation2 + $0x174] ss:$8 sps:$4 sm:$0xff]   ;;  %1652 = vmatprep.subr.bf16.mxu0 %v2279_v0  ;;  %v2284_v3 = vld [vmem:[#allocation2 + $0x170] ss:$8 sps:$4 sm:$0xff]   ;;  %v2285_v4 = vld [vmem:[#allocation2 + $0x64] ss:$8 sps:$4 sm:$0xff]  }
  0x1d   :  { %1693 = vmatprep.subr.bf16.mxu1 %v2281_v1  ;;  %1653 = vmatpush1.bf16.msra.mxu0 %v2283_v2  ;;  %v2287_v5 = vld [vmem:[#allocation2 + $0x164] ss:$8 sps:$4 sm:$0xff]   ;;  %v2289_v6 = vld [vmem:[#allocation2 + $0x60] ss:$8 sps:$4 sm:$0xff]   ;;  %v2291_v8 = vld [vmem:[#allocation2 + $0x54] ss:$8 sps:$4 sm:$0xff]  }
  0x1e   :  { %1694 = vmatpush1.bf16.msra.mxu1 %v2284_v3  ;;  %1654 = vmatprep.subr.bf16.mxu0 %v2285_v4  ;;  %v2290_v7 = vld [vmem:[#allocation2 + $0x160] ss:$8 sps:$4 sm:$0xff]   ;;  %v2293_v9 = vld [vmem:[#allocation2 + $0x154] ss:$8 sps:$4 sm:$0xff]   ;;  %v2295_v10 = vld [vmem:[#allocation2 + $0x50] ss:$8 sps:$4 sm:$0xff]  }
  0x1f   :  { %1695 = vmatprep.subr.bf16.mxu1 %v2287_v5  ;;  %v2296_v11 = vld [vmem:[#allocation2 + $0x150] ss:$8 sps:$4 sm:$0xff]   ;;  %v2297_v12 = vld [vmem:[#allocation2 + $0x44] ss:$8 sps:$4 sm:$0xff]   ;;  %v2301_v14 = vld [vmem:[#allocation2 + $0x40] ss:$8 sps:$4 sm:$0xff]  }
  0x20   :  { %v2299_v13 = vld [vmem:[#allocation2 + $0x144] ss:$8 sps:$4 sm:$0xff]   ;;  %v2302_v15 = vld [vmem:[#allocation2 + $0x140] ss:$8 sps:$4 sm:$0xff]   ;;  %v2303_v16 = vld [vmem:[#allocation2 + $0x34] ss:$8 sps:$4 sm:$0xff]  }
  0x21   :  { %1655 = vmatpush1.bf16.msra.mxu0 %v2289_v6  ;;  %v2305_v17 = vld [vmem:[#allocation2 + $0x134] ss:$8 sps:$4 sm:$0xff]   ;;  %v2307_v18 = vld [vmem:[#allocation2 + $0x30] ss:$8 sps:$4 sm:$0xff]   ;;  %v2309_v20 = vld [vmem:[#allocation2 + $0x24] ss:$8 sps:$4 sm:$0xff]  }
  0x22   :  { %1696 = vmatpush1.bf16.msra.mxu1 %v2290_v7  ;;  %1656 = vmatprep.subr.bf16.mxu0 %v2291_v8  ;;  %v2308_v19 = vld [vmem:[#allocation2 + $0x130] ss:$8 sps:$4 sm:$0xff]   ;;  %v2311_v21 = vld [vmem:[#allocation2 + $0x124] ss:$8 sps:$4 sm:$0xff]   ;;  %v2313_v22 = vld [vmem:[#allocation2 + $0x20] ss:$8 sps:$4 sm:$0xff]  }
  0x23   :  { %1697 = vmatprep.subr.bf16.mxu1 %v2293_v9  ;;  %v2314_v23 = vld [vmem:[#allocation2 + $0x120] ss:$8 sps:$4 sm:$0xff]   ;;  %v2315_v24 = vld [vmem:[#allocation2 + $0x14] ss:$8 sps:$4 sm:$0xff]   ;;  %v2319_v26 = vld [vmem:[#allocation2 + $0x10] ss:$8 sps:$4 sm:$0xff]  }
  0x24   :  { %v2317_v25 = vld [vmem:[#allocation2 + $0x114] ss:$8 sps:$4 sm:$0xff]   ;;  %v2320_v27 = vld [vmem:[#allocation2 + $0x110] ss:$8 sps:$4 sm:$0xff]   ;;  %v2321_v28 = vld [vmem:[#allocation2 + $0x4] ss:$8 sps:$4 sm:$0xff]  }
  0x25   :  { %1657 = vmatpush1.bf16.msra.mxu0 %v2295_v10  ;;  %v2323_v29 = vld [vmem:[#allocation2 + $0x104] ss:$8 sps:$4 sm:$0xff]   ;;  %v2325_v30 = vld [vmem:[#allocation2] ss:$8 sps:$4 sm:$0xff]   ;;  %v2327_v32 = vld [vmem:[#allocation2 + $0xf4] ss:$8 sps:$4 sm:$0xff]  }
  0x26   :  { %1698 = vmatpush1.bf16.msra.mxu1 %v2296_v11  ;;  %1658 = vmatprep.subr.bf16.mxu0 %v2297_v12  ;;  %v2326_v31 = vld [vmem:[#allocation2 + $0x100] ss:$8 sps:$4 sm:$0xff]   ;;  %v2329_v33 = vld [vmem:[#allocation2 + $0x1f4] ss:$8 sps:$4 sm:$0xff]   ;;  %v2331_v34 = vld [vmem:[#allocation2 + $0xf0] ss:$8 sps:$4 sm:$0xff]  }
  0x27   :  { %1699 = vmatprep.subr.bf16.mxu1 %v2299_v13  ;;  %v2332_v35 = vld [vmem:[#allocation2 + $0x1f0] ss:$8 sps:$4 sm:$0xff]   ;;  %v2333_v36 = vld [vmem:[#allocation2 + $0xe4] ss:$8 sps:$4 sm:$0xff]   ;;  %v2337_v38 = vld [vmem:[#allocation2 + $0xe0] ss:$8 sps:$4 sm:$0xff]  }
  0x28   :  { %v2335_v37 = vld [vmem:[#allocation2 + $0x1e4] ss:$8 sps:$4 sm:$0xff]   ;;  %v2338_v39 = vld [vmem:[#allocation2 + $0x1e0] ss:$8 sps:$4 sm:$0xff]   ;;  %v2339_v40 = vld [vmem:[#allocation2 + $0xd4] ss:$8 sps:$4 sm:$0xff]  }
  0x29   :  { %1659 = vmatpush1.bf16.msra.mxu0 %v2301_v14  ;;  %v2341_v41 = vld [vmem:[#allocation2 + $0x1d4] ss:$8 sps:$4 sm:$0xff]   ;;  %v2343_v42 = vld [vmem:[#allocation2 + $0xd0] ss:$8 sps:$4 sm:$0xff]   ;;  %v2345_v44 = vld [vmem:[#allocation2 + $0xc4] ss:$8 sps:$4 sm:$0xff]  }
  0x2a   :  { %1700 = vmatpush1.bf16.msra.mxu1 %v2302_v15  ;;  %1660 = vmatprep.subr.bf16.mxu0 %v2303_v16  ;;  %v2344_v43 = vld [vmem:[#allocation2 + $0x1d0] ss:$8 sps:$4 sm:$0xff]   ;;  %v2347_v45 = vld [vmem:[#allocation2 + $0x1c4] ss:$8 sps:$4 sm:$0xff]   ;;  %v2349_v49 = vld [vmem:[#allocation2 + $0xc0] ss:$8 sps:$4 sm:$0xff]  }
  0x2b   :  { %1701 = vmatprep.subr.bf16.mxu1 %v2305_v17  ;;  %v40_v46 = vld [vmem:[%s2816_s0] sm:$0xff]  ;;  %v41_v48 = vld [vmem:[%s2816_s0 + $0x8] sm:$0xff]  ;;  %v2351_v52 = vld [vmem:[#allocation2 + $0xb4] ss:$8 sps:$4 sm:$0xff]  }
  0x2c   :  { %v2002_v47 = vcombine.high %v40_v46, %v40_v46  ;;  %v2350_v50 = vld [vmem:[#allocation2 + $0x1c0] ss:$8 sps:$4 sm:$0xff]   ;;  %v2004_v51 = vcombine.high %v41_v48, %v41_v48  ;;  %v2353_v53 = vld [vmem:[#allocation2 + $0x1b4] ss:$8 sps:$4 sm:$0xff]   ;;  %v2355_v54 = vld [vmem:[#allocation2 + $0xb0] ss:$8 sps:$4 sm:$0xff]   ;;  %v2001_v6 = vcombine.low %v40_v46, %v40_v46  ;;  %v2003_v7 = vcombine.low %v41_v48, %v41_v48 }
  0x2d   :  { %1661 = vmatpush1.bf16.msra.mxu0 %v2307_v18  ;;  %v2356_v55 = vld [vmem:[#allocation2 + $0x1b0] ss:$8 sps:$4 sm:$0xff]   ;;  %v2357_v56 = vld [vmem:[#allocation2 + $0xa4] ss:$8 sps:$4 sm:$0xff]   ;;  %v2361_v58 = vld [vmem:[#allocation2 + $0xa0] ss:$8 sps:$4 sm:$0xff]  }
  0x2e   :  { %1702 = vmatpush1.bf16.msra.mxu1 %v2308_v19  ;;  %1662 = vmatprep.subr.bf16.mxu0 %v2309_v20  ;;  %v2359_v57 = vld [vmem:[#allocation2 + $0x1a4] ss:$8 sps:$4 sm:$0xff]   ;;  %v2362_v59 = vld [vmem:[#allocation2 + $0x1a0] ss:$8 sps:$4 sm:$0xff]   ;;  %v2363_v60 = vld [vmem:[#allocation2 + $0x94] ss:$8 sps:$4 sm:$0xff]  }
  0x2f   :  { %1703 = vmatprep.subr.bf16.mxu1 %v2311_v21  ;;  %1684 = vmatprep.mubr.bf16.mxu0 %v2002_v47  ;;  %v2365_v61 = vld [vmem:[#allocation2 + $0x194] ss:$8 sps:$4 sm:$0xff]   ;;  %v2367_v62 = vld [vmem:[#allocation2 + $0x90] ss:$8 sps:$4 sm:$0xff]   ;;  %v2369_v0 = vld [vmem:[#allocation2 + $0x84] ss:$8 sps:$4 sm:$0xff]  }
  0x30   :  { %1725 = vmatprep.mubr.bf16.mxu1 %v2004_v51  ;;  %v2368_v63 = vld [vmem:[#allocation2 + $0x190] ss:$8 sps:$4 sm:$0xff]   ;;  %v2371_v1 = vld [vmem:[#allocation2 + $0x184] ss:$8 sps:$4 sm:$0xff]   ;;  %v2373_v2 = vld [vmem:[#allocation2 + $0x80] ss:$8 sps:$4 sm:$0xff]  }
  0x31   :  { %1663 = vmatpush1.bf16.msra.mxu0 %v2313_v22  ;;  %v2374_v3 = vld [vmem:[#allocation2 + $0x180] ss:$8 sps:$4 sm:$0xff]   ;;  %v2381_v4 = vld [vmem:[#allocation2 + $0x274] ss:$8 sps:$4 sm:$0xff]   ;;  %v2379_v8 = vld [vmem:[#allocation2 + $0x270] ss:$8 sps:$4 sm:$0xff]  }
  0x32   :  { %1704 = vmatpush1.bf16.msra.mxu1 %v2314_v23  ;;  %1664 = vmatprep.subr.bf16.mxu0 %v2315_v24  ;;  %v2384_v5 = vld [vmem:[#allocation2 + $0x374] ss:$8 sps:$4 sm:$0xff]   ;;  %v2382_v9 = vld [vmem:[#allocation2 + $0x370] ss:$8 sps:$4 sm:$0xff]   ;;  %v2387_v10 = vld [vmem:[#allocation2 + $0x264] ss:$8 sps:$4 sm:$0xff]  }
  0x33   :  { %1705 = vmatprep.subr.bf16.mxu1 %v2317_v25  ;;  %v2390_v11 = vld [vmem:[#allocation2 + $0x364] ss:$8 sps:$4 sm:$0xff]   ;;  %v2385_v12 = vld [vmem:[#allocation2 + $0x260] ss:$8 sps:$4 sm:$0xff]   ;;  %v2393_v14 = vld [vmem:[#allocation2 + $0x254] ss:$8 sps:$4 sm:$0xff]  }
  0x34   :  { %v2388_v13 = vld [vmem:[#allocation2 + $0x360] ss:$8 sps:$4 sm:$0xff]   ;;  %v2396_v15 = vld [vmem:[#allocation2 + $0x354] ss:$8 sps:$4 sm:$0xff]   ;;  %v2391_v16 = vld [vmem:[#allocation2 + $0x250] ss:$8 sps:$4 sm:$0xff]  }
  0x35   :  { %1665 = vmatpush1.bf16.msra.mxu0 %v2319_v26  ;;  %v2394_v17 = vld [vmem:[#allocation2 + $0x350] ss:$8 sps:$4 sm:$0xff]   ;;  %v2399_v18 = vld [vmem:[#allocation2 + $0x244] ss:$8 sps:$4 sm:$0xff]   ;;  %v2397_v20 = vld [vmem:[#allocation2 + $0x240] ss:$8 sps:$4 sm:$0xff]  }
  0x36   :  { %1706 = vmatpush1.bf16.msra.mxu1 %v2320_v27  ;;  %1666 = vmatprep.subr.bf16.mxu0 %v2321_v28  ;;  %v2402_v19 = vld [vmem:[#allocation2 + $0x344] ss:$8 sps:$4 sm:$0xff]   ;;  %v2400_v21 = vld [vmem:[#allocation2 + $0x340] ss:$8 sps:$4 sm:$0xff]   ;;  %v2405_v22 = vld [vmem:[#allocation2 + $0x234] ss:$8 sps:$4 sm:$0xff]  }
  0x37   :  { %1707 = vmatprep.subr.bf16.mxu1 %v2323_v29  ;;  %v2408_v23 = vld [vmem:[#allocation2 + $0x334] ss:$8 sps:$4 sm:$0xff]   ;;  %v2403_v24 = vld [vmem:[#allocation2 + $0x230] ss:$8 sps:$4 sm:$0xff]   ;;  %v2411_v26 = vld [vmem:[#allocation2 + $0x224] ss:$8 sps:$4 sm:$0xff]  }
  0x38   :  { %v2406_v25 = vld [vmem:[#allocation2 + $0x330] ss:$8 sps:$4 sm:$0xff]   ;;  %v2414_v27 = vld [vmem:[#allocation2 + $0x324] ss:$8 sps:$4 sm:$0xff]   ;;  %v2409_v28 = vld [vmem:[#allocation2 + $0x220] ss:$8 sps:$4 sm:$0xff]  }
  0x39   :  { %1667 = vmatpush1.bf16.msra.mxu0 %v2325_v30  ;;  %v2412_v29 = vld [vmem:[#allocation2 + $0x320] ss:$8 sps:$4 sm:$0xff]   ;;  %v2417_v30 = vld [vmem:[#allocation2 + $0x214] ss:$8 sps:$4 sm:$0xff]   ;;  %v2435_v46 = vld [vmem:[#allocation2 + $0x2e4] ss:$8 sps:$4 sm:$0xff]  }
  0x3a   :  { %1708 = vmatpush1.bf16.msra.mxu1 %v2326_v31  ;;  %1668 = vmatprep.subr.bf16.mxu0 %v2327_v32  ;;  %v2420_v31 = vld [vmem:[#allocation2 + $0x314] ss:$8 sps:$4 sm:$0xff]   ;;  %v2438_v47 = vld [vmem:[#allocation2 + $0x3e4] ss:$8 sps:$4 sm:$0xff]   ;;  %v2433_v48 = vld [vmem:[#allocation2 + $0x2e0] ss:$8 sps:$4 sm:$0xff]  }
  0x3b   :  { %1709 = vmatprep.subr.bf16.mxu1 %v2329_v33  ;;  %v2762_v32 = vld [vmem:[%s2816_s0 + $0x10] sm:$0xff]  ;;  %v2767_v33 = vld [vmem:[%s2816_s0 + $0x18] sm:$0xff] }
  0x3c   :  { %v2444_v51 = vld [vmem:[#allocation2 + $0x3d4] ss:$8 sps:$4 sm:$0xff]  }
  0x3d   :  { %1669 = vmatpush2.bf16.msra.mxu0 %v2331_v34  ;;  %v2415_v34 = vld [vmem:[#allocation2 + $0x210] ss:$8 sps:$4 sm:$0xff]  }
  0x3e   :  { %1710 = vmatpush2.bf16.msra.mxu1 %v2332_v35  ;;  %1670 = vmatprep.subr.bf16.mxu0 %v2333_v36  ;;  %v2418_v35 = vld [vmem:[#allocation2 + $0x310] ss:$8 sps:$4 sm:$0xff]   ;;  %v2006_v36 = vcombine.high %v2762_v32, %v2762_v32 }
  0x3f   :  { %1711 = vmatprep.subr.bf16.mxu1 %v2335_v37  ;;  %v2008_v37 = vcombine.high %v2767_v33, %v2767_v33 }
  0x41   :  { %1671 = vmatpush2.bf16.msra.mxu0 %v2337_v38  ;;  %v2423_v38 = vld [vmem:[#allocation2 + $0x204] ss:$8 sps:$4 sm:$0xff]  }
  0x42   :  { %1712 = vmatpush2.bf16.msra.mxu1 %v2338_v39  ;;  %1672 = vmatprep.subr.bf16.mxu0 %v2339_v40  ;;  %v2426_v39 = vld [vmem:[#allocation2 + $0x304] ss:$8 sps:$4 sm:$0xff]   ;;  %v2421_v40 = vld [vmem:[#allocation2 + $0x200] ss:$8 sps:$4 sm:$0xff]  }
  0x43   :  { %1713 = vmatprep.subr.bf16.mxu1 %v2341_v41  ;;  %v2424_v41 = vld [vmem:[#allocation2 + $0x300] ss:$8 sps:$4 sm:$0xff]  }
  0x45   :  { %1673 = vmatpush2.bf16.msra.mxu0 %v2343_v42  ;;  %v2429_v42 = vld [vmem:[#allocation2 + $0x2f4] ss:$8 sps:$4 sm:$0xff]  }
  0x46   :  { %1714 = vmatpush2.bf16.msra.mxu1 %v2344_v43  ;;  %1674 = vmatprep.subr.bf16.mxu0 %v2345_v44  ;;  %v2432_v43 = vld [vmem:[#allocation2 + $0x3f4] ss:$8 sps:$4 sm:$0xff]   ;;  %v2427_v44 = vld [vmem:[#allocation2 + $0x2f0] ss:$8 sps:$4 sm:$0xff]  }
  0x47   :  { %1715 = vmatprep.subr.bf16.mxu1 %v2347_v45  ;;  %v2430_v45 = vld [vmem:[#allocation2 + $0x3f0] ss:$8 sps:$4 sm:$0xff]  }
  0x49   :  { %1675 = vmatpush2.bf16.msra.mxu0 %v2349_v49  ;;  %v2436_v49 = vld [vmem:[#allocation2 + $0x3e0] ss:$8 sps:$4 sm:$0xff]  }
  0x4a   :  { %1716 = vmatpush2.bf16.msra.mxu1 %v2350_v50  ;;  %1676 = vmatprep.subr.bf16.mxu0 %v2351_v52  ;;  %v2441_v50 = vld [vmem:[#allocation2 + $0x2d4] ss:$8 sps:$4 sm:$0xff]   ;;  %v2439_v52 = vld [vmem:[#allocation2 + $0x2d0] ss:$8 sps:$4 sm:$0xff]  }
  0x4b   :  { %1717 = vmatprep.subr.bf16.mxu1 %v2353_v53  ;;  %v2442_v53 = vld [vmem:[#allocation2 + $0x3d0] ss:$8 sps:$4 sm:$0xff]  }
  0x4d   :  { %1677 = vmatpush2.bf16.msra.mxu0 %v2355_v54  ;;  %v2447_v54 = vld [vmem:[#allocation2 + $0x2c4] ss:$8 sps:$4 sm:$0xff]  }
  0x4e   :  { %1718 = vmatpush2.bf16.msra.mxu1 %v2356_v55  ;;  %1678 = vmatprep.subr.bf16.mxu0 %v2357_v56  ;;  %v2450_v55 = vld [vmem:[#allocation2 + $0x3c4] ss:$8 sps:$4 sm:$0xff]   ;;  %v2445_v56 = vld [vmem:[#allocation2 + $0x2c0] ss:$8 sps:$4 sm:$0xff]  }
  0x4f   :  { %1719 = vmatprep.subr.bf16.mxu1 %v2359_v57  ;;  %v2448_v57 = vld [vmem:[#allocation2 + $0x3c0] ss:$8 sps:$4 sm:$0xff]  }
  0x51   :  { %1679 = vmatpush2.bf16.msra.mxu0 %v2361_v58  ;;  %v2453_v58 = vld [vmem:[#allocation2 + $0x2b4] ss:$8 sps:$4 sm:$0xff]  }
  0x52   :  { %1720 = vmatpush2.bf16.msra.mxu1 %v2362_v59  ;;  %1680 = vmatprep.subr.bf16.mxu0 %v2363_v60  ;;  %v2456_v59 = vld [vmem:[#allocation2 + $0x3b4] ss:$8 sps:$4 sm:$0xff]   ;;  %v2451_v60 = vld [vmem:[#allocation2 + $0x2b0] ss:$8 sps:$4 sm:$0xff]  }
  0x53   :  { %1721 = vmatprep.subr.bf16.mxu1 %v2365_v61  ;;  %v2454_v61 = vld [vmem:[#allocation2 + $0x3b0] ss:$8 sps:$4 sm:$0xff]  }
  0x55   :  { %1681 = vmatpush2.bf16.msra.mxu0 %v2367_v62  ;;  %v2459_v62 = vld [vmem:[#allocation2 + $0x2a4] ss:$8 sps:$4 sm:$0xff]  }
  0x56   :  { %1722 = vmatpush2.bf16.msra.mxu1 %v2368_v63  ;;  %1682 = vmatprep.subr.bf16.mxu0 %v2369_v0  ;;  %v2462_v63 = vld [vmem:[#allocation2 + $0x3a4] ss:$8 sps:$4 sm:$0xff]   ;;  %v2457_v0 = vld [vmem:[#allocation2 + $0x2a0] ss:$8 sps:$4 sm:$0xff]  }
  0x57   :  { %1723 = vmatprep.subr.bf16.mxu1 %v2371_v1  ;;  %v2460_v1 = vld [vmem:[#allocation2 + $0x3a0] ss:$8 sps:$4 sm:$0xff]  }
  0x59   :  { %1683 = vmatpush2.bf16.msra.mxu0 %v2373_v2  ;;  %v2465_v2 = vld [vmem:[#allocation2 + $0x294] ss:$8 sps:$4 sm:$0xff]  }
  0x5a   :  { %1724 = vmatpush2.bf16.msra.mxu1 %v2374_v3  ;;  %1734 = vmatprep.subr.bf16.mxu0 %v2381_v4  ;;  %v2468_v3 = vld [vmem:[#allocation2 + $0x394] ss:$8 sps:$4 sm:$0xff]   ;;  %v2463_v4 = vld [vmem:[#allocation2 + $0x290] ss:$8 sps:$4 sm:$0xff]  }
  0x5b   :  { %1775 = vmatprep.subr.bf16.mxu1 %v2384_v5  ;;  %v2466_v5 = vld [vmem:[#allocation2 + $0x390] ss:$8 sps:$4 sm:$0xff]  }
  0x5c   :  { %1685 = vmatmul.mubr.bf16.vlgmr.msra.gmra.mxu0 %v2001_v6  ;;  %v2471_v6 = vld [vmem:[#allocation2 + $0x284] ss:$8 sps:$4 sm:$0xff]  }
  0x5d   :  { %1726 = vmatmul.mubr.bf16.vlgmr.msra.gmra.mxu1 %v2003_v7  ;;  %1735 = vmatpush1.bf16.msra.mxu0 %v2379_v8  ;;  %v2474_v7 = vld [vmem:[#allocation2 + $0x384] ss:$8 sps:$4 sm:$0xff]   ;;  %v2469_v8 = vld [vmem:[#allocation2 + $0x280] ss:$8 sps:$4 sm:$0xff]  }
  0x5e   :  { %1776 = vmatpush1.bf16.msra.mxu1 %v2382_v9  ;;  %1736 = vmatprep.subr.bf16.mxu0 %v2387_v10  ;;  %v2472_v9 = vld [vmem:[#allocation2 + $0x380] ss:$8 sps:$4 sm:$0xff]   ;;  %v2481_v10 = vld [vmem:[#allocation2 + $0x474] ss:$8 sps:$4 sm:$0xff]  }
  0x5f   :  { %1777 = vmatprep.subr.bf16.mxu1 %v2390_v11  ;;  %1766 = vmatprep.mubr.bf16.mxu0 %v2006_v36  ;;  %v2484_v11 = vld [vmem:[#allocation2 + $0x574] ss:$8 sps:$4 sm:$0xff]   ;;  %v2511_v36 = vld [vmem:[#allocation2 + $0x424] ss:$8 sps:$4 sm:$0xff]  }
  0x60   :  { %1807 = vmatprep.mubr.bf16.mxu1 %v2008_v37  ;;  %v2514_v37 = vld [vmem:[#allocation2 + $0x524] ss:$8 sps:$4 sm:$0xff]  }
  0x61   :  { %1737 = vmatpush1.bf16.msra.mxu0 %v2385_v12  ;;  %v2005_v12 = vcombine.low %v2762_v32, %v2762_v32  ;;  %v2505_v32 = vld [vmem:[#allocation2 + $0x434] ss:$8 sps:$4 sm:$0xff]  }
  0x62   :  { %1778 = vmatpush1.bf16.msra.mxu1 %v2388_v13  ;;  %1738 = vmatprep.subr.bf16.mxu0 %v2393_v14  ;;  %v2007_v13 = vcombine.low %v2767_v33, %v2767_v33  ;;  %v2479_v14 = vld [vmem:[#allocation2 + $0x470] ss:$8 sps:$4 sm:$0xff]   ;;  %v2508_v33 = vld [vmem:[#allocation2 + $0x534] ss:$8 sps:$4 sm:$0xff]  }
  0x63   :  { %1779 = vmatprep.subr.bf16.mxu1 %v2396_v15  ;;  %v2482_v15 = vld [vmem:[#allocation2 + $0x570] ss:$8 sps:$4 sm:$0xff]  }
  0x65   :  { %1739 = vmatpush1.bf16.msra.mxu0 %v2391_v16  ;;  %v2487_v16 = vld [vmem:[#allocation2 + $0x464] ss:$8 sps:$4 sm:$0xff]  }
  0x66   :  { %1780 = vmatpush1.bf16.msra.mxu1 %v2394_v17  ;;  %1740 = vmatprep.subr.bf16.mxu0 %v2399_v18  ;;  %v2490_v17 = vld [vmem:[#allocation2 + $0x564] ss:$8 sps:$4 sm:$0xff]  }
  0x67   :  { %1781 = vmatprep.subr.bf16.mxu1 %v2402_v19  ;;  %v2780_v18 = vld [vmem:[%s2816_s0 + $0x20] sm:$0xff]  ;;  %v2785_v19 = vld [vmem:[%s2816_s0 + $0x28] sm:$0xff] }
  0x69   :  { %1741 = vmatpush1.bf16.msra.mxu0 %v2397_v20  ;;  %v2010_v20 = vcombine.high %v2780_v18, %v2780_v18 }
  0x6a   :  { %1782 = vmatpush1.bf16.msra.mxu1 %v2400_v21  ;;  %1742 = vmatprep.subr.bf16.mxu0 %v2405_v22  ;;  %v2012_v21 = vcombine.high %v2785_v19, %v2785_v19  ;;  %v2485_v22 = vld [vmem:[#allocation2 + $0x460] ss:$8 sps:$4 sm:$0xff]  }
  0x6b   :  { %1783 = vmatprep.subr.bf16.mxu1 %v2408_v23  ;;  %v2488_v23 = vld [vmem:[#allocation2 + $0x560] ss:$8 sps:$4 sm:$0xff]  }
  0x6d   :  { %1743 = vmatpush1.bf16.msra.mxu0 %v2403_v24  ;;  %v2493_v24 = vld [vmem:[#allocation2 + $0x454] ss:$8 sps:$4 sm:$0xff]  }
  0x6e   :  { %1784 = vmatpush1.bf16.msra.mxu1 %v2406_v25  ;;  %1744 = vmatprep.subr.bf16.mxu0 %v2411_v26  ;;  %v2496_v25 = vld [vmem:[#allocation2 + $0x554] ss:$8 sps:$4 sm:$0xff]   ;;  %v2491_v26 = vld [vmem:[#allocation2 + $0x450] ss:$8 sps:$4 sm:$0xff]  }
  0x6f   :  { %1785 = vmatprep.subr.bf16.mxu1 %v2414_v27  ;;  %v2494_v27 = vld [vmem:[#allocation2 + $0x550] ss:$8 sps:$4 sm:$0xff]  }
  0x71   :  { %1745 = vmatpush1.bf16.msra.mxu0 %v2409_v28  ;;  %v2499_v28 = vld [vmem:[#allocation2 + $0x444] ss:$8 sps:$4 sm:$0xff]  }
  0x72   :  { %1786 = vmatpush1.bf16.msra.mxu1 %v2412_v29  ;;  %1746 = vmatprep.subr.bf16.mxu0 %v2417_v30  ;;  %v2502_v29 = vld [vmem:[#allocation2 + $0x544] ss:$8 sps:$4 sm:$0xff]   ;;  %v2497_v30 = vld [vmem:[#allocation2 + $0x440] ss:$8 sps:$4 sm:$0xff]  }
  0x73   :  { %1787 = vmatprep.subr.bf16.mxu1 %v2420_v31  ;;  %v2500_v31 = vld [vmem:[#allocation2 + $0x540] ss:$8 sps:$4 sm:$0xff]  }
  0x75   :  { %1747 = vmatpush1.bf16.msra.mxu0 %v2415_v34  ;;  %v2503_v34 = vld [vmem:[#allocation2 + $0x430] ss:$8 sps:$4 sm:$0xff]  }
  0x76   :  { %1788 = vmatpush1.bf16.msra.mxu1 %v2418_v35  ;;  %1748 = vmatprep.subr.bf16.mxu0 %v2423_v38  ;;  %v2506_v35 = vld [vmem:[#allocation2 + $0x530] ss:$8 sps:$4 sm:$0xff]   ;;  %v2509_v38 = vld [vmem:[#allocation2 + $0x420] ss:$8 sps:$4 sm:$0xff]  }
  0x77   :  { %1789 = vmatprep.subr.bf16.mxu1 %v2426_v39  ;;  %v2512_v39 = vld [vmem:[#allocation2 + $0x520] ss:$8 sps:$4 sm:$0xff]  }
  0x79   :  { %1749 = vmatpush1.bf16.msra.mxu0 %v2421_v40  ;;  %v2517_v40 = vld [vmem:[#allocation2 + $0x414] ss:$8 sps:$4 sm:$0xff]  }
  0x7a   :  { %1790 = vmatpush1.bf16.msra.mxu1 %v2424_v41  ;;  %1750 = vmatprep.subr.bf16.mxu0 %v2429_v42  ;;  %v2520_v41 = vld [vmem:[#allocation2 + $0x514] ss:$8 sps:$4 sm:$0xff]   ;;  %v2515_v42 = vld [vmem:[#allocation2 + $0x410] ss:$8 sps:$4 sm:$0xff]  }
  0x7b   :  { %1791 = vmatprep.subr.bf16.mxu1 %v2432_v43  ;;  %v2518_v43 = vld [vmem:[#allocation2 + $0x510] ss:$8 sps:$4 sm:$0xff]  }
  0x7d   :  { %1751 = vmatpush2.bf16.msra.mxu0 %v2427_v44  ;;  %v2523_v44 = vld [vmem:[#allocation2 + $0x404] ss:$8 sps:$4 sm:$0xff]  }
  0x7e   :  { %1792 = vmatpush2.bf16.msra.mxu1 %v2430_v45  ;;  %1752 = vmatprep.subr.bf16.mxu0 %v2435_v46  ;;  %v2526_v45 = vld [vmem:[#allocation2 + $0x504] ss:$8 sps:$4 sm:$0xff]   ;;  %v2521_v46 = vld [vmem:[#allocation2 + $0x400] ss:$8 sps:$4 sm:$0xff]  }
  0x7f   :  { %1793 = vmatprep.subr.bf16.mxu1 %v2438_v47  ;;  %v2524_v47 = vld [vmem:[#allocation2 + $0x500] ss:$8 sps:$4 sm:$0xff]  }
  0x81   :  { %1753 = vmatpush2.bf16.msra.mxu0 %v2433_v48  ;;  %v2529_v48 = vld [vmem:[#allocation2 + $0x4f4] ss:$8 sps:$4 sm:$0xff]  }
  0x82   :  { %1794 = vmatpush2.bf16.msra.mxu1 %v2436_v49  ;;  %1754 = vmatprep.subr.bf16.mxu0 %v2441_v50  ;;  %v2532_v49 = vld [vmem:[#allocation2 + $0x5f4] ss:$8 sps:$4 sm:$0xff]   ;;  %v2527_v50 = vld [vmem:[#allocation2 + $0x4f0] ss:$8 sps:$4 sm:$0xff]  }
  0x83   :  { %1795 = vmatprep.subr.bf16.mxu1 %v2444_v51  ;;  %v2530_v51 = vld [vmem:[#allocation2 + $0x5f0] ss:$8 sps:$4 sm:$0xff]  }
  0x85   :  { %1755 = vmatpush2.bf16.msra.mxu0 %v2439_v52  ;;  %v2535_v52 = vld [vmem:[#allocation2 + $0x4e4] ss:$8 sps:$4 sm:$0xff]  }
  0x86   :  { %1796 = vmatpush2.bf16.msra.mxu1 %v2442_v53  ;;  %1756 = vmatprep.subr.bf16.mxu0 %v2447_v54  ;;  %v2538_v53 = vld [vmem:[#allocation2 + $0x5e4] ss:$8 sps:$4 sm:$0xff]   ;;  %v2533_v54 = vld [vmem:[#allocation2 + $0x4e0] ss:$8 sps:$4 sm:$0xff]  }
  0x87   :  { %1797 = vmatprep.subr.bf16.mxu1 %v2450_v55  ;;  %v2536_v55 = vld [vmem:[#allocation2 + $0x5e0] ss:$8 sps:$4 sm:$0xff]  }
  0x89   :  { %1757 = vmatpush2.bf16.msra.mxu0 %v2445_v56  ;;  %v2541_v56 = vld [vmem:[#allocation2 + $0x4d4] ss:$8 sps:$4 sm:$0xff]  }
  0x8a   :  { %1798 = vmatpush2.bf16.msra.mxu1 %v2448_v57  ;;  %1758 = vmatprep.subr.bf16.mxu0 %v2453_v58  ;;  %v2544_v57 = vld [vmem:[#allocation2 + $0x5d4] ss:$8 sps:$4 sm:$0xff]   ;;  %v2539_v58 = vld [vmem:[#allocation2 + $0x4d0] ss:$8 sps:$4 sm:$0xff]  }
  0x8b   :  { %1799 = vmatprep.subr.bf16.mxu1 %v2456_v59  ;;  %v2542_v59 = vld [vmem:[#allocation2 + $0x5d0] ss:$8 sps:$4 sm:$0xff]  }
  0x8d   :  { %1759 = vmatpush2.bf16.msra.mxu0 %v2451_v60  ;;  %v2547_v60 = vld [vmem:[#allocation2 + $0x4c4] ss:$8 sps:$4 sm:$0xff]  }
  0x8e   :  { %1800 = vmatpush2.bf16.msra.mxu1 %v2454_v61  ;;  %1760 = vmatprep.subr.bf16.mxu0 %v2459_v62  ;;  %v2550_v61 = vld [vmem:[#allocation2 + $0x5c4] ss:$8 sps:$4 sm:$0xff]   ;;  %v2545_v62 = vld [vmem:[#allocation2 + $0x4c0] ss:$8 sps:$4 sm:$0xff]  }
  0x8f   :  { %1801 = vmatprep.subr.bf16.mxu1 %v2462_v63  ;;  %v2548_v63 = vld [vmem:[#allocation2 + $0x5c0] ss:$8 sps:$4 sm:$0xff]  }
  0x91   :  { %1761 = vmatpush2.bf16.msra.mxu0 %v2457_v0  ;;  %v2553_v0 = vld [vmem:[#allocation2 + $0x4b4] ss:$8 sps:$4 sm:$0xff]  }
  0x92   :  { %1802 = vmatpush2.bf16.msra.mxu1 %v2460_v1  ;;  %1762 = vmatprep.subr.bf16.mxu0 %v2465_v2  ;;  %v2556_v1 = vld [vmem:[#allocation2 + $0x5b4] ss:$8 sps:$4 sm:$0xff]   ;;  %v2551_v2 = vld [vmem:[#allocation2 + $0x4b0] ss:$8 sps:$4 sm:$0xff]  }
  0x93   :  { %1803 = vmatprep.subr.bf16.mxu1 %v2468_v3  ;;  %v2554_v3 = vld [vmem:[#allocation2 + $0x5b0] ss:$8 sps:$4 sm:$0xff]  }
  0x95   :  { %1763 = vmatpush2.bf16.msra.mxu0 %v2463_v4  ;;  %v2559_v4 = vld [vmem:[#allocation2 + $0x4a4] ss:$8 sps:$4 sm:$0xff]  }
  0x96   :  { %1804 = vmatpush2.bf16.msra.mxu1 %v2466_v5  ;;  %1764 = vmatprep.subr.bf16.mxu0 %v2471_v6  ;;  %v2562_v5 = vld [vmem:[#allocation2 + $0x5a4] ss:$8 sps:$4 sm:$0xff]   ;;  %v2557_v6 = vld [vmem:[#allocation2 + $0x4a0] ss:$8 sps:$4 sm:$0xff]  }
  0x97   :  { %1805 = vmatprep.subr.bf16.mxu1 %v2474_v7  ;;  %v2560_v7 = vld [vmem:[#allocation2 + $0x5a0] ss:$8 sps:$4 sm:$0xff]  }
  0x99   :  { %1765 = vmatpush2.bf16.msra.mxu0 %v2469_v8  ;;  %v2565_v8 = vld [vmem:[#allocation2 + $0x494] ss:$8 sps:$4 sm:$0xff]  }
  0x9a   :  { %1806 = vmatpush2.bf16.msra.mxu1 %v2472_v9  ;;  %1816 = vmatprep.subr.bf16.mxu0 %v2481_v10  ;;  %v2568_v9 = vld [vmem:[#allocation2 + $0x594] ss:$8 sps:$4 sm:$0xff]   ;;  %v2563_v10 = vld [vmem:[#allocation2 + $0x490] ss:$8 sps:$4 sm:$0xff]  }
  0x9b   :  { %1857 = vmatprep.subr.bf16.mxu1 %v2484_v11  ;;  %v2566_v11 = vld [vmem:[#allocation2 + $0x590] ss:$8 sps:$4 sm:$0xff]  }
  0x9c   :  { %1767 = vmatmul.mubr.bf16.vlgmr.msra.gmra.mxu0 %v2005_v12  ;;  %v2571_v12 = vld [vmem:[#allocation2 + $0x484] ss:$8 sps:$4 sm:$0xff]  }
  0x9d   :  { %1808 = vmatmul.mubr.bf16.vlgmr.msra.gmra.mxu1 %v2007_v13  ;;  %1817 = vmatpush1.bf16.msra.mxu0 %v2479_v14  ;;  %v2574_v13 = vld [vmem:[#allocation2 + $0x584] ss:$8 sps:$4 sm:$0xff]   ;;  %v2569_v14 = vld [vmem:[#allocation2 + $0x480] ss:$8 sps:$4 sm:$0xff]  }
  0x9e   :  { %1858 = vmatpush1.bf16.msra.mxu1 %v2482_v15  ;;  %1818 = vmatprep.subr.bf16.mxu0 %v2487_v16  ;;  %v2572_v15 = vld [vmem:[#allocation2 + $0x580] ss:$8 sps:$4 sm:$0xff]   ;;  %v2581_v16 = vld [vmem:[#allocation2 + $0x674] ss:$8 sps:$4 sm:$0xff]  }
  0x9f   :  { %1859 = vmatprep.subr.bf16.mxu1 %v2490_v17  ;;  %1848 = vmatprep.mubr.bf16.mxu0 %v2010_v20  ;;  %v2584_v17 = vld [vmem:[#allocation2 + $0x774] ss:$8 sps:$4 sm:$0xff]   ;;  %v2009_v20 = vcombine.low %v2780_v18, %v2780_v18  ;;  %v2587_v18 = vld [vmem:[#allocation2 + $0x664] ss:$8 sps:$4 sm:$0xff]  }
  0xa0   :  { %1889 = vmatprep.mubr.bf16.mxu1 %v2012_v21  ;;  %v2011_v21 = vcombine.low %v2785_v19, %v2785_v19 }
  0xa1   :  { %1819 = vmatpush1.bf16.msra.mxu0 %v2485_v22  ;;  %v2798_v22 = vld [vmem:[%s2816_s0 + $0x30] sm:$0xff] }
  0xa2   :  { %1860 = vmatpush1.bf16.msra.mxu1 %v2488_v23  ;;  %1820 = vmatprep.subr.bf16.mxu0 %v2493_v24  ;;  %v2803_v23 = vld [vmem:[%s2816_s0 + $0x38] sm:$0xff]  ;;  %v2014_v19 = vcombine.high %v2798_v22, %v2798_v22 }
  0xa3   :  { %1861 = vmatprep.subr.bf16.mxu1 %v2496_v25  ;;  %v2579_v24 = vld [vmem:[#allocation2 + $0x670] ss:$8 sps:$4 sm:$0xff]  }
  0xa4   :  { %v2582_v25 = vld [vmem:[#allocation2 + $0x770] ss:$8 sps:$4 sm:$0xff]  }
  0xa5   :  { %1821 = vmatpush1.bf16.msra.mxu0 %v2491_v26  ;;  %v2590_v26 = vld [vmem:[#allocation2 + $0x764] ss:$8 sps:$4 sm:$0xff]  }
  0xa6   :  { %1862 = vmatpush1.bf16.msra.mxu1 %v2494_v27  ;;  %1822 = vmatprep.subr.bf16.mxu0 %v2499_v28  ;;  %v2016_v27 = vcombine.high %v2803_v23, %v2803_v23  ;;  %v2585_v28 = vld [vmem:[#allocation2 + $0x660] ss:$8 sps:$4 sm:$0xff]  }
  0xa7   :  { %1863 = vmatprep.subr.bf16.mxu1 %v2502_v29  ;;  %v2588_v29 = vld [vmem:[#allocation2 + $0x760] ss:$8 sps:$4 sm:$0xff]  }
  0xa9   :  { %1823 = vmatpush1.bf16.msra.mxu0 %v2497_v30  ;;  %v2593_v30 = vld [vmem:[#allocation2 + $0x654] ss:$8 sps:$4 sm:$0xff]  }
  0xaa   :  { %1864 = vmatpush1.bf16.msra.mxu1 %v2500_v31  ;;  %1824 = vmatprep.subr.bf16.mxu0 %v2505_v32  ;;  %v2596_v31 = vld [vmem:[#allocation2 + $0x754] ss:$8 sps:$4 sm:$0xff]   ;;  %v2591_v32 = vld [vmem:[#allocation2 + $0x650] ss:$8 sps:$4 sm:$0xff]  }
  0xab   :  { %1865 = vmatprep.subr.bf16.mxu1 %v2508_v33  ;;  %v2594_v33 = vld [vmem:[#allocation2 + $0x750] ss:$8 sps:$4 sm:$0xff]  }
  0xad   :  { %1825 = vmatpush1.bf16.msra.mxu0 %v2503_v34  ;;  %v2599_v34 = vld [vmem:[#allocation2 + $0x644] ss:$8 sps:$4 sm:$0xff]  }
  0xae   :  { %1866 = vmatpush1.bf16.msra.mxu1 %v2506_v35  ;;  %1826 = vmatprep.subr.bf16.mxu0 %v2511_v36  ;;  %v2602_v35 = vld [vmem:[#allocation2 + $0x744] ss:$8 sps:$4 sm:$0xff]   ;;  %v2597_v36 = vld [vmem:[#allocation2 + $0x640] ss:$8 sps:$4 sm:$0xff]  }
  0xaf   :  { %1867 = vmatprep.subr.bf16.mxu1 %v2514_v37  ;;  %v2600_v37 = vld [vmem:[#allocation2 + $0x740] ss:$8 sps:$4 sm:$0xff]  }
  0xb1   :  { %1827 = vmatpush1.bf16.msra.mxu0 %v2509_v38  ;;  %v2605_v38 = vld [vmem:[#allocation2 + $0x634] ss:$8 sps:$4 sm:$0xff]  }
  0xb2   :  { %1868 = vmatpush1.bf16.msra.mxu1 %v2512_v39  ;;  %1828 = vmatprep.subr.bf16.mxu0 %v2517_v40  ;;  %v2608_v39 = vld [vmem:[#allocation2 + $0x734] ss:$8 sps:$4 sm:$0xff]   ;;  %v2603_v40 = vld [vmem:[#allocation2 + $0x630] ss:$8 sps:$4 sm:$0xff]  }
  0xb3   :  { %1869 = vmatprep.subr.bf16.mxu1 %v2520_v41  ;;  %v2606_v41 = vld [vmem:[#allocation2 + $0x730] ss:$8 sps:$4 sm:$0xff]  }
  0xb5   :  { %1829 = vmatpush1.bf16.msra.mxu0 %v2515_v42  ;;  %v2611_v42 = vld [vmem:[#allocation2 + $0x624] ss:$8 sps:$4 sm:$0xff]  }
  0xb6   :  { %1870 = vmatpush1.bf16.msra.mxu1 %v2518_v43  ;;  %1830 = vmatprep.subr.bf16.mxu0 %v2523_v44  ;;  %v2614_v43 = vld [vmem:[#allocation2 + $0x724] ss:$8 sps:$4 sm:$0xff]   ;;  %v2609_v44 = vld [vmem:[#allocation2 + $0x620] ss:$8 sps:$4 sm:$0xff]  }
  0xb7   :  { %1871 = vmatprep.subr.bf16.mxu1 %v2526_v45  ;;  %v2612_v45 = vld [vmem:[#allocation2 + $0x720] ss:$8 sps:$4 sm:$0xff]  }
  0xb9   :  { %1831 = vmatpush1.bf16.msra.mxu0 %v2521_v46  ;;  %v2617_v46 = vld [vmem:[#allocation2 + $0x614] ss:$8 sps:$4 sm:$0xff]  }
  0xba   :  { %1872 = vmatpush1.bf16.msra.mxu1 %v2524_v47  ;;  %1832 = vmatprep.subr.bf16.mxu0 %v2529_v48  ;;  %v2620_v47 = vld [vmem:[#allocation2 + $0x714] ss:$8 sps:$4 sm:$0xff]   ;;  %v2615_v48 = vld [vmem:[#allocation2 + $0x610] ss:$8 sps:$4 sm:$0xff]  }
  0xbb   :  { %1873 = vmatprep.subr.bf16.mxu1 %v2532_v49  ;;  %v2618_v49 = vld [vmem:[#allocation2 + $0x710] ss:$8 sps:$4 sm:$0xff]  }
  0xbd   :  { %1833 = vmatpush2.bf16.msra.mxu0 %v2527_v50  ;;  %v2623_v50 = vld [vmem:[#allocation2 + $0x604] ss:$8 sps:$4 sm:$0xff]  }
  0xbe   :  { %1874 = vmatpush2.bf16.msra.mxu1 %v2530_v51  ;;  %1834 = vmatprep.subr.bf16.mxu0 %v2535_v52  ;;  %v2626_v51 = vld [vmem:[#allocation2 + $0x704] ss:$8 sps:$4 sm:$0xff]   ;;  %v2621_v52 = vld [vmem:[#allocation2 + $0x600] ss:$8 sps:$4 sm:$0xff]  }
  0xbf   :  { %1875 = vmatprep.subr.bf16.mxu1 %v2538_v53  ;;  %v2624_v53 = vld [vmem:[#allocation2 + $0x700] ss:$8 sps:$4 sm:$0xff]  }
  0xc1   :  { %1835 = vmatpush2.bf16.msra.mxu0 %v2533_v54  ;;  %v2629_v54 = vld [vmem:[#allocation2 + $0x6f4] ss:$8 sps:$4 sm:$0xff]  }
  0xc2   :  { %1876 = vmatpush2.bf16.msra.mxu1 %v2536_v55  ;;  %1836 = vmatprep.subr.bf16.mxu0 %v2541_v56  ;;  %v2632_v55 = vld [vmem:[#allocation2 + $0x7f4] ss:$8 sps:$4 sm:$0xff]   ;;  %v2627_v56 = vld [vmem:[#allocation2 + $0x6f0] ss:$8 sps:$4 sm:$0xff]  }
  0xc3   :  { %1877 = vmatprep.subr.bf16.mxu1 %v2544_v57  ;;  %v2630_v57 = vld [vmem:[#allocation2 + $0x7f0] ss:$8 sps:$4 sm:$0xff]  }
  0xc5   :  { %1837 = vmatpush2.bf16.msra.mxu0 %v2539_v58  ;;  %v2635_v58 = vld [vmem:[#allocation2 + $0x6e4] ss:$8 sps:$4 sm:$0xff]  }
  0xc6   :  { %1878 = vmatpush2.bf16.msra.mxu1 %v2542_v59  ;;  %1838 = vmatprep.subr.bf16.mxu0 %v2547_v60  ;;  %v2638_v59 = vld [vmem:[#allocation2 + $0x7e4] ss:$8 sps:$4 sm:$0xff]   ;;  %v2633_v60 = vld [vmem:[#allocation2 + $0x6e0] ss:$8 sps:$4 sm:$0xff]  }
  0xc7   :  { %1879 = vmatprep.subr.bf16.mxu1 %v2550_v61  ;;  %v2636_v61 = vld [vmem:[#allocation2 + $0x7e0] ss:$8 sps:$4 sm:$0xff]  }
  0xc9   :  { %1839 = vmatpush2.bf16.msra.mxu0 %v2545_v62  ;;  %v2641_v62 = vld [vmem:[#allocation2 + $0x6d4] ss:$8 sps:$4 sm:$0xff]  }
  0xca   :  { %1880 = vmatpush2.bf16.msra.mxu1 %v2548_v63  ;;  %1840 = vmatprep.subr.bf16.mxu0 %v2553_v0  ;;  %v2644_v63 = vld [vmem:[#allocation2 + $0x7d4] ss:$8 sps:$4 sm:$0xff]   ;;  %v2639_v0 = vld [vmem:[#allocation2 + $0x6d0] ss:$8 sps:$4 sm:$0xff]  }
  0xcb   :  { %1881 = vmatprep.subr.bf16.mxu1 %v2556_v1  ;;  %v2642_v1 = vld [vmem:[#allocation2 + $0x7d0] ss:$8 sps:$4 sm:$0xff]  }
  0xcd   :  { %1841 = vmatpush2.bf16.msra.mxu0 %v2551_v2  ;;  %v2647_v2 = vld [vmem:[#allocation2 + $0x6c4] ss:$8 sps:$4 sm:$0xff]  }
  0xce   :  { %1882 = vmatpush2.bf16.msra.mxu1 %v2554_v3  ;;  %1842 = vmatprep.subr.bf16.mxu0 %v2559_v4  ;;  %v2650_v3 = vld [vmem:[#allocation2 + $0x7c4] ss:$8 sps:$4 sm:$0xff]   ;;  %v2645_v4 = vld [vmem:[#allocation2 + $0x6c0] ss:$8 sps:$4 sm:$0xff]  }
  0xcf   :  { %1883 = vmatprep.subr.bf16.mxu1 %v2562_v5  ;;  %v2648_v5 = vld [vmem:[#allocation2 + $0x7c0] ss:$8 sps:$4 sm:$0xff]  }
  0xd1   :  { %1843 = vmatpush2.bf16.msra.mxu0 %v2557_v6  ;;  %v2653_v6 = vld [vmem:[#allocation2 + $0x6b4] ss:$8 sps:$4 sm:$0xff]  }
  0xd2   :  { %1884 = vmatpush2.bf16.msra.mxu1 %v2560_v7  ;;  %1844 = vmatprep.subr.bf16.mxu0 %v2565_v8  ;;  %v2656_v7 = vld [vmem:[#allocation2 + $0x7b4] ss:$8 sps:$4 sm:$0xff]   ;;  %v2651_v8 = vld [vmem:[#allocation2 + $0x6b0] ss:$8 sps:$4 sm:$0xff]  }
  0xd3   :  { %1885 = vmatprep.subr.bf16.mxu1 %v2568_v9  ;;  %v2654_v9 = vld [vmem:[#allocation2 + $0x7b0] ss:$8 sps:$4 sm:$0xff]  }
  0xd5   :  { %1845 = vmatpush2.bf16.msra.mxu0 %v2563_v10  ;;  %v2659_v10 = vld [vmem:[#allocation2 + $0x6a4] ss:$8 sps:$4 sm:$0xff]  }
  0xd6   :  { %1886 = vmatpush2.bf16.msra.mxu1 %v2566_v11  ;;  %1846 = vmatprep.subr.bf16.mxu0 %v2571_v12  ;;  %v2662_v11 = vld [vmem:[#allocation2 + $0x7a4] ss:$8 sps:$4 sm:$0xff]   ;;  %v2657_v12 = vld [vmem:[#allocation2 + $0x6a0] ss:$8 sps:$4 sm:$0xff]  }
  0xd7   :  { %1887 = vmatprep.subr.bf16.mxu1 %v2574_v13  ;;  %v2660_v13 = vld [vmem:[#allocation2 + $0x7a0] ss:$8 sps:$4 sm:$0xff]  }
  0xd9   :  { %1847 = vmatpush2.bf16.msra.mxu0 %v2569_v14  ;;  %v306_v14 = vlaneseq }
  0xda   :  { %1888 = vmatpush2.bf16.msra.mxu1 %v2572_v15  ;;  %1898 = vmatprep.subr.bf16.mxu0 %v2581_v16  ;;  %v2665_v15 = vld [vmem:[#allocation2 + $0x694] ss:$8 sps:$4 sm:$0xff]  }
  0xdb   :  { %1939 = vmatprep.subr.bf16.mxu1 %v2584_v17  ;;  %v2668_v16 = vld [vmem:[#allocation2 + $0x794] ss:$8 sps:$4 sm:$0xff]   ;;  %v2663_v17 = vld [vmem:[#allocation2 + $0x690] ss:$8 sps:$4 sm:$0xff]  }
  0xdc   :  { %1849 = vmatmul.mubr.bf16.vlgmr.msra.gmra.mxu0 %v2009_v20  ;;  %v2666_v20 = vld [vmem:[#allocation2 + $0x790] ss:$8 sps:$4 sm:$0xff]  }
  0xdd   :  { %1890 = vmatmul.mubr.bf16.vlgmr.msra.gmra.mxu1 %v2011_v21  ;;  %1899 = vmatpush1.bf16.msra.mxu0 %v2579_v24  ;;  %v307_v21 = vshrl.u32 %v306_v14, 7  ;;  %v2671_v24 = vld [vmem:[#allocation2 + $0x684] ss:$8 sps:$4 sm:$0xff]  }
  0xde   :  { %1940 = vmatpush1.bf16.msra.mxu1 %v2582_v25  ;;  %1900 = vmatprep.subr.bf16.mxu0 %v2587_v18  ;;  %v2674_v25 = vld [vmem:[#allocation2 + $0x784] ss:$8 sps:$4 sm:$0xff]   ;;  %v2669_v18 = vld [vmem:[#allocation2 + $0x680] ss:$8 sps:$4 sm:$0xff]  }
  0xdf   :  { %1941 = vmatprep.subr.bf16.mxu1 %v2590_v26  ;;  %1930 = vmatprep.mubr.bf16.mxu0 %v2014_v19  ;;  %v2672_v26 = vld [vmem:[#allocation2 + $0x780] ss:$8 sps:$4 sm:$0xff]   ;;  %v308_v19 = vsub.s32 0, %v307_v21 }
  0xe0   :  { %1971 = vmatprep.mubr.bf16.mxu1 %v2016_v27  ;;  %v304_v27 = vld [vmem:[#allocation4] sm:$0x3] }
  0xe1   :  { %1901 = vmatpush1.bf16.msra.mxu0 %v2585_v28  ;;  %v312_v28 = vsub.s32 1, %v307_v21 }
  0xe2   :  { %1942 = vmatpush1.bf16.msra.mxu1 %v2588_v29  ;;  %1902 = vmatprep.subr.bf16.mxu0 %v2593_v30  ;;  %v2013_v29 = vcombine.low %v2798_v22, %v2798_v22  ;;  %v2015_v30 = vcombine.low %v2803_v23, %v2803_v23 }
  0xe3   :  { %1943 = vmatprep.subr.bf16.mxu1 %v2596_v31  ;;  %v309_v31 = vrot.slane %v304_v27, %v308_v19 }
  0xe5   :  { %1903 = vmatpush1.bf16.msra.mxu0 %v2591_v32  ;;  %v313_v32 = vrot.slane %v304_v27, %v312_v28 }
  0xe6   :  { %1944 = vmatpush1.bf16.msra.mxu1 %v2594_v33  ;;  %1904 = vmatprep.subr.bf16.mxu0 %v2599_v34 }
  0xe7   :  { %1945 = vmatprep.subr.bf16.mxu1 %v2602_v35 }
  0xe9   :  { %1905 = vmatpush1.bf16.msra.mxu0 %v2597_v36 }
  0xea   :  { %1946 = vmatpush1.bf16.msra.mxu1 %v2600_v37  ;;  %1906 = vmatprep.subr.bf16.mxu0 %v2605_v38 }
  0xeb   :  { %1947 = vmatprep.subr.bf16.mxu1 %v2608_v39 }
  0xed   :  { %1907 = vmatpush1.bf16.msra.mxu0 %v2603_v40 }
  0xee   :  { %1948 = vmatpush1.bf16.msra.mxu1 %v2606_v41  ;;  %1908 = vmatprep.subr.bf16.mxu0 %v2611_v42 }
  0xef   :  { %1949 = vmatprep.subr.bf16.mxu1 %v2614_v43 }
  0xf1   :  { %1909 = vmatpush1.bf16.msra.mxu0 %v2609_v44 }
  0xf2   :  { %1950 = vmatpush1.bf16.msra.mxu1 %v2612_v45  ;;  %1910 = vmatprep.subr.bf16.mxu0 %v2617_v46 }
  0xf3   :  { %1951 = vmatprep.subr.bf16.mxu1 %v2620_v47 }
  0xf5   :  { %1911 = vmatpush1.bf16.msra.mxu0 %v2615_v48 }
  0xf6   :  { %1952 = vmatpush1.bf16.msra.mxu1 %v2618_v49  ;;  %1912 = vmatprep.subr.bf16.mxu0 %v2623_v50 }
  0xf7   :  { %1953 = vmatprep.subr.bf16.mxu1 %v2626_v51 }
  0xf9   :  { %1913 = vmatpush1.bf16.msra.mxu0 %v2621_v52 }
  0xfa   :  { %1954 = vmatpush1.bf16.msra.mxu1 %v2624_v53  ;;  %1914 = vmatprep.subr.bf16.mxu0 %v2629_v54 }
  0xfb   :  { %1955 = vmatprep.subr.bf16.mxu1 %v2632_v55 }
  0xfd   :  { %1915 = vmatpush2.bf16.msra.mxu0 %v2627_v56 }
  0xfe   :  { %1956 = vmatpush2.bf16.msra.mxu1 %v2630_v57  ;;  %1916 = vmatprep.subr.bf16.mxu0 %v2635_v58 }
  0xff   :  { %1957 = vmatprep.subr.bf16.mxu1 %v2638_v59 }
 0x101   :  { %1917 = vmatpush2.bf16.msra.mxu0 %v2633_v60 }
 0x102   :  { %1958 = vmatpush2.bf16.msra.mxu1 %v2636_v61  ;;  %1918 = vmatprep.subr.bf16.mxu0 %v2641_v62 }
 0x103   :  { %1959 = vmatprep.subr.bf16.mxu1 %v2644_v63 }
 0x105   :  { %1919 = vmatpush2.bf16.msra.mxu0 %v2639_v0 }
 0x106   :  { %1960 = vmatpush2.bf16.msra.mxu1 %v2642_v1  ;;  %1920 = vmatprep.subr.bf16.mxu0 %v2647_v2 }
 0x107   :  { %1961 = vmatprep.subr.bf16.mxu1 %v2650_v3 }
 0x109   :  { %1921 = vmatpush2.bf16.msra.mxu0 %v2645_v4 }
 0x10a   :  { %1962 = vmatpush2.bf16.msra.mxu1 %v2648_v5  ;;  %1922 = vmatprep.subr.bf16.mxu0 %v2653_v6 }
 0x10b   :  { %1963 = vmatprep.subr.bf16.mxu1 %v2656_v7 }
 0x10d   :  { %1923 = vmatpush2.bf16.msra.mxu0 %v2651_v8 }
 0x10e   :  { %1964 = vmatpush2.bf16.msra.mxu1 %v2654_v9  ;;  %1924 = vmatprep.subr.bf16.mxu0 %v2659_v10 }
 0x10f   :  { %1965 = vmatprep.subr.bf16.mxu1 %v2662_v11 }
 0x111   :  { %1925 = vmatpush2.bf16.msra.mxu0 %v2657_v12 }
 0x112   :  { %1966 = vmatpush2.bf16.msra.mxu1 %v2660_v13  ;;  %1926 = vmatprep.subr.bf16.mxu0 %v2665_v15 }
 0x113   :  { %1967 = vmatprep.subr.bf16.mxu1 %v2668_v16 }
 0x115   :  { %1927 = vmatpush2.bf16.msra.mxu0 %v2663_v17 }
 0x116   :  { %1968 = vmatpush2.bf16.msra.mxu1 %v2666_v20  ;;  %1928 = vmatprep.subr.bf16.mxu0 %v2671_v24 }
 0x117   :  { %1969 = vmatprep.subr.bf16.mxu1 %v2674_v25 }
 0x119   :  { %1929 = vmatpush2.bf16.msra.mxu0 %v2669_v18 }
 0x11a   :  { %1970 = vmatpush2.bf16.msra.mxu1 %v2672_v26 }
 0x11c   :  { %v1686_v33 = vpop.f32.mrf.mxu0  ;;  %1931 = vmatmul.mubr.bf16.vlgmr.msra.gmra.mxu0 %v2013_v29 }
 0x11d   :  { %v1727_v34 = vpop.f32.mrf.mxu1  ;;  %1972 = vmatmul.mubr.bf16.vlgmr.msra.gmra.mxu1 %v2015_v30  ;;  %v1687_v35 = vadd.f32 %v1686_v33, %v309_v31 }
 0x11e   :  { %v1688_v36 = vpop.f32.mrf.mxu0 }
 0x11f   :  { %v1729_v37 = vpop.f32.mrf.mxu1  ;;  %v1728_v38 = vadd.f32 %v1727_v34, %v1687_v35  ;;  %v1689_v39 = vadd.f32 %v1688_v36, %v313_v32 }
 0x120   :  { %v1690_v40 = vpop.f32.mrf.mxu0 }
 0x121   :  { %v1731_v41 = vpop.f32.mrf.mxu1  ;;  %v1730_v42 = vadd.f32 %v1729_v37, %v1689_v39 }
 0x122   :  { %v1691_v22 = vpop.f32.mrf.mxu0 }
 0x123   :  { %v1732_v43 = vpop.f32.mrf.mxu1 }
 0x15c   :  { %v1768_v44 = vpop.f32.mrf.mxu0 }
 0x15d   :  { %v1809_v23 = vpop.f32.mrf.mxu1  ;;  %v1769_v45 = vadd.f32 %v1768_v44, %v1728_v38 }
 0x15e   :  { %v1770_v46 = vpop.f32.mrf.mxu0 }
 0x15f   :  { %v1811_v47 = vpop.f32.mrf.mxu1  ;;  %v1810_v48 = vadd.f32 %v1809_v23, %v1769_v45  ;;  %v1771_v49 = vadd.f32 %v1770_v46, %v1730_v42 }
 0x160   :  { %v1772_v50 = vpop.f32.mrf.mxu0 }
 0x161   :  { %v1813_v51 = vpop.f32.mrf.mxu1  ;;  %v1812_v52 = vadd.f32 %v1811_v47, %v1771_v49 }
 0x162   :  { %v1773_v53 = vpop.f32.mrf.mxu0 }
 0x163   :  { %v1814_v54 = vpop.f32.mrf.mxu1 }
 0x19c   :  { %v1850_v55 = vpop.f32.mrf.mxu0 }
 0x19d   :  { %v1891_v56 = vpop.f32.mrf.mxu1  ;;  %v1851_v57 = vadd.f32 %v1850_v55, %v1810_v48 }
 0x19e   :  { %v1852_v58 = vpop.f32.mrf.mxu0 }
 0x19f   :  { %v1893_v59 = vpop.f32.mrf.mxu1  ;;  %v1892_v60 = vadd.f32 %v1891_v56, %v1851_v57  ;;  %v1853_v1 = vadd.f32 %v1852_v58, %v1812_v52 }
 0x1a0   :  { %v1854_v61 = vpop.f32.mrf.mxu0 }
 0x1a1   :  { %v1895_v62 = vpop.f32.mrf.mxu1  ;;  %v1894_v4 = vadd.f32 %v1893_v59, %v1853_v1 }
 0x1a2   :  { %v1855_v63 = vpop.f32.mrf.mxu0 }
 0x1a3   :  { %v1896_v0 = vpop.f32.mrf.mxu1 }
 0x1dc   :  { %v1932_v2 = vpop.f32.mrf.mxu0 }
 0x1dd   :  { %v1973_v3 = vpop.f32.mrf.mxu1  ;;  %v1933_v5 = vadd.f32 %v1932_v2, %v1892_v60 }
 0x1de   :  { %v1934_v6 = vpop.f32.mrf.mxu0 }
 0x1df   :  { %v1975_v7 = vpop.f32.mrf.mxu1  ;;  %v1974_v8 = vadd.f32 %v1973_v3, %v1933_v5  ;;  %v1935_v9 = vadd.f32 %v1934_v6, %v1894_v4 }
 0x1e0   :  { %v1936_v10 = vpop.f32.mrf.mxu0 }
 0x1e1   :  { %v1977_v11 = vpop.f32.mrf.mxu1  ;;  %v1982_v12 = vmul.f32 0.2, %v1974_v8  ;;  %v1976_v13 = vadd.f32 %v1975_v7, %v1935_v9  ;;  %vm1980_vm0 = vcmp.ge.f32.partialorder %v1974_v8, 0.0 }
 0x1e2   :  { %v1937_v14 = vpop.f32.mrf.mxu0 }
 0x1e3   :  { %v1978_v15 = vpop.f32.mrf.mxu1  ;;  %vm1981_vm1 = vcmp.ge.f32.partialorder %v1976_v13, 0.0  ;;  %v1983_v16 = vmul.f32 0.2, %v1976_v13  ;;  %v1984_v17 = vsel %vm1980_vm0, %v1974_v8, %v1982_v12 }
 0x1e5   :  { %v1985_v20 = vsel %vm1981_vm1, %v1976_v13, %v1983_v16 }
 0x1e6   :  { %v2274_v21 = vpack.c.bf16 %v1985_v20, %v1984_v17 }
 0x1e8   :  { %1994 = vst [vmem:[%s2819_s3] sm:$0xff] %v2274_v21 }
 0x1e9   :  { %1999 = vsyncpa [#allocation3], 1 }
 0x1ea   :  { %2000 = vsyncpa [#allocation5], 1 }

// kernel: encoder_forward.8
= control target key start
LH: loop header
LB: loop body
LE: loop exit
PB: predicated region body
PF: predicated region fallthrough
CT: control target
= control target key end

     0   :  { %v1044_v36 = vlaneseq  ;;  %v10347_v37 = vmov 1966171168   ;;  %s13781_s1 = inlined_call_operand.vmem [shape: bf16[4096,512], index: 1, kind: input, shape index: {}]   ;;  %s13782_s0 = inlined_call_operand.vmem [shape: bf16[2,4096], index: 0, kind: input, shape index: {}]   ;;  %s13783_s2 = inlined_call_operand.vmem [shape: f32[1,512], index: 2, kind: input, shape index: {}]   ;;  %s13784_s3 = inlined_call_operand.vmem [shape: bf16[2,512], index: 3, kind: output, shape index: {}]  }
   0x1   :  { %v8806_v0 = vld [vmem:[%s13781_s1 + $0xe4] ss:$16 sps:$4 sm:$0xff]   ;;  %v8810_v2 = vld [vmem:[%s13781_s1 + $0xe0] ss:$16 sps:$4 sm:$0xff]   ;;  %v1070_v38 = vunpack.c.l.s4 %v10347_v37 }
   0x2   :  { %v8808_v1 = vld [vmem:[%s13781_s1 + $0x2e4] ss:$16 sps:$4 sm:$0xff]   ;;  %6416 = vmatprep.subr.bf16.mxu0 %v8806_v0  ;;  %v8811_v3 = vld [vmem:[%s13781_s1 + $0x2e0] ss:$16 sps:$4 sm:$0xff]   ;;  %v10485_v42 = vshrl.u32 %v1044_v36, 7 }
   0x3   :  { %6457 = vmatprep.subr.bf16.mxu1 %v8808_v1  ;;  %v8812_v4 = vld [vmem:[%s13781_s1 + $0xc4] ss:$16 sps:$4 sm:$0xff]   ;;  %6417 = vmatpush1.bf16.msra.mxu0 %v8810_v2  ;;  %v8816_v6 = vld [vmem:[%s13781_s1 + $0xc0] ss:$16 sps:$4 sm:$0xff]   ;;  %v1071_v43 = vunpack.c.0.s8 %v1070_v38 }
   0x4   :  { %6458 = vmatpush1.bf16.msra.mxu1 %v8811_v3  ;;  %v8814_v5 = vld [vmem:[%s13781_s1 + $0x2c4] ss:$16 sps:$4 sm:$0xff]   ;;  %6418 = vmatprep.subr.bf16.mxu0 %v8812_v4  ;;  %v8817_v7 = vld [vmem:[%s13781_s1 + $0x2c0] ss:$16 sps:$4 sm:$0xff]  }
   0x5   :  { %6459 = vmatprep.subr.bf16.mxu1 %v8814_v5  ;;  %v8818_v8 = vld [vmem:[%s13781_s1 + $0xa4] ss:$16 sps:$4 sm:$0xff]   ;;  %v8822_v10 = vld [vmem:[%s13781_s1 + $0xa0] ss:$16 sps:$4 sm:$0xff]   ;;  %v10503_v49 = vsub.s32 %v1071_v43, %v10485_v42 }
   0x6   :  { %v8820_v9 = vld [vmem:[%s13781_s1 + $0x2a4] ss:$16 sps:$4 sm:$0xff]   ;;  %v8823_v11 = vld [vmem:[%s13781_s1 + $0x2a0] ss:$16 sps:$4 sm:$0xff]  }
   0x7   :  { %6419 = vmatpush1.bf16.msra.mxu0 %v8816_v6  ;;  %v8824_v12 = vld [vmem:[%s13781_s1 + $0x84] ss:$16 sps:$4 sm:$0xff]   ;;  %v8828_v14 = vld [vmem:[%s13781_s1 + $0x80] ss:$16 sps:$4 sm:$0xff]  }
   0x8   :  { %6460 = vmatpush1.bf16.msra.mxu1 %v8817_v7  ;;  %6420 = vmatprep.subr.bf16.mxu0 %v8818_v8  ;;  %v8826_v13 = vld [vmem:[%s13781_s1 + $0x284] ss:$16 sps:$4 sm:$0xff]   ;;  %v8829_v15 = vld [vmem:[%s13781_s1 + $0x280] ss:$16 sps:$4 sm:$0xff]  }
   0x9   :  { %6461 = vmatprep.subr.bf16.mxu1 %v8820_v9  ;;  %v8830_v16 = vld [vmem:[%s13781_s1 + $0x64] ss:$16 sps:$4 sm:$0xff]   ;;  %v8834_v18 = vld [vmem:[%s13781_s1 + $0x60] ss:$16 sps:$4 sm:$0xff]  }
   0xa   :  { %v8832_v17 = vld [vmem:[%s13781_s1 + $0x264] ss:$16 sps:$4 sm:$0xff]   ;;  %v8835_v19 = vld [vmem:[%s13781_s1 + $0x260] ss:$16 sps:$4 sm:$0xff]  }
   0xb   :  { %6421 = vmatpush1.bf16.msra.mxu0 %v8822_v10  ;;  %v8836_v20 = vld [vmem:[%s13781_s1 + $0x44] ss:$16 sps:$4 sm:$0xff]   ;;  %v8840_v22 = vld [vmem:[%s13781_s1 + $0x40] ss:$16 sps:$4 sm:$0xff]  }
   0xc   :  { %6462 = vmatpush1.bf16.msra.mxu1 %v8823_v11  ;;  %6422 = vmatprep.subr.bf16.mxu0 %v8824_v12  ;;  %v8838_v21 = vld [vmem:[%s13781_s1 + $0x244] ss:$16 sps:$4 sm:$0xff]   ;;  %v8841_v23 = vld [vmem:[%s13781_s1 + $0x240] ss:$16 sps:$4 sm:$0xff]  }
   0xd   :  { %6463 = vmatprep.subr.bf16.mxu1 %v8826_v13  ;;  %v8842_v24 = vld [vmem:[%s13781_s1 + $0x24] ss:$16 sps:$4 sm:$0xff]   ;;  %v8846_v26 = vld [vmem:[%s13781_s1 + $0x20] ss:$16 sps:$4 sm:$0xff]  }
   0xe   :  { %v8844_v25 = vld [vmem:[%s13781_s1 + $0x224] ss:$16 sps:$4 sm:$0xff]   ;;  %v8847_v27 = vld [vmem:[%s13781_s1 + $0x220] ss:$16 sps:$4 sm:$0xff]  }
   0xf   :  { %6423 = vmatpush1.bf16.msra.mxu0 %v8828_v14  ;;  %v8848_v28 = vld [vmem:[%s13781_s1 + $0x4] ss:$16 sps:$4 sm:$0xff]   ;;  %v8852_v30 = vld [vmem:[%s13781_s1] ss:$16 sps:$4 sm:$0xff]  }
  0x10   :  { %6464 = vmatpush1.bf16.msra.mxu1 %v8829_v15  ;;  %6424 = vmatprep.subr.bf16.mxu0 %v8830_v16  ;;  %v8850_v29 = vld [vmem:[%s13781_s1 + $0x204] ss:$16 sps:$4 sm:$0xff]   ;;  %v8853_v31 = vld [vmem:[%s13781_s1 + $0x200] ss:$16 sps:$4 sm:$0xff]  }
  0x11   :  { %6465 = vmatprep.subr.bf16.mxu1 %v8832_v17  ;;  %v8854_v32 = vld [vmem:[%s13781_s1 + $0x1e4] ss:$16 sps:$4 sm:$0xff]   ;;  %v8858_v34 = vld [vmem:[%s13781_s1 + $0x1e0] ss:$16 sps:$4 sm:$0xff]  }
  0x12   :  { %v8856_v33 = vld [vmem:[%s13781_s1 + $0x3e4] ss:$16 sps:$4 sm:$0xff]   ;;  %v8859_v35 = vld [vmem:[%s13781_s1 + $0x3e0] ss:$16 sps:$4 sm:$0xff]  }
  0x13   :  { %6425 = vmatpush1.bf16.msra.mxu0 %v8834_v18  ;;  %v8860_v39 = vld [vmem:[%s13781_s1 + $0x1c4] ss:$16 sps:$4 sm:$0xff]   ;;  %v8864_v41 = vld [vmem:[%s13781_s1 + $0x1c0] ss:$16 sps:$4 sm:$0xff]  }
  0x14   :  { %6466 = vmatpush1.bf16.msra.mxu1 %v8835_v19  ;;  %6426 = vmatprep.subr.bf16.mxu0 %v8836_v20  ;;  %v8862_v40 = vld [vmem:[%s13781_s1 + $0x3c4] ss:$16 sps:$4 sm:$0xff]   ;;  %v8865_v44 = vld [vmem:[%s13781_s1 + $0x3c0] ss:$16 sps:$4 sm:$0xff]  }
  0x15   :  { %6467 = vmatprep.subr.bf16.mxu1 %v8838_v21  ;;  %v8866_v45 = vld [vmem:[%s13781_s1 + $0x1a4] ss:$16 sps:$4 sm:$0xff]   ;;  %v8870_v47 = vld [vmem:[%s13781_s1 + $0x1a0] ss:$16 sps:$4 sm:$0xff]  }
  0x16   :  { %v8868_v46 = vld [vmem:[%s13781_s1 + $0x3a4] ss:$16 sps:$4 sm:$0xff]   ;;  %v8871_v48 = vld [vmem:[%s13781_s1 + $0x3a0] ss:$16 sps:$4 sm:$0xff]  }
  0x17   :  { %6427 = vmatpush1.bf16.msra.mxu0 %v8840_v22  ;;  %v8872_v50 = vld [vmem:[%s13781_s1 + $0x184] ss:$16 sps:$4 sm:$0xff]   ;;  %v8876_v53 = vld [vmem:[%s13781_s1 + $0x180] ss:$16 sps:$4 sm:$0xff]  }
  0x18   :  { %6468 = vmatpush1.bf16.msra.mxu1 %v8841_v23  ;;  %6428 = vmatprep.subr.bf16.mxu0 %v8842_v24  ;;  %v8874_v51 = vld [vmem:[%s13781_s1 + $0x384] ss:$16 sps:$4 sm:$0xff]   ;;  %v8877_v55 = vld [vmem:[%s13781_s1 + $0x380] ss:$16 sps:$4 sm:$0xff]  }
  0x19   :  { %6469 = vmatprep.subr.bf16.mxu1 %v8844_v25  ;;  %v14_v52 = vld [vmem:[%s13782_s0] sm:$0xff] }
  0x1a   :  { %v1075_v54 = vrot.slane %v14_v52, %v10503_v49  ;;  %v8878_v56 = vld [vmem:[%s13781_s1 + $0x164] ss:$16 sps:$4 sm:$0xff]   ;;  %v8882_v59 = vld [vmem:[%s13781_s1 + $0x160] ss:$16 sps:$4 sm:$0xff]   ;;  %v1068_v1 = vcombine.high %v14_v52, %v14_v52 }
  0x1b   :  { %6429 = vmatpush1.bf16.msra.mxu0 %v8846_v26  ;;  %v8880_v57 = vld [vmem:[%s13781_s1 + $0x364] ss:$16 sps:$4 sm:$0xff]   ;;  %v8883_v61 = vld [vmem:[%s13781_s1 + $0x360] ss:$16 sps:$4 sm:$0xff]  }
  0x1c   :  { %6470 = vmatpush1.bf16.msra.mxu1 %v8847_v27  ;;  %6430 = vmatprep.subr.bf16.mxu0 %v8848_v28  ;;  %v1083_v58 = vcombine.high %v1075_v54, %v1075_v54  ;;  %v8884_v62 = vld [vmem:[%s13781_s1 + $0x144] ss:$16 sps:$4 sm:$0xff]   ;;  %v8888_v2 = vld [vmem:[%s13781_s1 + $0x140] ss:$16 sps:$4 sm:$0xff]   ;;  %v10561_v6 = vrot.slane %v1068_v1, %v10503_v49  ;;  %v10581_v13 = vrot.slane %v1075_v54, %v10503_v49 }
  0x1d   :  { %6471 = vmatprep.subr.bf16.mxu1 %v8850_v29  ;;  %v8886_v63 = vld [vmem:[%s13781_s1 + $0x344] ss:$16 sps:$4 sm:$0xff]   ;;  %v8889_v3 = vld [vmem:[%s13781_s1 + $0x340] ss:$16 sps:$4 sm:$0xff]  }
  0x1e   :  { %v10531_v60 = vrot.slane %v1083_v58, %v10503_v49  ;;  %v8890_v4 = vld [vmem:[%s13781_s1 + $0x124] ss:$16 sps:$4 sm:$0xff]   ;;  %v8894_v7 = vld [vmem:[%s13781_s1 + $0x120] ss:$16 sps:$4 sm:$0xff]   ;;  %v1084_v11 = vcombine.high %v10561_v6, %v10561_v6  ;;  %v10597_v18 = vcombine.high %v10581_v13, %v10581_v13 }
  0x1f   :  { %6431 = vmatpush1.bf16.msra.mxu0 %v8852_v30  ;;  %v8892_v5 = vld [vmem:[%s13781_s1 + $0x324] ss:$16 sps:$4 sm:$0xff]   ;;  %v8895_v8 = vld [vmem:[%s13781_s1 + $0x320] ss:$16 sps:$4 sm:$0xff]  }
  0x20   :  { %6472 = vmatpush1.bf16.msra.mxu1 %v8853_v31  ;;  %6432 = vmatprep.subr.bf16.mxu0 %v8854_v32  ;;  %v10544_v0 = vcombine.high %v10531_v60, %v10531_v60  ;;  %v8896_v9 = vld [vmem:[%s13781_s1 + $0x104] ss:$16 sps:$4 sm:$0xff]   ;;  %v8900_v12 = vld [vmem:[%s13781_s1 + $0x100] ss:$16 sps:$4 sm:$0xff]   ;;  %v10593_v17 = vrot.slane %v1084_v11, %v10503_v49 }
  0x21   :  { %6473 = vmatprep.subr.bf16.mxu1 %v8856_v33  ;;  %6448 = vmatprep.mubr.bf16.mxu0 %v10531_v60  ;;  %v8898_v10 = vld [vmem:[%s13781_s1 + $0x304] ss:$16 sps:$4 sm:$0xff]   ;;  %v8901_v14 = vld [vmem:[%s13781_s1 + $0x300] ss:$16 sps:$4 sm:$0xff]  }
  0x22   :  { %6489 = vmatprep.mubr.bf16.mxu1 %v10544_v0  ;;  %v8904_v15 = vld [vmem:[%s13781_s1 + $0x4e4] ss:$16 sps:$4 sm:$0xff]   ;;  %v8902_v19 = vld [vmem:[%s13781_s1 + $0x4e0] ss:$16 sps:$4 sm:$0xff]   ;;  %v10613_v23 = vcombine.high %v10593_v17, %v10593_v17 }
  0x23   :  { %6433 = vmatpush2.bf16.msra.mxu0 %v8858_v34  ;;  %v8907_v16 = vld [vmem:[%s13781_s1 + $0x6e4] ss:$16 sps:$4 sm:$0xff]   ;;  %v8905_v20 = vld [vmem:[%s13781_s1 + $0x6e0] ss:$16 sps:$4 sm:$0xff]  }
  0x24   :  { %6474 = vmatpush2.bf16.msra.mxu1 %v8859_v35  ;;  %6434 = vmatprep.subr.bf16.mxu0 %v8860_v39  ;;  %v8910_v21 = vld [vmem:[%s13781_s1 + $0x4c4] ss:$16 sps:$4 sm:$0xff]   ;;  %v8908_v24 = vld [vmem:[%s13781_s1 + $0x4c0] ss:$16 sps:$4 sm:$0xff]  }
  0x25   :  { %6475 = vmatprep.subr.bf16.mxu1 %v8862_v40  ;;  %v8913_v22 = vld [vmem:[%s13781_s1 + $0x6c4] ss:$16 sps:$4 sm:$0xff]   ;;  %v8911_v25 = vld [vmem:[%s13781_s1 + $0x6c0] ss:$16 sps:$4 sm:$0xff]  }
  0x26   :  { %v8916_v26 = vld [vmem:[%s13781_s1 + $0x4a4] ss:$16 sps:$4 sm:$0xff]   ;;  %v8914_v28 = vld [vmem:[%s13781_s1 + $0x4a0] ss:$16 sps:$4 sm:$0xff]  }
  0x27   :  { %6435 = vmatpush2.bf16.msra.mxu0 %v8864_v41  ;;  %v8919_v27 = vld [vmem:[%s13781_s1 + $0x6a4] ss:$16 sps:$4 sm:$0xff]   ;;  %v8917_v29 = vld [vmem:[%s13781_s1 + $0x6a0] ss:$16 sps:$4 sm:$0xff]  }
  0x28   :  { %6476 = vmatpush2.bf16.msra.mxu1 %v8865_v44  ;;  %6436 = vmatprep.subr.bf16.mxu0 %v8866_v45  ;;  %v8922_v30 = vld [vmem:[%s13781_s1 + $0x484] ss:$16 sps:$4 sm:$0xff]   ;;  %v8920_v32 = vld [vmem:[%s13781_s1 + $0x480] ss:$16 sps:$4 sm:$0xff]  }
  0x29   :  { %6477 = vmatprep.subr.bf16.mxu1 %v8868_v46  ;;  %v8925_v31 = vld [vmem:[%s13781_s1 + $0x684] ss:$16 sps:$4 sm:$0xff]   ;;  %v8923_v33 = vld [vmem:[%s13781_s1 + $0x680] ss:$16 sps:$4 sm:$0xff]  }
  0x2a   :  { %v8928_v34 = vld [vmem:[%s13781_s1 + $0x464] ss:$16 sps:$4 sm:$0xff]   ;;  %v8926_v36 = vld [vmem:[%s13781_s1 + $0x460] ss:$16 sps:$4 sm:$0xff]  }
  0x2b   :  { %6437 = vmatpush2.bf16.msra.mxu0 %v8870_v47  ;;  %v8931_v35 = vld [vmem:[%s13781_s1 + $0x664] ss:$16 sps:$4 sm:$0xff]   ;;  %v8929_v37 = vld [vmem:[%s13781_s1 + $0x660] ss:$16 sps:$4 sm:$0xff]  }
  0x2c   :  { %6478 = vmatpush2.bf16.msra.mxu1 %v8871_v48  ;;  %6438 = vmatprep.subr.bf16.mxu0 %v8872_v50  ;;  %v8934_v38 = vld [vmem:[%s13781_s1 + $0x444] ss:$16 sps:$4 sm:$0xff]   ;;  %v8932_v40 = vld [vmem:[%s13781_s1 + $0x440] ss:$16 sps:$4 sm:$0xff]  }
  0x2d   :  { %6479 = vmatprep.subr.bf16.mxu1 %v8874_v51  ;;  %v8937_v39 = vld [vmem:[%s13781_s1 + $0x644] ss:$16 sps:$4 sm:$0xff]   ;;  %v8935_v41 = vld [vmem:[%s13781_s1 + $0x640] ss:$16 sps:$4 sm:$0xff]  }
  0x2e   :  { %v8940_v43 = vld [vmem:[%s13781_s1 + $0x424] ss:$16 sps:$4 sm:$0xff]   ;;  %v8938_v45 = vld [vmem:[%s13781_s1 + $0x420] ss:$16 sps:$4 sm:$0xff]  }
  0x2f   :  { %6439 = vmatpush2.bf16.msra.mxu0 %v8876_v53  ;;  %v8943_v44 = vld [vmem:[%s13781_s1 + $0x624] ss:$16 sps:$4 sm:$0xff]   ;;  %v8941_v46 = vld [vmem:[%s13781_s1 + $0x620] ss:$16 sps:$4 sm:$0xff]  }
  0x30   :  { %6480 = vmatpush2.bf16.msra.mxu1 %v8877_v55  ;;  %6440 = vmatprep.subr.bf16.mxu0 %v8878_v56  ;;  %v8946_v47 = vld [vmem:[%s13781_s1 + $0x404] ss:$16 sps:$4 sm:$0xff]   ;;  %v8944_v50 = vld [vmem:[%s13781_s1 + $0x400] ss:$16 sps:$4 sm:$0xff]  }
  0x31   :  { %6481 = vmatprep.subr.bf16.mxu1 %v8880_v57  ;;  %v8949_v48 = vld [vmem:[%s13781_s1 + $0x604] ss:$16 sps:$4 sm:$0xff]   ;;  %v8947_v51 = vld [vmem:[%s13781_s1 + $0x600] ss:$16 sps:$4 sm:$0xff]  }
  0x32   :  { %v8952_v52 = vld [vmem:[%s13781_s1 + $0x5e4] ss:$16 sps:$4 sm:$0xff]   ;;  %v8950_v54 = vld [vmem:[%s13781_s1 + $0x5e0] ss:$16 sps:$4 sm:$0xff]  }
  0x33   :  { %6441 = vmatpush2.bf16.msra.mxu0 %v8882_v59  ;;  %v8955_v53 = vld [vmem:[%s13781_s1 + $0x7e4] ss:$16 sps:$4 sm:$0xff]   ;;  %v8953_v55 = vld [vmem:[%s13781_s1 + $0x7e0] ss:$16 sps:$4 sm:$0xff]  }
  0x34   :  { %6482 = vmatpush2.bf16.msra.mxu1 %v8883_v61  ;;  %6442 = vmatprep.subr.bf16.mxu0 %v8884_v62  ;;  %v8958_v56 = vld [vmem:[%s13781_s1 + $0x5c4] ss:$16 sps:$4 sm:$0xff]   ;;  %v8956_v58 = vld [vmem:[%s13781_s1 + $0x5c0] ss:$16 sps:$4 sm:$0xff]  }
  0x35   :  { %6483 = vmatprep.subr.bf16.mxu1 %v8886_v63  ;;  %v8961_v57 = vld [vmem:[%s13781_s1 + $0x7c4] ss:$16 sps:$4 sm:$0xff]   ;;  %v8959_v59 = vld [vmem:[%s13781_s1 + $0x7c0] ss:$16 sps:$4 sm:$0xff]  }
  0x36   :  { %v8964_v61 = vld [vmem:[%s13781_s1 + $0x5a4] ss:$16 sps:$4 sm:$0xff]   ;;  %v8962_v63 = vld [vmem:[%s13781_s1 + $0x5a0] ss:$16 sps:$4 sm:$0xff]  }
  0x37   :  { %6443 = vmatpush2.bf16.msra.mxu0 %v8888_v2  ;;  %v8967_v62 = vld [vmem:[%s13781_s1 + $0x7a4] ss:$16 sps:$4 sm:$0xff]   ;;  %v8965_v1 = vld [vmem:[%s13781_s1 + $0x7a0] ss:$16 sps:$4 sm:$0xff]  }
  0x38   :  { %6484 = vmatpush2.bf16.msra.mxu1 %v8889_v3  ;;  %6444 = vmatprep.subr.bf16.mxu0 %v8890_v4  ;;  %v8970_v2 = vld [vmem:[%s13781_s1 + $0x584] ss:$16 sps:$4 sm:$0xff]   ;;  %v8968_v4 = vld [vmem:[%s13781_s1 + $0x580] ss:$16 sps:$4 sm:$0xff]  }
  0x39   :  { %6485 = vmatprep.subr.bf16.mxu1 %v8892_v5  ;;  %v8973_v3 = vld [vmem:[%s13781_s1 + $0x784] ss:$16 sps:$4 sm:$0xff]   ;;  %v8971_v5 = vld [vmem:[%s13781_s1 + $0x780] ss:$16 sps:$4 sm:$0xff]  }
  0x3a   :  { %v8982_v11 = vld [vmem:[%s13781_s1 + $0x544] ss:$16 sps:$4 sm:$0xff]  }
  0x3b   :  { %6445 = vmatpush2.bf16.msra.mxu0 %v8894_v7  ;;  %v8976_v7 = vld [vmem:[%s13781_s1 + $0x564] ss:$16 sps:$4 sm:$0xff]  }
  0x3c   :  { %6486 = vmatpush2.bf16.msra.mxu1 %v8895_v8  ;;  %6446 = vmatprep.subr.bf16.mxu0 %v8896_v9  ;;  %v8979_v8 = vld [vmem:[%s13781_s1 + $0x764] ss:$16 sps:$4 sm:$0xff]   ;;  %v8974_v9 = vld [vmem:[%s13781_s1 + $0x560] ss:$16 sps:$4 sm:$0xff]  }
  0x3d   :  { %6487 = vmatprep.subr.bf16.mxu1 %v8898_v10  ;;  %v8977_v10 = vld [vmem:[%s13781_s1 + $0x760] ss:$16 sps:$4 sm:$0xff]  }
  0x3f   :  { %6447 = vmatpush2.bf16.msra.mxu0 %v8900_v12  ;;  %v8985_v12 = vld [vmem:[%s13781_s1 + $0x744] ss:$16 sps:$4 sm:$0xff]  }
  0x40   :  { %6488 = vmatpush2.bf16.msra.mxu1 %v8901_v14  ;;  %6498 = vmatprep.subr.bf16.mxu0 %v8904_v15  ;;  %v8980_v14 = vld [vmem:[%s13781_s1 + $0x540] ss:$16 sps:$4 sm:$0xff]  }
  0x41   :  { %6539 = vmatprep.subr.bf16.mxu1 %v8907_v16  ;;  %v8983_v15 = vld [vmem:[%s13781_s1 + $0x740] ss:$16 sps:$4 sm:$0xff]   ;;  %v8988_v16 = vld [vmem:[%s13781_s1 + $0x524] ss:$16 sps:$4 sm:$0xff]  }
  0x42   :  { %6449 = vmatmul.mubr.bf16.vlgmr.msra.gmra.mxu0 %v10581_v13 }
  0x43   :  { %6490 = vmatmul.mubr.bf16.vlgmr.msra.gmra.mxu1 %v10597_v18  ;;  %6499 = vmatpush1.bf16.msra.mxu0 %v8902_v19  ;;  %v8991_v19 = vld [vmem:[%s13781_s1 + $0x724] ss:$16 sps:$4 sm:$0xff]  }
  0x44   :  { %6540 = vmatpush1.bf16.msra.mxu1 %v8905_v20  ;;  %6500 = vmatprep.subr.bf16.mxu0 %v8910_v21  ;;  %v8986_v20 = vld [vmem:[%s13781_s1 + $0x520] ss:$16 sps:$4 sm:$0xff]  }
  0x45   :  { %6541 = vmatprep.subr.bf16.mxu1 %v8913_v22  ;;  %6530 = vmatprep.mubr.bf16.mxu0 %v10593_v17  ;;  %v8989_v21 = vld [vmem:[%s13781_s1 + $0x720] ss:$16 sps:$4 sm:$0xff]   ;;  %v8994_v22 = vld [vmem:[%s13781_s1 + $0x504] ss:$16 sps:$4 sm:$0xff]  }
  0x46   :  { %6571 = vmatprep.mubr.bf16.mxu1 %v10613_v23 }
  0x47   :  { %6501 = vmatpush1.bf16.msra.mxu0 %v8908_v24  ;;  %v8997_v24 = vld [vmem:[%s13781_s1 + $0x704] ss:$16 sps:$4 sm:$0xff]  }
  0x48   :  { %6542 = vmatpush1.bf16.msra.mxu1 %v8911_v25  ;;  %6502 = vmatprep.subr.bf16.mxu0 %v8916_v26  ;;  %v8992_v25 = vld [vmem:[%s13781_s1 + $0x500] ss:$16 sps:$4 sm:$0xff]   ;;  %v10792_v26 = vrot.slane %v10561_v6, %v10503_v49 }
  0x49   :  { %6543 = vmatprep.subr.bf16.mxu1 %v8919_v27  ;;  %v8995_v27 = vld [vmem:[%s13781_s1 + $0x700] ss:$16 sps:$4 sm:$0xff]  }
  0x4a   :  { %v10805_v6 = vcombine.high %v10792_v26, %v10792_v26 }
  0x4b   :  { %6503 = vmatpush1.bf16.msra.mxu0 %v8914_v28  ;;  %v9001_v28 = vld [vmem:[%s13781_s1 + $0x8e4] ss:$16 sps:$4 sm:$0xff]  }
  0x4c   :  { %6544 = vmatpush1.bf16.msra.mxu1 %v8917_v29  ;;  %6504 = vmatprep.subr.bf16.mxu0 %v8922_v30  ;;  %v9004_v29 = vld [vmem:[%s13781_s1 + $0xae4] ss:$16 sps:$4 sm:$0xff]   ;;  %v8999_v30 = vld [vmem:[%s13781_s1 + $0x8e0] ss:$16 sps:$4 sm:$0xff]  }
  0x4d   :  { %6545 = vmatprep.subr.bf16.mxu1 %v8925_v31  ;;  %v9002_v31 = vld [vmem:[%s13781_s1 + $0xae0] ss:$16 sps:$4 sm:$0xff]  }
  0x4f   :  { %6505 = vmatpush1.bf16.msra.mxu0 %v8920_v32  ;;  %v10816_v32 = vld [vmem:[%s13782_s0 + $0x8] sm:$0xff] }
  0x50   :  { %6546 = vmatpush1.bf16.msra.mxu1 %v8923_v33  ;;  %6506 = vmatprep.subr.bf16.mxu0 %v8928_v34  ;;  %v9007_v33 = vld [vmem:[%s13781_s1 + $0x8c4] ss:$16 sps:$4 sm:$0xff]  }
  0x51   :  { %6547 = vmatprep.subr.bf16.mxu1 %v8931_v35  ;;  %v9010_v34 = vld [vmem:[%s13781_s1 + $0xac4] ss:$16 sps:$4 sm:$0xff]   ;;  %v10826_v35 = vrot.slane %v10816_v32, %v10503_v49 }
  0x53   :  { %6507 = vmatpush1.bf16.msra.mxu0 %v8926_v36  ;;  %v1132_v36 = vcombine.high %v10826_v35, %v10826_v35 }
  0x54   :  { %6548 = vmatpush1.bf16.msra.mxu1 %v8929_v37  ;;  %6508 = vmatprep.subr.bf16.mxu0 %v8934_v38  ;;  %v9005_v37 = vld [vmem:[%s13781_s1 + $0x8c0] ss:$16 sps:$4 sm:$0xff]  }
  0x55   :  { %6549 = vmatprep.subr.bf16.mxu1 %v8937_v39  ;;  %v9008_v38 = vld [vmem:[%s13781_s1 + $0xac0] ss:$16 sps:$4 sm:$0xff]   ;;  %v9013_v39 = vld [vmem:[%s13781_s1 + $0x8a4] ss:$16 sps:$4 sm:$0xff]  }
  0x57   :  { %6509 = vmatpush1.bf16.msra.mxu0 %v8932_v40  ;;  %v9016_v40 = vld [vmem:[%s13781_s1 + $0xaa4] ss:$16 sps:$4 sm:$0xff]  }
  0x58   :  { %6550 = vmatpush1.bf16.msra.mxu1 %v8935_v41  ;;  %6510 = vmatprep.subr.bf16.mxu0 %v8940_v43  ;;  %v10845_v41 = vrot.slane %v1132_v36, %v10503_v49  ;;  %v9077_v36 = vld [vmem:[%s13781_s1 + $0x940] ss:$16 sps:$4 sm:$0xff]  }
  0x59   :  { %6551 = vmatprep.subr.bf16.mxu1 %v8943_v44  ;;  %v9011_v44 = vld [vmem:[%s13781_s1 + $0x8a0] ss:$16 sps:$4 sm:$0xff]  }
  0x5a   :  { %v10850_v43 = vcombine.high %v10845_v41, %v10845_v41 }
  0x5b   :  { %6511 = vmatpush1.bf16.msra.mxu0 %v8938_v45  ;;  %v9014_v45 = vld [vmem:[%s13781_s1 + $0xaa0] ss:$16 sps:$4 sm:$0xff]  }
  0x5c   :  { %6552 = vmatpush1.bf16.msra.mxu1 %v8941_v46  ;;  %6512 = vmatprep.subr.bf16.mxu0 %v8946_v47  ;;  %v9019_v46 = vld [vmem:[%s13781_s1 + $0x884] ss:$16 sps:$4 sm:$0xff]  }
  0x5d   :  { %6553 = vmatprep.subr.bf16.mxu1 %v8949_v48  ;;  %v9022_v47 = vld [vmem:[%s13781_s1 + $0xa84] ss:$16 sps:$4 sm:$0xff]   ;;  %v9017_v48 = vld [vmem:[%s13781_s1 + $0x880] ss:$16 sps:$4 sm:$0xff]  }
  0x5f   :  { %6513 = vmatpush1.bf16.msra.mxu0 %v8944_v50  ;;  %v9020_v50 = vld [vmem:[%s13781_s1 + $0xa80] ss:$16 sps:$4 sm:$0xff]  }
  0x60   :  { %6554 = vmatpush1.bf16.msra.mxu1 %v8947_v51  ;;  %6514 = vmatprep.subr.bf16.mxu0 %v8952_v52  ;;  %v9025_v51 = vld [vmem:[%s13781_s1 + $0x864] ss:$16 sps:$4 sm:$0xff]  }
  0x61   :  { %6555 = vmatprep.subr.bf16.mxu1 %v8955_v53  ;;  %v9028_v52 = vld [vmem:[%s13781_s1 + $0xa64] ss:$16 sps:$4 sm:$0xff]   ;;  %v9023_v53 = vld [vmem:[%s13781_s1 + $0x860] ss:$16 sps:$4 sm:$0xff]  }
  0x63   :  { %6515 = vmatpush2.bf16.msra.mxu0 %v8950_v54  ;;  %v9026_v54 = vld [vmem:[%s13781_s1 + $0xa60] ss:$16 sps:$4 sm:$0xff]  }
  0x64   :  { %6556 = vmatpush2.bf16.msra.mxu1 %v8953_v55  ;;  %6516 = vmatprep.subr.bf16.mxu0 %v8958_v56  ;;  %v9031_v55 = vld [vmem:[%s13781_s1 + $0x844] ss:$16 sps:$4 sm:$0xff]  }
  0x65   :  { %6557 = vmatprep.subr.bf16.mxu1 %v8961_v57  ;;  %v9034_v56 = vld [vmem:[%s13781_s1 + $0xa44] ss:$16 sps:$4 sm:$0xff]   ;;  %v9029_v57 = vld [vmem:[%s13781_s1 + $0x840] ss:$16 sps:$4 sm:$0xff]  }
  0x67   :  { %6517 = vmatpush2.bf16.msra.mxu0 %v8956_v58  ;;  %v9032_v58 = vld [vmem:[%s13781_s1 + $0xa40] ss:$16 sps:$4 sm:$0xff]  }
  0x68   :  { %6558 = vmatpush2.bf16.msra.mxu1 %v8959_v59  ;;  %6518 = vmatprep.subr.bf16.mxu0 %v8964_v61  ;;  %v9037_v59 = vld [vmem:[%s13781_s1 + $0x824] ss:$16 sps:$4 sm:$0xff]  }
  0x69   :  { %6559 = vmatprep.subr.bf16.mxu1 %v8967_v62  ;;  %v9040_v61 = vld [vmem:[%s13781_s1 + $0xa24] ss:$16 sps:$4 sm:$0xff]   ;;  %v9035_v62 = vld [vmem:[%s13781_s1 + $0x820] ss:$16 sps:$4 sm:$0xff]  }
  0x6b   :  { %6519 = vmatpush2.bf16.msra.mxu0 %v8962_v63  ;;  %v9038_v63 = vld [vmem:[%s13781_s1 + $0xa20] ss:$16 sps:$4 sm:$0xff]  }
  0x6c   :  { %6560 = vmatpush2.bf16.msra.mxu1 %v8965_v1  ;;  %6520 = vmatprep.subr.bf16.mxu0 %v8970_v2  ;;  %v9043_v1 = vld [vmem:[%s13781_s1 + $0x804] ss:$16 sps:$4 sm:$0xff]  }
  0x6d   :  { %6561 = vmatprep.subr.bf16.mxu1 %v8973_v3  ;;  %v9046_v2 = vld [vmem:[%s13781_s1 + $0xa04] ss:$16 sps:$4 sm:$0xff]   ;;  %v9041_v3 = vld [vmem:[%s13781_s1 + $0x800] ss:$16 sps:$4 sm:$0xff]  }
  0x6f   :  { %6521 = vmatpush2.bf16.msra.mxu0 %v8968_v4  ;;  %v9044_v4 = vld [vmem:[%s13781_s1 + $0xa00] ss:$16 sps:$4 sm:$0xff]  }
  0x70   :  { %6562 = vmatpush2.bf16.msra.mxu1 %v8971_v5  ;;  %6522 = vmatprep.subr.bf16.mxu0 %v8976_v7  ;;  %v9049_v5 = vld [vmem:[%s13781_s1 + $0x9e4] ss:$16 sps:$4 sm:$0xff]  }
  0x71   :  { %6563 = vmatprep.subr.bf16.mxu1 %v8979_v8  ;;  %v9052_v7 = vld [vmem:[%s13781_s1 + $0xbe4] ss:$16 sps:$4 sm:$0xff]   ;;  %v9047_v8 = vld [vmem:[%s13781_s1 + $0x9e0] ss:$16 sps:$4 sm:$0xff]  }
  0x73   :  { %6523 = vmatpush2.bf16.msra.mxu0 %v8974_v9  ;;  %v9050_v9 = vld [vmem:[%s13781_s1 + $0xbe0] ss:$16 sps:$4 sm:$0xff]  }
  0x74   :  { %6564 = vmatpush2.bf16.msra.mxu1 %v8977_v10  ;;  %6524 = vmatprep.subr.bf16.mxu0 %v8982_v11  ;;  %v9055_v10 = vld [vmem:[%s13781_s1 + $0x9c4] ss:$16 sps:$4 sm:$0xff]  }
  0x75   :  { %6565 = vmatprep.subr.bf16.mxu1 %v8985_v12  ;;  %v9058_v11 = vld [vmem:[%s13781_s1 + $0xbc4] ss:$16 sps:$4 sm:$0xff]   ;;  %v9053_v12 = vld [vmem:[%s13781_s1 + $0x9c0] ss:$16 sps:$4 sm:$0xff]  }
  0x77   :  { %6525 = vmatpush2.bf16.msra.mxu0 %v8980_v14  ;;  %v9056_v14 = vld [vmem:[%s13781_s1 + $0xbc0] ss:$16 sps:$4 sm:$0xff]  }
  0x78   :  { %6566 = vmatpush2.bf16.msra.mxu1 %v8983_v15  ;;  %6526 = vmatprep.subr.bf16.mxu0 %v8988_v16  ;;  %v9061_v15 = vld [vmem:[%s13781_s1 + $0x9a4] ss:$16 sps:$4 sm:$0xff]  }
  0x79   :  { %6567 = vmatprep.subr.bf16.mxu1 %v8991_v19  ;;  %v9064_v16 = vld [vmem:[%s13781_s1 + $0xba4] ss:$16 sps:$4 sm:$0xff]   ;;  %v9059_v19 = vld [vmem:[%s13781_s1 + $0x9a0] ss:$16 sps:$4 sm:$0xff]  }
  0x7b   :  { %6527 = vmatpush2.bf16.msra.mxu0 %v8986_v20  ;;  %v9062_v20 = vld [vmem:[%s13781_s1 + $0xba0] ss:$16 sps:$4 sm:$0xff]  }
  0x7c   :  { %6568 = vmatpush2.bf16.msra.mxu1 %v8989_v21  ;;  %6528 = vmatprep.subr.bf16.mxu0 %v8994_v22  ;;  %v9067_v21 = vld [vmem:[%s13781_s1 + $0x984] ss:$16 sps:$4 sm:$0xff]  }
  0x7d   :  { %6569 = vmatprep.subr.bf16.mxu1 %v8997_v24  ;;  %v9070_v22 = vld [vmem:[%s13781_s1 + $0xb84] ss:$16 sps:$4 sm:$0xff]   ;;  %v9065_v24 = vld [vmem:[%s13781_s1 + $0x980] ss:$16 sps:$4 sm:$0xff]  }
  0x7f   :  { %6529 = vmatpush2.bf16.msra.mxu0 %v8992_v25  ;;  %v9068_v25 = vld [vmem:[%s13781_s1 + $0xb80] ss:$16 sps:$4 sm:$0xff]  }
  0x80   :  { %6570 = vmatpush2.bf16.msra.mxu1 %v8995_v27  ;;  %6580 = vmatprep.subr.bf16.mxu0 %v9001_v28  ;;  %v9073_v27 = vld [vmem:[%s13781_s1 + $0x964] ss:$16 sps:$4 sm:$0xff]  }
  0x81   :  { %6621 = vmatprep.subr.bf16.mxu1 %v9004_v29  ;;  %v9076_v28 = vld [vmem:[%s13781_s1 + $0xb64] ss:$16 sps:$4 sm:$0xff]   ;;  %v9071_v29 = vld [vmem:[%s13781_s1 + $0x960] ss:$16 sps:$4 sm:$0xff]  }
  0x82   :  { %6531 = vmatmul.mubr.bf16.vlgmr.msra.gmra.mxu0 %v10792_v26 }
  0x83   :  { %6572 = vmatmul.mubr.bf16.vlgmr.msra.gmra.mxu1 %v10805_v6  ;;  %6581 = vmatpush1.bf16.msra.mxu0 %v8999_v30  ;;  %v9074_v30 = vld [vmem:[%s13781_s1 + $0xb60] ss:$16 sps:$4 sm:$0xff]  }
  0x84   :  { %6622 = vmatpush1.bf16.msra.mxu1 %v9002_v31  ;;  %6582 = vmatprep.subr.bf16.mxu0 %v9007_v33  ;;  %v9079_v31 = vld [vmem:[%s13781_s1 + $0x944] ss:$16 sps:$4 sm:$0xff]  }
  0x85   :  { %6623 = vmatprep.subr.bf16.mxu1 %v9010_v34  ;;  %6612 = vmatprep.mubr.bf16.mxu0 %v10845_v41  ;;  %v9082_v33 = vld [vmem:[%s13781_s1 + $0xb44] ss:$16 sps:$4 sm:$0xff]   ;;  %v1117_v34 = vcombine.high %v10816_v32, %v10816_v32 }
  0x86   :  { %6653 = vmatprep.mubr.bf16.mxu1 %v10850_v43  ;;  %v9088_v32 = vld [vmem:[%s13781_s1 + $0xb24] ss:$16 sps:$4 sm:$0xff]  }
  0x87   :  { %6583 = vmatpush1.bf16.msra.mxu0 %v9005_v37  ;;  %v9080_v37 = vld [vmem:[%s13781_s1 + $0xb40] ss:$16 sps:$4 sm:$0xff]  }
  0x88   :  { %6624 = vmatpush1.bf16.msra.mxu1 %v9008_v38  ;;  %6584 = vmatprep.subr.bf16.mxu0 %v9013_v39  ;;  %v9085_v38 = vld [vmem:[%s13781_s1 + $0x924] ss:$16 sps:$4 sm:$0xff]   ;;  %v11000_v39 = vrot.slane %v1117_v34, %v10503_v49  ;;  %v9146_v34 = vld [vmem:[%s13781_s1 + $0xfe0] ss:$16 sps:$4 sm:$0xff]  }
  0x89   :  { %6625 = vmatprep.subr.bf16.mxu1 %v9016_v40  ;;  %v9083_v40 = vld [vmem:[%s13781_s1 + $0x920] ss:$16 sps:$4 sm:$0xff]  }
  0x8b   :  { %6585 = vmatpush1.bf16.msra.mxu0 %v9011_v44  ;;  %v9086_v44 = vld [vmem:[%s13781_s1 + $0xb20] ss:$16 sps:$4 sm:$0xff]  }
  0x8c   :  { %6626 = vmatpush1.bf16.msra.mxu1 %v9014_v45  ;;  %6586 = vmatprep.subr.bf16.mxu0 %v9019_v46  ;;  %v9091_v45 = vld [vmem:[%s13781_s1 + $0x904] ss:$16 sps:$4 sm:$0xff]  }
  0x8d   :  { %6627 = vmatprep.subr.bf16.mxu1 %v9022_v47  ;;  %v9094_v46 = vld [vmem:[%s13781_s1 + $0xb04] ss:$16 sps:$4 sm:$0xff]   ;;  %v1133_v47 = vcombine.high %v11000_v39, %v11000_v39 }
  0x8f   :  { %6587 = vmatpush1.bf16.msra.mxu0 %v9017_v48  ;;  %v9089_v48 = vld [vmem:[%s13781_s1 + $0x900] ss:$16 sps:$4 sm:$0xff]  }
  0x90   :  { %6628 = vmatpush1.bf16.msra.mxu1 %v9020_v50  ;;  %6588 = vmatprep.subr.bf16.mxu0 %v9025_v51  ;;  %v11021_v50 = vrot.slane %v10826_v35, %v10503_v49  ;;  %v9092_v51 = vld [vmem:[%s13781_s1 + $0xb00] ss:$16 sps:$4 sm:$0xff]  }
  0x91   :  { %6629 = vmatprep.subr.bf16.mxu1 %v9028_v52  ;;  %v9097_v52 = vld [vmem:[%s13781_s1 + $0xce4] ss:$16 sps:$4 sm:$0xff]  }
  0x92   :  { %v11037_v35 = vcombine.high %v11021_v50, %v11021_v50 }
  0x93   :  { %6589 = vmatpush1.bf16.msra.mxu0 %v9023_v53  ;;  %v9100_v53 = vld [vmem:[%s13781_s1 + $0xee4] ss:$16 sps:$4 sm:$0xff]  }
  0x94   :  { %6630 = vmatpush1.bf16.msra.mxu1 %v9026_v54  ;;  %6590 = vmatprep.subr.bf16.mxu0 %v9031_v55  ;;  %v11033_v54 = vrot.slane %v1133_v47, %v10503_v49  ;;  %v9095_v55 = vld [vmem:[%s13781_s1 + $0xce0] ss:$16 sps:$4 sm:$0xff]   ;;  %v9163_v47 = vld [vmem:[%s13781_s1 + $0xd84] ss:$16 sps:$4 sm:$0xff]  }
  0x95   :  { %6631 = vmatprep.subr.bf16.mxu1 %v9034_v56  ;;  %v9098_v56 = vld [vmem:[%s13781_s1 + $0xee0] ss:$16 sps:$4 sm:$0xff]  }
  0x97   :  { %6591 = vmatpush1.bf16.msra.mxu0 %v9029_v57  ;;  %v9103_v57 = vld [vmem:[%s13781_s1 + $0xcc4] ss:$16 sps:$4 sm:$0xff]  }
  0x98   :  { %6632 = vmatpush1.bf16.msra.mxu1 %v9032_v58  ;;  %6592 = vmatprep.subr.bf16.mxu0 %v9037_v59  ;;  %v9106_v58 = vld [vmem:[%s13781_s1 + $0xec4] ss:$16 sps:$4 sm:$0xff]   ;;  %v11053_v59 = vcombine.high %v11033_v54, %v11033_v54 }
  0x99   :  { %6633 = vmatprep.subr.bf16.mxu1 %v9040_v61  ;;  %v9101_v61 = vld [vmem:[%s13781_s1 + $0xcc0] ss:$16 sps:$4 sm:$0xff]  }
  0x9b   :  { %6593 = vmatpush1.bf16.msra.mxu0 %v9035_v62  ;;  %v9104_v62 = vld [vmem:[%s13781_s1 + $0xec0] ss:$16 sps:$4 sm:$0xff]  }
  0x9c   :  { %6634 = vmatpush1.bf16.msra.mxu1 %v9038_v63  ;;  %6594 = vmatprep.subr.bf16.mxu0 %v9043_v1  ;;  %v9109_v63 = vld [vmem:[%s13781_s1 + $0xca4] ss:$16 sps:$4 sm:$0xff]  }
  0x9d   :  { %6635 = vmatprep.subr.bf16.mxu1 %v9046_v2  ;;  %v9112_v1 = vld [vmem:[%s13781_s1 + $0xea4] ss:$16 sps:$4 sm:$0xff]   ;;  %v9107_v2 = vld [vmem:[%s13781_s1 + $0xca0] ss:$16 sps:$4 sm:$0xff]  }
  0x9f   :  { %6595 = vmatpush1.bf16.msra.mxu0 %v9041_v3  ;;  %v9110_v3 = vld [vmem:[%s13781_s1 + $0xea0] ss:$16 sps:$4 sm:$0xff]  }
  0xa0   :  { %6636 = vmatpush1.bf16.msra.mxu1 %v9044_v4  ;;  %6596 = vmatprep.subr.bf16.mxu0 %v9049_v5  ;;  %v9115_v4 = vld [vmem:[%s13781_s1 + $0xc84] ss:$16 sps:$4 sm:$0xff]  }
  0xa1   :  { %6637 = vmatprep.subr.bf16.mxu1 %v9052_v7  ;;  %v9118_v5 = vld [vmem:[%s13781_s1 + $0xe84] ss:$16 sps:$4 sm:$0xff]   ;;  %v9113_v7 = vld [vmem:[%s13781_s1 + $0xc80] ss:$16 sps:$4 sm:$0xff]  }
  0xa3   :  { %6597 = vmatpush2.bf16.msra.mxu0 %v9047_v8  ;;  %v9116_v8 = vld [vmem:[%s13781_s1 + $0xe80] ss:$16 sps:$4 sm:$0xff]  }
  0xa4   :  { %6638 = vmatpush2.bf16.msra.mxu1 %v9050_v9  ;;  %6598 = vmatprep.subr.bf16.mxu0 %v9055_v10  ;;  %v9121_v9 = vld [vmem:[%s13781_s1 + $0xc64] ss:$16 sps:$4 sm:$0xff]  }
  0xa5   :  { %6639 = vmatprep.subr.bf16.mxu1 %v9058_v11  ;;  %v9124_v10 = vld [vmem:[%s13781_s1 + $0xe64] ss:$16 sps:$4 sm:$0xff]   ;;  %v9119_v11 = vld [vmem:[%s13781_s1 + $0xc60] ss:$16 sps:$4 sm:$0xff]  }
  0xa7   :  { %6599 = vmatpush2.bf16.msra.mxu0 %v9053_v12  ;;  %v9122_v12 = vld [vmem:[%s13781_s1 + $0xe60] ss:$16 sps:$4 sm:$0xff]  }
  0xa8   :  { %6640 = vmatpush2.bf16.msra.mxu1 %v9056_v14  ;;  %6600 = vmatprep.subr.bf16.mxu0 %v9061_v15  ;;  %v9127_v14 = vld [vmem:[%s13781_s1 + $0xc44] ss:$16 sps:$4 sm:$0xff]  }
  0xa9   :  { %6641 = vmatprep.subr.bf16.mxu1 %v9064_v16  ;;  %v9130_v15 = vld [vmem:[%s13781_s1 + $0xe44] ss:$16 sps:$4 sm:$0xff]   ;;  %v9125_v16 = vld [vmem:[%s13781_s1 + $0xc40] ss:$16 sps:$4 sm:$0xff]  }
  0xab   :  { %6601 = vmatpush2.bf16.msra.mxu0 %v9059_v19  ;;  %v9128_v19 = vld [vmem:[%s13781_s1 + $0xe40] ss:$16 sps:$4 sm:$0xff]  }
  0xac   :  { %6642 = vmatpush2.bf16.msra.mxu1 %v9062_v20  ;;  %6602 = vmatprep.subr.bf16.mxu0 %v9067_v21  ;;  %v9133_v20 = vld [vmem:[%s13781_s1 + $0xc24] ss:$16 sps:$4 sm:$0xff]  }
  0xad   :  { %6643 = vmatprep.subr.bf16.mxu1 %v9070_v22  ;;  %v9136_v21 = vld [vmem:[%s13781_s1 + $0xe24] ss:$16 sps:$4 sm:$0xff]   ;;  %v9131_v22 = vld [vmem:[%s13781_s1 + $0xc20] ss:$16 sps:$4 sm:$0xff]  }
  0xaf   :  { %6603 = vmatpush2.bf16.msra.mxu0 %v9065_v24  ;;  %v9134_v24 = vld [vmem:[%s13781_s1 + $0xe20] ss:$16 sps:$4 sm:$0xff]  }
  0xb0   :  { %6644 = vmatpush2.bf16.msra.mxu1 %v9068_v25  ;;  %6604 = vmatprep.subr.bf16.mxu0 %v9073_v27  ;;  %v9139_v25 = vld [vmem:[%s13781_s1 + $0xc04] ss:$16 sps:$4 sm:$0xff]  }
  0xb1   :  { %6645 = vmatprep.subr.bf16.mxu1 %v9076_v28  ;;  %v9142_v27 = vld [vmem:[%s13781_s1 + $0xe04] ss:$16 sps:$4 sm:$0xff]   ;;  %v9137_v28 = vld [vmem:[%s13781_s1 + $0xc00] ss:$16 sps:$4 sm:$0xff]  }
  0xb3   :  { %6605 = vmatpush2.bf16.msra.mxu0 %v9071_v29  ;;  %v9140_v29 = vld [vmem:[%s13781_s1 + $0xe00] ss:$16 sps:$4 sm:$0xff]  }
  0xb4   :  { %6646 = vmatpush2.bf16.msra.mxu1 %v9074_v30  ;;  %6606 = vmatprep.subr.bf16.mxu0 %v9079_v31  ;;  %v9145_v30 = vld [vmem:[%s13781_s1 + $0xde4] ss:$16 sps:$4 sm:$0xff]  }
  0xb5   :  { %6647 = vmatprep.subr.bf16.mxu1 %v9082_v33  ;;  %v9148_v31 = vld [vmem:[%s13781_s1 + $0xfe4] ss:$16 sps:$4 sm:$0xff]   ;;  %v9143_v33 = vld [vmem:[%s13781_s1 + $0xde0] ss:$16 sps:$4 sm:$0xff]  }
  0xb7   :  { %6607 = vmatpush2.bf16.msra.mxu0 %v9077_v36  ;;  %v9151_v36 = vld [vmem:[%s13781_s1 + $0xdc4] ss:$16 sps:$4 sm:$0xff]  }
  0xb8   :  { %6648 = vmatpush2.bf16.msra.mxu1 %v9080_v37  ;;  %6608 = vmatprep.subr.bf16.mxu0 %v9085_v38  ;;  %v9154_v37 = vld [vmem:[%s13781_s1 + $0xfc4] ss:$16 sps:$4 sm:$0xff]   ;;  %v9149_v38 = vld [vmem:[%s13781_s1 + $0xdc0] ss:$16 sps:$4 sm:$0xff]  }
  0xb9   :  { %6649 = vmatprep.subr.bf16.mxu1 %v9088_v32  ;;  %v9152_v32 = vld [vmem:[%s13781_s1 + $0xfc0] ss:$16 sps:$4 sm:$0xff]  }
  0xbb   :  { %6609 = vmatpush2.bf16.msra.mxu0 %v9083_v40  ;;  %v9157_v40 = vld [vmem:[%s13781_s1 + $0xda4] ss:$16 sps:$4 sm:$0xff]  }
  0xbc   :  { %6650 = vmatpush2.bf16.msra.mxu1 %v9086_v44  ;;  %6610 = vmatprep.subr.bf16.mxu0 %v9091_v45  ;;  %v9160_v44 = vld [vmem:[%s13781_s1 + $0xfa4] ss:$16 sps:$4 sm:$0xff]   ;;  %v9155_v45 = vld [vmem:[%s13781_s1 + $0xda0] ss:$16 sps:$4 sm:$0xff]  }
  0xbd   :  { %6651 = vmatprep.subr.bf16.mxu1 %v9094_v46  ;;  %v9158_v46 = vld [vmem:[%s13781_s1 + $0xfa0] ss:$16 sps:$4 sm:$0xff]  }
  0xbf   :  { %6611 = vmatpush2.bf16.msra.mxu0 %v9089_v48  ;;  %v9166_v48 = vld [vmem:[%s13781_s1 + $0xf84] ss:$16 sps:$4 sm:$0xff]  }
  0xc0   :  { %6652 = vmatpush2.bf16.msra.mxu1 %v9092_v51  ;;  %6662 = vmatprep.subr.bf16.mxu0 %v9097_v52  ;;  %v9161_v51 = vld [vmem:[%s13781_s1 + $0xd80] ss:$16 sps:$4 sm:$0xff]  }
  0xc1   :  { %6703 = vmatprep.subr.bf16.mxu1 %v9100_v53  ;;  %v9164_v52 = vld [vmem:[%s13781_s1 + $0xf80] ss:$16 sps:$4 sm:$0xff]   ;;  %v9169_v53 = vld [vmem:[%s13781_s1 + $0xd64] ss:$16 sps:$4 sm:$0xff]  }
  0xc2   :  { %6613 = vmatmul.mubr.bf16.vlgmr.msra.gmra.mxu0 %v11021_v50 }
  0xc3   :  { %6654 = vmatmul.mubr.bf16.vlgmr.msra.gmra.mxu1 %v11037_v35  ;;  %6663 = vmatpush1.bf16.msra.mxu0 %v9095_v55  ;;  %v9172_v55 = vld [vmem:[%s13781_s1 + $0xf64] ss:$16 sps:$4 sm:$0xff]  }
  0xc4   :  { %6704 = vmatpush1.bf16.msra.mxu1 %v9098_v56  ;;  %6664 = vmatprep.subr.bf16.mxu0 %v9103_v57  ;;  %v9167_v56 = vld [vmem:[%s13781_s1 + $0xd60] ss:$16 sps:$4 sm:$0xff]  }
  0xc5   :  { %6705 = vmatprep.subr.bf16.mxu1 %v9106_v58  ;;  %6694 = vmatprep.mubr.bf16.mxu0 %v11033_v54  ;;  %v9170_v57 = vld [vmem:[%s13781_s1 + $0xf60] ss:$16 sps:$4 sm:$0xff]   ;;  %v9175_v58 = vld [vmem:[%s13781_s1 + $0xd44] ss:$16 sps:$4 sm:$0xff]  }
  0xc6   :  { %6735 = vmatprep.mubr.bf16.mxu1 %v11053_v59 }
  0xc7   :  { %6665 = vmatpush1.bf16.msra.mxu0 %v9101_v61  ;;  %v9178_v61 = vld [vmem:[%s13781_s1 + $0xf44] ss:$16 sps:$4 sm:$0xff]  }
  0xc8   :  { %6706 = vmatpush1.bf16.msra.mxu1 %v9104_v62  ;;  %6666 = vmatprep.subr.bf16.mxu0 %v9109_v63  ;;  %v9173_v62 = vld [vmem:[%s13781_s1 + $0xd40] ss:$16 sps:$4 sm:$0xff]  }
  0xc9   :  { %6707 = vmatprep.subr.bf16.mxu1 %v9112_v1  ;;  %v9176_v63 = vld [vmem:[%s13781_s1 + $0xf40] ss:$16 sps:$4 sm:$0xff]  }
  0xca   :  { %v11212_v1 = vld [vmem:[%s13782_s0 + $0x10] sm:$0xff] }
  0xcb   :  { %6667 = vmatpush1.bf16.msra.mxu0 %v9107_v2  ;;  %v9181_v2 = vld [vmem:[%s13781_s1 + $0xd24] ss:$16 sps:$4 sm:$0xff]  }
  0xcc   :  { %6708 = vmatpush1.bf16.msra.mxu1 %v9110_v3  ;;  %6668 = vmatprep.subr.bf16.mxu0 %v9115_v4  ;;  %v9184_v3 = vld [vmem:[%s13781_s1 + $0xf24] ss:$16 sps:$4 sm:$0xff]   ;;  %v11222_v4 = vrot.slane %v11212_v1, %v10503_v49 }
  0xcd   :  { %6709 = vmatprep.subr.bf16.mxu1 %v9118_v5  ;;  %v9179_v5 = vld [vmem:[%s13781_s1 + $0xd20] ss:$16 sps:$4 sm:$0xff]  }
  0xcf   :  { %6669 = vmatpush1.bf16.msra.mxu0 %v9113_v7  ;;  %v9182_v7 = vld [vmem:[%s13781_s1 + $0xf20] ss:$16 sps:$4 sm:$0xff]  }
  0xd0   :  { %6710 = vmatpush1.bf16.msra.mxu1 %v9116_v8  ;;  %6670 = vmatprep.subr.bf16.mxu0 %v9121_v9  ;;  %v9187_v8 = vld [vmem:[%s13781_s1 + $0xd04] ss:$16 sps:$4 sm:$0xff]  }
  0xd1   :  { %6711 = vmatprep.subr.bf16.mxu1 %v9124_v10  ;;  %v9190_v9 = vld [vmem:[%s13781_s1 + $0xf04] ss:$16 sps:$4 sm:$0xff]   ;;  %v9185_v10 = vld [vmem:[%s13781_s1 + $0xd00] ss:$16 sps:$4 sm:$0xff]  }
  0xd3   :  { %6671 = vmatpush1.bf16.msra.mxu0 %v9119_v11  ;;  %v1181_v11 = vcombine.high %v11222_v4, %v11222_v4 }
  0xd4   :  { %6712 = vmatpush1.bf16.msra.mxu1 %v9122_v12  ;;  %6672 = vmatprep.subr.bf16.mxu0 %v9127_v14  ;;  %v9188_v12 = vld [vmem:[%s13781_s1 + $0xf00] ss:$16 sps:$4 sm:$0xff]  }
  0xd5   :  { %6713 = vmatprep.subr.bf16.mxu1 %v9130_v15  ;;  %v1042_v14 = vld [vmem:[%s13783_s2] sm:$0xf]  ;;  %v11249_v15 = vrot.slane %v11000_v39, %v10503_v49 }
  0xd7   :  { %6673 = vmatpush1.bf16.msra.mxu0 %v9125_v16  ;;  %v1046_v16 = vsub.s32 0, %v10485_v42  ;;  %v11264_v39 = vcombine.high %v11249_v15, %v11249_v15 }
  0xd8   :  { %6714 = vmatpush1.bf16.msra.mxu1 %v9128_v19  ;;  %6674 = vmatprep.subr.bf16.mxu0 %v9133_v20  ;;  %v9194_v19 = vld [vmem:[%s13781_s1 + $0x10e4] ss:$16 sps:$4 sm:$0xff]  }
  0xd9   :  { %6715 = vmatprep.subr.bf16.mxu1 %v9136_v21  ;;  %v9197_v20 = vld [vmem:[%s13781_s1 + $0x12e4] ss:$16 sps:$4 sm:$0xff]   ;;  %v1050_v21 = vsub.s32 1, %v10485_v42 }
  0xdb   :  { %6675 = vmatpush1.bf16.msra.mxu0 %v9131_v22  ;;  %v11260_v22 = vrot.slane %v1181_v11, %v10503_v49  ;;  %v9225_v11 = vld [vmem:[%s13781_s1 + $0x1240] ss:$16 sps:$4 sm:$0xff]  }
  0xdc   :  { %6716 = vmatpush1.bf16.msra.mxu1 %v9134_v24  ;;  %6676 = vmatprep.subr.bf16.mxu0 %v9139_v25  ;;  %v9192_v24 = vld [vmem:[%s13781_s1 + $0x10e0] ss:$16 sps:$4 sm:$0xff]  }
  0xdd   :  { %6717 = vmatprep.subr.bf16.mxu1 %v9142_v27  ;;  %v9195_v25 = vld [vmem:[%s13781_s1 + $0x12e0] ss:$16 sps:$4 sm:$0xff]   ;;  %v1047_v27 = vrot.slane %v1042_v14, %v1046_v16 }
  0xde   :  { %v9228_v16 = vld [vmem:[%s13781_s1 + $0x1020] ss:$16 sps:$4 sm:$0xff]  }
  0xdf   :  { %6677 = vmatpush1.bf16.msra.mxu0 %v9137_v28  ;;  %v9200_v28 = vld [vmem:[%s13781_s1 + $0x10c4] ss:$16 sps:$4 sm:$0xff]  }
  0xe0   :  { %6718 = vmatpush1.bf16.msra.mxu1 %v9140_v29  ;;  %6678 = vmatprep.subr.bf16.mxu0 %v9145_v30  ;;  %v9203_v29 = vld [vmem:[%s13781_s1 + $0x12c4] ss:$16 sps:$4 sm:$0xff]   ;;  %v1051_v30 = vrot.slane %v1042_v14, %v1050_v21 }
  0xe1   :  { %6719 = vmatprep.subr.bf16.mxu1 %v9148_v31  ;;  %v11280_v31 = vcombine.high %v11260_v22, %v11260_v22  ;;  %v9233_v14 = vld [vmem:[%s13781_s1 + $0x1224] ss:$16 sps:$4 sm:$0xff]  }
  0xe2   :  { %v9239_v21 = vld [vmem:[%s13781_s1 + $0x1204] ss:$16 sps:$4 sm:$0xff]  }
  0xe3   :  { %6679 = vmatpush2.bf16.msra.mxu0 %v9143_v33 }
  0xe4   :  { %6720 = vmatpush2.bf16.msra.mxu1 %v9146_v34  ;;  %6680 = vmatprep.subr.bf16.mxu0 %v9151_v36  ;;  %v9198_v36 = vld [vmem:[%s13781_s1 + $0x10c0] ss:$16 sps:$4 sm:$0xff]  }
  0xe5   :  { %6721 = vmatprep.subr.bf16.mxu1 %v9154_v37  ;;  %v9201_v37 = vld [vmem:[%s13781_s1 + $0x12c0] ss:$16 sps:$4 sm:$0xff]  }
  0xe7   :  { %6681 = vmatpush2.bf16.msra.mxu0 %v9149_v38 }
  0xe8   :  { %6722 = vmatpush2.bf16.msra.mxu1 %v9152_v32  ;;  %6682 = vmatprep.subr.bf16.mxu0 %v9157_v40 }
  0xe9   :  { %6723 = vmatprep.subr.bf16.mxu1 %v9160_v44  ;;  %v9206_v44 = vld [vmem:[%s13781_s1 + $0x10a4] ss:$16 sps:$4 sm:$0xff]  }
  0xeb   :  { %6683 = vmatpush2.bf16.msra.mxu0 %v9155_v45  ;;  %v9209_v45 = vld [vmem:[%s13781_s1 + $0x12a4] ss:$16 sps:$4 sm:$0xff]  }
  0xec   :  { %6724 = vmatpush2.bf16.msra.mxu1 %v9158_v46  ;;  %6684 = vmatprep.subr.bf16.mxu0 %v9163_v47 }
  0xed   :  { %6725 = vmatprep.subr.bf16.mxu1 %v9166_v48  ;;  %v9204_v48 = vld [vmem:[%s13781_s1 + $0x10a0] ss:$16 sps:$4 sm:$0xff]  }
  0xef   :  { %6685 = vmatpush2.bf16.msra.mxu0 %v9161_v51  ;;  %v9207_v51 = vld [vmem:[%s13781_s1 + $0x12a0] ss:$16 sps:$4 sm:$0xff]  }
  0xf0   :  { %6726 = vmatpush2.bf16.msra.mxu1 %v9164_v52  ;;  %6686 = vmatprep.subr.bf16.mxu0 %v9169_v53 }
  0xf1   :  { %6727 = vmatprep.subr.bf16.mxu1 %v9172_v55 }
  0xf3   :  { %6687 = vmatpush2.bf16.msra.mxu0 %v9167_v56 }
  0xf4   :  { %6728 = vmatpush2.bf16.msra.mxu1 %v9170_v57  ;;  %6688 = vmatprep.subr.bf16.mxu0 %v9175_v58  ;;  %v9212_v58 = vld [vmem:[%s13781_s1 + $0x1084] ss:$16 sps:$4 sm:$0xff]  }
  0xf5   :  { %6729 = vmatprep.subr.bf16.mxu1 %v9178_v61  ;;  %v9215_v61 = vld [vmem:[%s13781_s1 + $0x1284] ss:$16 sps:$4 sm:$0xff]  }
  0xf7   :  { %6689 = vmatpush2.bf16.msra.mxu0 %v9173_v62  ;;  %v9210_v62 = vld [vmem:[%s13781_s1 + $0x1080] ss:$16 sps:$4 sm:$0xff]  }
  0xf8   :  { %6730 = vmatpush2.bf16.msra.mxu1 %v9176_v63  ;;  %6690 = vmatprep.subr.bf16.mxu0 %v9181_v2  ;;  %v9213_v63 = vld [vmem:[%s13781_s1 + $0x1280] ss:$16 sps:$4 sm:$0xff]   ;;  %v9218_v2 = vld [vmem:[%s13781_s1 + $0x1064] ss:$16 sps:$4 sm:$0xff]  }
  0xf9   :  { %6731 = vmatprep.subr.bf16.mxu1 %v9184_v3  ;;  %v9221_v3 = vld [vmem:[%s13781_s1 + $0x1264] ss:$16 sps:$4 sm:$0xff]  }
  0xfb   :  { %6691 = vmatpush2.bf16.msra.mxu0 %v9179_v5  ;;  %v9216_v5 = vld [vmem:[%s13781_s1 + $0x1060] ss:$16 sps:$4 sm:$0xff]  }
  0xfc   :  { %6732 = vmatpush2.bf16.msra.mxu1 %v9182_v7  ;;  %6692 = vmatprep.subr.bf16.mxu0 %v9187_v8  ;;  %v9219_v7 = vld [vmem:[%s13781_s1 + $0x1260] ss:$16 sps:$4 sm:$0xff]   ;;  %v9224_v8 = vld [vmem:[%s13781_s1 + $0x1044] ss:$16 sps:$4 sm:$0xff]  }
  0xfd   :  { %6733 = vmatprep.subr.bf16.mxu1 %v9190_v9  ;;  %v9227_v9 = vld [vmem:[%s13781_s1 + $0x1244] ss:$16 sps:$4 sm:$0xff]  }
  0xff   :  { %6693 = vmatpush2.bf16.msra.mxu0 %v9185_v10  ;;  %v9222_v10 = vld [vmem:[%s13781_s1 + $0x1040] ss:$16 sps:$4 sm:$0xff]  }
 0x100   :  { %6734 = vmatpush2.bf16.msra.mxu1 %v9188_v12  ;;  %6744 = vmatprep.subr.bf16.mxu0 %v9194_v19  ;;  %v9230_v12 = vld [vmem:[%s13781_s1 + $0x1024] ss:$16 sps:$4 sm:$0xff]   ;;  %v9231_v19 = vld [vmem:[%s13781_s1 + $0x1220] ss:$16 sps:$4 sm:$0xff]  }
 0x101   :  { %6785 = vmatprep.subr.bf16.mxu1 %v9197_v20  ;;  %v9236_v20 = vld [vmem:[%s13781_s1 + $0x1004] ss:$16 sps:$4 sm:$0xff]  }
 0x102   :  { %v6450_v33 = vpop.f32.mrf.mxu0  ;;  %6695 = vmatmul.mubr.bf16.vlgmr.msra.gmra.mxu0 %v11249_v15 }
 0x103   :  { %v6491_v34 = vpop.f32.mrf.mxu1  ;;  %6736 = vmatmul.mubr.bf16.vlgmr.msra.gmra.mxu1 %v11264_v39  ;;  %v6451_v38 = vadd.f32 %v6450_v33, %v1047_v27  ;;  %6745 = vmatpush1.bf16.msra.mxu0 %v9192_v24  ;;  %v9234_v24 = vld [vmem:[%s13781_s1 + $0x1000] ss:$16 sps:$4 sm:$0xff]   ;;  %v9242_v27 = vld [vmem:[%s13781_s1 + $0x11e4] ss:$16 sps:$4 sm:$0xff]  }
 0x104   :  { %6786 = vmatpush1.bf16.msra.mxu1 %v9195_v25  ;;  %v6452_v32 = vpop.f32.mrf.mxu0  ;;  %6746 = vmatprep.subr.bf16.mxu0 %v9200_v28  ;;  %v9237_v25 = vld [vmem:[%s13781_s1 + $0x1200] ss:$16 sps:$4 sm:$0xff]   ;;  %v9245_v28 = vld [vmem:[%s13781_s1 + $0x13e4] ss:$16 sps:$4 sm:$0xff]  }
 0x105   :  { %v6493_v40 = vpop.f32.mrf.mxu1  ;;  %6787 = vmatprep.subr.bf16.mxu1 %v9203_v29  ;;  %v11296_v46 = vadd.f32 %v6491_v34, %v6451_v38  ;;  %v6453_v47 = vadd.f32 %v6452_v32, %v1051_v30  ;;  %6776 = vmatprep.mubr.bf16.mxu0 %v11260_v22  ;;  %v9240_v29 = vld [vmem:[%s13781_s1 + $0x11e0] ss:$16 sps:$4 sm:$0xff]   ;;  %v9248_v33 = vld [vmem:[%s13781_s1 + $0x11c4] ss:$16 sps:$4 sm:$0xff]  }
 0x106   :  { %6817 = vmatprep.mubr.bf16.mxu1 %v11280_v31  ;;  %v6454_v52 = vpop.f32.mrf.mxu0  ;;  %v9243_v30 = vld [vmem:[%s13781_s1 + $0x13e0] ss:$16 sps:$4 sm:$0xff]   ;;  %v9251_v34 = vld [vmem:[%s13781_s1 + $0x13c4] ss:$16 sps:$4 sm:$0xff]  }
 0x107   :  { %v6495_v53 = vpop.f32.mrf.mxu1  ;;  %v11306_v55 = vadd.f32 %v6493_v40, %v6453_v47  ;;  %6747 = vmatpush1.bf16.msra.mxu0 %v9198_v36  ;;  %v9246_v36 = vld [vmem:[%s13781_s1 + $0x11c0] ss:$16 sps:$4 sm:$0xff]   ;;  %v9254_v38 = vld [vmem:[%s13781_s1 + $0x11a4] ss:$16 sps:$4 sm:$0xff]  }
 0x108   :  { %6788 = vmatpush1.bf16.msra.mxu1 %v9201_v37  ;;  %v6455_v56 = vpop.f32.mrf.mxu0  ;;  %6748 = vmatprep.subr.bf16.mxu0 %v9206_v44  ;;  %v9249_v37 = vld [vmem:[%s13781_s1 + $0x13c0] ss:$16 sps:$4 sm:$0xff]   ;;  %v9257_v32 = vld [vmem:[%s13781_s1 + $0x13a4] ss:$16 sps:$4 sm:$0xff]  }
 0x109   :  { %v6496_v57 = vpop.f32.mrf.mxu1  ;;  %6789 = vmatprep.subr.bf16.mxu1 %v9209_v45  ;;  %v9252_v40 = vld [vmem:[%s13781_s1 + $0x11a0] ss:$16 sps:$4 sm:$0xff]   ;;  %v9260_v45 = vld [vmem:[%s13781_s1 + $0x1184] ss:$16 sps:$4 sm:$0xff]  }
 0x10a   :  { %v9255_v44 = vld [vmem:[%s13781_s1 + $0x13a0] ss:$16 sps:$4 sm:$0xff]   ;;  %v9263_v47 = vld [vmem:[%s13781_s1 + $0x1384] ss:$16 sps:$4 sm:$0xff]  }
 0x10b   :  { %6749 = vmatpush1.bf16.msra.mxu0 %v9204_v48  ;;  %v9258_v48 = vld [vmem:[%s13781_s1 + $0x1180] ss:$16 sps:$4 sm:$0xff]   ;;  %v9266_v52 = vld [vmem:[%s13781_s1 + $0x1164] ss:$16 sps:$4 sm:$0xff]  }
 0x10c   :  { %6790 = vmatpush1.bf16.msra.mxu1 %v9207_v51  ;;  %6750 = vmatprep.subr.bf16.mxu0 %v9212_v58  ;;  %v9261_v51 = vld [vmem:[%s13781_s1 + $0x1380] ss:$16 sps:$4 sm:$0xff]   ;;  %v9269_v53 = vld [vmem:[%s13781_s1 + $0x1364] ss:$16 sps:$4 sm:$0xff]  }
 0x10d   :  { %6791 = vmatprep.subr.bf16.mxu1 %v9215_v61  ;;  %v9264_v56 = vld [vmem:[%s13781_s1 + $0x1160] ss:$16 sps:$4 sm:$0xff]   ;;  %v9272_v58 = vld [vmem:[%s13781_s1 + $0x1144] ss:$16 sps:$4 sm:$0xff]  }
 0x10e   :  { %v9267_v57 = vld [vmem:[%s13781_s1 + $0x1360] ss:$16 sps:$4 sm:$0xff]   ;;  %v9275_v61 = vld [vmem:[%s13781_s1 + $0x1344] ss:$16 sps:$4 sm:$0xff]  }
 0x10f   :  { %6751 = vmatpush1.bf16.msra.mxu0 %v9210_v62  ;;  %v1166_v62 = vcombine.high %v11212_v1, %v11212_v1  ;;  %v9281_v1 = vld [vmem:[%s13781_s1 + $0x1324] ss:$16 sps:$4 sm:$0xff]  }
 0x110   :  { %6792 = vmatpush1.bf16.msra.mxu1 %v9213_v63  ;;  %6752 = vmatprep.subr.bf16.mxu0 %v9218_v2  ;;  %v9270_v63 = vld [vmem:[%s13781_s1 + $0x1140] ss:$16 sps:$4 sm:$0xff]  }
 0x111   :  { %6793 = vmatprep.subr.bf16.mxu1 %v9221_v3  ;;  %v9273_v2 = vld [vmem:[%s13781_s1 + $0x1340] ss:$16 sps:$4 sm:$0xff]   ;;  %v9278_v3 = vld [vmem:[%s13781_s1 + $0x1124] ss:$16 sps:$4 sm:$0xff]  }
 0x113   :  { %6753 = vmatpush1.bf16.msra.mxu0 %v9216_v5  ;;  %v11449_v5 = vrot.slane %v1166_v62, %v10503_v49  ;;  %v9309_v62 = vld [vmem:[%s13781_s1 + $0x1680] ss:$16 sps:$4 sm:$0xff]  }
 0x114   :  { %6794 = vmatpush1.bf16.msra.mxu1 %v9219_v7  ;;  %6754 = vmatprep.subr.bf16.mxu0 %v9224_v8  ;;  %v9276_v7 = vld [vmem:[%s13781_s1 + $0x1120] ss:$16 sps:$4 sm:$0xff]  }
 0x115   :  { %6795 = vmatprep.subr.bf16.mxu1 %v9227_v9  ;;  %v9279_v8 = vld [vmem:[%s13781_s1 + $0x1320] ss:$16 sps:$4 sm:$0xff]   ;;  %v9284_v9 = vld [vmem:[%s13781_s1 + $0x1104] ss:$16 sps:$4 sm:$0xff]  }
 0x117   :  { %6755 = vmatpush1.bf16.msra.mxu0 %v9222_v10  ;;  %v9287_v10 = vld [vmem:[%s13781_s1 + $0x1304] ss:$16 sps:$4 sm:$0xff]  }
 0x118   :  { %6796 = vmatpush1.bf16.msra.mxu1 %v9225_v11  ;;  %6756 = vmatprep.subr.bf16.mxu0 %v9230_v12  ;;  %v1182_v11 = vcombine.high %v11449_v5, %v11449_v5  ;;  %v11467_v12 = vrot.slane %v11222_v4, %v10503_v49  ;;  %v9293_v4 = vld [vmem:[%s13781_s1 + $0x16e4] ss:$16 sps:$4 sm:$0xff]  }
 0x119   :  { %6797 = vmatprep.subr.bf16.mxu1 %v9233_v14  ;;  %v9282_v14 = vld [vmem:[%s13781_s1 + $0x1100] ss:$16 sps:$4 sm:$0xff]  }
 0x11b   :  { %6757 = vmatpush1.bf16.msra.mxu0 %v9228_v16  ;;  %v9285_v16 = vld [vmem:[%s13781_s1 + $0x1300] ss:$16 sps:$4 sm:$0xff]  }
 0x11c   :  { %6798 = vmatpush1.bf16.msra.mxu1 %v9231_v19  ;;  %6758 = vmatprep.subr.bf16.mxu0 %v9236_v20  ;;  %v9290_v19 = vld [vmem:[%s13781_s1 + $0x14e4] ss:$16 sps:$4 sm:$0xff]   ;;  %v9288_v20 = vld [vmem:[%s13781_s1 + $0x14e0] ss:$16 sps:$4 sm:$0xff]  }
 0x11d   :  { %6799 = vmatprep.subr.bf16.mxu1 %v9239_v21  ;;  %v9291_v21 = vld [vmem:[%s13781_s1 + $0x16e0] ss:$16 sps:$4 sm:$0xff]  }
 0x11f   :  { %6759 = vmatpush1.bf16.msra.mxu0 %v9234_v24  ;;  %v11488_v24 = vrot.slane %v1182_v11, %v10503_v49  ;;  %v9326_v11 = vld [vmem:[%s13781_s1 + $0x1424] ss:$16 sps:$4 sm:$0xff]  }
 0x120   :  { %6800 = vmatpush1.bf16.msra.mxu1 %v9237_v25  ;;  %6760 = vmatprep.subr.bf16.mxu0 %v9242_v27  ;;  %v11492_v25 = vcombine.high %v11467_v12, %v11467_v12  ;;  %v9296_v27 = vld [vmem:[%s13781_s1 + $0x14c4] ss:$16 sps:$4 sm:$0xff]  }
 0x121   :  { %6801 = vmatprep.subr.bf16.mxu1 %v9245_v28  ;;  %v9299_v28 = vld [vmem:[%s13781_s1 + $0x16c4] ss:$16 sps:$4 sm:$0xff]  }
 0x123   :  { %6761 = vmatpush2.bf16.msra.mxu0 %v9240_v29  ;;  %v9294_v29 = vld [vmem:[%s13781_s1 + $0x14c0] ss:$16 sps:$4 sm:$0xff]  }
 0x124   :  { %6802 = vmatpush2.bf16.msra.mxu1 %v9243_v30  ;;  %6762 = vmatprep.subr.bf16.mxu0 %v9248_v33  ;;  %v9297_v30 = vld [vmem:[%s13781_s1 + $0x16c0] ss:$16 sps:$4 sm:$0xff]   ;;  %v11508_v33 = vcombine.high %v11488_v24, %v11488_v24 }
 0x125   :  { %6803 = vmatprep.subr.bf16.mxu1 %v9251_v34 }
 0x127   :  { %6763 = vmatpush2.bf16.msra.mxu0 %v9246_v36 }
 0x128   :  { %6804 = vmatpush2.bf16.msra.mxu1 %v9249_v37  ;;  %6764 = vmatprep.subr.bf16.mxu0 %v9254_v38 }
 0x129   :  { %6805 = vmatprep.subr.bf16.mxu1 %v9257_v32 }
 0x12b   :  { %6765 = vmatpush2.bf16.msra.mxu0 %v9252_v40  ;;  %v9302_v40 = vld [vmem:[%s13781_s1 + $0x14a4] ss:$16 sps:$4 sm:$0xff]  }
 0x12c   :  { %6806 = vmatpush2.bf16.msra.mxu1 %v9255_v44  ;;  %6766 = vmatprep.subr.bf16.mxu0 %v9260_v45  ;;  %v9305_v44 = vld [vmem:[%s13781_s1 + $0x16a4] ss:$16 sps:$4 sm:$0xff]  }
 0x12d   :  { %6807 = vmatprep.subr.bf16.mxu1 %v9263_v47 }
 0x12f   :  { %6767 = vmatpush2.bf16.msra.mxu0 %v9258_v48  ;;  %v9303_v48 = vld [vmem:[%s13781_s1 + $0x16a0] ss:$16 sps:$4 sm:$0xff]  }
 0x130   :  { %6808 = vmatpush2.bf16.msra.mxu1 %v9261_v51  ;;  %6768 = vmatprep.subr.bf16.mxu0 %v9266_v52 }
 0x131   :  { %6809 = vmatprep.subr.bf16.mxu1 %v9269_v53 }
 0x133   :  { %6769 = vmatpush2.bf16.msra.mxu0 %v9264_v56 }
 0x134   :  { %6810 = vmatpush2.bf16.msra.mxu1 %v9267_v57  ;;  %6770 = vmatprep.subr.bf16.mxu0 %v9272_v58  ;;  %v9308_v57 = vld [vmem:[%s13781_s1 + $0x1484] ss:$16 sps:$4 sm:$0xff]  }
 0x135   :  { %6811 = vmatprep.subr.bf16.mxu1 %v9275_v61  ;;  %v9311_v58 = vld [vmem:[%s13781_s1 + $0x1684] ss:$16 sps:$4 sm:$0xff]   ;;  %v9306_v61 = vld [vmem:[%s13781_s1 + $0x1480] ss:$16 sps:$4 sm:$0xff]  }
 0x137   :  { %6771 = vmatpush2.bf16.msra.mxu0 %v9270_v63  ;;  %v9314_v63 = vld [vmem:[%s13781_s1 + $0x1464] ss:$16 sps:$4 sm:$0xff]  }
 0x138   :  { %6812 = vmatpush2.bf16.msra.mxu1 %v9273_v2  ;;  %6772 = vmatprep.subr.bf16.mxu0 %v9278_v3  ;;  %v9317_v2 = vld [vmem:[%s13781_s1 + $0x1664] ss:$16 sps:$4 sm:$0xff]   ;;  %v9312_v3 = vld [vmem:[%s13781_s1 + $0x1460] ss:$16 sps:$4 sm:$0xff]  }
 0x139   :  { %6813 = vmatprep.subr.bf16.mxu1 %v9281_v1  ;;  %v9315_v1 = vld [vmem:[%s13781_s1 + $0x1660] ss:$16 sps:$4 sm:$0xff]  }
 0x13b   :  { %6773 = vmatpush2.bf16.msra.mxu0 %v9276_v7  ;;  %v9320_v7 = vld [vmem:[%s13781_s1 + $0x1444] ss:$16 sps:$4 sm:$0xff]  }
 0x13c   :  { %6814 = vmatpush2.bf16.msra.mxu1 %v9279_v8  ;;  %6774 = vmatprep.subr.bf16.mxu0 %v9284_v9  ;;  %v9323_v8 = vld [vmem:[%s13781_s1 + $0x1644] ss:$16 sps:$4 sm:$0xff]   ;;  %v9318_v9 = vld [vmem:[%s13781_s1 + $0x1440] ss:$16 sps:$4 sm:$0xff]  }
 0x13d   :  { %6815 = vmatprep.subr.bf16.mxu1 %v9287_v10  ;;  %v9321_v10 = vld [vmem:[%s13781_s1 + $0x1640] ss:$16 sps:$4 sm:$0xff]  }
 0x13f   :  { %6775 = vmatpush2.bf16.msra.mxu0 %v9282_v14  ;;  %v9329_v14 = vld [vmem:[%s13781_s1 + $0x1624] ss:$16 sps:$4 sm:$0xff]  }
 0x140   :  { %6816 = vmatpush2.bf16.msra.mxu1 %v9285_v16  ;;  %6826 = vmatprep.subr.bf16.mxu0 %v9290_v19  ;;  %v9324_v16 = vld [vmem:[%s13781_s1 + $0x1420] ss:$16 sps:$4 sm:$0xff]  }
 0x141   :  { %6867 = vmatprep.subr.bf16.mxu1 %v9293_v4  ;;  %v9327_v19 = vld [vmem:[%s13781_s1 + $0x1620] ss:$16 sps:$4 sm:$0xff]   ;;  %v9332_v4 = vld [vmem:[%s13781_s1 + $0x1404] ss:$16 sps:$4 sm:$0xff]  }
 0x142   :  { %v6532_v34 = vpop.f32.mrf.mxu0  ;;  %6777 = vmatmul.mubr.bf16.vlgmr.msra.gmra.mxu0 %v11467_v12 }
 0x143   :  { %v6573_v36 = vpop.f32.mrf.mxu1  ;;  %6818 = vmatmul.mubr.bf16.vlgmr.msra.gmra.mxu1 %v11492_v25  ;;  %v6533_v37 = vadd.f32 %v6532_v34, %v11296_v46  ;;  %6827 = vmatpush1.bf16.msra.mxu0 %v9288_v20  ;;  %v9300_v46 = vld [vmem:[%s13781_s1 + $0x14a0] ss:$16 sps:$4 sm:$0xff]   ;;  %v9335_v20 = vld [vmem:[%s13781_s1 + $0x1604] ss:$16 sps:$4 sm:$0xff]  }
 0x144   :  { %6868 = vmatpush1.bf16.msra.mxu1 %v9291_v21  ;;  %v6534_v38 = vpop.f32.mrf.mxu0  ;;  %6828 = vmatprep.subr.bf16.mxu0 %v9296_v27  ;;  %v9330_v21 = vld [vmem:[%s13781_s1 + $0x1400] ss:$16 sps:$4 sm:$0xff]  }
 0x145   :  { %v6575_v32 = vpop.f32.mrf.mxu1  ;;  %6869 = vmatprep.subr.bf16.mxu1 %v9299_v28  ;;  %v11519_v45 = vadd.f32 %v6573_v36, %v6533_v37  ;;  %v6535_v47 = vadd.f32 %v6534_v38, %v11306_v55  ;;  %6858 = vmatprep.mubr.bf16.mxu0 %v11488_v24  ;;  %v9333_v27 = vld [vmem:[%s13781_s1 + $0x1600] ss:$16 sps:$4 sm:$0xff]   ;;  %v9338_v28 = vld [vmem:[%s13781_s1 + $0x15e4] ss:$16 sps:$4 sm:$0xff]  }
 0x146   :  { %6899 = vmatprep.mubr.bf16.mxu1 %v11508_v33  ;;  %v6536_v51 = vpop.f32.mrf.mxu0  ;;  %v9339_v34 = vld [vmem:[%s13781_s1 + $0x17e0] ss:$16 sps:$4 sm:$0xff]   ;;  %v9344_v36 = vld [vmem:[%s13781_s1 + $0x15c4] ss:$16 sps:$4 sm:$0xff]  }
 0x147   :  { %v6577_v52 = vpop.f32.mrf.mxu1  ;;  %v11530_v53 = vadd.f32 %v6575_v32, %v6535_v47  ;;  %6829 = vmatpush1.bf16.msra.mxu0 %v9294_v29  ;;  %v9341_v29 = vld [vmem:[%s13781_s1 + $0x17e4] ss:$16 sps:$4 sm:$0xff]   ;;  %v9342_v38 = vld [vmem:[%s13781_s1 + $0x15c0] ss:$16 sps:$4 sm:$0xff]  }
 0x148   :  { %6870 = vmatpush1.bf16.msra.mxu1 %v9297_v30  ;;  %v6537_v56 = vpop.f32.mrf.mxu0  ;;  %6830 = vmatprep.subr.bf16.mxu0 %v9302_v40  ;;  %v9336_v30 = vld [vmem:[%s13781_s1 + $0x15e0] ss:$16 sps:$4 sm:$0xff]   ;;  %v9347_v37 = vld [vmem:[%s13781_s1 + $0x17c4] ss:$16 sps:$4 sm:$0xff]  }
 0x149   :  { %v6578_v55 = vpop.f32.mrf.mxu1  ;;  %6871 = vmatprep.subr.bf16.mxu1 %v9305_v44  ;;  %v9345_v32 = vld [vmem:[%s13781_s1 + $0x17c0] ss:$16 sps:$4 sm:$0xff]   ;;  %v9350_v40 = vld [vmem:[%s13781_s1 + $0x15a4] ss:$16 sps:$4 sm:$0xff]  }
 0x14a   :  { %v9353_v44 = vld [vmem:[%s13781_s1 + $0x17a4] ss:$16 sps:$4 sm:$0xff]   ;;  %v9348_v47 = vld [vmem:[%s13781_s1 + $0x15a0] ss:$16 sps:$4 sm:$0xff]  }
 0x14b   :  { %6831 = vmatpush1.bf16.msra.mxu0 %v9300_v46  ;;  %v9351_v46 = vld [vmem:[%s13781_s1 + $0x17a0] ss:$16 sps:$4 sm:$0xff]   ;;  %v9359_v51 = vld [vmem:[%s13781_s1 + $0x1784] ss:$16 sps:$4 sm:$0xff]  }
 0x14c   :  { %6872 = vmatpush1.bf16.msra.mxu1 %v9303_v48  ;;  %6832 = vmatprep.subr.bf16.mxu0 %v9308_v57  ;;  %v9356_v48 = vld [vmem:[%s13781_s1 + $0x1584] ss:$16 sps:$4 sm:$0xff]   ;;  %v9354_v52 = vld [vmem:[%s13781_s1 + $0x1580] ss:$16 sps:$4 sm:$0xff]  }
 0x14d   :  { %6873 = vmatprep.subr.bf16.mxu1 %v9311_v58  ;;  %v9357_v56 = vld [vmem:[%s13781_s1 + $0x1780] ss:$16 sps:$4 sm:$0xff]   ;;  %v9362_v55 = vld [vmem:[%s13781_s1 + $0x1564] ss:$16 sps:$4 sm:$0xff]  }
 0x14e   :  { %v9365_v57 = vld [vmem:[%s13781_s1 + $0x1764] ss:$16 sps:$4 sm:$0xff]   ;;  %v9360_v58 = vld [vmem:[%s13781_s1 + $0x1560] ss:$16 sps:$4 sm:$0xff]  }
 0x14f   :  { %6833 = vmatpush1.bf16.msra.mxu0 %v9306_v61  ;;  %v9363_v61 = vld [vmem:[%s13781_s1 + $0x1760] ss:$16 sps:$4 sm:$0xff]  }
 0x150   :  { %6874 = vmatpush1.bf16.msra.mxu1 %v9309_v62  ;;  %6834 = vmatprep.subr.bf16.mxu0 %v9314_v63  ;;  %v9368_v62 = vld [vmem:[%s13781_s1 + $0x1544] ss:$16 sps:$4 sm:$0xff]  }
 0x151   :  { %6875 = vmatprep.subr.bf16.mxu1 %v9317_v2  ;;  %v9371_v63 = vld [vmem:[%s13781_s1 + $0x1744] ss:$16 sps:$4 sm:$0xff]   ;;  %v11661_v2 = vld [vmem:[%s13782_s0 + $0x18] sm:$0xff] }
 0x153   :  { %6835 = vmatpush1.bf16.msra.mxu0 %v9312_v3  ;;  %v9366_v3 = vld [vmem:[%s13781_s1 + $0x1540] ss:$16 sps:$4 sm:$0xff]  }
 0x154   :  { %6876 = vmatpush1.bf16.msra.mxu1 %v9315_v1  ;;  %6836 = vmatprep.subr.bf16.mxu0 %v9320_v7  ;;  %v9369_v1 = vld [vmem:[%s13781_s1 + $0x1740] ss:$16 sps:$4 sm:$0xff]   ;;  %v9374_v7 = vld [vmem:[%s13781_s1 + $0x1524] ss:$16 sps:$4 sm:$0xff]  }
 0x155   :  { %6877 = vmatprep.subr.bf16.mxu1 %v9323_v8  ;;  %v9377_v8 = vld [vmem:[%s13781_s1 + $0x1724] ss:$16 sps:$4 sm:$0xff]  }
 0x157   :  { %6837 = vmatpush1.bf16.msra.mxu0 %v9318_v9  ;;  %v11677_v9 = vrot.slane %v11661_v2, %v10503_v49 }
 0x158   :  { %6878 = vmatpush1.bf16.msra.mxu1 %v9321_v10  ;;  %6838 = vmatprep.subr.bf16.mxu0 %v9326_v11  ;;  %v9372_v10 = vld [vmem:[%s13781_s1 + $0x1520] ss:$16 sps:$4 sm:$0xff]  }
 0x159   :  { %6879 = vmatprep.subr.bf16.mxu1 %v9329_v14  ;;  %v9375_v11 = vld [vmem:[%s13781_s1 + $0x1720] ss:$16 sps:$4 sm:$0xff]   ;;  %v9380_v14 = vld [vmem:[%s13781_s1 + $0x1504] ss:$16 sps:$4 sm:$0xff]  }
 0x15b   :  { %6839 = vmatpush1.bf16.msra.mxu0 %v9324_v16  ;;  %v9383_v16 = vld [vmem:[%s13781_s1 + $0x1704] ss:$16 sps:$4 sm:$0xff]  }
 0x15c   :  { %6880 = vmatpush1.bf16.msra.mxu1 %v9327_v19  ;;  %6840 = vmatprep.subr.bf16.mxu0 %v9332_v4  ;;  %v1230_v19 = vcombine.high %v11677_v9, %v11677_v9  ;;  %v11695_v4 = vrot.slane %v11449_v5, %v10503_v49  ;;  %v9390_v5 = vld [vmem:[%s13781_s1 + $0x1ae4] ss:$16 sps:$4 sm:$0xff]  }
 0x15d   :  { %6881 = vmatprep.subr.bf16.mxu1 %v9335_v20  ;;  %v9378_v20 = vld [vmem:[%s13781_s1 + $0x1500] ss:$16 sps:$4 sm:$0xff]  }
 0x15f   :  { %6841 = vmatpush1.bf16.msra.mxu0 %v9330_v21  ;;  %v9381_v21 = vld [vmem:[%s13781_s1 + $0x1700] ss:$16 sps:$4 sm:$0xff]  }
 0x160   :  { %6882 = vmatpush1.bf16.msra.mxu1 %v9333_v27  ;;  %6842 = vmatprep.subr.bf16.mxu0 %v9338_v28  ;;  %v9387_v27 = vld [vmem:[%s13781_s1 + $0x18e4] ss:$16 sps:$4 sm:$0xff]   ;;  %v9385_v28 = vld [vmem:[%s13781_s1 + $0x18e0] ss:$16 sps:$4 sm:$0xff]  }
 0x161   :  { %6883 = vmatprep.subr.bf16.mxu1 %v9341_v29  ;;  %v9388_v29 = vld [vmem:[%s13781_s1 + $0x1ae0] ss:$16 sps:$4 sm:$0xff]  }
 0x163   :  { %6843 = vmatpush2.bf16.msra.mxu0 %v9336_v30  ;;  %v11716_v30 = vrot.slane %v1230_v19, %v10503_v49  ;;  %v9412_v19 = vld [vmem:[%s13781_s1 + $0x1a60] ss:$16 sps:$4 sm:$0xff]  }
 0x164   :  { %6884 = vmatpush2.bf16.msra.mxu1 %v9339_v34  ;;  %6844 = vmatprep.subr.bf16.mxu0 %v9344_v36  ;;  %v11720_v34 = vcombine.high %v11695_v4, %v11695_v4  ;;  %v9393_v36 = vld [vmem:[%s13781_s1 + $0x18c4] ss:$16 sps:$4 sm:$0xff]  }
 0x165   :  { %6885 = vmatprep.subr.bf16.mxu1 %v9347_v37  ;;  %v9396_v37 = vld [vmem:[%s13781_s1 + $0x1ac4] ss:$16 sps:$4 sm:$0xff]  }
 0x167   :  { %6845 = vmatpush2.bf16.msra.mxu0 %v9342_v38  ;;  %v9391_v38 = vld [vmem:[%s13781_s1 + $0x18c0] ss:$16 sps:$4 sm:$0xff]  }
 0x168   :  { %6886 = vmatpush2.bf16.msra.mxu1 %v9345_v32  ;;  %6846 = vmatprep.subr.bf16.mxu0 %v9350_v40  ;;  %v9394_v32 = vld [vmem:[%s13781_s1 + $0x1ac0] ss:$16 sps:$4 sm:$0xff]   ;;  %v11736_v40 = vcombine.high %v11716_v30, %v11716_v30 }
 0x169   :  { %6887 = vmatprep.subr.bf16.mxu1 %v9353_v44 }
 0x16b   :  { %6847 = vmatpush2.bf16.msra.mxu0 %v9348_v47 }
 0x16c   :  { %6888 = vmatpush2.bf16.msra.mxu1 %v9351_v46  ;;  %6848 = vmatprep.subr.bf16.mxu0 %v9356_v48 }
 0x16d   :  { %6889 = vmatprep.subr.bf16.mxu1 %v9359_v51 }
 0x16f   :  { %6849 = vmatpush2.bf16.msra.mxu0 %v9354_v52  ;;  %v9399_v52 = vld [vmem:[%s13781_s1 + $0x18a4] ss:$16 sps:$4 sm:$0xff]  }
 0x170   :  { %6890 = vmatpush2.bf16.msra.mxu1 %v9357_v56  ;;  %6850 = vmatprep.subr.bf16.mxu0 %v9362_v55  ;;  %v9402_v56 = vld [vmem:[%s13781_s1 + $0x1aa4] ss:$16 sps:$4 sm:$0xff]  }
 0x171   :  { %6891 = vmatprep.subr.bf16.mxu1 %v9365_v57 }
 0x173   :  { %6851 = vmatpush2.bf16.msra.mxu0 %v9360_v58  ;;  %v9400_v58 = vld [vmem:[%s13781_s1 + $0x1aa0] ss:$16 sps:$4 sm:$0xff]  }
 0x174   :  { %6892 = vmatpush2.bf16.msra.mxu1 %v9363_v61  ;;  %6852 = vmatprep.subr.bf16.mxu0 %v9368_v62 }
 0x175   :  { %6893 = vmatprep.subr.bf16.mxu1 %v9371_v63 }
 0x177   :  { %6853 = vmatpush2.bf16.msra.mxu0 %v9366_v3 }
 0x178   :  { %6894 = vmatpush2.bf16.msra.mxu1 %v9369_v1  ;;  %6854 = vmatprep.subr.bf16.mxu0 %v9374_v7  ;;  %v9405_v1 = vld [vmem:[%s13781_s1 + $0x1884] ss:$16 sps:$4 sm:$0xff]  }
 0x179   :  { %6895 = vmatprep.subr.bf16.mxu1 %v9377_v8  ;;  %v9408_v7 = vld [vmem:[%s13781_s1 + $0x1a84] ss:$16 sps:$4 sm:$0xff]   ;;  %v9403_v8 = vld [vmem:[%s13781_s1 + $0x1880] ss:$16 sps:$4 sm:$0xff]  }
 0x17b   :  { %6855 = vmatpush2.bf16.msra.mxu0 %v9372_v10  ;;  %v9406_v10 = vld [vmem:[%s13781_s1 + $0x1a80] ss:$16 sps:$4 sm:$0xff]  }
 0x17c   :  { %6896 = vmatpush2.bf16.msra.mxu1 %v9375_v11  ;;  %6856 = vmatprep.subr.bf16.mxu0 %v9380_v14  ;;  %v9411_v11 = vld [vmem:[%s13781_s1 + $0x1864] ss:$16 sps:$4 sm:$0xff]  }
 0x17d   :  { %6897 = vmatprep.subr.bf16.mxu1 %v9383_v16  ;;  %v9414_v14 = vld [vmem:[%s13781_s1 + $0x1a64] ss:$16 sps:$4 sm:$0xff]   ;;  %v9409_v16 = vld [vmem:[%s13781_s1 + $0x1860] ss:$16 sps:$4 sm:$0xff]  }
 0x17f   :  { %6857 = vmatpush2.bf16.msra.mxu0 %v9378_v20  ;;  %v9417_v20 = vld [vmem:[%s13781_s1 + $0x1844] ss:$16 sps:$4 sm:$0xff]  }
 0x180   :  { %6898 = vmatpush2.bf16.msra.mxu1 %v9381_v21  ;;  %6908 = vmatprep.subr.bf16.mxu0 %v9387_v27  ;;  %v9420_v21 = vld [vmem:[%s13781_s1 + $0x1a44] ss:$16 sps:$4 sm:$0xff]   ;;  %v9415_v27 = vld [vmem:[%s13781_s1 + $0x1840] ss:$16 sps:$4 sm:$0xff]  }
 0x181   :  { %6949 = vmatprep.subr.bf16.mxu1 %v9390_v5  ;;  %v9418_v5 = vld [vmem:[%s13781_s1 + $0x1a40] ss:$16 sps:$4 sm:$0xff]  }
 0x182   :  { %v6614_v44 = vpop.f32.mrf.mxu0  ;;  %6859 = vmatmul.mubr.bf16.vlgmr.msra.gmra.mxu0 %v11695_v4 }
 0x183   :  { %v6655_v47 = vpop.f32.mrf.mxu1  ;;  %6900 = vmatmul.mubr.bf16.vlgmr.msra.gmra.mxu1 %v11720_v34  ;;  %v6615_v46 = vadd.f32 %v6614_v44, %v11519_v45  ;;  %6909 = vmatpush1.bf16.msra.mxu0 %v9385_v28  ;;  %v9397_v45 = vld [vmem:[%s13781_s1 + $0x18a0] ss:$16 sps:$4 sm:$0xff]   ;;  %v9423_v28 = vld [vmem:[%s13781_s1 + $0x1824] ss:$16 sps:$4 sm:$0xff]  }
 0x184   :  { %6950 = vmatpush1.bf16.msra.mxu1 %v9388_v29  ;;  %v6616_v48 = vpop.f32.mrf.mxu0  ;;  %6910 = vmatprep.subr.bf16.mxu0 %v9393_v36  ;;  %v9426_v29 = vld [vmem:[%s13781_s1 + $0x1a24] ss:$16 sps:$4 sm:$0xff]   ;;  %v9421_v36 = vld [vmem:[%s13781_s1 + $0x1820] ss:$16 sps:$4 sm:$0xff]  }
 0x185   :  { %v6657_v51 = vpop.f32.mrf.mxu1  ;;  %6951 = vmatprep.subr.bf16.mxu1 %v9396_v37  ;;  %v11747_v55 = vadd.f32 %v6655_v47, %v6615_v46  ;;  %v6617_v57 = vadd.f32 %v6616_v48, %v11530_v53  ;;  %6940 = vmatprep.mubr.bf16.mxu0 %v11716_v30  ;;  %v9424_v37 = vld [vmem:[%s13781_s1 + $0x1a20] ss:$16 sps:$4 sm:$0xff]   ;;  %v9435_v46 = vld [vmem:[%s13781_s1 + $0x19e4] ss:$16 sps:$4 sm:$0xff]  }
 0x186   :  { %6981 = vmatprep.mubr.bf16.mxu1 %v11736_v40  ;;  %v6618_v61 = vpop.f32.mrf.mxu0  ;;  %v9427_v44 = vld [vmem:[%s13781_s1 + $0x1800] ss:$16 sps:$4 sm:$0xff]   ;;  %v9438_v48 = vld [vmem:[%s13781_s1 + $0x1be4] ss:$16 sps:$4 sm:$0xff]  }
 0x187   :  { %v6659_v62 = vpop.f32.mrf.mxu1  ;;  %v11758_v63 = vadd.f32 %v6657_v51, %v6617_v57  ;;  %6911 = vmatpush1.bf16.msra.mxu0 %v9391_v38  ;;  %v9429_v38 = vld [vmem:[%s13781_s1 + $0x1804] ss:$16 sps:$4 sm:$0xff]   ;;  %v9430_v47 = vld [vmem:[%s13781_s1 + $0x1a00] ss:$16 sps:$4 sm:$0xff]  }
 0x188   :  { %6952 = vmatpush1.bf16.msra.mxu1 %v9394_v32  ;;  %v6619_v3 = vpop.f32.mrf.mxu0  ;;  %6912 = vmatprep.subr.bf16.mxu0 %v9399_v52  ;;  %v9432_v32 = vld [vmem:[%s13781_s1 + $0x1a04] ss:$16 sps:$4 sm:$0xff]   ;;  %v9433_v51 = vld [vmem:[%s13781_s1 + $0x19e0] ss:$16 sps:$4 sm:$0xff]  }
 0x189   :  { %v6660_v53 = vpop.f32.mrf.mxu1  ;;  %6953 = vmatprep.subr.bf16.mxu1 %v9402_v56  ;;  %v9436_v52 = vld [vmem:[%s13781_s1 + $0x1be0] ss:$16 sps:$4 sm:$0xff]   ;;  %v9441_v56 = vld [vmem:[%s13781_s1 + $0x19c4] ss:$16 sps:$4 sm:$0xff]  }
 0x18a   :  { %v9444_v57 = vld [vmem:[%s13781_s1 + $0x1bc4] ss:$16 sps:$4 sm:$0xff]   ;;  %v9445_v3 = vld [vmem:[%s13781_s1 + $0x19a0] ss:$16 sps:$4 sm:$0xff]  }
 0x18b   :  { %6913 = vmatpush1.bf16.msra.mxu0 %v9397_v45  ;;  %v9439_v45 = vld [vmem:[%s13781_s1 + $0x19c0] ss:$16 sps:$4 sm:$0xff]   ;;  %v9447_v61 = vld [vmem:[%s13781_s1 + $0x19a4] ss:$16 sps:$4 sm:$0xff]  }
 0x18c   :  { %6954 = vmatpush1.bf16.msra.mxu1 %v9400_v58  ;;  %6914 = vmatprep.subr.bf16.mxu0 %v9405_v1  ;;  %v9442_v58 = vld [vmem:[%s13781_s1 + $0x1bc0] ss:$16 sps:$4 sm:$0xff]   ;;  %v9450_v62 = vld [vmem:[%s13781_s1 + $0x1ba4] ss:$16 sps:$4 sm:$0xff]  }
 0x18d   :  { %6955 = vmatprep.subr.bf16.mxu1 %v9408_v7  ;;  %v9448_v53 = vld [vmem:[%s13781_s1 + $0x1ba0] ss:$16 sps:$4 sm:$0xff]   ;;  %v9453_v1 = vld [vmem:[%s13781_s1 + $0x1984] ss:$16 sps:$4 sm:$0xff]  }
 0x18e   :  { %v9456_v7 = vld [vmem:[%s13781_s1 + $0x1b84] ss:$16 sps:$4 sm:$0xff]  }
 0x18f   :  { %6915 = vmatpush1.bf16.msra.mxu0 %v9403_v8  ;;  %v9451_v8 = vld [vmem:[%s13781_s1 + $0x1980] ss:$16 sps:$4 sm:$0xff]  }
 0x190   :  { %6956 = vmatpush1.bf16.msra.mxu1 %v9406_v10  ;;  %6916 = vmatprep.subr.bf16.mxu0 %v9411_v11  ;;  %v9454_v10 = vld [vmem:[%s13781_s1 + $0x1b80] ss:$16 sps:$4 sm:$0xff]   ;;  %v9459_v11 = vld [vmem:[%s13781_s1 + $0x1964] ss:$16 sps:$4 sm:$0xff]  }
 0x191   :  { %6957 = vmatprep.subr.bf16.mxu1 %v9414_v14  ;;  %v9462_v14 = vld [vmem:[%s13781_s1 + $0x1b64] ss:$16 sps:$4 sm:$0xff]  }
 0x193   :  { %6917 = vmatpush1.bf16.msra.mxu0 %v9409_v16  ;;  %v9457_v16 = vld [vmem:[%s13781_s1 + $0x1960] ss:$16 sps:$4 sm:$0xff]  }
 0x194   :  { %6958 = vmatpush1.bf16.msra.mxu1 %v9412_v19  ;;  %6918 = vmatprep.subr.bf16.mxu0 %v9417_v20  ;;  %v9460_v19 = vld [vmem:[%s13781_s1 + $0x1b60] ss:$16 sps:$4 sm:$0xff]   ;;  %v9465_v20 = vld [vmem:[%s13781_s1 + $0x1944] ss:$16 sps:$4 sm:$0xff]  }
 0x195   :  { %6959 = vmatprep.subr.bf16.mxu1 %v9420_v21  ;;  %v9468_v21 = vld [vmem:[%s13781_s1 + $0x1b44] ss:$16 sps:$4 sm:$0xff]  }
 0x197   :  { %6919 = vmatpush1.bf16.msra.mxu0 %v9415_v27  ;;  %v1215_v27 = vcombine.high %v11661_v2, %v11661_v2  ;;  %v9474_v2 = vld [vmem:[%s13781_s1 + $0x1b24] ss:$16 sps:$4 sm:$0xff]  }
 0x198   :  { %6960 = vmatpush1.bf16.msra.mxu1 %v9418_v5  ;;  %6920 = vmatprep.subr.bf16.mxu0 %v9423_v28  ;;  %v9463_v5 = vld [vmem:[%s13781_s1 + $0x1940] ss:$16 sps:$4 sm:$0xff]  }
 0x199   :  { %6961 = vmatprep.subr.bf16.mxu1 %v9426_v29  ;;  %v9466_v28 = vld [vmem:[%s13781_s1 + $0x1b40] ss:$16 sps:$4 sm:$0xff]   ;;  %v9471_v29 = vld [vmem:[%s13781_s1 + $0x1924] ss:$16 sps:$4 sm:$0xff]  }
 0x19b   :  { %6921 = vmatpush1.bf16.msra.mxu0 %v9421_v36  ;;  %v11901_v36 = vrot.slane %v1215_v27, %v10503_v49  ;;  %v9496_v27 = vld [vmem:[%s13781_s1 + $0x1ea0] ss:$16 sps:$4 sm:$0xff]  }
 0x19c   :  { %6962 = vmatpush1.bf16.msra.mxu1 %v9424_v37  ;;  %6922 = vmatprep.subr.bf16.mxu0 %v9429_v38  ;;  %v9469_v37 = vld [vmem:[%s13781_s1 + $0x1920] ss:$16 sps:$4 sm:$0xff]  }
 0x19d   :  { %6963 = vmatprep.subr.bf16.mxu1 %v9432_v32  ;;  %v9472_v38 = vld [vmem:[%s13781_s1 + $0x1b20] ss:$16 sps:$4 sm:$0xff]   ;;  %v9477_v32 = vld [vmem:[%s13781_s1 + $0x1904] ss:$16 sps:$4 sm:$0xff]  }
 0x19f   :  { %6923 = vmatpush1.bf16.msra.mxu0 %v9427_v44  ;;  %v9480_v44 = vld [vmem:[%s13781_s1 + $0x1b04] ss:$16 sps:$4 sm:$0xff]  }
 0x1a0   :  { %6964 = vmatpush1.bf16.msra.mxu1 %v9430_v47  ;;  %6924 = vmatprep.subr.bf16.mxu0 %v9435_v46  ;;  %v1231_v47 = vcombine.high %v11901_v36, %v11901_v36  ;;  %v11919_v46 = vrot.slane %v11677_v9, %v10503_v49  ;;  %v9486_v9 = vld [vmem:[%s13781_s1 + $0x1ee4] ss:$16 sps:$4 sm:$0xff]  }
 0x1a1   :  { %6965 = vmatprep.subr.bf16.mxu1 %v9438_v48  ;;  %v9475_v48 = vld [vmem:[%s13781_s1 + $0x1900] ss:$16 sps:$4 sm:$0xff]  }
 0x1a3   :  { %6925 = vmatpush2.bf16.msra.mxu0 %v9433_v51  ;;  %v9478_v51 = vld [vmem:[%s13781_s1 + $0x1b00] ss:$16 sps:$4 sm:$0xff]  }
 0x1a4   :  { %6966 = vmatpush2.bf16.msra.mxu1 %v9436_v52  ;;  %6926 = vmatprep.subr.bf16.mxu0 %v9441_v56  ;;  %v9483_v52 = vld [vmem:[%s13781_s1 + $0x1ce4] ss:$16 sps:$4 sm:$0xff]   ;;  %v9481_v56 = vld [vmem:[%s13781_s1 + $0x1ce0] ss:$16 sps:$4 sm:$0xff]  }
 0x1a5   :  { %6967 = vmatprep.subr.bf16.mxu1 %v9444_v57  ;;  %v9484_v57 = vld [vmem:[%s13781_s1 + $0x1ee0] ss:$16 sps:$4 sm:$0xff]  }
 0x1a7   :  { %6927 = vmatpush2.bf16.msra.mxu0 %v9439_v45  ;;  %v11940_v45 = vrot.slane %v1231_v47, %v10503_v49  ;;  %v9507_v47 = vld [vmem:[%s13781_s1 + $0x1c64] ss:$16 sps:$4 sm:$0xff]  }
 0x1a8   :  { %6968 = vmatpush2.bf16.msra.mxu1 %v9442_v58  ;;  %6928 = vmatprep.subr.bf16.mxu0 %v9447_v61  ;;  %v11944_v58 = vcombine.high %v11919_v46, %v11919_v46  ;;  %v9489_v61 = vld [vmem:[%s13781_s1 + $0x1cc4] ss:$16 sps:$4 sm:$0xff]  }
 0x1a9   :  { %6969 = vmatprep.subr.bf16.mxu1 %v9450_v62  ;;  %v9492_v62 = vld [vmem:[%s13781_s1 + $0x1ec4] ss:$16 sps:$4 sm:$0xff]  }
 0x1ab   :  { %6929 = vmatpush2.bf16.msra.mxu0 %v9445_v3  ;;  %v9487_v3 = vld [vmem:[%s13781_s1 + $0x1cc0] ss:$16 sps:$4 sm:$0xff]  }
 0x1ac   :  { %6970 = vmatpush2.bf16.msra.mxu1 %v9448_v53  ;;  %6930 = vmatprep.subr.bf16.mxu0 %v9453_v1  ;;  %v9490_v53 = vld [vmem:[%s13781_s1 + $0x1ec0] ss:$16 sps:$4 sm:$0xff]   ;;  %v11960_v1 = vcombine.high %v11940_v45, %v11940_v45 }
 0x1ad   :  { %6971 = vmatprep.subr.bf16.mxu1 %v9456_v7 }
 0x1af   :  { %6931 = vmatpush2.bf16.msra.mxu0 %v9451_v8 }
 0x1b0   :  { %6972 = vmatpush2.bf16.msra.mxu1 %v9454_v10  ;;  %6932 = vmatprep.subr.bf16.mxu0 %v9459_v11 }
 0x1b1   :  { %6973 = vmatprep.subr.bf16.mxu1 %v9462_v14 }
 0x1b3   :  { %6933 = vmatpush2.bf16.msra.mxu0 %v9457_v16  ;;  %v9495_v16 = vld [vmem:[%s13781_s1 + $0x1ca4] ss:$16 sps:$4 sm:$0xff]  }
 0x1b4   :  { %6974 = vmatpush2.bf16.msra.mxu1 %v9460_v19  ;;  %6934 = vmatprep.subr.bf16.mxu0 %v9465_v20  ;;  %v9498_v19 = vld [vmem:[%s13781_s1 + $0x1ea4] ss:$16 sps:$4 sm:$0xff]  }
 0x1b5   :  { %6975 = vmatprep.subr.bf16.mxu1 %v9468_v21 }
 0x1b7   :  { %6935 = vmatpush2.bf16.msra.mxu0 %v9463_v5 }
 0x1b8   :  { %6976 = vmatpush2.bf16.msra.mxu1 %v9466_v28  ;;  %6936 = vmatprep.subr.bf16.mxu0 %v9471_v29 }
 0x1b9   :  { %6977 = vmatprep.subr.bf16.mxu1 %v9474_v2 }
 0x1bb   :  { %6937 = vmatpush2.bf16.msra.mxu0 %v9469_v37  ;;  %v9501_v37 = vld [vmem:[%s13781_s1 + $0x1c84] ss:$16 sps:$4 sm:$0xff]  }
 0x1bc   :  { %6978 = vmatpush2.bf16.msra.mxu1 %v9472_v38  ;;  %6938 = vmatprep.subr.bf16.mxu0 %v9477_v32  ;;  %v9504_v38 = vld [vmem:[%s13781_s1 + $0x1e84] ss:$16 sps:$4 sm:$0xff]   ;;  %v9499_v32 = vld [vmem:[%s13781_s1 + $0x1c80] ss:$16 sps:$4 sm:$0xff]  }
 0x1bd   :  { %6979 = vmatprep.subr.bf16.mxu1 %v9480_v44  ;;  %v9502_v44 = vld [vmem:[%s13781_s1 + $0x1e80] ss:$16 sps:$4 sm:$0xff]  }
 0x1bf   :  { %6939 = vmatpush2.bf16.msra.mxu0 %v9475_v48  ;;  %v9510_v48 = vld [vmem:[%s13781_s1 + $0x1e64] ss:$16 sps:$4 sm:$0xff]  }
 0x1c0   :  { %6980 = vmatpush2.bf16.msra.mxu1 %v9478_v51  ;;  %6990 = vmatprep.subr.bf16.mxu0 %v9483_v52  ;;  %v9505_v51 = vld [vmem:[%s13781_s1 + $0x1c60] ss:$16 sps:$4 sm:$0xff]  }
 0x1c1   :  { %7031 = vmatprep.subr.bf16.mxu1 %v9486_v9  ;;  %v9508_v52 = vld [vmem:[%s13781_s1 + $0x1e60] ss:$16 sps:$4 sm:$0xff]   ;;  %v9513_v9 = vld [vmem:[%s13781_s1 + $0x1c44] ss:$16 sps:$4 sm:$0xff]  }
 0x1c2   :  { %v6696_v7 = vpop.f32.mrf.mxu0  ;;  %6941 = vmatmul.mubr.bf16.vlgmr.msra.gmra.mxu0 %v11919_v46 }
 0x1c3   :  { %v6737_v8 = vpop.f32.mrf.mxu1  ;;  %6982 = vmatmul.mubr.bf16.vlgmr.msra.gmra.mxu1 %v11944_v58  ;;  %v6697_v10 = vadd.f32 %v6696_v7, %v11747_v55  ;;  %6991 = vmatpush1.bf16.msra.mxu0 %v9481_v56  ;;  %v9493_v55 = vld [vmem:[%s13781_s1 + $0x1ca0] ss:$16 sps:$4 sm:$0xff]   ;;  %v9516_v56 = vld [vmem:[%s13781_s1 + $0x1e44] ss:$16 sps:$4 sm:$0xff]  }
 0x1c4   :  { %7032 = vmatpush1.bf16.msra.mxu1 %v9484_v57  ;;  %v6698_v11 = vpop.f32.mrf.mxu0  ;;  %6992 = vmatprep.subr.bf16.mxu0 %v9489_v61  ;;  %v9511_v57 = vld [vmem:[%s13781_s1 + $0x1c40] ss:$16 sps:$4 sm:$0xff]  }
 0x1c5   :  { %v6739_v14 = vpop.f32.mrf.mxu1  ;;  %7033 = vmatprep.subr.bf16.mxu1 %v9492_v62  ;;  %v11971_v20 = vadd.f32 %v6737_v8, %v6697_v10  ;;  %v6699_v21 = vadd.f32 %v6698_v11, %v11758_v63  ;;  %7022 = vmatprep.mubr.bf16.mxu0 %v11940_v45  ;;  %v9514_v61 = vld [vmem:[%s13781_s1 + $0x1e40] ss:$16 sps:$4 sm:$0xff]   ;;  %v9519_v62 = vld [vmem:[%s13781_s1 + $0x1c24] ss:$16 sps:$4 sm:$0xff]  }
 0x1c6   :  { %7063 = vmatprep.mubr.bf16.mxu1 %v11960_v1  ;;  %v6700_v5 = vpop.f32.mrf.mxu0  ;;  %v9520_v7 = vld [vmem:[%s13781_s1 + $0x1e20] ss:$16 sps:$4 sm:$0xff]   ;;  %v9525_v8 = vld [vmem:[%s13781_s1 + $0x1c04] ss:$16 sps:$4 sm:$0xff]  }
 0x1c7   :  { %v6741_v28 = vpop.f32.mrf.mxu1  ;;  %v11982_v29 = vadd.f32 %v6739_v14, %v6699_v21  ;;  %6993 = vmatpush1.bf16.msra.mxu0 %v9487_v3  ;;  %v9522_v3 = vld [vmem:[%s13781_s1 + $0x1e24] ss:$16 sps:$4 sm:$0xff]   ;;  %v9523_v11 = vld [vmem:[%s13781_s1 + $0x1c00] ss:$16 sps:$4 sm:$0xff]  }
 0x1c8   :  { %7034 = vmatpush1.bf16.msra.mxu1 %v9490_v53  ;;  %v6701_v2 = vpop.f32.mrf.mxu0  ;;  %6994 = vmatprep.subr.bf16.mxu0 %v9495_v16  ;;  %v9517_v53 = vld [vmem:[%s13781_s1 + $0x1c20] ss:$16 sps:$4 sm:$0xff]   ;;  %v9528_v10 = vld [vmem:[%s13781_s1 + $0x1e04] ss:$16 sps:$4 sm:$0xff]  }
 0x1c9   :  { %v6742_v63 = vpop.f32.mrf.mxu1  ;;  %7035 = vmatprep.subr.bf16.mxu1 %v9498_v19  ;;  %v9526_v14 = vld [vmem:[%s13781_s1 + $0x1e00] ss:$16 sps:$4 sm:$0xff]   ;;  %v9531_v16 = vld [vmem:[%s13781_s1 + $0x1de4] ss:$16 sps:$4 sm:$0xff]  }
 0x1ca   :  { %v9534_v19 = vld [vmem:[%s13781_s1 + $0x1fe4] ss:$16 sps:$4 sm:$0xff]   ;;  %v9529_v21 = vld [vmem:[%s13781_s1 + $0x1de0] ss:$16 sps:$4 sm:$0xff]  }
 0x1cb   :  { %6995 = vmatpush1.bf16.msra.mxu0 %v9493_v55  ;;  %v9532_v55 = vld [vmem:[%s13781_s1 + $0x1fe0] ss:$16 sps:$4 sm:$0xff]   ;;  %v9540_v5 = vld [vmem:[%s13781_s1 + $0x1fc4] ss:$16 sps:$4 sm:$0xff]  }
 0x1cc   :  { %7036 = vmatpush1.bf16.msra.mxu1 %v9496_v27  ;;  %6996 = vmatprep.subr.bf16.mxu0 %v9501_v37  ;;  %v9537_v27 = vld [vmem:[%s13781_s1 + $0x1dc4] ss:$16 sps:$4 sm:$0xff]   ;;  %v9535_v28 = vld [vmem:[%s13781_s1 + $0x1dc0] ss:$16 sps:$4 sm:$0xff]  }
 0x1cd   :  { %7037 = vmatprep.subr.bf16.mxu1 %v9504_v38  ;;  %v9538_v2 = vld [vmem:[%s13781_s1 + $0x1fc0] ss:$16 sps:$4 sm:$0xff]   ;;  %v9543_v63 = vld [vmem:[%s13781_s1 + $0x1da4] ss:$16 sps:$4 sm:$0xff]  }
 0x1ce   :  { %v9546_v37 = vld [vmem:[%s13781_s1 + $0x1fa4] ss:$16 sps:$4 sm:$0xff]   ;;  %v9541_v38 = vld [vmem:[%s13781_s1 + $0x1da0] ss:$16 sps:$4 sm:$0xff]  }
 0x1cf   :  { %6997 = vmatpush1.bf16.msra.mxu0 %v9499_v32  ;;  %v9544_v32 = vld [vmem:[%s13781_s1 + $0x1fa0] ss:$16 sps:$4 sm:$0xff]  }
 0x1d0   :  { %7038 = vmatpush1.bf16.msra.mxu1 %v9502_v44  ;;  %6998 = vmatprep.subr.bf16.mxu0 %v9507_v47  ;;  %v9549_v44 = vld [vmem:[%s13781_s1 + $0x1d84] ss:$16 sps:$4 sm:$0xff]  }
 0x1d1   :  { %7039 = vmatprep.subr.bf16.mxu1 %v9510_v48  ;;  %v9552_v47 = vld [vmem:[%s13781_s1 + $0x1f84] ss:$16 sps:$4 sm:$0xff]   ;;  %v9547_v48 = vld [vmem:[%s13781_s1 + $0x1d80] ss:$16 sps:$4 sm:$0xff]  }
 0x1d3   :  { %6999 = vmatpush1.bf16.msra.mxu0 %v9505_v51  ;;  %v9550_v51 = vld [vmem:[%s13781_s1 + $0x1f80] ss:$16 sps:$4 sm:$0xff]  }
 0x1d4   :  { %7040 = vmatpush1.bf16.msra.mxu1 %v9508_v52  ;;  %7000 = vmatprep.subr.bf16.mxu0 %v9513_v9  ;;  %v9555_v52 = vld [vmem:[%s13781_s1 + $0x1d64] ss:$16 sps:$4 sm:$0xff]  }
 0x1d5   :  { %7041 = vmatprep.subr.bf16.mxu1 %v9516_v56  ;;  %v9558_v9 = vld [vmem:[%s13781_s1 + $0x1f64] ss:$16 sps:$4 sm:$0xff]   ;;  %v9553_v56 = vld [vmem:[%s13781_s1 + $0x1d60] ss:$16 sps:$4 sm:$0xff]  }
 0x1d7   :  { %7001 = vmatpush1.bf16.msra.mxu0 %v9511_v57  ;;  %v9556_v57 = vld [vmem:[%s13781_s1 + $0x1f60] ss:$16 sps:$4 sm:$0xff]  }
 0x1d8   :  { %7042 = vmatpush1.bf16.msra.mxu1 %v9514_v61  ;;  %7002 = vmatprep.subr.bf16.mxu0 %v9519_v62  ;;  %v9561_v61 = vld [vmem:[%s13781_s1 + $0x1d44] ss:$16 sps:$4 sm:$0xff]  }
 0x1d9   :  { %7043 = vmatprep.subr.bf16.mxu1 %v9522_v3  ;;  %v9564_v62 = vld [vmem:[%s13781_s1 + $0x1f44] ss:$16 sps:$4 sm:$0xff]   ;;  %v9559_v3 = vld [vmem:[%s13781_s1 + $0x1d40] ss:$16 sps:$4 sm:$0xff]  }
 0x1db   :  { %7003 = vmatpush1.bf16.msra.mxu0 %v9517_v53  ;;  %v9562_v53 = vld [vmem:[%s13781_s1 + $0x1f40] ss:$16 sps:$4 sm:$0xff]  }
 0x1dc   :  { %7044 = vmatpush1.bf16.msra.mxu1 %v9520_v7  ;;  %7004 = vmatprep.subr.bf16.mxu0 %v9525_v8  ;;  %v9567_v7 = vld [vmem:[%s13781_s1 + $0x1d24] ss:$16 sps:$4 sm:$0xff]  }
 0x1dd   :  { %7045 = vmatprep.subr.bf16.mxu1 %v9528_v10  ;;  %v9570_v8 = vld [vmem:[%s13781_s1 + $0x1f24] ss:$16 sps:$4 sm:$0xff]   ;;  %v9565_v10 = vld [vmem:[%s13781_s1 + $0x1d20] ss:$16 sps:$4 sm:$0xff]  }
 0x1df   :  { %7005 = vmatpush1.bf16.msra.mxu0 %v9523_v11  ;;  %v9568_v11 = vld [vmem:[%s13781_s1 + $0x1f20] ss:$16 sps:$4 sm:$0xff]  }
 0x1e0   :  { %7046 = vmatpush1.bf16.msra.mxu1 %v9526_v14  ;;  %7006 = vmatprep.subr.bf16.mxu0 %v9531_v16  ;;  %v9573_v14 = vld [vmem:[%s13781_s1 + $0x1d04] ss:$16 sps:$4 sm:$0xff]  }
 0x1e1   :  { %7047 = vmatprep.subr.bf16.mxu1 %v9534_v19  ;;  %v9576_v16 = vld [vmem:[%s13781_s1 + $0x1f04] ss:$16 sps:$4 sm:$0xff]   ;;  %v12136_v19 = vrot.slane %v11901_v36, %v10503_v49  ;;  %v9583_v36 = vld [vmem:[%s13781_s1 + $0x2ec] ss:$16 sps:$4 sm:$0xff]  }
 0x1e3   :  { %7007 = vmatpush2.bf16.msra.mxu0 %v9529_v21  ;;  %v9571_v21 = vld [vmem:[%s13781_s1 + $0x1d00] ss:$16 sps:$4 sm:$0xff]  }
 0x1e4   :  { %7048 = vmatpush2.bf16.msra.mxu1 %v9532_v55  ;;  %7008 = vmatprep.subr.bf16.mxu0 %v9537_v27  ;;  %v9574_v55 = vld [vmem:[%s13781_s1 + $0x1f00] ss:$16 sps:$4 sm:$0xff]   ;;  %v9580_v27 = vld [vmem:[%s13781_s1 + $0xec] ss:$16 sps:$4 sm:$0xff]  }
 0x1e5   :  { %7049 = vmatprep.subr.bf16.mxu1 %v9540_v5  ;;  %v9578_v5 = vld [vmem:[%s13781_s1 + $0xe8] ss:$16 sps:$4 sm:$0xff]  }
 0x1e7   :  { %7009 = vmatpush2.bf16.msra.mxu0 %v9535_v28  ;;  %v9581_v28 = vld [vmem:[%s13781_s1 + $0x2e8] ss:$16 sps:$4 sm:$0xff]  }
 0x1e8   :  { %7050 = vmatpush2.bf16.msra.mxu1 %v9538_v2  ;;  %7010 = vmatprep.subr.bf16.mxu0 %v9543_v63  ;;  %v12158_v2 = vcombine.high %v12136_v19, %v12136_v19  ;;  %v9586_v63 = vld [vmem:[%s13781_s1 + $0xcc] ss:$16 sps:$4 sm:$0xff]  }
 0x1e9   :  { %7051 = vmatprep.subr.bf16.mxu1 %v9546_v37  ;;  %v9589_v37 = vld [vmem:[%s13781_s1 + $0x2cc] ss:$16 sps:$4 sm:$0xff]  }
 0x1eb   :  { %7011 = vmatpush2.bf16.msra.mxu0 %v9541_v38  ;;  %v9584_v38 = vld [vmem:[%s13781_s1 + $0xc8] ss:$16 sps:$4 sm:$0xff]  }
 0x1ec   :  { %7052 = vmatpush2.bf16.msra.mxu1 %v9544_v32  ;;  %7012 = vmatprep.subr.bf16.mxu0 %v9549_v44  ;;  %v9587_v32 = vld [vmem:[%s13781_s1 + $0x2c8] ss:$16 sps:$4 sm:$0xff]  }
 0x1ed   :  { %7053 = vmatprep.subr.bf16.mxu1 %v9552_v47 }
 0x1ef   :  { %7013 = vmatpush2.bf16.msra.mxu0 %v9547_v48 }
 0x1f0   :  { %7054 = vmatpush2.bf16.msra.mxu1 %v9550_v51  ;;  %7014 = vmatprep.subr.bf16.mxu0 %v9555_v52 }
 0x1f1   :  { %7055 = vmatprep.subr.bf16.mxu1 %v9558_v9  ;;  %v9592_v9 = vld [vmem:[%s13781_s1 + $0xac] ss:$16 sps:$4 sm:$0xff]  }
 0x1f3   :  { %7015 = vmatpush2.bf16.msra.mxu0 %v9553_v56  ;;  %v9595_v56 = vld [vmem:[%s13781_s1 + $0x2ac] ss:$16 sps:$4 sm:$0xff]  }
 0x1f4   :  { %7056 = vmatpush2.bf16.msra.mxu1 %v9556_v57  ;;  %7016 = vmatprep.subr.bf16.mxu0 %v9561_v61 }
 0x1f5   :  { %7057 = vmatprep.subr.bf16.mxu1 %v9564_v62  ;;  %v9593_v62 = vld [vmem:[%s13781_s1 + $0x2a8] ss:$16 sps:$4 sm:$0xff]  }
 0x1f7   :  { %7017 = vmatpush2.bf16.msra.mxu0 %v9559_v3 }
 0x1f8   :  { %7058 = vmatpush2.bf16.msra.mxu1 %v9562_v53  ;;  %7018 = vmatprep.subr.bf16.mxu0 %v9567_v7 }
 0x1f9   :  { %7059 = vmatprep.subr.bf16.mxu1 %v9570_v8 }
 0x1fb   :  { %7019 = vmatpush2.bf16.msra.mxu0 %v9565_v10  ;;  %v9598_v10 = vld [vmem:[%s13781_s1 + $0x8c] ss:$16 sps:$4 sm:$0xff]  }
 0x1fc   :  { %7060 = vmatpush2.bf16.msra.mxu1 %v9568_v11  ;;  %7020 = vmatprep.subr.bf16.mxu0 %v9573_v14  ;;  %v9599_v11 = vld [vmem:[%s13781_s1 + $0x288] ss:$16 sps:$4 sm:$0xff]   ;;  %v9604_v14 = vld [vmem:[%s13781_s1 + $0x6c] ss:$16 sps:$4 sm:$0xff]  }
 0x1fd   :  { %7061 = vmatprep.subr.bf16.mxu1 %v9576_v16  ;;  %v9607_v16 = vld [vmem:[%s13781_s1 + $0x26c] ss:$16 sps:$4 sm:$0xff]  }
 0x1ff   :  { %7021 = vmatpush2.bf16.msra.mxu0 %v9571_v21  ;;  %v9602_v21 = vld [vmem:[%s13781_s1 + $0x68] ss:$16 sps:$4 sm:$0xff]  }
 0x200   :  { %7062 = vmatpush2.bf16.msra.mxu1 %v9574_v55  ;;  %7072 = vmatprep.subr.bf16.mxu0 %v9580_v27  ;;  %v9605_v55 = vld [vmem:[%s13781_s1 + $0x268] ss:$16 sps:$4 sm:$0xff]   ;;  %v9610_v27 = vld [vmem:[%s13781_s1 + $0x4c] ss:$16 sps:$4 sm:$0xff]  }
 0x201   :  { %7113 = vmatprep.subr.bf16.mxu1 %v9583_v36  ;;  %v9613_v36 = vld [vmem:[%s13781_s1 + $0x24c] ss:$16 sps:$4 sm:$0xff]  }
 0x202   :  { %v6778_v44 = vpop.f32.mrf.mxu0  ;;  %7023 = vmatmul.mubr.bf16.vlgmr.msra.gmra.mxu0 %v12136_v19 }
 0x203   :  { %v6819_v47 = vpop.f32.mrf.mxu1  ;;  %7064 = vmatmul.mubr.bf16.vlgmr.msra.gmra.mxu1 %v12158_v2  ;;  %v6779_v48 = vadd.f32 %v6778_v44, %v11971_v20  ;;  %7073 = vmatpush1.bf16.msra.mxu0 %v9578_v5  ;;  %v9590_v20 = vld [vmem:[%s13781_s1 + $0xa8] ss:$16 sps:$4 sm:$0xff]   ;;  %v9622_v44 = vld [vmem:[%s13781_s1 + $0xc] ss:$16 sps:$4 sm:$0xff]  }
 0x204   :  { %7114 = vmatpush1.bf16.msra.mxu1 %v9581_v28  ;;  %v6780_v51 = vpop.f32.mrf.mxu0  ;;  %7074 = vmatprep.subr.bf16.mxu0 %v9586_v63  ;;  %v9608_v5 = vld [vmem:[%s13781_s1 + $0x48] ss:$16 sps:$4 sm:$0xff]   ;;  %v9616_v63 = vld [vmem:[%s13781_s1 + $0x2c] ss:$16 sps:$4 sm:$0xff]  }
 0x205   :  { %v6821_v52 = vpop.f32.mrf.mxu1  ;;  %7115 = vmatprep.subr.bf16.mxu1 %v9589_v37  ;;  %v12181_v57 = vadd.f32 %v6819_v47, %v6779_v48  ;;  %v6781_v61 = vadd.f32 %v6780_v51, %v11982_v29  ;;  %7104 = vmatprep.mubr.bf16.mxu0 %v10531_v60  ;;  %v9601_v60 = vld [vmem:[%s13781_s1 + $0x28c] ss:$16 sps:$4 sm:$0xff]   ;;  %v9611_v28 = vld [vmem:[%s13781_s1 + $0x248] ss:$16 sps:$4 sm:$0xff]  }
 0x206   :  { %7145 = vmatprep.mubr.bf16.mxu1 %v10544_v0  ;;  %v6782_v3 = vpop.f32.mrf.mxu0  ;;  %v9596_v0 = vld [vmem:[%s13781_s1 + $0x88] ss:$16 sps:$4 sm:$0xff]   ;;  %v9619_v37 = vld [vmem:[%s13781_s1 + $0x22c] ss:$16 sps:$4 sm:$0xff]  }
 0x207   :  { %v6823_v53 = vpop.f32.mrf.mxu1  ;;  %v12192_v7 = vadd.f32 %v6821_v52, %v6781_v61  ;;  %7075 = vmatpush1.bf16.msra.mxu0 %v9584_v38  ;;  %v9614_v38 = vld [vmem:[%s13781_s1 + $0x28] ss:$16 sps:$4 sm:$0xff]   ;;  %v9625_v47 = vld [vmem:[%s13781_s1 + $0x20c] ss:$16 sps:$4 sm:$0xff]  }
 0x208   :  { %7116 = vmatpush1.bf16.msra.mxu1 %v9587_v32  ;;  %v6783_v8 = vpop.f32.mrf.mxu0  ;;  %7076 = vmatprep.subr.bf16.mxu0 %v9592_v9  ;;  %v9617_v32 = vld [vmem:[%s13781_s1 + $0x228] ss:$16 sps:$4 sm:$0xff]   ;;  %v9628_v52 = vld [vmem:[%s13781_s1 + $0x1ec] ss:$16 sps:$4 sm:$0xff]  }
 0x209   :  { %v6824_v29 = vpop.f32.mrf.mxu1  ;;  %7117 = vmatprep.subr.bf16.mxu1 %v9595_v56  ;;  %v9620_v48 = vld [vmem:[%s13781_s1 + $0x8] ss:$16 sps:$4 sm:$0xff]   ;;  %v9631_v9 = vld [vmem:[%s13781_s1 + $0x3ec] ss:$16 sps:$4 sm:$0xff]  }
 0x20a   :  { %v9623_v51 = vld [vmem:[%s13781_s1 + $0x208] ss:$16 sps:$4 sm:$0xff]   ;;  %v9640_v8 = vld [vmem:[%s13781_s1 + $0x1ac] ss:$16 sps:$4 sm:$0xff]  }
 0x20b   :  { %7077 = vmatpush1.bf16.msra.mxu0 %v9590_v20  ;;  %v9626_v56 = vld [vmem:[%s13781_s1 + $0x1e8] ss:$16 sps:$4 sm:$0xff]   ;;  %v9634_v20 = vld [vmem:[%s13781_s1 + $0x1cc] ss:$16 sps:$4 sm:$0xff]  }
 0x20c   :  { %7118 = vmatpush1.bf16.msra.mxu1 %v9593_v62  ;;  %7078 = vmatprep.subr.bf16.mxu0 %v9598_v10  ;;  %v9629_v61 = vld [vmem:[%s13781_s1 + $0x3e8] ss:$16 sps:$4 sm:$0xff]   ;;  %v9637_v62 = vld [vmem:[%s13781_s1 + $0x3cc] ss:$16 sps:$4 sm:$0xff]  }
 0x20d   :  { %7119 = vmatprep.subr.bf16.mxu1 %v9601_v60  ;;  %v9632_v3 = vld [vmem:[%s13781_s1 + $0x1c8] ss:$16 sps:$4 sm:$0xff]   ;;  %v9643_v29 = vld [vmem:[%s13781_s1 + $0x3ac] ss:$16 sps:$4 sm:$0xff]  }
 0x20e   :  { %v9635_v53 = vld [vmem:[%s13781_s1 + $0x3c8] ss:$16 sps:$4 sm:$0xff]  }
 0x20f   :  { %7079 = vmatpush1.bf16.msra.mxu0 %v9596_v0  ;;  %v9638_v10 = vld [vmem:[%s13781_s1 + $0x1a8] ss:$16 sps:$4 sm:$0xff]   ;;  %v9646_v0 = vld [vmem:[%s13781_s1 + $0x18c] ss:$16 sps:$4 sm:$0xff]  }
 0x210   :  { %7120 = vmatpush1.bf16.msra.mxu1 %v9599_v11  ;;  %7080 = vmatprep.subr.bf16.mxu0 %v9604_v14  ;;  %v9641_v60 = vld [vmem:[%s13781_s1 + $0x3a8] ss:$16 sps:$4 sm:$0xff]   ;;  %v9649_v11 = vld [vmem:[%s13781_s1 + $0x38c] ss:$16 sps:$4 sm:$0xff]  }
 0x211   :  { %7121 = vmatprep.subr.bf16.mxu1 %v9607_v16  ;;  %v9644_v14 = vld [vmem:[%s13781_s1 + $0x188] ss:$16 sps:$4 sm:$0xff]  }
 0x212   :  { %v9647_v16 = vld [vmem:[%s13781_s1 + $0x388] ss:$16 sps:$4 sm:$0xff]  }
 0x213   :  { %7081 = vmatpush1.bf16.msra.mxu0 %v9602_v21  ;;  %v9652_v21 = vld [vmem:[%s13781_s1 + $0x16c] ss:$16 sps:$4 sm:$0xff]  }
 0x214   :  { %7122 = vmatpush1.bf16.msra.mxu1 %v9605_v55  ;;  %7082 = vmatprep.subr.bf16.mxu0 %v9610_v27  ;;  %v9655_v55 = vld [vmem:[%s13781_s1 + $0x36c] ss:$16 sps:$4 sm:$0xff]   ;;  %v9650_v27 = vld [vmem:[%s13781_s1 + $0x168] ss:$16 sps:$4 sm:$0xff]  }
 0x215   :  { %7123 = vmatprep.subr.bf16.mxu1 %v9613_v36  ;;  %v9653_v36 = vld [vmem:[%s13781_s1 + $0x368] ss:$16 sps:$4 sm:$0xff]  }
 0x217   :  { %7083 = vmatpush1.bf16.msra.mxu0 %v9608_v5  ;;  %v9658_v5 = vld [vmem:[%s13781_s1 + $0x14c] ss:$16 sps:$4 sm:$0xff]  }
 0x218   :  { %7124 = vmatpush1.bf16.msra.mxu1 %v9611_v28  ;;  %7084 = vmatprep.subr.bf16.mxu0 %v9616_v63  ;;  %v9661_v28 = vld [vmem:[%s13781_s1 + $0x34c] ss:$16 sps:$4 sm:$0xff]   ;;  %v9656_v63 = vld [vmem:[%s13781_s1 + $0x148] ss:$16 sps:$4 sm:$0xff]  }
 0x219   :  { %7125 = vmatprep.subr.bf16.mxu1 %v9619_v37  ;;  %v9659_v37 = vld [vmem:[%s13781_s1 + $0x348] ss:$16 sps:$4 sm:$0xff]  }
 0x21b   :  { %7085 = vmatpush1.bf16.msra.mxu0 %v9614_v38  ;;  %v9664_v38 = vld [vmem:[%s13781_s1 + $0x12c] ss:$16 sps:$4 sm:$0xff]  }
 0x21c   :  { %7126 = vmatpush1.bf16.msra.mxu1 %v9617_v32  ;;  %7086 = vmatprep.subr.bf16.mxu0 %v9622_v44  ;;  %v9667_v32 = vld [vmem:[%s13781_s1 + $0x32c] ss:$16 sps:$4 sm:$0xff]   ;;  %v9662_v44 = vld [vmem:[%s13781_s1 + $0x128] ss:$16 sps:$4 sm:$0xff]  }
 0x21d   :  { %7127 = vmatprep.subr.bf16.mxu1 %v9625_v47  ;;  %v9665_v47 = vld [vmem:[%s13781_s1 + $0x328] ss:$16 sps:$4 sm:$0xff]  }
 0x21f   :  { %7087 = vmatpush1.bf16.msra.mxu0 %v9620_v48  ;;  %v9670_v48 = vld [vmem:[%s13781_s1 + $0x10c] ss:$16 sps:$4 sm:$0xff]  }
 0x220   :  { %7128 = vmatpush1.bf16.msra.mxu1 %v9623_v51  ;;  %7088 = vmatprep.subr.bf16.mxu0 %v9628_v52  ;;  %v9673_v51 = vld [vmem:[%s13781_s1 + $0x30c] ss:$16 sps:$4 sm:$0xff]   ;;  %v9668_v52 = vld [vmem:[%s13781_s1 + $0x108] ss:$16 sps:$4 sm:$0xff]  }
 0x221   :  { %7129 = vmatprep.subr.bf16.mxu1 %v9631_v9  ;;  %v9671_v9 = vld [vmem:[%s13781_s1 + $0x308] ss:$16 sps:$4 sm:$0xff]  }
 0x223   :  { %7089 = vmatpush2.bf16.msra.mxu0 %v9626_v56  ;;  %v9676_v56 = vld [vmem:[%s13781_s1 + $0x4ec] ss:$16 sps:$4 sm:$0xff]  }
 0x224   :  { %7130 = vmatpush2.bf16.msra.mxu1 %v9629_v61  ;;  %7090 = vmatprep.subr.bf16.mxu0 %v9634_v20  ;;  %v9679_v61 = vld [vmem:[%s13781_s1 + $0x6ec] ss:$16 sps:$4 sm:$0xff]   ;;  %v9674_v20 = vld [vmem:[%s13781_s1 + $0x4e8] ss:$16 sps:$4 sm:$0xff]  }
 0x225   :  { %7131 = vmatprep.subr.bf16.mxu1 %v9637_v62  ;;  %v9677_v62 = vld [vmem:[%s13781_s1 + $0x6e8] ss:$16 sps:$4 sm:$0xff]  }
 0x227   :  { %7091 = vmatpush2.bf16.msra.mxu0 %v9632_v3  ;;  %v9682_v3 = vld [vmem:[%s13781_s1 + $0x4cc] ss:$16 sps:$4 sm:$0xff]  }
 0x228   :  { %7132 = vmatpush2.bf16.msra.mxu1 %v9635_v53  ;;  %7092 = vmatprep.subr.bf16.mxu0 %v9640_v8  ;;  %v9685_v53 = vld [vmem:[%s13781_s1 + $0x6cc] ss:$16 sps:$4 sm:$0xff]  }
 0x229   :  { %7133 = vmatprep.subr.bf16.mxu1 %v9643_v29 }
 0x22b   :  { %7093 = vmatpush2.bf16.msra.mxu0 %v9638_v10 }
 0x22c   :  { %7134 = vmatpush2.bf16.msra.mxu1 %v9641_v60  ;;  %7094 = vmatprep.subr.bf16.mxu0 %v9646_v0  ;;  %v9680_v60 = vld [vmem:[%s13781_s1 + $0x4c8] ss:$16 sps:$4 sm:$0xff]  }
 0x22d   :  { %7135 = vmatprep.subr.bf16.mxu1 %v9649_v11  ;;  %v9683_v0 = vld [vmem:[%s13781_s1 + $0x6c8] ss:$16 sps:$4 sm:$0xff]  }
 0x22f   :  { %7095 = vmatpush2.bf16.msra.mxu0 %v9644_v14 }
 0x230   :  { %7136 = vmatpush2.bf16.msra.mxu1 %v9647_v16  ;;  %7096 = vmatprep.subr.bf16.mxu0 %v9652_v21 }
 0x231   :  { %7137 = vmatprep.subr.bf16.mxu1 %v9655_v55 }
 0x233   :  { %7097 = vmatpush2.bf16.msra.mxu0 %v9650_v27 }
 0x234   :  { %7138 = vmatpush2.bf16.msra.mxu1 %v9653_v36  ;;  %7098 = vmatprep.subr.bf16.mxu0 %v9658_v5  ;;  %v9686_v36 = vld [vmem:[%s13781_s1 + $0x4a8] ss:$16 sps:$4 sm:$0xff]  }
 0x235   :  { %7139 = vmatprep.subr.bf16.mxu1 %v9661_v28  ;;  %v9689_v5 = vld [vmem:[%s13781_s1 + $0x6a8] ss:$16 sps:$4 sm:$0xff]  }
 0x237   :  { %7099 = vmatpush2.bf16.msra.mxu0 %v9656_v63  ;;  %v9692_v63 = vld [vmem:[%s13781_s1 + $0x488] ss:$16 sps:$4 sm:$0xff]  }
 0x238   :  { %7140 = vmatpush2.bf16.msra.mxu1 %v9659_v37  ;;  %7100 = vmatprep.subr.bf16.mxu0 %v9664_v38  ;;  %v9695_v37 = vld [vmem:[%s13781_s1 + $0x688] ss:$16 sps:$4 sm:$0xff]   ;;  %v9700_v38 = vld [vmem:[%s13781_s1 + $0x46c] ss:$16 sps:$4 sm:$0xff]  }
 0x239   :  { %7141 = vmatprep.subr.bf16.mxu1 %v9667_v32  ;;  %v9703_v32 = vld [vmem:[%s13781_s1 + $0x66c] ss:$16 sps:$4 sm:$0xff]  }
 0x23b   :  { %7101 = vmatpush2.bf16.msra.mxu0 %v9662_v44  ;;  %v9698_v44 = vld [vmem:[%s13781_s1 + $0x468] ss:$16 sps:$4 sm:$0xff]  }
 0x23c   :  { %7142 = vmatpush2.bf16.msra.mxu1 %v9665_v47  ;;  %7102 = vmatprep.subr.bf16.mxu0 %v9670_v48  ;;  %v9701_v47 = vld [vmem:[%s13781_s1 + $0x668] ss:$16 sps:$4 sm:$0xff]   ;;  %v9706_v48 = vld [vmem:[%s13781_s1 + $0x44c] ss:$16 sps:$4 sm:$0xff]  }
 0x23d   :  { %7143 = vmatprep.subr.bf16.mxu1 %v9673_v51  ;;  %v9709_v51 = vld [vmem:[%s13781_s1 + $0x64c] ss:$16 sps:$4 sm:$0xff]  }
 0x23f   :  { %7103 = vmatpush2.bf16.msra.mxu0 %v9668_v52  ;;  %v9704_v52 = vld [vmem:[%s13781_s1 + $0x448] ss:$16 sps:$4 sm:$0xff]  }
 0x240   :  { %7144 = vmatpush2.bf16.msra.mxu1 %v9671_v9  ;;  %7154 = vmatprep.subr.bf16.mxu0 %v9676_v56  ;;  %v9707_v9 = vld [vmem:[%s13781_s1 + $0x648] ss:$16 sps:$4 sm:$0xff]   ;;  %v9712_v56 = vld [vmem:[%s13781_s1 + $0x42c] ss:$16 sps:$4 sm:$0xff]  }
 0x241   :  { %7195 = vmatprep.subr.bf16.mxu1 %v9679_v61  ;;  %v9715_v61 = vld [vmem:[%s13781_s1 + $0x62c] ss:$16 sps:$4 sm:$0xff]  }
 0x242   :  { %v6860_v8 = vpop.f32.mrf.mxu0  ;;  %7105 = vmatmul.mubr.bf16.vlgmr.msra.gmra.mxu0 %v10581_v13  ;;  %v9688_v13 = vld [vmem:[%s13781_s1 + $0x4ac] ss:$16 sps:$4 sm:$0xff]  }
 0x243   :  { %v6901_v29 = vpop.f32.mrf.mxu1  ;;  %7146 = vmatmul.mubr.bf16.vlgmr.msra.gmra.mxu1 %v10597_v18  ;;  %v6861_v10 = vadd.f32 %v6860_v8, %v12181_v57  ;;  %7155 = vmatpush1.bf16.msra.mxu0 %v9674_v20  ;;  %v9691_v18 = vld [vmem:[%s13781_s1 + $0x6ac] ss:$16 sps:$4 sm:$0xff]   ;;  %v9710_v20 = vld [vmem:[%s13781_s1 + $0x428] ss:$16 sps:$4 sm:$0xff]  }
 0x244   :  { %7196 = vmatpush1.bf16.msra.mxu1 %v9677_v62  ;;  %v6862_v11 = vpop.f32.mrf.mxu0  ;;  %7156 = vmatprep.subr.bf16.mxu0 %v9682_v3  ;;  %v9713_v62 = vld [vmem:[%s13781_s1 + $0x628] ss:$16 sps:$4 sm:$0xff]   ;;  %v9718_v3 = vld [vmem:[%s13781_s1 + $0x40c] ss:$16 sps:$4 sm:$0xff]  }
 0x245   :  { %v6903_v14 = vpop.f32.mrf.mxu1  ;;  %7197 = vmatprep.subr.bf16.mxu1 %v9685_v53  ;;  %v12383_v57 = vadd.f32 %v6901_v29, %v6861_v10  ;;  %v6863_v16 = vadd.f32 %v6862_v11, %v12192_v7  ;;  %7186 = vmatprep.mubr.bf16.mxu0 %v10593_v17  ;;  %v9694_v17 = vld [vmem:[%s13781_s1 + $0x48c] ss:$16 sps:$4 sm:$0xff]   ;;  %v9716_v8 = vld [vmem:[%s13781_s1 + $0x408] ss:$16 sps:$4 sm:$0xff]  }
 0x246   :  { %7227 = vmatprep.mubr.bf16.mxu1 %v10613_v23  ;;  %v6864_v21 = vpop.f32.mrf.mxu0  ;;  %v9697_v23 = vld [vmem:[%s13781_s1 + $0x68c] ss:$16 sps:$4 sm:$0xff]   ;;  %v9719_v29 = vld [vmem:[%s13781_s1 + $0x608] ss:$16 sps:$4 sm:$0xff]  }
 0x247   :  { %v6905_v55 = vpop.f32.mrf.mxu1  ;;  %v12388_v27 = vadd.f32 %v6903_v14, %v6863_v16  ;;  %7157 = vmatpush1.bf16.msra.mxu0 %v9680_v60  ;;  %v9721_v53 = vld [vmem:[%s13781_s1 + $0x60c] ss:$16 sps:$4 sm:$0xff]   ;;  %v9725_v11 = vld [vmem:[%s13781_s1 + $0x7e8] ss:$16 sps:$4 sm:$0xff]  }
 0x248   :  { %7198 = vmatpush1.bf16.msra.mxu1 %v9683_v0  ;;  %v6865_v28 = vpop.f32.mrf.mxu0  ;;  %7158 = vmatprep.subr.bf16.mxu0 %v9688_v13  ;;  %v9724_v10 = vld [vmem:[%s13781_s1 + $0x5ec] ss:$16 sps:$4 sm:$0xff]   ;;  %v9722_v0 = vld [vmem:[%s13781_s1 + $0x5e8] ss:$16 sps:$4 sm:$0xff]  }
 0x249   :  { %v6906_v7 = vpop.f32.mrf.mxu1  ;;  %7199 = vmatprep.subr.bf16.mxu1 %v9691_v18  ;;  %v9727_v60 = vld [vmem:[%s13781_s1 + $0x7ec] ss:$16 sps:$4 sm:$0xff]   ;;  %v9728_v18 = vld [vmem:[%s13781_s1 + $0x5c8] ss:$16 sps:$4 sm:$0xff]  }
 0x24a   :  { %v9730_v14 = vld [vmem:[%s13781_s1 + $0x5cc] ss:$16 sps:$4 sm:$0xff]   ;;  %v9731_v16 = vld [vmem:[%s13781_s1 + $0x7c8] ss:$16 sps:$4 sm:$0xff]  }
 0x24b   :  { %7159 = vmatpush1.bf16.msra.mxu0 %v9686_v36  ;;  %v9733_v13 = vld [vmem:[%s13781_s1 + $0x7cc] ss:$16 sps:$4 sm:$0xff]   ;;  %v9734_v36 = vld [vmem:[%s13781_s1 + $0x5a8] ss:$16 sps:$4 sm:$0xff]  }
 0x24c   :  { %7200 = vmatpush1.bf16.msra.mxu1 %v9689_v5  ;;  %7160 = vmatprep.subr.bf16.mxu0 %v9694_v17  ;;  %v9736_v21 = vld [vmem:[%s13781_s1 + $0x5ac] ss:$16 sps:$4 sm:$0xff]   ;;  %v9737_v5 = vld [vmem:[%s13781_s1 + $0x7a8] ss:$16 sps:$4 sm:$0xff]  }
 0x24d   :  { %7201 = vmatprep.subr.bf16.mxu1 %v9697_v23  ;;  %v9739_v55 = vld [vmem:[%s13781_s1 + $0x7ac] ss:$16 sps:$4 sm:$0xff]   ;;  %v9740_v17 = vld [vmem:[%s13781_s1 + $0x588] ss:$16 sps:$4 sm:$0xff]  }
 0x24e   :  { %v9742_v28 = vld [vmem:[%s13781_s1 + $0x58c] ss:$16 sps:$4 sm:$0xff]   ;;  %v9743_v23 = vld [vmem:[%s13781_s1 + $0x788] ss:$16 sps:$4 sm:$0xff]  }
 0x24f   :  { %7161 = vmatpush1.bf16.msra.mxu0 %v9692_v63  ;;  %v9745_v7 = vld [vmem:[%s13781_s1 + $0x78c] ss:$16 sps:$4 sm:$0xff]  }
 0x250   :  { %7202 = vmatpush1.bf16.msra.mxu1 %v9695_v37  ;;  %7162 = vmatprep.subr.bf16.mxu0 %v9700_v38  ;;  %v9748_v63 = vld [vmem:[%s13781_s1 + $0x56c] ss:$16 sps:$4 sm:$0xff]   ;;  %v9746_v38 = vld [vmem:[%s13781_s1 + $0x568] ss:$16 sps:$4 sm:$0xff]  }
 0x251   :  { %7203 = vmatprep.subr.bf16.mxu1 %v9703_v32  ;;  %v9751_v37 = vld [vmem:[%s13781_s1 + $0x76c] ss:$16 sps:$4 sm:$0xff]   ;;  %v9749_v32 = vld [vmem:[%s13781_s1 + $0x768] ss:$16 sps:$4 sm:$0xff]  }
 0x253   :  { %7163 = vmatpush1.bf16.msra.mxu0 %v9698_v44  ;;  %v9754_v44 = vld [vmem:[%s13781_s1 + $0x54c] ss:$16 sps:$4 sm:$0xff]  }
 0x254   :  { %7204 = vmatpush1.bf16.msra.mxu1 %v9701_v47  ;;  %7164 = vmatprep.subr.bf16.mxu0 %v9706_v48  ;;  %v9757_v47 = vld [vmem:[%s13781_s1 + $0x74c] ss:$16 sps:$4 sm:$0xff]   ;;  %v9752_v48 = vld [vmem:[%s13781_s1 + $0x548] ss:$16 sps:$4 sm:$0xff]  }
 0x255   :  { %7205 = vmatprep.subr.bf16.mxu1 %v9709_v51  ;;  %v9755_v51 = vld [vmem:[%s13781_s1 + $0x748] ss:$16 sps:$4 sm:$0xff]  }
 0x257   :  { %7165 = vmatpush1.bf16.msra.mxu0 %v9704_v52  ;;  %v9760_v52 = vld [vmem:[%s13781_s1 + $0x52c] ss:$16 sps:$4 sm:$0xff]  }
 0x258   :  { %7206 = vmatpush1.bf16.msra.mxu1 %v9707_v9  ;;  %7166 = vmatprep.subr.bf16.mxu0 %v9712_v56  ;;  %v9763_v9 = vld [vmem:[%s13781_s1 + $0x72c] ss:$16 sps:$4 sm:$0xff]   ;;  %v9758_v56 = vld [vmem:[%s13781_s1 + $0x528] ss:$16 sps:$4 sm:$0xff]  }
 0x259   :  { %7207 = vmatprep.subr.bf16.mxu1 %v9715_v61  ;;  %v9761_v61 = vld [vmem:[%s13781_s1 + $0x728] ss:$16 sps:$4 sm:$0xff]  }
 0x25b   :  { %7167 = vmatpush1.bf16.msra.mxu0 %v9710_v20  ;;  %v9766_v20 = vld [vmem:[%s13781_s1 + $0x50c] ss:$16 sps:$4 sm:$0xff]  }
 0x25c   :  { %7208 = vmatpush1.bf16.msra.mxu1 %v9713_v62  ;;  %7168 = vmatprep.subr.bf16.mxu0 %v9718_v3  ;;  %v9769_v62 = vld [vmem:[%s13781_s1 + $0x70c] ss:$16 sps:$4 sm:$0xff]   ;;  %v9764_v3 = vld [vmem:[%s13781_s1 + $0x508] ss:$16 sps:$4 sm:$0xff]  }
 0x25d   :  { %7209 = vmatprep.subr.bf16.mxu1 %v9721_v53  ;;  %v9767_v53 = vld [vmem:[%s13781_s1 + $0x708] ss:$16 sps:$4 sm:$0xff]  }
 0x25f   :  { %7169 = vmatpush1.bf16.msra.mxu0 %v9716_v8  ;;  %v9772_v8 = vld [vmem:[%s13781_s1 + $0x8ec] ss:$16 sps:$4 sm:$0xff]  }
 0x260   :  { %7210 = vmatpush1.bf16.msra.mxu1 %v9719_v29  ;;  %7170 = vmatprep.subr.bf16.mxu0 %v9724_v10  ;;  %v9775_v29 = vld [vmem:[%s13781_s1 + $0xaec] ss:$16 sps:$4 sm:$0xff]   ;;  %v9770_v10 = vld [vmem:[%s13781_s1 + $0x8e8] ss:$16 sps:$4 sm:$0xff]  }
 0x261   :  { %7211 = vmatprep.subr.bf16.mxu1 %v9727_v60  ;;  %v9773_v60 = vld [vmem:[%s13781_s1 + $0xae8] ss:$16 sps:$4 sm:$0xff]  }
 0x263   :  { %7171 = vmatpush2.bf16.msra.mxu0 %v9722_v0  ;;  %v9778_v0 = vld [vmem:[%s13781_s1 + $0x8cc] ss:$16 sps:$4 sm:$0xff]  }
 0x264   :  { %7212 = vmatpush2.bf16.msra.mxu1 %v9725_v11  ;;  %7172 = vmatprep.subr.bf16.mxu0 %v9730_v14  ;;  %v9781_v11 = vld [vmem:[%s13781_s1 + $0xacc] ss:$16 sps:$4 sm:$0xff]  }
 0x265   :  { %7213 = vmatprep.subr.bf16.mxu1 %v9733_v13 }
 0x267   :  { %7173 = vmatpush2.bf16.msra.mxu0 %v9728_v18 }
 0x268   :  { %7214 = vmatpush2.bf16.msra.mxu1 %v9731_v16  ;;  %7174 = vmatprep.subr.bf16.mxu0 %v9736_v21  ;;  %v9776_v16 = vld [vmem:[%s13781_s1 + $0x8c8] ss:$16 sps:$4 sm:$0xff]  }
 0x269   :  { %7215 = vmatprep.subr.bf16.mxu1 %v9739_v55  ;;  %v9779_v21 = vld [vmem:[%s13781_s1 + $0xac8] ss:$16 sps:$4 sm:$0xff]  }
 0x26b   :  { %7175 = vmatpush2.bf16.msra.mxu0 %v9734_v36 }
 0x26c   :  { %7216 = vmatpush2.bf16.msra.mxu1 %v9737_v5  ;;  %7176 = vmatprep.subr.bf16.mxu0 %v9742_v28 }
 0x26d   :  { %7217 = vmatprep.subr.bf16.mxu1 %v9745_v7 }
 0x26f   :  { %7177 = vmatpush2.bf16.msra.mxu0 %v9740_v17 }
 0x270   :  { %7218 = vmatpush2.bf16.msra.mxu1 %v9743_v23  ;;  %7178 = vmatprep.subr.bf16.mxu0 %v9748_v63  ;;  %v9782_v23 = vld [vmem:[%s13781_s1 + $0x8a8] ss:$16 sps:$4 sm:$0xff]  }
 0x271   :  { %7219 = vmatprep.subr.bf16.mxu1 %v9751_v37  ;;  %v9785_v63 = vld [vmem:[%s13781_s1 + $0xaa8] ss:$16 sps:$4 sm:$0xff]  }
 0x273   :  { %7179 = vmatpush2.bf16.msra.mxu0 %v9746_v38  ;;  %v9788_v38 = vld [vmem:[%s13781_s1 + $0x888] ss:$16 sps:$4 sm:$0xff]  }
 0x274   :  { %7220 = vmatpush2.bf16.msra.mxu1 %v9749_v32  ;;  %7180 = vmatprep.subr.bf16.mxu0 %v9754_v44  ;;  %v9791_v32 = vld [vmem:[%s13781_s1 + $0xa88] ss:$16 sps:$4 sm:$0xff]   ;;  %v9796_v44 = vld [vmem:[%s13781_s1 + $0x86c] ss:$16 sps:$4 sm:$0xff]  }
 0x275   :  { %7221 = vmatprep.subr.bf16.mxu1 %v9757_v47  ;;  %v9799_v47 = vld [vmem:[%s13781_s1 + $0xa6c] ss:$16 sps:$4 sm:$0xff]  }
 0x277   :  { %7181 = vmatpush2.bf16.msra.mxu0 %v9752_v48  ;;  %v9794_v48 = vld [vmem:[%s13781_s1 + $0x868] ss:$16 sps:$4 sm:$0xff]  }
 0x278   :  { %7222 = vmatpush2.bf16.msra.mxu1 %v9755_v51  ;;  %7182 = vmatprep.subr.bf16.mxu0 %v9760_v52  ;;  %v9797_v51 = vld [vmem:[%s13781_s1 + $0xa68] ss:$16 sps:$4 sm:$0xff]   ;;  %v9802_v52 = vld [vmem:[%s13781_s1 + $0x84c] ss:$16 sps:$4 sm:$0xff]  }
 0x279   :  { %7223 = vmatprep.subr.bf16.mxu1 %v9763_v9  ;;  %v9805_v9 = vld [vmem:[%s13781_s1 + $0xa4c] ss:$16 sps:$4 sm:$0xff]  }
 0x27b   :  { %7183 = vmatpush2.bf16.msra.mxu0 %v9758_v56  ;;  %v9800_v56 = vld [vmem:[%s13781_s1 + $0x848] ss:$16 sps:$4 sm:$0xff]  }
 0x27c   :  { %7224 = vmatpush2.bf16.msra.mxu1 %v9761_v61  ;;  %7184 = vmatprep.subr.bf16.mxu0 %v9766_v20  ;;  %v9803_v61 = vld [vmem:[%s13781_s1 + $0xa48] ss:$16 sps:$4 sm:$0xff]   ;;  %v9808_v20 = vld [vmem:[%s13781_s1 + $0x82c] ss:$16 sps:$4 sm:$0xff]  }
 0x27d   :  { %7225 = vmatprep.subr.bf16.mxu1 %v9769_v62  ;;  %v9811_v62 = vld [vmem:[%s13781_s1 + $0xa2c] ss:$16 sps:$4 sm:$0xff]  }
 0x27f   :  { %7185 = vmatpush2.bf16.msra.mxu0 %v9764_v3  ;;  %v9806_v3 = vld [vmem:[%s13781_s1 + $0x828] ss:$16 sps:$4 sm:$0xff]  }
 0x280   :  { %7226 = vmatpush2.bf16.msra.mxu1 %v9767_v53  ;;  %7236 = vmatprep.subr.bf16.mxu0 %v9772_v8  ;;  %v9809_v53 = vld [vmem:[%s13781_s1 + $0xa28] ss:$16 sps:$4 sm:$0xff]   ;;  %v9814_v8 = vld [vmem:[%s13781_s1 + $0x80c] ss:$16 sps:$4 sm:$0xff]  }
 0x281   :  { %7277 = vmatprep.subr.bf16.mxu1 %v9775_v29  ;;  %v9817_v29 = vld [vmem:[%s13781_s1 + $0xa0c] ss:$16 sps:$4 sm:$0xff]  }
 0x282   :  { %v6942_v14 = vpop.f32.mrf.mxu0  ;;  %7187 = vmatmul.mubr.bf16.vlgmr.msra.gmra.mxu0 %v10792_v26  ;;  %v9784_v26 = vld [vmem:[%s13781_s1 + $0x8ac] ss:$16 sps:$4 sm:$0xff]  }
 0x283   :  { %v6983_v13 = vpop.f32.mrf.mxu1  ;;  %7228 = vmatmul.mubr.bf16.vlgmr.msra.gmra.mxu1 %v10805_v6  ;;  %v6943_v18 = vadd.f32 %v6942_v14, %v12383_v57  ;;  %7237 = vmatpush1.bf16.msra.mxu0 %v9770_v10  ;;  %v9787_v6 = vld [vmem:[%s13781_s1 + $0xaac] ss:$16 sps:$4 sm:$0xff]   ;;  %v9812_v10 = vld [vmem:[%s13781_s1 + $0x808] ss:$16 sps:$4 sm:$0xff]  }
 0x284   :  { %7278 = vmatpush1.bf16.msra.mxu1 %v9773_v60  ;;  %v6944_v55 = vpop.f32.mrf.mxu0  ;;  %7238 = vmatprep.subr.bf16.mxu0 %v9778_v0  ;;  %v9815_v60 = vld [vmem:[%s13781_s1 + $0xa08] ss:$16 sps:$4 sm:$0xff]   ;;  %v9820_v0 = vld [vmem:[%s13781_s1 + $0x9ec] ss:$16 sps:$4 sm:$0xff]  }
 0x285   :  { %v6985_v36 = vpop.f32.mrf.mxu1  ;;  %7279 = vmatprep.subr.bf16.mxu1 %v9781_v11  ;;  %v12585_v57 = vadd.f32 %v6983_v13, %v6943_v18  ;;  %v6945_v5 = vadd.f32 %v6944_v55, %v12388_v27  ;;  %7268 = vmatprep.mubr.bf16.mxu0 %v10845_v41  ;;  %v9790_v41 = vld [vmem:[%s13781_s1 + $0x88c] ss:$16 sps:$4 sm:$0xff]   ;;  %v9818_v14 = vld [vmem:[%s13781_s1 + $0x9e8] ss:$16 sps:$4 sm:$0xff]  }
 0x286   :  { %7309 = vmatprep.mubr.bf16.mxu1 %v10850_v43  ;;  %v6946_v28 = vpop.f32.mrf.mxu0  ;;  %v9793_v43 = vld [vmem:[%s13781_s1 + $0xa8c] ss:$16 sps:$4 sm:$0xff]   ;;  %v9821_v13 = vld [vmem:[%s13781_s1 + $0xbe8] ss:$16 sps:$4 sm:$0xff]  }
 0x287   :  { %v6987_v7 = vpop.f32.mrf.mxu1  ;;  %v12590_v17 = vadd.f32 %v6985_v36, %v6945_v5  ;;  %7239 = vmatpush1.bf16.msra.mxu0 %v9776_v16  ;;  %v9823_v11 = vld [vmem:[%s13781_s1 + $0xbec] ss:$16 sps:$4 sm:$0xff]   ;;  %v9827_v55 = vld [vmem:[%s13781_s1 + $0xbc8] ss:$16 sps:$4 sm:$0xff]  }
 0x288   :  { %7280 = vmatpush1.bf16.msra.mxu1 %v9779_v21  ;;  %v6947_v37 = vpop.f32.mrf.mxu0  ;;  %7240 = vmatprep.subr.bf16.mxu0 %v9784_v26  ;;  %v9826_v18 = vld [vmem:[%s13781_s1 + $0x9cc] ss:$16 sps:$4 sm:$0xff]   ;;  %v9824_v21 = vld [vmem:[%s13781_s1 + $0x9c8] ss:$16 sps:$4 sm:$0xff]  }
 0x289   :  { %v6988_v27 = vpop.f32.mrf.mxu1  ;;  %7281 = vmatprep.subr.bf16.mxu1 %v9787_v6  ;;  %v9829_v16 = vld [vmem:[%s13781_s1 + $0xbcc] ss:$16 sps:$4 sm:$0xff]   ;;  %v9830_v6 = vld [vmem:[%s13781_s1 + $0x9a8] ss:$16 sps:$4 sm:$0xff]  }
 0x28a   :  { %v9832_v36 = vld [vmem:[%s13781_s1 + $0x9ac] ss:$16 sps:$4 sm:$0xff]   ;;  %v9833_v5 = vld [vmem:[%s13781_s1 + $0xba8] ss:$16 sps:$4 sm:$0xff]  }
 0x28b   :  { %7241 = vmatpush1.bf16.msra.mxu0 %v9782_v23  ;;  %v9835_v26 = vld [vmem:[%s13781_s1 + $0xbac] ss:$16 sps:$4 sm:$0xff]   ;;  %v9836_v23 = vld [vmem:[%s13781_s1 + $0x988] ss:$16 sps:$4 sm:$0xff]  }
 0x28c   :  { %7282 = vmatpush1.bf16.msra.mxu1 %v9785_v63  ;;  %7242 = vmatprep.subr.bf16.mxu0 %v9790_v41  ;;  %v9838_v28 = vld [vmem:[%s13781_s1 + $0x98c] ss:$16 sps:$4 sm:$0xff]   ;;  %v9839_v63 = vld [vmem:[%s13781_s1 + $0xb88] ss:$16 sps:$4 sm:$0xff]  }
 0x28d   :  { %7283 = vmatprep.subr.bf16.mxu1 %v9793_v43  ;;  %v9841_v7 = vld [vmem:[%s13781_s1 + $0xb8c] ss:$16 sps:$4 sm:$0xff]   ;;  %v9842_v41 = vld [vmem:[%s13781_s1 + $0x968] ss:$16 sps:$4 sm:$0xff]  }
 0x28e   :  { %v9844_v37 = vld [vmem:[%s13781_s1 + $0x96c] ss:$16 sps:$4 sm:$0xff]   ;;  %v9845_v43 = vld [vmem:[%s13781_s1 + $0xb68] ss:$16 sps:$4 sm:$0xff]  }
 0x28f   :  { %7243 = vmatpush1.bf16.msra.mxu0 %v9788_v38  ;;  %v9847_v27 = vld [vmem:[%s13781_s1 + $0xb6c] ss:$16 sps:$4 sm:$0xff]  }
 0x290   :  { %7284 = vmatpush1.bf16.msra.mxu1 %v9791_v32  ;;  %7244 = vmatprep.subr.bf16.mxu0 %v9796_v44  ;;  %v9850_v38 = vld [vmem:[%s13781_s1 + $0x94c] ss:$16 sps:$4 sm:$0xff]   ;;  %v9848_v44 = vld [vmem:[%s13781_s1 + $0x948] ss:$16 sps:$4 sm:$0xff]  }
 0x291   :  { %7285 = vmatprep.subr.bf16.mxu1 %v9799_v47  ;;  %v9853_v32 = vld [vmem:[%s13781_s1 + $0xb4c] ss:$16 sps:$4 sm:$0xff]   ;;  %v9851_v47 = vld [vmem:[%s13781_s1 + $0xb48] ss:$16 sps:$4 sm:$0xff]  }
 0x293   :  { %7245 = vmatpush1.bf16.msra.mxu0 %v9794_v48  ;;  %v9856_v48 = vld [vmem:[%s13781_s1 + $0x92c] ss:$16 sps:$4 sm:$0xff]  }
 0x294   :  { %7286 = vmatpush1.bf16.msra.mxu1 %v9797_v51  ;;  %7246 = vmatprep.subr.bf16.mxu0 %v9802_v52  ;;  %v9859_v51 = vld [vmem:[%s13781_s1 + $0xb2c] ss:$16 sps:$4 sm:$0xff]   ;;  %v9854_v52 = vld [vmem:[%s13781_s1 + $0x928] ss:$16 sps:$4 sm:$0xff]  }
 0x295   :  { %7287 = vmatprep.subr.bf16.mxu1 %v9805_v9  ;;  %v9857_v9 = vld [vmem:[%s13781_s1 + $0xb28] ss:$16 sps:$4 sm:$0xff]  }
 0x297   :  { %7247 = vmatpush1.bf16.msra.mxu0 %v9800_v56  ;;  %v9862_v56 = vld [vmem:[%s13781_s1 + $0x90c] ss:$16 sps:$4 sm:$0xff]  }
 0x298   :  { %7288 = vmatpush1.bf16.msra.mxu1 %v9803_v61  ;;  %7248 = vmatprep.subr.bf16.mxu0 %v9808_v20  ;;  %v9865_v61 = vld [vmem:[%s13781_s1 + $0xb0c] ss:$16 sps:$4 sm:$0xff]   ;;  %v9860_v20 = vld [vmem:[%s13781_s1 + $0x908] ss:$16 sps:$4 sm:$0xff]  }
 0x299   :  { %7289 = vmatprep.subr.bf16.mxu1 %v9811_v62  ;;  %v9863_v62 = vld [vmem:[%s13781_s1 + $0xb08] ss:$16 sps:$4 sm:$0xff]  }
 0x29b   :  { %7249 = vmatpush1.bf16.msra.mxu0 %v9806_v3  ;;  %v9868_v3 = vld [vmem:[%s13781_s1 + $0xcec] ss:$16 sps:$4 sm:$0xff]  }
 0x29c   :  { %7290 = vmatpush1.bf16.msra.mxu1 %v9809_v53  ;;  %7250 = vmatprep.subr.bf16.mxu0 %v9814_v8  ;;  %v9871_v53 = vld [vmem:[%s13781_s1 + $0xeec] ss:$16 sps:$4 sm:$0xff]   ;;  %v9866_v8 = vld [vmem:[%s13781_s1 + $0xce8] ss:$16 sps:$4 sm:$0xff]  }
 0x29d   :  { %7291 = vmatprep.subr.bf16.mxu1 %v9817_v29  ;;  %v9869_v29 = vld [vmem:[%s13781_s1 + $0xee8] ss:$16 sps:$4 sm:$0xff]  }
 0x29f   :  { %7251 = vmatpush1.bf16.msra.mxu0 %v9812_v10  ;;  %v9874_v10 = vld [vmem:[%s13781_s1 + $0xccc] ss:$16 sps:$4 sm:$0xff]  }
 0x2a0   :  { %7292 = vmatpush1.bf16.msra.mxu1 %v9815_v60  ;;  %7252 = vmatprep.subr.bf16.mxu0 %v9820_v0  ;;  %v9877_v60 = vld [vmem:[%s13781_s1 + $0xecc] ss:$16 sps:$4 sm:$0xff]  }
 0x2a1   :  { %7293 = vmatprep.subr.bf16.mxu1 %v9823_v11 }
 0x2a3   :  { %7253 = vmatpush2.bf16.msra.mxu0 %v9818_v14 }
 0x2a4   :  { %7294 = vmatpush2.bf16.msra.mxu1 %v9821_v13  ;;  %7254 = vmatprep.subr.bf16.mxu0 %v9826_v18  ;;  %v9872_v13 = vld [vmem:[%s13781_s1 + $0xcc8] ss:$16 sps:$4 sm:$0xff]  }
 0x2a5   :  { %7295 = vmatprep.subr.bf16.mxu1 %v9829_v16  ;;  %v9875_v18 = vld [vmem:[%s13781_s1 + $0xec8] ss:$16 sps:$4 sm:$0xff]  }
 0x2a7   :  { %7255 = vmatpush2.bf16.msra.mxu0 %v9824_v21 }
 0x2a8   :  { %7296 = vmatpush2.bf16.msra.mxu1 %v9827_v55  ;;  %7256 = vmatprep.subr.bf16.mxu0 %v9832_v36 }
 0x2a9   :  { %7297 = vmatprep.subr.bf16.mxu1 %v9835_v26 }
 0x2ab   :  { %7257 = vmatpush2.bf16.msra.mxu0 %v9830_v6 }
 0x2ac   :  { %7298 = vmatpush2.bf16.msra.mxu1 %v9833_v5  ;;  %7258 = vmatprep.subr.bf16.mxu0 %v9838_v28  ;;  %v9878_v28 = vld [vmem:[%s13781_s1 + $0xca8] ss:$16 sps:$4 sm:$0xff]  }
 0x2ad   :  { %7299 = vmatprep.subr.bf16.mxu1 %v9841_v7  ;;  %v9881_v7 = vld [vmem:[%s13781_s1 + $0xea8] ss:$16 sps:$4 sm:$0xff]  }
 0x2af   :  { %7259 = vmatpush2.bf16.msra.mxu0 %v9836_v23 }
 0x2b0   :  { %7300 = vmatpush2.bf16.msra.mxu1 %v9839_v63  ;;  %7260 = vmatprep.subr.bf16.mxu0 %v9844_v37 }
 0x2b1   :  { %7301 = vmatprep.subr.bf16.mxu1 %v9847_v27 }
 0x2b3   :  { %7261 = vmatpush2.bf16.msra.mxu0 %v9842_v41  ;;  %v9884_v41 = vld [vmem:[%s13781_s1 + $0xc88] ss:$16 sps:$4 sm:$0xff]  }
 0x2b4   :  { %7302 = vmatpush2.bf16.msra.mxu1 %v9845_v43  ;;  %7262 = vmatprep.subr.bf16.mxu0 %v9850_v38  ;;  %v9887_v43 = vld [vmem:[%s13781_s1 + $0xe88] ss:$16 sps:$4 sm:$0xff]  }
 0x2b5   :  { %7303 = vmatprep.subr.bf16.mxu1 %v9853_v32  ;;  %v9892_v32 = vld [vmem:[%s13781_s1 + $0xc6c] ss:$16 sps:$4 sm:$0xff]  }
 0x2b7   :  { %7263 = vmatpush2.bf16.msra.mxu0 %v9848_v44  ;;  %v9895_v44 = vld [vmem:[%s13781_s1 + $0xe6c] ss:$16 sps:$4 sm:$0xff]  }
 0x2b8   :  { %7304 = vmatpush2.bf16.msra.mxu1 %v9851_v47  ;;  %7264 = vmatprep.subr.bf16.mxu0 %v9856_v48  ;;  %v9890_v47 = vld [vmem:[%s13781_s1 + $0xc68] ss:$16 sps:$4 sm:$0xff]  }
 0x2b9   :  { %7305 = vmatprep.subr.bf16.mxu1 %v9859_v51  ;;  %v9893_v48 = vld [vmem:[%s13781_s1 + $0xe68] ss:$16 sps:$4 sm:$0xff]   ;;  %v9898_v51 = vld [vmem:[%s13781_s1 + $0xc4c] ss:$16 sps:$4 sm:$0xff]  }
 0x2bb   :  { %7265 = vmatpush2.bf16.msra.mxu0 %v9854_v52  ;;  %v9901_v52 = vld [vmem:[%s13781_s1 + $0xe4c] ss:$16 sps:$4 sm:$0xff]  }
 0x2bc   :  { %7306 = vmatpush2.bf16.msra.mxu1 %v9857_v9  ;;  %7266 = vmatprep.subr.bf16.mxu0 %v9862_v56  ;;  %v9896_v9 = vld [vmem:[%s13781_s1 + $0xc48] ss:$16 sps:$4 sm:$0xff]  }
 0x2bd   :  { %7307 = vmatprep.subr.bf16.mxu1 %v9865_v61  ;;  %v9899_v56 = vld [vmem:[%s13781_s1 + $0xe48] ss:$16 sps:$4 sm:$0xff]   ;;  %v9904_v61 = vld [vmem:[%s13781_s1 + $0xc2c] ss:$16 sps:$4 sm:$0xff]  }
 0x2bf   :  { %7267 = vmatpush2.bf16.msra.mxu0 %v9860_v20  ;;  %v9907_v20 = vld [vmem:[%s13781_s1 + $0xe2c] ss:$16 sps:$4 sm:$0xff]  }
 0x2c0   :  { %7308 = vmatpush2.bf16.msra.mxu1 %v9863_v62  ;;  %7318 = vmatprep.subr.bf16.mxu0 %v9868_v3  ;;  %v9902_v62 = vld [vmem:[%s13781_s1 + $0xc28] ss:$16 sps:$4 sm:$0xff]  }
 0x2c1   :  { %7359 = vmatprep.subr.bf16.mxu1 %v9871_v53  ;;  %v9905_v3 = vld [vmem:[%s13781_s1 + $0xe28] ss:$16 sps:$4 sm:$0xff]   ;;  %v9910_v53 = vld [vmem:[%s13781_s1 + $0xc0c] ss:$16 sps:$4 sm:$0xff]  }
 0x2c2   :  { %v7024_v0 = vpop.f32.mrf.mxu0  ;;  %7269 = vmatmul.mubr.bf16.vlgmr.msra.gmra.mxu0 %v11021_v50  ;;  %v9880_v50 = vld [vmem:[%s13781_s1 + $0xcac] ss:$16 sps:$4 sm:$0xff]  }
 0x2c3   :  { %v7065_v11 = vpop.f32.mrf.mxu1  ;;  %7310 = vmatmul.mubr.bf16.vlgmr.msra.gmra.mxu1 %v11037_v35  ;;  %v7025_v14 = vadd.f32 %v7024_v0, %v12585_v57  ;;  %7319 = vmatpush1.bf16.msra.mxu0 %v9866_v8  ;;  %v9883_v35 = vld [vmem:[%s13781_s1 + $0xeac] ss:$16 sps:$4 sm:$0xff]  }
 0x2c4   :  { %7360 = vmatpush1.bf16.msra.mxu1 %v9869_v29  ;;  %v7026_v16 = vpop.f32.mrf.mxu0  ;;  %7320 = vmatprep.subr.bf16.mxu0 %v9874_v10  ;;  %v9913_v8 = vld [vmem:[%s13781_s1 + $0xe0c] ss:$16 sps:$4 sm:$0xff]   ;;  %v9908_v29 = vld [vmem:[%s13781_s1 + $0xc08] ss:$16 sps:$4 sm:$0xff]  }
 0x2c5   :  { %v7067_v21 = vpop.f32.mrf.mxu1  ;;  %7361 = vmatprep.subr.bf16.mxu1 %v9877_v60  ;;  %v7066_v57 = vadd.f32 %v7065_v11, %v7025_v14  ;;  %v7027_v55 = vadd.f32 %v7026_v16, %v12590_v17  ;;  %7350 = vmatprep.mubr.bf16.mxu0 %v11033_v54  ;;  %v9886_v54 = vld [vmem:[%s13781_s1 + $0xc8c] ss:$16 sps:$4 sm:$0xff]   ;;  %v9911_v10 = vld [vmem:[%s13781_s1 + $0xe08] ss:$16 sps:$4 sm:$0xff]  }
 0x2c6   :  { %7391 = vmatprep.mubr.bf16.mxu1 %v11053_v59  ;;  %v7028_v36 = vpop.f32.mrf.mxu0  ;;  %v9889_v59 = vld [vmem:[%s13781_s1 + $0xe8c] ss:$16 sps:$4 sm:$0xff]   ;;  %v9914_v11 = vld [vmem:[%s13781_s1 + $0xde8] ss:$16 sps:$4 sm:$0xff]  }
 0x2c7   :  { %v7069_v26 = vpop.f32.mrf.mxu1  ;;  %v7732_v6 = vmul.f32 0.2, %v7066_v57  ;;  %v7068_v5 = vadd.f32 %v7067_v21, %v7027_v55  ;;  %7321 = vmatpush1.bf16.msra.mxu0 %v9872_v13  ;;  %vm7728_vm0 = vcmp.ge.f32.partialorder %v7066_v57, 0.0  ;;  %v9916_v60 = vld [vmem:[%s13781_s1 + $0xdec] ss:$16 sps:$4 sm:$0xff]  }
 0x2c8   :  { %7362 = vmatpush1.bf16.msra.mxu1 %v9875_v18  ;;  %v7029_v17 = vpop.f32.mrf.mxu0  ;;  %7322 = vmatprep.subr.bf16.mxu0 %v9880_v50  ;;  %v9919_v0 = vld [vmem:[%s13781_s1 + $0xfec] ss:$16 sps:$4 sm:$0xff]   ;;  %v9917_v14 = vld [vmem:[%s13781_s1 + $0xfe8] ss:$16 sps:$4 sm:$0xff]  }
 0x2c9   :  { %v7070_v23 = vpop.f32.mrf.mxu1  ;;  %7363 = vmatprep.subr.bf16.mxu1 %v9883_v35  ;;  %vm7729_vm1 = vcmp.ge.f32.partialorder %v7068_v5, 0.0  ;;  %v7733_v63 = vmul.f32 0.2, %v7068_v5  ;;  %v12802_v37 = vsel %vm7728_vm0, %v7066_v57, %v7732_v6  ;;  %v9922_v13 = vld [vmem:[%s13781_s1 + $0xdcc] ss:$16 sps:$4 sm:$0xff]  }
 0x2ca   :  { %v9925_v18 = vld [vmem:[%s13781_s1 + $0xfcc] ss:$16 sps:$4 sm:$0xff]   ;;  %v9920_v16 = vld [vmem:[%s13781_s1 + $0xdc8] ss:$16 sps:$4 sm:$0xff]  }
 0x2cb   :  { %v12804_v27 = vsel %vm7729_vm1, %v7068_v5, %v7733_v63  ;;  %7323 = vmatpush1.bf16.msra.mxu0 %v9878_v28  ;;  %v9923_v21 = vld [vmem:[%s13781_s1 + $0xfc8] ss:$16 sps:$4 sm:$0xff]   ;;  %v9928_v50 = vld [vmem:[%s13781_s1 + $0xdac] ss:$16 sps:$4 sm:$0xff]  }
 0x2cc   :  { %7364 = vmatpush1.bf16.msra.mxu1 %v9881_v7  ;;  %v8802_v38 = vpack.c.bf16 %v12804_v27, %v12802_v37  ;;  %7324 = vmatprep.subr.bf16.mxu0 %v9886_v54  ;;  %v9931_v35 = vld [vmem:[%s13781_s1 + $0xfac] ss:$16 sps:$4 sm:$0xff]   ;;  %v9926_v57 = vld [vmem:[%s13781_s1 + $0xda8] ss:$16 sps:$4 sm:$0xff]  }
 0x2cd   :  { %7365 = vmatprep.subr.bf16.mxu1 %v9889_v59  ;;  %v9929_v55 = vld [vmem:[%s13781_s1 + $0xfa8] ss:$16 sps:$4 sm:$0xff]   ;;  %v9934_v36 = vld [vmem:[%s13781_s1 + $0xd8c] ss:$16 sps:$4 sm:$0xff]  }
 0x2ce   :  { %v9937_v26 = vld [vmem:[%s13781_s1 + $0xf8c] ss:$16 sps:$4 sm:$0xff]   ;;  %v9932_v6 = vld [vmem:[%s13781_s1 + $0xd88] ss:$16 sps:$4 sm:$0xff]  }
 0x2cf   :  { %7325 = vmatpush1.bf16.msra.mxu0 %v9884_v41  ;;  %v9935_v5 = vld [vmem:[%s13781_s1 + $0xf88] ss:$16 sps:$4 sm:$0xff]   ;;  %v9940_v28 = vld [vmem:[%s13781_s1 + $0xd6c] ss:$16 sps:$4 sm:$0xff]  }
 0x2d0   :  { %7366 = vmatpush1.bf16.msra.mxu1 %v9887_v43  ;;  %7326 = vmatprep.subr.bf16.mxu0 %v9892_v32  ;;  %v9943_v7 = vld [vmem:[%s13781_s1 + $0xf6c] ss:$16 sps:$4 sm:$0xff]   ;;  %v9938_v17 = vld [vmem:[%s13781_s1 + $0xd68] ss:$16 sps:$4 sm:$0xff]  }
 0x2d1   :  { %7367 = vmatprep.subr.bf16.mxu1 %v9895_v44  ;;  %v9941_v23 = vld [vmem:[%s13781_s1 + $0xf68] ss:$16 sps:$4 sm:$0xff]   ;;  %v9946_v54 = vld [vmem:[%s13781_s1 + $0xd4c] ss:$16 sps:$4 sm:$0xff]  }
 0x2d2   :  { %v9949_v59 = vld [vmem:[%s13781_s1 + $0xf4c] ss:$16 sps:$4 sm:$0xff]   ;;  %v9944_v63 = vld [vmem:[%s13781_s1 + $0xd48] ss:$16 sps:$4 sm:$0xff]  }
 0x2d3   :  { %7327 = vmatpush1.bf16.msra.mxu0 %v9890_v47  ;;  %v9947_v41 = vld [vmem:[%s13781_s1 + $0xf48] ss:$16 sps:$4 sm:$0xff]   ;;  %v9952_v43 = vld [vmem:[%s13781_s1 + $0xd2c] ss:$16 sps:$4 sm:$0xff]  }
 0x2d4   :  { %7368 = vmatpush1.bf16.msra.mxu1 %v9893_v48  ;;  %7328 = vmatprep.subr.bf16.mxu0 %v9898_v51  ;;  %v9955_v32 = vld [vmem:[%s13781_s1 + $0xf2c] ss:$16 sps:$4 sm:$0xff]   ;;  %v9950_v44 = vld [vmem:[%s13781_s1 + $0xd28] ss:$16 sps:$4 sm:$0xff]  }
 0x2d5   :  { %7369 = vmatprep.subr.bf16.mxu1 %v9901_v52  ;;  %v9953_v47 = vld [vmem:[%s13781_s1 + $0xf28] ss:$16 sps:$4 sm:$0xff]   ;;  %v9958_v48 = vld [vmem:[%s13781_s1 + $0xd0c] ss:$16 sps:$4 sm:$0xff]  }
 0x2d6   :  { %v9961_v51 = vld [vmem:[%s13781_s1 + $0xf0c] ss:$16 sps:$4 sm:$0xff]   ;;  %v9956_v52 = vld [vmem:[%s13781_s1 + $0xd08] ss:$16 sps:$4 sm:$0xff]  }
 0x2d7   :  { %7329 = vmatpush1.bf16.msra.mxu0 %v9896_v9  ;;  %v9959_v9 = vld [vmem:[%s13781_s1 + $0xf08] ss:$16 sps:$4 sm:$0xff]  }
 0x2d8   :  { %7370 = vmatpush1.bf16.msra.mxu1 %v9899_v56  ;;  %7330 = vmatprep.subr.bf16.mxu0 %v9904_v61  ;;  %v1054_v56 = vsub.s32 2, %v10485_v42  ;;  %v9964_v61 = vld [vmem:[%s13781_s1 + $0x10ec] ss:$16 sps:$4 sm:$0xff]  }
 0x2d9   :  { %7371 = vmatprep.subr.bf16.mxu1 %v9907_v20  ;;  %v9967_v20 = vld [vmem:[%s13781_s1 + $0x12ec] ss:$16 sps:$4 sm:$0xff]  }
 0x2db   :  { %7331 = vmatpush1.bf16.msra.mxu0 %v9902_v62  ;;  %v1058_v62 = vsub.s32 3, %v10485_v42  ;;  %v9970_v42 = vld [vmem:[%s13781_s1 + $0x10cc] ss:$16 sps:$4 sm:$0xff]  }
 0x2dc   :  { %7372 = vmatpush1.bf16.msra.mxu1 %v9905_v3  ;;  %7332 = vmatprep.subr.bf16.mxu0 %v9910_v53  ;;  %v10346_v3 = vld [vmem:[%s13783_s2] sm:$0xf] }
 0x2dd   :  { %7373 = vmatprep.subr.bf16.mxu1 %v9913_v8  ;;  %v1055_v53 = vrot.slane %v10346_v3, %v1054_v56  ;;  %v9962_v8 = vld [vmem:[%s13781_s1 + $0x10e8] ss:$16 sps:$4 sm:$0xff]   ;;  %v10009_v56 = vld [vmem:[%s13781_s1 + $0x120c] ss:$16 sps:$4 sm:$0xff]  }
 0x2df   :  { %7333 = vmatpush1.bf16.msra.mxu0 %v9908_v29  ;;  %v9965_v29 = vld [vmem:[%s13781_s1 + $0x12e8] ss:$16 sps:$4 sm:$0xff]  }
 0x2e0   :  { %7374 = vmatpush1.bf16.msra.mxu1 %v9911_v10  ;;  %7334 = vmatprep.subr.bf16.mxu0 %v9916_v60  ;;  %v9973_v10 = vld [vmem:[%s13781_s1 + $0x12cc] ss:$16 sps:$4 sm:$0xff]   ;;  %v1059_v60 = vrot.slane %v10346_v3, %v1058_v62 }
 0x2e1   :  { %7375 = vmatprep.subr.bf16.mxu1 %v9919_v0  ;;  %v10012_v62 = vld [vmem:[%s13781_s1 + $0x11ec] ss:$16 sps:$4 sm:$0xff]  }
 0x2e2   :  { %v10015_v3 = vld [vmem:[%s13781_s1 + $0x13ec] ss:$16 sps:$4 sm:$0xff]  }
 0x2e3   :  { %7335 = vmatpush2.bf16.msra.mxu0 %v9914_v11 }
 0x2e4   :  { %7376 = vmatpush2.bf16.msra.mxu1 %v9917_v14  ;;  %7336 = vmatprep.subr.bf16.mxu0 %v9922_v13  ;;  %v9968_v13 = vld [vmem:[%s13781_s1 + $0x10c8] ss:$16 sps:$4 sm:$0xff]  }
 0x2e5   :  { %7377 = vmatprep.subr.bf16.mxu1 %v9925_v18  ;;  %v9971_v18 = vld [vmem:[%s13781_s1 + $0x12c8] ss:$16 sps:$4 sm:$0xff]  }
 0x2e7   :  { %7337 = vmatpush2.bf16.msra.mxu0 %v9920_v16 }
 0x2e8   :  { %7378 = vmatpush2.bf16.msra.mxu1 %v9923_v21  ;;  %7338 = vmatprep.subr.bf16.mxu0 %v9928_v50 }
 0x2e9   :  { %7379 = vmatprep.subr.bf16.mxu1 %v9931_v35 }
 0x2eb   :  { %7339 = vmatpush2.bf16.msra.mxu0 %v9926_v57 }
 0x2ec   :  { %7380 = vmatpush2.bf16.msra.mxu1 %v9929_v55  ;;  %7340 = vmatprep.subr.bf16.mxu0 %v9934_v36 }
 0x2ed   :  { %7381 = vmatprep.subr.bf16.mxu1 %v9937_v26  ;;  %v9974_v26 = vld [vmem:[%s13781_s1 + $0x10a8] ss:$16 sps:$4 sm:$0xff]  }
 0x2ef   :  { %7341 = vmatpush2.bf16.msra.mxu0 %v9932_v6  ;;  %v9977_v6 = vld [vmem:[%s13781_s1 + $0x12a8] ss:$16 sps:$4 sm:$0xff]  }
 0x2f0   :  { %7382 = vmatpush2.bf16.msra.mxu1 %v9935_v5  ;;  %7342 = vmatprep.subr.bf16.mxu0 %v9940_v28 }
 0x2f1   :  { %7383 = vmatprep.subr.bf16.mxu1 %v9943_v7  ;;  %v9980_v7 = vld [vmem:[%s13781_s1 + $0x1088] ss:$16 sps:$4 sm:$0xff]  }
 0x2f3   :  { %7343 = vmatpush2.bf16.msra.mxu0 %v9938_v17  ;;  %v9983_v17 = vld [vmem:[%s13781_s1 + $0x1288] ss:$16 sps:$4 sm:$0xff]  }
 0x2f4   :  { %7384 = vmatpush2.bf16.msra.mxu1 %v9941_v23  ;;  %7344 = vmatprep.subr.bf16.mxu0 %v9946_v54  ;;  %v9988_v23 = vld [vmem:[%s13781_s1 + $0x106c] ss:$16 sps:$4 sm:$0xff]  }
 0x2f5   :  { %7385 = vmatprep.subr.bf16.mxu1 %v9949_v59  ;;  %v9991_v54 = vld [vmem:[%s13781_s1 + $0x126c] ss:$16 sps:$4 sm:$0xff]   ;;  %v9986_v59 = vld [vmem:[%s13781_s1 + $0x1068] ss:$16 sps:$4 sm:$0xff]  }
 0x2f7   :  { %7345 = vmatpush2.bf16.msra.mxu0 %v9944_v63  ;;  %v9989_v63 = vld [vmem:[%s13781_s1 + $0x1268] ss:$16 sps:$4 sm:$0xff]  }
 0x2f8   :  { %7386 = vmatpush2.bf16.msra.mxu1 %v9947_v41  ;;  %7346 = vmatprep.subr.bf16.mxu0 %v9952_v43  ;;  %v9994_v41 = vld [vmem:[%s13781_s1 + $0x104c] ss:$16 sps:$4 sm:$0xff]  }
 0x2f9   :  { %7387 = vmatprep.subr.bf16.mxu1 %v9955_v32  ;;  %v9997_v43 = vld [vmem:[%s13781_s1 + $0x124c] ss:$16 sps:$4 sm:$0xff]   ;;  %v9992_v32 = vld [vmem:[%s13781_s1 + $0x1048] ss:$16 sps:$4 sm:$0xff]  }
 0x2fb   :  { %7347 = vmatpush2.bf16.msra.mxu0 %v9950_v44  ;;  %v9995_v44 = vld [vmem:[%s13781_s1 + $0x1248] ss:$16 sps:$4 sm:$0xff]  }
 0x2fc   :  { %7388 = vmatpush2.bf16.msra.mxu1 %v9953_v47  ;;  %7348 = vmatprep.subr.bf16.mxu0 %v9958_v48  ;;  %v10000_v47 = vld [vmem:[%s13781_s1 + $0x102c] ss:$16 sps:$4 sm:$0xff]  }
 0x2fd   :  { %7389 = vmatprep.subr.bf16.mxu1 %v9961_v51  ;;  %v10003_v48 = vld [vmem:[%s13781_s1 + $0x122c] ss:$16 sps:$4 sm:$0xff]   ;;  %v9998_v51 = vld [vmem:[%s13781_s1 + $0x1028] ss:$16 sps:$4 sm:$0xff]  }
 0x2ff   :  { %7349 = vmatpush2.bf16.msra.mxu0 %v9956_v52  ;;  %v10001_v52 = vld [vmem:[%s13781_s1 + $0x1228] ss:$16 sps:$4 sm:$0xff]  }
 0x300   :  { %7390 = vmatpush2.bf16.msra.mxu1 %v9959_v9  ;;  %7400 = vmatprep.subr.bf16.mxu0 %v9964_v61  ;;  %v10006_v9 = vld [vmem:[%s13781_s1 + $0x100c] ss:$16 sps:$4 sm:$0xff]   ;;  %v10004_v61 = vld [vmem:[%s13781_s1 + $0x1008] ss:$16 sps:$4 sm:$0xff]  }
 0x301   :  { %7441 = vmatprep.subr.bf16.mxu1 %v9967_v20  ;;  %v10007_v20 = vld [vmem:[%s13781_s1 + $0x1208] ss:$16 sps:$4 sm:$0xff]  }
 0x302   :  { %v7106_v0 = vpop.f32.mrf.mxu0  ;;  %7351 = vmatmul.mubr.bf16.vlgmr.msra.gmra.mxu0 %v11249_v15  ;;  %v9976_v15 = vld [vmem:[%s13781_s1 + $0x10ac] ss:$16 sps:$4 sm:$0xff]  }
 0x303   :  { %v7147_v11 = vpop.f32.mrf.mxu1  ;;  %7392 = vmatmul.mubr.bf16.vlgmr.msra.gmra.mxu1 %v11264_v39  ;;  %v7107_v14 = vadd.f32 %v7106_v0, %v1055_v53  ;;  %7401 = vmatpush1.bf16.msra.mxu0 %v9962_v8  ;;  %v9979_v39 = vld [vmem:[%s13781_s1 + $0x12ac] ss:$16 sps:$4 sm:$0xff]   ;;  %v10010_v53 = vld [vmem:[%s13781_s1 + $0x11e8] ss:$16 sps:$4 sm:$0xff]  }
 0x304   :  { %7442 = vmatpush1.bf16.msra.mxu1 %v9965_v29  ;;  %v7108_v16 = vpop.f32.mrf.mxu0  ;;  %7402 = vmatprep.subr.bf16.mxu0 %v9970_v42  ;;  %v10013_v8 = vld [vmem:[%s13781_s1 + $0x13e8] ss:$16 sps:$4 sm:$0xff]   ;;  %v10018_v29 = vld [vmem:[%s13781_s1 + $0x11cc] ss:$16 sps:$4 sm:$0xff]  }
 0x305   :  { %v7149_v21 = vpop.f32.mrf.mxu1  ;;  %7443 = vmatprep.subr.bf16.mxu1 %v9973_v10  ;;  %v12995_v50 = vadd.f32 %v7147_v11, %v7107_v14  ;;  %v7109_v35 = vadd.f32 %v7108_v16, %v1059_v60  ;;  %7432 = vmatprep.mubr.bf16.mxu0 %v11260_v22  ;;  %v9982_v22 = vld [vmem:[%s13781_s1 + $0x108c] ss:$16 sps:$4 sm:$0xff]   ;;  %v10016_v10 = vld [vmem:[%s13781_s1 + $0x11c8] ss:$16 sps:$4 sm:$0xff]  }
 0x306   :  { %7473 = vmatprep.mubr.bf16.mxu1 %v11280_v31  ;;  %v7110_v57 = vpop.f32.mrf.mxu0  ;;  %v9985_v31 = vld [vmem:[%s13781_s1 + $0x128c] ss:$16 sps:$4 sm:$0xff]   ;;  %v10019_v60 = vld [vmem:[%s13781_s1 + $0x13c8] ss:$16 sps:$4 sm:$0xff]  }
 0x307   :  { %v7151_v55 = vpop.f32.mrf.mxu1  ;;  %v12999_v36 = vadd.f32 %v7149_v21, %v7109_v35  ;;  %7403 = vmatpush1.bf16.msra.mxu0 %v9968_v13  ;;  %v10021_v42 = vld [vmem:[%s13781_s1 + $0x13cc] ss:$16 sps:$4 sm:$0xff]   ;;  %v10022_v14 = vld [vmem:[%s13781_s1 + $0x11a8] ss:$16 sps:$4 sm:$0xff]  }
 0x308   :  { %7444 = vmatpush1.bf16.msra.mxu1 %v9971_v18  ;;  %v7111_v5 = vpop.f32.mrf.mxu0  ;;  %7404 = vmatprep.subr.bf16.mxu0 %v9976_v15  ;;  %v10024_v0 = vld [vmem:[%s13781_s1 + $0x11ac] ss:$16 sps:$4 sm:$0xff]   ;;  %v10025_v13 = vld [vmem:[%s13781_s1 + $0x13a8] ss:$16 sps:$4 sm:$0xff]  }
 0x309   :  { %v7152_v28 = vpop.f32.mrf.mxu1  ;;  %7445 = vmatprep.subr.bf16.mxu1 %v9979_v39  ;;  %v10027_v11 = vld [vmem:[%s13781_s1 + $0x13ac] ss:$16 sps:$4 sm:$0xff]   ;;  %v10028_v21 = vld [vmem:[%s13781_s1 + $0x1188] ss:$16 sps:$4 sm:$0xff]  }
 0x30a   :  { %v10030_v18 = vld [vmem:[%s13781_s1 + $0x118c] ss:$16 sps:$4 sm:$0xff]   ;;  %v10031_v15 = vld [vmem:[%s13781_s1 + $0x1388] ss:$16 sps:$4 sm:$0xff]  }
 0x30b   :  { %7405 = vmatpush1.bf16.msra.mxu0 %v9974_v26  ;;  %v10033_v16 = vld [vmem:[%s13781_s1 + $0x138c] ss:$16 sps:$4 sm:$0xff]   ;;  %v10034_v57 = vld [vmem:[%s13781_s1 + $0x1168] ss:$16 sps:$4 sm:$0xff]  }
 0x30c   :  { %7446 = vmatpush1.bf16.msra.mxu1 %v9977_v6  ;;  %7406 = vmatprep.subr.bf16.mxu0 %v9982_v22  ;;  %v10036_v39 = vld [vmem:[%s13781_s1 + $0x116c] ss:$16 sps:$4 sm:$0xff]   ;;  %v10037_v55 = vld [vmem:[%s13781_s1 + $0x1368] ss:$16 sps:$4 sm:$0xff]  }
 0x30d   :  { %7447 = vmatprep.subr.bf16.mxu1 %v9985_v31  ;;  %v10039_v35 = vld [vmem:[%s13781_s1 + $0x136c] ss:$16 sps:$4 sm:$0xff]   ;;  %v10040_v5 = vld [vmem:[%s13781_s1 + $0x1148] ss:$16 sps:$4 sm:$0xff]  }
 0x30e   :  { %v10042_v26 = vld [vmem:[%s13781_s1 + $0x114c] ss:$16 sps:$4 sm:$0xff]   ;;  %v10043_v28 = vld [vmem:[%s13781_s1 + $0x1348] ss:$16 sps:$4 sm:$0xff]  }
 0x30f   :  { %7407 = vmatpush1.bf16.msra.mxu0 %v9980_v7  ;;  %v10045_v6 = vld [vmem:[%s13781_s1 + $0x134c] ss:$16 sps:$4 sm:$0xff]   ;;  %v10046_v7 = vld [vmem:[%s13781_s1 + $0x1128] ss:$16 sps:$4 sm:$0xff]  }
 0x310   :  { %7448 = vmatpush1.bf16.msra.mxu1 %v9983_v17  ;;  %7408 = vmatprep.subr.bf16.mxu0 %v9988_v23  ;;  %v10048_v22 = vld [vmem:[%s13781_s1 + $0x112c] ss:$16 sps:$4 sm:$0xff]   ;;  %v10049_v17 = vld [vmem:[%s13781_s1 + $0x1328] ss:$16 sps:$4 sm:$0xff]  }
 0x311   :  { %7449 = vmatprep.subr.bf16.mxu1 %v9991_v54  ;;  %v10051_v31 = vld [vmem:[%s13781_s1 + $0x132c] ss:$16 sps:$4 sm:$0xff]  }
 0x312   :  { %v10054_v23 = vld [vmem:[%s13781_s1 + $0x110c] ss:$16 sps:$4 sm:$0xff]  }
 0x313   :  { %7409 = vmatpush1.bf16.msra.mxu0 %v9986_v59  ;;  %v10057_v54 = vld [vmem:[%s13781_s1 + $0x130c] ss:$16 sps:$4 sm:$0xff]   ;;  %v10052_v59 = vld [vmem:[%s13781_s1 + $0x1108] ss:$16 sps:$4 sm:$0xff]  }
 0x314   :  { %7450 = vmatpush1.bf16.msra.mxu1 %v9989_v63  ;;  %7410 = vmatprep.subr.bf16.mxu0 %v9994_v41  ;;  %v10055_v63 = vld [vmem:[%s13781_s1 + $0x1308] ss:$16 sps:$4 sm:$0xff]   ;;  %v10060_v41 = vld [vmem:[%s13781_s1 + $0x14ec] ss:$16 sps:$4 sm:$0xff]  }
 0x315   :  { %7451 = vmatprep.subr.bf16.mxu1 %v9997_v43  ;;  %v10063_v43 = vld [vmem:[%s13781_s1 + $0x16ec] ss:$16 sps:$4 sm:$0xff]  }
 0x317   :  { %7411 = vmatpush1.bf16.msra.mxu0 %v9992_v32  ;;  %v10058_v32 = vld [vmem:[%s13781_s1 + $0x14e8] ss:$16 sps:$4 sm:$0xff]  }
 0x318   :  { %7452 = vmatpush1.bf16.msra.mxu1 %v9995_v44  ;;  %7412 = vmatprep.subr.bf16.mxu0 %v10000_v47  ;;  %v10061_v44 = vld [vmem:[%s13781_s1 + $0x16e8] ss:$16 sps:$4 sm:$0xff]   ;;  %v10066_v47 = vld [vmem:[%s13781_s1 + $0x14cc] ss:$16 sps:$4 sm:$0xff]  }
 0x319   :  { %7453 = vmatprep.subr.bf16.mxu1 %v10003_v48  ;;  %v10069_v48 = vld [vmem:[%s13781_s1 + $0x16cc] ss:$16 sps:$4 sm:$0xff]  }
 0x31b   :  { %7413 = vmatpush1.bf16.msra.mxu0 %v9998_v51 }
 0x31c   :  { %7454 = vmatpush1.bf16.msra.mxu1 %v10001_v52  ;;  %7414 = vmatprep.subr.bf16.mxu0 %v10006_v9 }
 0x31d   :  { %7455 = vmatprep.subr.bf16.mxu1 %v10009_v56  ;;  %v10064_v56 = vld [vmem:[%s13781_s1 + $0x14c8] ss:$16 sps:$4 sm:$0xff]  }
 0x31f   :  { %7415 = vmatpush1.bf16.msra.mxu0 %v10004_v61  ;;  %v10067_v61 = vld [vmem:[%s13781_s1 + $0x16c8] ss:$16 sps:$4 sm:$0xff]  }
 0x320   :  { %7456 = vmatpush1.bf16.msra.mxu1 %v10007_v20  ;;  %7416 = vmatprep.subr.bf16.mxu0 %v10012_v62 }
 0x321   :  { %7457 = vmatprep.subr.bf16.mxu1 %v10015_v3 }
 0x323   :  { %7417 = vmatpush2.bf16.msra.mxu0 %v10010_v53 }
 0x324   :  { %7458 = vmatpush2.bf16.msra.mxu1 %v10013_v8  ;;  %7418 = vmatprep.subr.bf16.mxu0 %v10018_v29 }
 0x325   :  { %7459 = vmatprep.subr.bf16.mxu1 %v10021_v42  ;;  %v10070_v42 = vld [vmem:[%s13781_s1 + $0x14a8] ss:$16 sps:$4 sm:$0xff]  }
 0x327   :  { %7419 = vmatpush2.bf16.msra.mxu0 %v10016_v10  ;;  %v10073_v10 = vld [vmem:[%s13781_s1 + $0x16a8] ss:$16 sps:$4 sm:$0xff]  }
 0x328   :  { %7460 = vmatpush2.bf16.msra.mxu1 %v10019_v60  ;;  %7420 = vmatprep.subr.bf16.mxu0 %v10024_v0  ;;  %v10076_v0 = vld [vmem:[%s13781_s1 + $0x1488] ss:$16 sps:$4 sm:$0xff]  }
 0x329   :  { %7461 = vmatprep.subr.bf16.mxu1 %v10027_v11  ;;  %v10079_v11 = vld [vmem:[%s13781_s1 + $0x1688] ss:$16 sps:$4 sm:$0xff]  }
 0x32b   :  { %7421 = vmatpush2.bf16.msra.mxu0 %v10022_v14  ;;  %v10084_v14 = vld [vmem:[%s13781_s1 + $0x146c] ss:$16 sps:$4 sm:$0xff]  }
 0x32c   :  { %7462 = vmatpush2.bf16.msra.mxu1 %v10025_v13  ;;  %7422 = vmatprep.subr.bf16.mxu0 %v10030_v18  ;;  %v10087_v13 = vld [vmem:[%s13781_s1 + $0x166c] ss:$16 sps:$4 sm:$0xff]   ;;  %v10082_v18 = vld [vmem:[%s13781_s1 + $0x1468] ss:$16 sps:$4 sm:$0xff]  }
 0x32d   :  { %7463 = vmatprep.subr.bf16.mxu1 %v10033_v16  ;;  %v10085_v16 = vld [vmem:[%s13781_s1 + $0x1668] ss:$16 sps:$4 sm:$0xff]  }
 0x32f   :  { %7423 = vmatpush2.bf16.msra.mxu0 %v10028_v21  ;;  %v10090_v21 = vld [vmem:[%s13781_s1 + $0x144c] ss:$16 sps:$4 sm:$0xff]  }
 0x330   :  { %7464 = vmatpush2.bf16.msra.mxu1 %v10031_v15  ;;  %7424 = vmatprep.subr.bf16.mxu0 %v10036_v39  ;;  %v10093_v15 = vld [vmem:[%s13781_s1 + $0x164c] ss:$16 sps:$4 sm:$0xff]   ;;  %v10088_v39 = vld [vmem:[%s13781_s1 + $0x1448] ss:$16 sps:$4 sm:$0xff]  }
 0x331   :  { %7465 = vmatprep.subr.bf16.mxu1 %v10039_v35  ;;  %v10091_v35 = vld [vmem:[%s13781_s1 + $0x1648] ss:$16 sps:$4 sm:$0xff]  }
 0x333   :  { %7425 = vmatpush2.bf16.msra.mxu0 %v10034_v57  ;;  %v10096_v57 = vld [vmem:[%s13781_s1 + $0x142c] ss:$16 sps:$4 sm:$0xff]  }
 0x334   :  { %7466 = vmatpush2.bf16.msra.mxu1 %v10037_v55  ;;  %7426 = vmatprep.subr.bf16.mxu0 %v10042_v26  ;;  %v10099_v55 = vld [vmem:[%s13781_s1 + $0x162c] ss:$16 sps:$4 sm:$0xff]   ;;  %v10094_v26 = vld [vmem:[%s13781_s1 + $0x1428] ss:$16 sps:$4 sm:$0xff]  }
 0x335   :  { %7467 = vmatprep.subr.bf16.mxu1 %v10045_v6  ;;  %v10097_v6 = vld [vmem:[%s13781_s1 + $0x1628] ss:$16 sps:$4 sm:$0xff]  }
 0x337   :  { %7427 = vmatpush2.bf16.msra.mxu0 %v10040_v5  ;;  %v10102_v5 = vld [vmem:[%s13781_s1 + $0x140c] ss:$16 sps:$4 sm:$0xff]  }
 0x338   :  { %7468 = vmatpush2.bf16.msra.mxu1 %v10043_v28  ;;  %7428 = vmatprep.subr.bf16.mxu0 %v10048_v22  ;;  %v10105_v28 = vld [vmem:[%s13781_s1 + $0x160c] ss:$16 sps:$4 sm:$0xff]   ;;  %v10100_v22 = vld [vmem:[%s13781_s1 + $0x1408] ss:$16 sps:$4 sm:$0xff]  }
 0x339   :  { %7469 = vmatprep.subr.bf16.mxu1 %v10051_v31  ;;  %v10103_v31 = vld [vmem:[%s13781_s1 + $0x1608] ss:$16 sps:$4 sm:$0xff]  }
 0x33b   :  { %7429 = vmatpush2.bf16.msra.mxu0 %v10046_v7  ;;  %v10108_v7 = vld [vmem:[%s13781_s1 + $0x15ec] ss:$16 sps:$4 sm:$0xff]  }
 0x33c   :  { %7470 = vmatpush2.bf16.msra.mxu1 %v10049_v17  ;;  %7430 = vmatprep.subr.bf16.mxu0 %v10054_v23  ;;  %v10111_v17 = vld [vmem:[%s13781_s1 + $0x17ec] ss:$16 sps:$4 sm:$0xff]   ;;  %v10106_v23 = vld [vmem:[%s13781_s1 + $0x15e8] ss:$16 sps:$4 sm:$0xff]  }
 0x33d   :  { %7471 = vmatprep.subr.bf16.mxu1 %v10057_v54  ;;  %v10109_v54 = vld [vmem:[%s13781_s1 + $0x17e8] ss:$16 sps:$4 sm:$0xff]  }
 0x33f   :  { %7431 = vmatpush2.bf16.msra.mxu0 %v10052_v59  ;;  %v10114_v59 = vld [vmem:[%s13781_s1 + $0x15cc] ss:$16 sps:$4 sm:$0xff]  }
 0x340   :  { %7472 = vmatpush2.bf16.msra.mxu1 %v10055_v63  ;;  %7482 = vmatprep.subr.bf16.mxu0 %v10060_v41  ;;  %v10117_v63 = vld [vmem:[%s13781_s1 + $0x17cc] ss:$16 sps:$4 sm:$0xff]   ;;  %v10112_v41 = vld [vmem:[%s13781_s1 + $0x15c8] ss:$16 sps:$4 sm:$0xff]  }
 0x341   :  { %7523 = vmatprep.subr.bf16.mxu1 %v10063_v43  ;;  %v10115_v43 = vld [vmem:[%s13781_s1 + $0x17c8] ss:$16 sps:$4 sm:$0xff]  }
 0x342   :  { %v7188_v51 = vpop.f32.mrf.mxu0  ;;  %7433 = vmatmul.mubr.bf16.vlgmr.msra.gmra.mxu0 %v11467_v12  ;;  %v10072_v12 = vld [vmem:[%s13781_s1 + $0x14ac] ss:$16 sps:$4 sm:$0xff]  }
 0x343   :  { %v7229_v52 = vpop.f32.mrf.mxu1  ;;  %7474 = vmatmul.mubr.bf16.vlgmr.msra.gmra.mxu1 %v11492_v25  ;;  %v7189_v9 = vadd.f32 %v7188_v51, %v12995_v50  ;;  %7483 = vmatpush1.bf16.msra.mxu0 %v10058_v32  ;;  %v10075_v25 = vld [vmem:[%s13781_s1 + $0x16ac] ss:$16 sps:$4 sm:$0xff]  }
 0x344   :  { %7524 = vmatpush1.bf16.msra.mxu1 %v10061_v44  ;;  %v7190_v20 = vpop.f32.mrf.mxu0  ;;  %7484 = vmatprep.subr.bf16.mxu0 %v10066_v47  ;;  %v10120_v32 = vld [vmem:[%s13781_s1 + $0x15ac] ss:$16 sps:$4 sm:$0xff]   ;;  %v10118_v47 = vld [vmem:[%s13781_s1 + $0x15a8] ss:$16 sps:$4 sm:$0xff]  }
 0x345   :  { %v7231_v62 = vpop.f32.mrf.mxu1  ;;  %7525 = vmatprep.subr.bf16.mxu1 %v10069_v48  ;;  %v13196_v50 = vadd.f32 %v7229_v52, %v7189_v9  ;;  %v7191_v3 = vadd.f32 %v7190_v20, %v12999_v36  ;;  %7514 = vmatprep.mubr.bf16.mxu0 %v11488_v24  ;;  %v10078_v24 = vld [vmem:[%s13781_s1 + $0x148c] ss:$16 sps:$4 sm:$0xff]   ;;  %v10121_v48 = vld [vmem:[%s13781_s1 + $0x17a8] ss:$16 sps:$4 sm:$0xff]  }
 0x346   :  { %7555 = vmatprep.mubr.bf16.mxu1 %v11508_v33  ;;  %v7192_v53 = vpop.f32.mrf.mxu0  ;;  %v10081_v33 = vld [vmem:[%s13781_s1 + $0x168c] ss:$16 sps:$4 sm:$0xff]   ;;  %v10124_v9 = vld [vmem:[%s13781_s1 + $0x1588] ss:$16 sps:$4 sm:$0xff]  }
 0x347   :  { %v7233_v8 = vpop.f32.mrf.mxu1  ;;  %v13201_v29 = vadd.f32 %v7231_v62, %v7191_v3  ;;  %7485 = vmatpush1.bf16.msra.mxu0 %v10064_v56  ;;  %v10123_v44 = vld [vmem:[%s13781_s1 + $0x17ac] ss:$16 sps:$4 sm:$0xff]   ;;  %v10127_v56 = vld [vmem:[%s13781_s1 + $0x1788] ss:$16 sps:$4 sm:$0xff]  }
 0x348   :  { %7526 = vmatpush1.bf16.msra.mxu1 %v10067_v61  ;;  %v7193_v60 = vpop.f32.mrf.mxu0  ;;  %7486 = vmatprep.subr.bf16.mxu0 %v10072_v12  ;;  %v10126_v51 = vld [vmem:[%s13781_s1 + $0x158c] ss:$16 sps:$4 sm:$0xff]   ;;  %v10130_v62 = vld [vmem:[%s13781_s1 + $0x1568] ss:$16 sps:$4 sm:$0xff]  }
 0x349   :  { %v7234_v36 = vpop.f32.mrf.mxu1  ;;  %7527 = vmatprep.subr.bf16.mxu1 %v10075_v25  ;;  %v10129_v52 = vld [vmem:[%s13781_s1 + $0x178c] ss:$16 sps:$4 sm:$0xff]   ;;  %v10133_v12 = vld [vmem:[%s13781_s1 + $0x1768] ss:$16 sps:$4 sm:$0xff]  }
 0x34a   :  { %v10132_v61 = vld [vmem:[%s13781_s1 + $0x156c] ss:$16 sps:$4 sm:$0xff]   ;;  %v10136_v53 = vld [vmem:[%s13781_s1 + $0x1548] ss:$16 sps:$4 sm:$0xff]  }
 0x34b   :  { %7487 = vmatpush1.bf16.msra.mxu0 %v10070_v42  ;;  %v10135_v20 = vld [vmem:[%s13781_s1 + $0x176c] ss:$16 sps:$4 sm:$0xff]   ;;  %v10139_v8 = vld [vmem:[%s13781_s1 + $0x1748] ss:$16 sps:$4 sm:$0xff]  }
 0x34c   :  { %7528 = vmatpush1.bf16.msra.mxu1 %v10073_v10  ;;  %7488 = vmatprep.subr.bf16.mxu0 %v10078_v24  ;;  %v10138_v25 = vld [vmem:[%s13781_s1 + $0x154c] ss:$16 sps:$4 sm:$0xff]   ;;  %v10142_v60 = vld [vmem:[%s13781_s1 + $0x1528] ss:$16 sps:$4 sm:$0xff]  }
 0x34d   :  { %7529 = vmatprep.subr.bf16.mxu1 %v10081_v33  ;;  %v10141_v3 = vld [vmem:[%s13781_s1 + $0x174c] ss:$16 sps:$4 sm:$0xff]   ;;  %v10145_v36 = vld [vmem:[%s13781_s1 + $0x1728] ss:$16 sps:$4 sm:$0xff]  }
 0x34e   :  { %v10144_v42 = vld [vmem:[%s13781_s1 + $0x152c] ss:$16 sps:$4 sm:$0xff]  }
 0x34f   :  { %7489 = vmatpush1.bf16.msra.mxu0 %v10076_v0  ;;  %v10147_v10 = vld [vmem:[%s13781_s1 + $0x172c] ss:$16 sps:$4 sm:$0xff]   ;;  %v10148_v0 = vld [vmem:[%s13781_s1 + $0x1508] ss:$16 sps:$4 sm:$0xff]  }
 0x350   :  { %7530 = vmatpush1.bf16.msra.mxu1 %v10079_v11  ;;  %7490 = vmatprep.subr.bf16.mxu0 %v10084_v14  ;;  %v10150_v24 = vld [vmem:[%s13781_s1 + $0x150c] ss:$16 sps:$4 sm:$0xff]   ;;  %v10151_v11 = vld [vmem:[%s13781_s1 + $0x1708] ss:$16 sps:$4 sm:$0xff]  }
 0x351   :  { %7531 = vmatprep.subr.bf16.mxu1 %v10087_v13  ;;  %v10153_v33 = vld [vmem:[%s13781_s1 + $0x170c] ss:$16 sps:$4 sm:$0xff]  }
 0x352   :  { %v10156_v14 = vld [vmem:[%s13781_s1 + $0x18ec] ss:$16 sps:$4 sm:$0xff]  }
 0x353   :  { %7491 = vmatpush1.bf16.msra.mxu0 %v10082_v18  ;;  %v10159_v13 = vld [vmem:[%s13781_s1 + $0x1aec] ss:$16 sps:$4 sm:$0xff]   ;;  %v10154_v18 = vld [vmem:[%s13781_s1 + $0x18e8] ss:$16 sps:$4 sm:$0xff]  }
 0x354   :  { %7532 = vmatpush1.bf16.msra.mxu1 %v10085_v16  ;;  %7492 = vmatprep.subr.bf16.mxu0 %v10090_v21  ;;  %v10157_v16 = vld [vmem:[%s13781_s1 + $0x1ae8] ss:$16 sps:$4 sm:$0xff]   ;;  %v10162_v21 = vld [vmem:[%s13781_s1 + $0x18cc] ss:$16 sps:$4 sm:$0xff]  }
 0x355   :  { %7533 = vmatprep.subr.bf16.mxu1 %v10093_v15  ;;  %v10165_v15 = vld [vmem:[%s13781_s1 + $0x1acc] ss:$16 sps:$4 sm:$0xff]  }
 0x357   :  { %7493 = vmatpush1.bf16.msra.mxu0 %v10088_v39 }
 0x358   :  { %7534 = vmatpush1.bf16.msra.mxu1 %v10091_v35  ;;  %7494 = vmatprep.subr.bf16.mxu0 %v10096_v57 }
 0x359   :  { %7535 = vmatprep.subr.bf16.mxu1 %v10099_v55  ;;  %v10160_v55 = vld [vmem:[%s13781_s1 + $0x18c8] ss:$16 sps:$4 sm:$0xff]  }
 0x35b   :  { %7495 = vmatpush1.bf16.msra.mxu0 %v10094_v26  ;;  %v10163_v26 = vld [vmem:[%s13781_s1 + $0x1ac8] ss:$16 sps:$4 sm:$0xff]  }
 0x35c   :  { %7536 = vmatpush1.bf16.msra.mxu1 %v10097_v6  ;;  %7496 = vmatprep.subr.bf16.mxu0 %v10102_v5 }
 0x35d   :  { %7537 = vmatprep.subr.bf16.mxu1 %v10105_v28 }
 0x35f   :  { %7497 = vmatpush1.bf16.msra.mxu0 %v10100_v22 }
 0x360   :  { %7538 = vmatpush1.bf16.msra.mxu1 %v10103_v31  ;;  %7498 = vmatprep.subr.bf16.mxu0 %v10108_v7 }
 0x361   :  { %7539 = vmatprep.subr.bf16.mxu1 %v10111_v17  ;;  %v10166_v17 = vld [vmem:[%s13781_s1 + $0x18a8] ss:$16 sps:$4 sm:$0xff]  }
 0x363   :  { %7499 = vmatpush2.bf16.msra.mxu0 %v10106_v23  ;;  %v10169_v23 = vld [vmem:[%s13781_s1 + $0x1aa8] ss:$16 sps:$4 sm:$0xff]  }
 0x364   :  { %7540 = vmatpush2.bf16.msra.mxu1 %v10109_v54  ;;  %7500 = vmatprep.subr.bf16.mxu0 %v10114_v59  ;;  %v10172_v59 = vld [vmem:[%s13781_s1 + $0x1888] ss:$16 sps:$4 sm:$0xff]  }
 0x365   :  { %7541 = vmatprep.subr.bf16.mxu1 %v10117_v63  ;;  %v10175_v63 = vld [vmem:[%s13781_s1 + $0x1a88] ss:$16 sps:$4 sm:$0xff]  }
 0x367   :  { %7501 = vmatpush2.bf16.msra.mxu0 %v10112_v41  ;;  %v10180_v41 = vld [vmem:[%s13781_s1 + $0x186c] ss:$16 sps:$4 sm:$0xff]  }
 0x368   :  { %7542 = vmatpush2.bf16.msra.mxu1 %v10115_v43  ;;  %7502 = vmatprep.subr.bf16.mxu0 %v10120_v32  ;;  %v10183_v43 = vld [vmem:[%s13781_s1 + $0x1a6c] ss:$16 sps:$4 sm:$0xff]   ;;  %v10178_v32 = vld [vmem:[%s13781_s1 + $0x1868] ss:$16 sps:$4 sm:$0xff]  }
 0x369   :  { %7543 = vmatprep.subr.bf16.mxu1 %v10123_v44  ;;  %v10181_v44 = vld [vmem:[%s13781_s1 + $0x1a68] ss:$16 sps:$4 sm:$0xff]  }
 0x36b   :  { %7503 = vmatpush2.bf16.msra.mxu0 %v10118_v47  ;;  %v10186_v47 = vld [vmem:[%s13781_s1 + $0x184c] ss:$16 sps:$4 sm:$0xff]  }
 0x36c   :  { %7544 = vmatpush2.bf16.msra.mxu1 %v10121_v48  ;;  %7504 = vmatprep.subr.bf16.mxu0 %v10126_v51  ;;  %v10189_v48 = vld [vmem:[%s13781_s1 + $0x1a4c] ss:$16 sps:$4 sm:$0xff]   ;;  %v10184_v51 = vld [vmem:[%s13781_s1 + $0x1848] ss:$16 sps:$4 sm:$0xff]  }
 0x36d   :  { %7545 = vmatprep.subr.bf16.mxu1 %v10129_v52  ;;  %v10187_v52 = vld [vmem:[%s13781_s1 + $0x1a48] ss:$16 sps:$4 sm:$0xff]  }
 0x36f   :  { %7505 = vmatpush2.bf16.msra.mxu0 %v10124_v9  ;;  %v10192_v9 = vld [vmem:[%s13781_s1 + $0x182c] ss:$16 sps:$4 sm:$0xff]  }
 0x370   :  { %7546 = vmatpush2.bf16.msra.mxu1 %v10127_v56  ;;  %7506 = vmatprep.subr.bf16.mxu0 %v10132_v61  ;;  %v10195_v56 = vld [vmem:[%s13781_s1 + $0x1a2c] ss:$16 sps:$4 sm:$0xff]   ;;  %v10190_v61 = vld [vmem:[%s13781_s1 + $0x1828] ss:$16 sps:$4 sm:$0xff]  }
 0x371   :  { %7547 = vmatprep.subr.bf16.mxu1 %v10135_v20  ;;  %v10193_v20 = vld [vmem:[%s13781_s1 + $0x1a28] ss:$16 sps:$4 sm:$0xff]  }
 0x373   :  { %7507 = vmatpush2.bf16.msra.mxu0 %v10130_v62  ;;  %v10198_v62 = vld [vmem:[%s13781_s1 + $0x180c] ss:$16 sps:$4 sm:$0xff]  }
 0x374   :  { %7548 = vmatpush2.bf16.msra.mxu1 %v10133_v12  ;;  %7508 = vmatprep.subr.bf16.mxu0 %v10138_v25  ;;  %v10201_v12 = vld [vmem:[%s13781_s1 + $0x1a0c] ss:$16 sps:$4 sm:$0xff]   ;;  %v10196_v25 = vld [vmem:[%s13781_s1 + $0x1808] ss:$16 sps:$4 sm:$0xff]  }
 0x375   :  { %7549 = vmatprep.subr.bf16.mxu1 %v10141_v3  ;;  %v10199_v3 = vld [vmem:[%s13781_s1 + $0x1a08] ss:$16 sps:$4 sm:$0xff]  }
 0x377   :  { %7509 = vmatpush2.bf16.msra.mxu0 %v10136_v53  ;;  %v10204_v53 = vld [vmem:[%s13781_s1 + $0x19ec] ss:$16 sps:$4 sm:$0xff]  }
 0x378   :  { %7550 = vmatpush2.bf16.msra.mxu1 %v10139_v8  ;;  %7510 = vmatprep.subr.bf16.mxu0 %v10144_v42  ;;  %v10207_v8 = vld [vmem:[%s13781_s1 + $0x1bec] ss:$16 sps:$4 sm:$0xff]   ;;  %v10202_v42 = vld [vmem:[%s13781_s1 + $0x19e8] ss:$16 sps:$4 sm:$0xff]  }
 0x379   :  { %7551 = vmatprep.subr.bf16.mxu1 %v10147_v10  ;;  %v10205_v10 = vld [vmem:[%s13781_s1 + $0x1be8] ss:$16 sps:$4 sm:$0xff]  }
 0x37b   :  { %7511 = vmatpush2.bf16.msra.mxu0 %v10142_v60  ;;  %v10210_v60 = vld [vmem:[%s13781_s1 + $0x19cc] ss:$16 sps:$4 sm:$0xff]  }
 0x37c   :  { %7552 = vmatpush2.bf16.msra.mxu1 %v10145_v36  ;;  %7512 = vmatprep.subr.bf16.mxu0 %v10150_v24  ;;  %v10213_v36 = vld [vmem:[%s13781_s1 + $0x1bcc] ss:$16 sps:$4 sm:$0xff]   ;;  %v10208_v24 = vld [vmem:[%s13781_s1 + $0x19c8] ss:$16 sps:$4 sm:$0xff]  }
 0x37d   :  { %7553 = vmatprep.subr.bf16.mxu1 %v10153_v33  ;;  %v10211_v33 = vld [vmem:[%s13781_s1 + $0x1bc8] ss:$16 sps:$4 sm:$0xff]  }
 0x37f   :  { %7513 = vmatpush2.bf16.msra.mxu0 %v10148_v0  ;;  %v10216_v0 = vld [vmem:[%s13781_s1 + $0x19ac] ss:$16 sps:$4 sm:$0xff]  }
 0x380   :  { %7554 = vmatpush2.bf16.msra.mxu1 %v10151_v11  ;;  %7564 = vmatprep.subr.bf16.mxu0 %v10156_v14  ;;  %v10219_v11 = vld [vmem:[%s13781_s1 + $0x1bac] ss:$16 sps:$4 sm:$0xff]   ;;  %v10214_v14 = vld [vmem:[%s13781_s1 + $0x19a8] ss:$16 sps:$4 sm:$0xff]  }
 0x381   :  { %7605 = vmatprep.subr.bf16.mxu1 %v10159_v13  ;;  %v10217_v13 = vld [vmem:[%s13781_s1 + $0x1ba8] ss:$16 sps:$4 sm:$0xff]  }
 0x382   :  { %v7270_v39 = vpop.f32.mrf.mxu0  ;;  %7515 = vmatmul.mubr.bf16.vlgmr.msra.gmra.mxu0 %v11695_v4  ;;  %v10168_v4 = vld [vmem:[%s13781_s1 + $0x18ac] ss:$16 sps:$4 sm:$0xff]  }
 0x383   :  { %v7311_v35 = vpop.f32.mrf.mxu1  ;;  %7556 = vmatmul.mubr.bf16.vlgmr.msra.gmra.mxu1 %v11720_v34  ;;  %v7271_v57 = vadd.f32 %v7270_v39, %v13196_v50  ;;  %7565 = vmatpush1.bf16.msra.mxu0 %v10154_v18  ;;  %v10171_v34 = vld [vmem:[%s13781_s1 + $0x1aac] ss:$16 sps:$4 sm:$0xff]  }
 0x384   :  { %7606 = vmatpush1.bf16.msra.mxu1 %v10157_v16  ;;  %v7272_v6 = vpop.f32.mrf.mxu0  ;;  %7566 = vmatprep.subr.bf16.mxu0 %v10162_v21  ;;  %v10222_v18 = vld [vmem:[%s13781_s1 + $0x198c] ss:$16 sps:$4 sm:$0xff]   ;;  %v10220_v21 = vld [vmem:[%s13781_s1 + $0x1988] ss:$16 sps:$4 sm:$0xff]  }
 0x385   :  { %v7313_v5 = vpop.f32.mrf.mxu1  ;;  %7607 = vmatprep.subr.bf16.mxu1 %v10165_v15  ;;  %v13398_v50 = vadd.f32 %v7311_v35, %v7271_v57  ;;  %v7273_v28 = vadd.f32 %v7272_v6, %v13201_v29  ;;  %7596 = vmatprep.mubr.bf16.mxu0 %v11716_v30  ;;  %v10174_v30 = vld [vmem:[%s13781_s1 + $0x188c] ss:$16 sps:$4 sm:$0xff]   ;;  %v10223_v15 = vld [vmem:[%s13781_s1 + $0x1b88] ss:$16 sps:$4 sm:$0xff]  }
 0x386   :  { %7637 = vmatprep.mubr.bf16.mxu1 %v11736_v40  ;;  %v7274_v22 = vpop.f32.mrf.mxu0  ;;  %v10177_v40 = vld [vmem:[%s13781_s1 + $0x1a8c] ss:$16 sps:$4 sm:$0xff]   ;;  %v10226_v57 = vld [vmem:[%s13781_s1 + $0x1968] ss:$16 sps:$4 sm:$0xff]  }
 0x387   :  { %v7315_v31 = vpop.f32.mrf.mxu1  ;;  %v13403_v7 = vadd.f32 %v7313_v5, %v7273_v28  ;;  %7567 = vmatpush1.bf16.msra.mxu0 %v10160_v55  ;;  %v10225_v16 = vld [vmem:[%s13781_s1 + $0x1b8c] ss:$16 sps:$4 sm:$0xff]   ;;  %v10229_v55 = vld [vmem:[%s13781_s1 + $0x1b68] ss:$16 sps:$4 sm:$0xff]  }
 0x388   :  { %7608 = vmatpush1.bf16.msra.mxu1 %v10163_v26  ;;  %v7275_v54 = vpop.f32.mrf.mxu0  ;;  %7568 = vmatprep.subr.bf16.mxu0 %v10168_v4  ;;  %v10228_v39 = vld [vmem:[%s13781_s1 + $0x196c] ss:$16 sps:$4 sm:$0xff]   ;;  %v10232_v5 = vld [vmem:[%s13781_s1 + $0x1948] ss:$16 sps:$4 sm:$0xff]  }
 0x389   :  { %v7316_v29 = vpop.f32.mrf.mxu1  ;;  %7609 = vmatprep.subr.bf16.mxu1 %v10171_v34  ;;  %v10231_v35 = vld [vmem:[%s13781_s1 + $0x1b6c] ss:$16 sps:$4 sm:$0xff]   ;;  %v10235_v4 = vld [vmem:[%s13781_s1 + $0x1b48] ss:$16 sps:$4 sm:$0xff]  }
 0x38a   :  { %v10234_v26 = vld [vmem:[%s13781_s1 + $0x194c] ss:$16 sps:$4 sm:$0xff]   ;;  %v10238_v22 = vld [vmem:[%s13781_s1 + $0x1928] ss:$16 sps:$4 sm:$0xff]  }
 0x38b   :  { %7569 = vmatpush1.bf16.msra.mxu0 %v10166_v17  ;;  %v10237_v6 = vld [vmem:[%s13781_s1 + $0x1b4c] ss:$16 sps:$4 sm:$0xff]   ;;  %v10241_v31 = vld [vmem:[%s13781_s1 + $0x1b28] ss:$16 sps:$4 sm:$0xff]  }
 0x38c   :  { %7610 = vmatpush1.bf16.msra.mxu1 %v10169_v23  ;;  %7570 = vmatprep.subr.bf16.mxu0 %v10174_v30  ;;  %v10240_v34 = vld [vmem:[%s13781_s1 + $0x192c] ss:$16 sps:$4 sm:$0xff]   ;;  %v10244_v54 = vld [vmem:[%s13781_s1 + $0x1908] ss:$16 sps:$4 sm:$0xff]  }
 0x38d   :  { %7611 = vmatprep.subr.bf16.mxu1 %v10177_v40  ;;  %v10243_v28 = vld [vmem:[%s13781_s1 + $0x1b2c] ss:$16 sps:$4 sm:$0xff]   ;;  %v10247_v29 = vld [vmem:[%s13781_s1 + $0x1b08] ss:$16 sps:$4 sm:$0xff]  }
 0x38e   :  { %v10246_v17 = vld [vmem:[%s13781_s1 + $0x190c] ss:$16 sps:$4 sm:$0xff]  }
 0x38f   :  { %7571 = vmatpush1.bf16.msra.mxu0 %v10172_v59  ;;  %v10249_v23 = vld [vmem:[%s13781_s1 + $0x1b0c] ss:$16 sps:$4 sm:$0xff]   ;;  %v10250_v59 = vld [vmem:[%s13781_s1 + $0x1ce8] ss:$16 sps:$4 sm:$0xff]  }
 0x390   :  { %7612 = vmatpush1.bf16.msra.mxu1 %v10175_v63  ;;  %7572 = vmatprep.subr.bf16.mxu0 %v10180_v41  ;;  %v10252_v30 = vld [vmem:[%s13781_s1 + $0x1cec] ss:$16 sps:$4 sm:$0xff]   ;;  %v10253_v63 = vld [vmem:[%s13781_s1 + $0x1ee8] ss:$16 sps:$4 sm:$0xff]  }
 0x391   :  { %7613 = vmatprep.subr.bf16.mxu1 %v10183_v43  ;;  %v10255_v40 = vld [vmem:[%s13781_s1 + $0x1eec] ss:$16 sps:$4 sm:$0xff]  }
 0x392   :  { %v10258_v41 = vld [vmem:[%s13781_s1 + $0x1ccc] ss:$16 sps:$4 sm:$0xff]  }
 0x393   :  { %7573 = vmatpush1.bf16.msra.mxu0 %v10178_v32  ;;  %v10261_v43 = vld [vmem:[%s13781_s1 + $0x1ecc] ss:$16 sps:$4 sm:$0xff]  }
 0x394   :  { %7614 = vmatpush1.bf16.msra.mxu1 %v10181_v44  ;;  %7574 = vmatprep.subr.bf16.mxu0 %v10186_v47 }
 0x395   :  { %7615 = vmatprep.subr.bf16.mxu1 %v10189_v48  ;;  %v10256_v48 = vld [vmem:[%s13781_s1 + $0x1cc8] ss:$16 sps:$4 sm:$0xff]  }
 0x397   :  { %7575 = vmatpush1.bf16.msra.mxu0 %v10184_v51  ;;  %v10259_v51 = vld [vmem:[%s13781_s1 + $0x1ec8] ss:$16 sps:$4 sm:$0xff]  }
 0x398   :  { %7616 = vmatpush1.bf16.msra.mxu1 %v10187_v52  ;;  %7576 = vmatprep.subr.bf16.mxu0 %v10192_v9 }
 0x399   :  { %7617 = vmatprep.subr.bf16.mxu1 %v10195_v56 }
 0x39b   :  { %7577 = vmatpush1.bf16.msra.mxu0 %v10190_v61 }
 0x39c   :  { %7618 = vmatpush1.bf16.msra.mxu1 %v10193_v20  ;;  %7578 = vmatprep.subr.bf16.mxu0 %v10198_v62 }
 0x39d   :  { %7619 = vmatprep.subr.bf16.mxu1 %v10201_v12  ;;  %v10262_v12 = vld [vmem:[%s13781_s1 + $0x1ca8] ss:$16 sps:$4 sm:$0xff]  }
 0x39f   :  { %7579 = vmatpush1.bf16.msra.mxu0 %v10196_v25  ;;  %v10265_v25 = vld [vmem:[%s13781_s1 + $0x1ea8] ss:$16 sps:$4 sm:$0xff]  }
 0x3a0   :  { %7620 = vmatpush1.bf16.msra.mxu1 %v10199_v3  ;;  %7580 = vmatprep.subr.bf16.mxu0 %v10204_v53  ;;  %v10268_v53 = vld [vmem:[%s13781_s1 + $0x1c88] ss:$16 sps:$4 sm:$0xff]  }
 0x3a1   :  { %7621 = vmatprep.subr.bf16.mxu1 %v10207_v8  ;;  %v10271_v8 = vld [vmem:[%s13781_s1 + $0x1e88] ss:$16 sps:$4 sm:$0xff]  }
 0x3a3   :  { %7581 = vmatpush2.bf16.msra.mxu0 %v10202_v42  ;;  %v10276_v42 = vld [vmem:[%s13781_s1 + $0x1c6c] ss:$16 sps:$4 sm:$0xff]  }
 0x3a4   :  { %7622 = vmatpush2.bf16.msra.mxu1 %v10205_v10  ;;  %7582 = vmatprep.subr.bf16.mxu0 %v10210_v60  ;;  %v10279_v10 = vld [vmem:[%s13781_s1 + $0x1e6c] ss:$16 sps:$4 sm:$0xff]   ;;  %v10274_v60 = vld [vmem:[%s13781_s1 + $0x1c68] ss:$16 sps:$4 sm:$0xff]  }
 0x3a5   :  { %7623 = vmatprep.subr.bf16.mxu1 %v10213_v36  ;;  %v10277_v36 = vld [vmem:[%s13781_s1 + $0x1e68] ss:$16 sps:$4 sm:$0xff]  }
 0x3a7   :  { %7583 = vmatpush2.bf16.msra.mxu0 %v10208_v24  ;;  %v10282_v24 = vld [vmem:[%s13781_s1 + $0x1c4c] ss:$16 sps:$4 sm:$0xff]  }
 0x3a8   :  { %7624 = vmatpush2.bf16.msra.mxu1 %v10211_v33  ;;  %7584 = vmatprep.subr.bf16.mxu0 %v10216_v0  ;;  %v10285_v33 = vld [vmem:[%s13781_s1 + $0x1e4c] ss:$16 sps:$4 sm:$0xff]   ;;  %v10280_v0 = vld [vmem:[%s13781_s1 + $0x1c48] ss:$16 sps:$4 sm:$0xff]  }
 0x3a9   :  { %7625 = vmatprep.subr.bf16.mxu1 %v10219_v11  ;;  %v10283_v11 = vld [vmem:[%s13781_s1 + $0x1e48] ss:$16 sps:$4 sm:$0xff]  }
 0x3ab   :  { %7585 = vmatpush2.bf16.msra.mxu0 %v10214_v14  ;;  %v10288_v14 = vld [vmem:[%s13781_s1 + $0x1c2c] ss:$16 sps:$4 sm:$0xff]  }
 0x3ac   :  { %7626 = vmatpush2.bf16.msra.mxu1 %v10217_v13  ;;  %7586 = vmatprep.subr.bf16.mxu0 %v10222_v18  ;;  %v10291_v13 = vld [vmem:[%s13781_s1 + $0x1e2c] ss:$16 sps:$4 sm:$0xff]   ;;  %v10286_v18 = vld [vmem:[%s13781_s1 + $0x1c28] ss:$16 sps:$4 sm:$0xff]  }
 0x3ad   :  { %7627 = vmatprep.subr.bf16.mxu1 %v10225_v16  ;;  %v10289_v16 = vld [vmem:[%s13781_s1 + $0x1e28] ss:$16 sps:$4 sm:$0xff]  }
 0x3af   :  { %7587 = vmatpush2.bf16.msra.mxu0 %v10220_v21  ;;  %v10294_v21 = vld [vmem:[%s13781_s1 + $0x1c0c] ss:$16 sps:$4 sm:$0xff]  }
 0x3b0   :  { %7628 = vmatpush2.bf16.msra.mxu1 %v10223_v15  ;;  %7588 = vmatprep.subr.bf16.mxu0 %v10228_v39  ;;  %v10297_v15 = vld [vmem:[%s13781_s1 + $0x1e0c] ss:$16 sps:$4 sm:$0xff]   ;;  %v10292_v39 = vld [vmem:[%s13781_s1 + $0x1c08] ss:$16 sps:$4 sm:$0xff]  }
 0x3b1   :  { %7629 = vmatprep.subr.bf16.mxu1 %v10231_v35  ;;  %v10295_v35 = vld [vmem:[%s13781_s1 + $0x1e08] ss:$16 sps:$4 sm:$0xff]  }
 0x3b3   :  { %7589 = vmatpush2.bf16.msra.mxu0 %v10226_v57  ;;  %v10300_v57 = vld [vmem:[%s13781_s1 + $0x1dec] ss:$16 sps:$4 sm:$0xff]  }
 0x3b4   :  { %7630 = vmatpush2.bf16.msra.mxu1 %v10229_v55  ;;  %7590 = vmatprep.subr.bf16.mxu0 %v10234_v26  ;;  %v10303_v55 = vld [vmem:[%s13781_s1 + $0x1fec] ss:$16 sps:$4 sm:$0xff]   ;;  %v10298_v26 = vld [vmem:[%s13781_s1 + $0x1de8] ss:$16 sps:$4 sm:$0xff]  }
 0x3b5   :  { %7631 = vmatprep.subr.bf16.mxu1 %v10237_v6  ;;  %v10301_v6 = vld [vmem:[%s13781_s1 + $0x1fe8] ss:$16 sps:$4 sm:$0xff]  }
 0x3b7   :  { %7591 = vmatpush2.bf16.msra.mxu0 %v10232_v5  ;;  %v10306_v5 = vld [vmem:[%s13781_s1 + $0x1dcc] ss:$16 sps:$4 sm:$0xff]  }
 0x3b8   :  { %7632 = vmatpush2.bf16.msra.mxu1 %v10235_v4  ;;  %7592 = vmatprep.subr.bf16.mxu0 %v10240_v34  ;;  %v10309_v4 = vld [vmem:[%s13781_s1 + $0x1fcc] ss:$16 sps:$4 sm:$0xff]   ;;  %v10304_v34 = vld [vmem:[%s13781_s1 + $0x1dc8] ss:$16 sps:$4 sm:$0xff]  }
 0x3b9   :  { %7633 = vmatprep.subr.bf16.mxu1 %v10243_v28  ;;  %v10307_v28 = vld [vmem:[%s13781_s1 + $0x1fc8] ss:$16 sps:$4 sm:$0xff]  }
 0x3bb   :  { %7593 = vmatpush2.bf16.msra.mxu0 %v10238_v22  ;;  %v10312_v22 = vld [vmem:[%s13781_s1 + $0x1dac] ss:$16 sps:$4 sm:$0xff]  }
 0x3bc   :  { %7634 = vmatpush2.bf16.msra.mxu1 %v10241_v31  ;;  %7594 = vmatprep.subr.bf16.mxu0 %v10246_v17  ;;  %v10315_v31 = vld [vmem:[%s13781_s1 + $0x1fac] ss:$16 sps:$4 sm:$0xff]   ;;  %v10310_v17 = vld [vmem:[%s13781_s1 + $0x1da8] ss:$16 sps:$4 sm:$0xff]  }
 0x3bd   :  { %7635 = vmatprep.subr.bf16.mxu1 %v10249_v23  ;;  %v10313_v23 = vld [vmem:[%s13781_s1 + $0x1fa8] ss:$16 sps:$4 sm:$0xff]  }
 0x3bf   :  { %7595 = vmatpush2.bf16.msra.mxu0 %v10244_v54  ;;  %v10318_v54 = vld [vmem:[%s13781_s1 + $0x1d8c] ss:$16 sps:$4 sm:$0xff]  }
 0x3c0   :  { %7636 = vmatpush2.bf16.msra.mxu1 %v10247_v29  ;;  %7646 = vmatprep.subr.bf16.mxu0 %v10252_v30  ;;  %v10321_v29 = vld [vmem:[%s13781_s1 + $0x1f8c] ss:$16 sps:$4 sm:$0xff]   ;;  %v10316_v30 = vld [vmem:[%s13781_s1 + $0x1d88] ss:$16 sps:$4 sm:$0xff]  }
 0x3c1   :  { %7687 = vmatprep.subr.bf16.mxu1 %v10255_v40  ;;  %v10319_v40 = vld [vmem:[%s13781_s1 + $0x1f88] ss:$16 sps:$4 sm:$0xff]  }
 0x3c2   :  { %v7352_v32 = vpop.f32.mrf.mxu0  ;;  %7597 = vmatmul.mubr.bf16.vlgmr.msra.gmra.mxu0 %v11919_v46  ;;  %v10264_v46 = vld [vmem:[%s13781_s1 + $0x1cac] ss:$16 sps:$4 sm:$0xff]  }
 0x3c3   :  { %v7393_v44 = vpop.f32.mrf.mxu1  ;;  %7638 = vmatmul.mubr.bf16.vlgmr.msra.gmra.mxu1 %v11944_v58  ;;  %v7353_v47 = vadd.f32 %v7352_v32, %v13398_v50  ;;  %7647 = vmatpush1.bf16.msra.mxu0 %v10250_v59  ;;  %v10267_v58 = vld [vmem:[%s13781_s1 + $0x1eac] ss:$16 sps:$4 sm:$0xff]  }
 0x3c4   :  { %7688 = vmatpush1.bf16.msra.mxu1 %v10253_v63  ;;  %v7354_v52 = vpop.f32.mrf.mxu0  ;;  %7648 = vmatprep.subr.bf16.mxu0 %v10258_v41  ;;  %v10324_v59 = vld [vmem:[%s13781_s1 + $0x1d6c] ss:$16 sps:$4 sm:$0xff]   ;;  %v10322_v41 = vld [vmem:[%s13781_s1 + $0x1d68] ss:$16 sps:$4 sm:$0xff]  }
 0x3c5   :  { %v7395_v9 = vpop.f32.mrf.mxu1  ;;  %7689 = vmatprep.subr.bf16.mxu1 %v10261_v43  ;;  %v13600_v50 = vadd.f32 %v7393_v44, %v7353_v47  ;;  %v7355_v56 = vadd.f32 %v7354_v52, %v13403_v7  ;;  %7678 = vmatprep.mubr.bf16.mxu0 %v11940_v45  ;;  %v10270_v45 = vld [vmem:[%s13781_s1 + $0x1c8c] ss:$16 sps:$4 sm:$0xff]   ;;  %v10325_v43 = vld [vmem:[%s13781_s1 + $0x1f68] ss:$16 sps:$4 sm:$0xff]  }
 0x3c6   :  { %7719 = vmatprep.mubr.bf16.mxu1 %v11960_v1  ;;  %v7356_v61 = vpop.f32.mrf.mxu0  ;;  %v10273_v1 = vld [vmem:[%s13781_s1 + $0x1e8c] ss:$16 sps:$4 sm:$0xff]   ;;  %v10328_v47 = vld [vmem:[%s13781_s1 + $0x1d48] ss:$16 sps:$4 sm:$0xff]  }
 0x3c7   :  { %v7397_v20 = vpop.f32.mrf.mxu1  ;;  %v13605_v62 = vadd.f32 %v7395_v9, %v7355_v56  ;;  %7649 = vmatpush1.bf16.msra.mxu0 %v10256_v48  ;;  %v10327_v63 = vld [vmem:[%s13781_s1 + $0x1f6c] ss:$16 sps:$4 sm:$0xff]   ;;  %v10331_v48 = vld [vmem:[%s13781_s1 + $0x1f48] ss:$16 sps:$4 sm:$0xff]  }
 0x3c8   :  { %7690 = vmatpush1.bf16.msra.mxu1 %v10259_v51  ;;  %v7357_v3 = vpop.f32.mrf.mxu0  ;;  %7650 = vmatprep.subr.bf16.mxu0 %v10264_v46  ;;  %v10330_v32 = vld [vmem:[%s13781_s1 + $0x1d4c] ss:$16 sps:$4 sm:$0xff]   ;;  %v10334_v9 = vld [vmem:[%s13781_s1 + $0x1d28] ss:$16 sps:$4 sm:$0xff]  }
 0x3c9   :  { %v7398_v7 = vpop.f32.mrf.mxu1  ;;  %7691 = vmatprep.subr.bf16.mxu1 %v10267_v58  ;;  %v10333_v44 = vld [vmem:[%s13781_s1 + $0x1f4c] ss:$16 sps:$4 sm:$0xff]   ;;  %v10337_v46 = vld [vmem:[%s13781_s1 + $0x1f28] ss:$16 sps:$4 sm:$0xff]  }
 0x3ca   :  { %v10336_v51 = vld [vmem:[%s13781_s1 + $0x1d2c] ss:$16 sps:$4 sm:$0xff]   ;;  %v10340_v61 = vld [vmem:[%s13781_s1 + $0x1d08] ss:$16 sps:$4 sm:$0xff]  }
 0x3cb   :  { %7651 = vmatpush1.bf16.msra.mxu0 %v10262_v12  ;;  %v10339_v52 = vld [vmem:[%s13781_s1 + $0x1f2c] ss:$16 sps:$4 sm:$0xff]   ;;  %v10343_v20 = vld [vmem:[%s13781_s1 + $0x1f08] ss:$16 sps:$4 sm:$0xff]  }
 0x3cc   :  { %7692 = vmatpush1.bf16.msra.mxu1 %v10265_v25  ;;  %7652 = vmatprep.subr.bf16.mxu0 %v10270_v45  ;;  %v10342_v58 = vld [vmem:[%s13781_s1 + $0x1d0c] ss:$16 sps:$4 sm:$0xff]  }
 0x3cd   :  { %7693 = vmatprep.subr.bf16.mxu1 %v10273_v1  ;;  %v10345_v56 = vld [vmem:[%s13781_s1 + $0x1f0c] ss:$16 sps:$4 sm:$0xff]  }
 0x3cf   :  { %7653 = vmatpush1.bf16.msra.mxu0 %v10268_v53 }
 0x3d0   :  { %7694 = vmatpush1.bf16.msra.mxu1 %v10271_v8  ;;  %7654 = vmatprep.subr.bf16.mxu0 %v10276_v42 }
 0x3d1   :  { %7695 = vmatprep.subr.bf16.mxu1 %v10279_v10 }
 0x3d3   :  { %7655 = vmatpush1.bf16.msra.mxu0 %v10274_v60 }
 0x3d4   :  { %7696 = vmatpush1.bf16.msra.mxu1 %v10277_v36  ;;  %7656 = vmatprep.subr.bf16.mxu0 %v10282_v24 }
 0x3d5   :  { %7697 = vmatprep.subr.bf16.mxu1 %v10285_v33 }
 0x3d7   :  { %7657 = vmatpush1.bf16.msra.mxu0 %v10280_v0 }
 0x3d8   :  { %7698 = vmatpush1.bf16.msra.mxu1 %v10283_v11  ;;  %7658 = vmatprep.subr.bf16.mxu0 %v10288_v14 }
 0x3d9   :  { %7699 = vmatprep.subr.bf16.mxu1 %v10291_v13 }
 0x3db   :  { %7659 = vmatpush1.bf16.msra.mxu0 %v10286_v18 }
 0x3dc   :  { %7700 = vmatpush1.bf16.msra.mxu1 %v10289_v16  ;;  %7660 = vmatprep.subr.bf16.mxu0 %v10294_v21 }
 0x3dd   :  { %7701 = vmatprep.subr.bf16.mxu1 %v10297_v15 }
 0x3df   :  { %7661 = vmatpush1.bf16.msra.mxu0 %v10292_v39 }
 0x3e0   :  { %7702 = vmatpush1.bf16.msra.mxu1 %v10295_v35  ;;  %7662 = vmatprep.subr.bf16.mxu0 %v10300_v57 }
 0x3e1   :  { %7703 = vmatprep.subr.bf16.mxu1 %v10303_v55 }
 0x3e3   :  { %7663 = vmatpush2.bf16.msra.mxu0 %v10298_v26 }
 0x3e4   :  { %7704 = vmatpush2.bf16.msra.mxu1 %v10301_v6  ;;  %7664 = vmatprep.subr.bf16.mxu0 %v10306_v5 }
 0x3e5   :  { %7705 = vmatprep.subr.bf16.mxu1 %v10309_v4 }
 0x3e7   :  { %7665 = vmatpush2.bf16.msra.mxu0 %v10304_v34 }
 0x3e8   :  { %7706 = vmatpush2.bf16.msra.mxu1 %v10307_v28  ;;  %7666 = vmatprep.subr.bf16.mxu0 %v10312_v22 }
 0x3e9   :  { %7707 = vmatprep.subr.bf16.mxu1 %v10315_v31 }
 0x3eb   :  { %7667 = vmatpush2.bf16.msra.mxu0 %v10310_v17 }
 0x3ec   :  { %7708 = vmatpush2.bf16.msra.mxu1 %v10313_v23  ;;  %7668 = vmatprep.subr.bf16.mxu0 %v10318_v54 }
 0x3ed   :  { %7709 = vmatprep.subr.bf16.mxu1 %v10321_v29 }
 0x3ef   :  { %7669 = vmatpush2.bf16.msra.mxu0 %v10316_v30 }
 0x3f0   :  { %7710 = vmatpush2.bf16.msra.mxu1 %v10319_v40  ;;  %7670 = vmatprep.subr.bf16.mxu0 %v10324_v59 }
 0x3f1   :  { %7711 = vmatprep.subr.bf16.mxu1 %v10327_v63 }
 0x3f3   :  { %7671 = vmatpush2.bf16.msra.mxu0 %v10322_v41 }
 0x3f4   :  { %7712 = vmatpush2.bf16.msra.mxu1 %v10325_v43  ;;  %7672 = vmatprep.subr.bf16.mxu0 %v10330_v32 }
 0x3f5   :  { %7713 = vmatprep.subr.bf16.mxu1 %v10333_v44 }
 0x3f7   :  { %7673 = vmatpush2.bf16.msra.mxu0 %v10328_v47 }
 0x3f8   :  { %7714 = vmatpush2.bf16.msra.mxu1 %v10331_v48  ;;  %7674 = vmatprep.subr.bf16.mxu0 %v10336_v51 }
 0x3f9   :  { %7715 = vmatprep.subr.bf16.mxu1 %v10339_v52  ;;  %v7756_v52 = vrot.slane %v8802_v38, %v10503_v49 }
 0x3fb   :  { %7675 = vmatpush2.bf16.msra.mxu0 %v10334_v9 }
 0x3fc   :  { %7716 = vmatpush2.bf16.msra.mxu1 %v10337_v46  ;;  %7676 = vmatprep.subr.bf16.mxu0 %v10342_v58 }
 0x3fd   :  { %7717 = vmatprep.subr.bf16.mxu1 %v10345_v56 }
 0x3ff   :  { %7677 = vmatpush2.bf16.msra.mxu0 %v10340_v61 }
 0x400   :  { %7718 = vmatpush2.bf16.msra.mxu1 %v10343_v20 }
 0x402   :  { %v7434_v12 = vpop.f32.mrf.mxu0  ;;  %7679 = vmatmul.mubr.bf16.vlgmr.msra.gmra.mxu0 %v12136_v19 }
 0x403   :  { %v7475_v25 = vpop.f32.mrf.mxu1  ;;  %7720 = vmatmul.mubr.bf16.vlgmr.msra.gmra.mxu1 %v12158_v2  ;;  %v7435_v3 = vadd.f32 %v7434_v12, %v13600_v50 }
 0x404   :  { %v7436_v7 = vpop.f32.mrf.mxu0 }
 0x405   :  { %v7477_v45 = vpop.f32.mrf.mxu1  ;;  %v7476_v1 = vadd.f32 %v7475_v25, %v7435_v3  ;;  %v7437_v53 = vadd.f32 %v7436_v7, %v13605_v62 }
 0x406   :  { %v7438_v8 = vpop.f32.mrf.mxu0 }
 0x407   :  { %v7479_v42 = vpop.f32.mrf.mxu1  ;;  %v7478_v10 = vadd.f32 %v7477_v45, %v7437_v53 }
 0x408   :  { %v7439_v60 = vpop.f32.mrf.mxu0 }
 0x409   :  { %v7480_v36 = vpop.f32.mrf.mxu1 }
 0x442   :  { %v7516_v24 = vpop.f32.mrf.mxu0 }
 0x443   :  { %v7557_v33 = vpop.f32.mrf.mxu1  ;;  %v7517_v0 = vadd.f32 %v7516_v24, %v7476_v1 }
 0x444   :  { %v7518_v11 = vpop.f32.mrf.mxu0 }
 0x445   :  { %v7559_v14 = vpop.f32.mrf.mxu1  ;;  %v7558_v19 = vadd.f32 %v7557_v33, %v7517_v0  ;;  %v7519_v13 = vadd.f32 %v7518_v11, %v7478_v10 }
 0x446   :  { %v7520_v2 = vpop.f32.mrf.mxu0 }
 0x447   :  { %v7561_v18 = vpop.f32.mrf.mxu1  ;;  %v7560_v50 = vadd.f32 %v7559_v14, %v7519_v13 }
 0x448   :  { %v7521_v16 = vpop.f32.mrf.mxu0 }
 0x449   :  { %v7562_v21 = vpop.f32.mrf.mxu1 }
 0x482   :  { %v7598_v15 = vpop.f32.mrf.mxu0 }
 0x483   :  { %v7639_v39 = vpop.f32.mrf.mxu1  ;;  %v7599_v62 = vadd.f32 %v7598_v15, %v7558_v19 }
 0x484   :  { %v7600_v35 = vpop.f32.mrf.mxu0 }
 0x485   :  { %v7641_v57 = vpop.f32.mrf.mxu1  ;;  %v7640_v55 = vadd.f32 %v7639_v39, %v7599_v62  ;;  %v7601_v34 = vadd.f32 %v7600_v35, %v7560_v50 }
 0x486   :  { %v7602_v26 = vpop.f32.mrf.mxu0 }
 0x487   :  { %v7643_v6 = vpop.f32.mrf.mxu1  ;;  %v7642_v31 = vadd.f32 %v7641_v57, %v7601_v34 }
 0x488   :  { %v7603_v5 = vpop.f32.mrf.mxu0 }
 0x489   :  { %v7644_v4 = vpop.f32.mrf.mxu1 }
 0x4c2   :  { %v7680_v28 = vpop.f32.mrf.mxu0 }
 0x4c3   :  { %v7721_v22 = vpop.f32.mrf.mxu1  ;;  %v7681_v17 = vadd.f32 %v7680_v28, %v7640_v55 }
 0x4c4   :  { %v7682_v23 = vpop.f32.mrf.mxu0 }
 0x4c5   :  { %v7723_v54 = vpop.f32.mrf.mxu1  ;;  %v7722_v29 = vadd.f32 %v7721_v22, %v7681_v17  ;;  %v7683_v30 = vadd.f32 %v7682_v23, %v7642_v31 }
 0x4c6   :  { %v7684_v40 = vpop.f32.mrf.mxu0 }
 0x4c7   :  { %v7725_v59 = vpop.f32.mrf.mxu1  ;;  %v7734_v63 = vmul.f32 0.2, %v7722_v29  ;;  %v7724_v41 = vadd.f32 %v7723_v54, %v7683_v30  ;;  %vm7730_vm2 = vcmp.ge.f32.partialorder %v7722_v29, 0.0 }
 0x4c8   :  { %v7685_v43 = vpop.f32.mrf.mxu0 }
 0x4c9   :  { %v7726_v32 = vpop.f32.mrf.mxu1  ;;  %vm7731_vm3 = vcmp.ge.f32.partialorder %v7724_v41, 0.0  ;;  %v7735_v44 = vmul.f32 0.2, %v7724_v41  ;;  %v7738_v47 = vsel %vm7730_vm2, %v7722_v29, %v7734_v63 }
 0x4cb   :  { %v7739_v48 = vsel %vm7731_vm3, %v7724_v41, %v7735_v44 }
 0x4cc   :  { %v8803_v51 = vpack.c.bf16 %v7739_v48, %v7738_v47 }
 0x4ce   :  { %v7763_v9 = vrot.slane %v8803_v51, %v10503_v49 }
 0x4d0   :  { %v7764_v46 = vcombine.low %v7756_v52, %v7763_v9 }
 0x4d2   :  { %8804 = vst.sshfl [vmem:[%s13784_s3] sm:$0x55 pattern:$0x73625140] %v7764_v46 }

</bundles_post_ra>
